<compile_context>
chip_gen: v7x
topology: tpu7x:2x2x1
jax: 0.10.0
libtpu: 0.0.40
codegen_flags: <defaults>
</compile_context>

<pallas_src>
import functools

import jax
import jax.numpy as jnp
from jax import lax
from jax.experimental import pallas as pl
from jax.experimental.pallas import tpu as pltpu


def _vmem_limit_bytes():
    # 48 MiB on 128-MiB parts (v5e/v6e), 32 MiB on 64-MiB parts (v7x).
    try:
        cap = getattr(pltpu.get_tpu_info(), "vmem_capacity_bytes", None)
    except Exception:
        cap = None
    if cap is None:
        cap = 64 * 1024 * 1024
    return (48 if cap >= 100 * 1024 * 1024 else 32) * 1024 * 1024


_VMEM_LIMIT = _vmem_limit_bytes()


# --------------------------------------------------------------------------
# Matmul + bias (+ optional fused activation).  bf16 MXU operands, f32 acc.
# K is small everywhere in this module (<= 2*C), so it is a single full block:
# no accumulator scratch, no pad/slice round trips.
# --------------------------------------------------------------------------
def _matmul_bias_kernel(x_ref, w_ref, b_ref, o_ref, *, activation):
    x = x_ref[...].astype(jnp.bfloat16)          # in-kernel cast (VPU filler)
    w = w_ref[...].astype(jnp.bfloat16)
    out = jnp.dot(x, w, preferred_element_type=jnp.float32) + b_ref[...]
    if activation == "relu":
        out = jnp.maximum(out, 0.0)
    o_ref[...] = out


def matmul_bias(x, w, b=None, *, activation=None):
    """x:(N,K) @ w:(K,M) + b:(M,) -> (N,M) f32."""
    N, K = x.shape
    K2, M = w.shape
    assert K == K2
    if b is None:
        b = jnp.zeros((M,), jnp.float32)
    b2 = b.reshape(1, M).astype(jnp.float32)

    # Row tile: full extent when small, 512 otherwise (ragged last block OK:
    # garbage rows are dropped on the masked store and never read).
    tm = N if N <= 512 else 512
    # Column tile: full extent when small, 128-aligned tiles otherwise.
    if M > 512 and M % 128 == 0:
        tn = 512 if M % 512 == 0 else (256 if M % 256 == 0 else 128)
    else:
        tn = M

    kern = functools.partial(_matmul_bias_kernel, activation=activation)
    return pl.pallas_call(
        kern,
        out_shape=jax.ShapeDtypeStruct((N, M), jnp.float32),
        grid=(pl.cdiv(N, tm), M // tn),
        in_specs=[pl.BlockSpec((tm, K), lambda i, j: (i, 0)),
                  pl.BlockSpec((K, tn), lambda i, j: (0, j)),
                  pl.BlockSpec((1, tn), lambda i, j: (0, j))],
        out_specs=pl.BlockSpec((tm, tn), lambda i, j: (i, j)),
        compiler_params=pltpu.CompilerParams(
            dimension_semantics=("parallel", "parallel"),
            vmem_limit_bytes=_VMEM_LIMIT),
    )(x.astype(jnp.float32), w.astype(jnp.float32), b2)


def conv1x1(x, w, b=None, *, activation=None):
    """x: (..., Cin) channels-last, w: (Cout, Cin) torch layout, b: (Cout,)."""
    shp = x.shape
    rows = x.reshape(-1, shp[-1])
    out = matmul_bias(rows, jnp.transpose(w), b, activation=activation)
    return out.reshape(shp[:-1] + (w.shape[0],))


# --------------------------------------------------------------------------
# 3x3 conv (stride 1, pad 1), channels-last, no HBM im2col.
# Grid = (batch, output row); the three needed padded rows arrive via three
# BlockSpecs on the same padded input, the 9 taps are 9 in-VMEM matmuls.
# --------------------------------------------------------------------------
def _conv3x3_row_kernel(x0, x1, x2, w_ref, b_ref, o_ref, *, width, relu):
    rows = (x0, x1, x2)
    cout = o_ref.shape[-1]
    acc = jnp.zeros((width, cout), jnp.float32)
    for dy in range(3):
        band = rows[dy][0, 0].astype(jnp.bfloat16)       # (W+2, C)
        for dx in range(3):
            acc += jnp.dot(band[dx:dx + width, :], w_ref[3 * dy + dx],
                           preferred_element_type=jnp.float32)
    val = acc + b_ref[...]
    if relu:                                             # fused epilogue
        val = jnp.maximum(val, 0.0)
    o_ref[0, 0] = val


def conv3x3(x, w, b=None, *, relu=False):
    """x: (B,H,W,C) NHWC; w: (Cout,Cin,3,3) torch layout; stride 1, pad 1."""
    B, H, W, C = x.shape
    Cout = w.shape[0]
    xp = jnp.pad(x.astype(jnp.float32), ((0, 0), (1, 1), (1, 1), (0, 0)))
    wk = jnp.transpose(w, (2, 3, 1, 0)).reshape(9, C, Cout).astype(jnp.bfloat16)
    if b is None:
        b = jnp.zeros((Cout,), jnp.float32)
    b2 = b.reshape(1, Cout).astype(jnp.float32)

    def row_spec(dy):
        return pl.BlockSpec((1, 1, W + 2, C),
                            lambda bi, hi, dy=dy: (bi, hi + dy, 0, 0))

    kern = functools.partial(_conv3x3_row_kernel, width=W, relu=relu)
    return pl.pallas_call(
        kern,
        out_shape=jax.ShapeDtypeStruct((B, H, W, Cout), jnp.float32),
        grid=(B, H),
        in_specs=[row_spec(0), row_spec(1), row_spec(2),
                  pl.BlockSpec((9, C, Cout), lambda bi, hi: (0, 0, 0)),
                  pl.BlockSpec((1, Cout), lambda bi, hi: (0, 0))],
        out_specs=pl.BlockSpec((1, 1, W, Cout), lambda bi, hi: (bi, hi, 0, 0)),
        compiler_params=pltpu.CompilerParams(
            dimension_semantics=("parallel", "parallel"),
            vmem_limit_bytes=_VMEM_LIMIT),
    )(xp, xp, xp, wk, b2)


# --------------------------------------------------------------------------
# Cross attention: (B, Lq, C) x (B, Lk, 2C fused k|v) -> (B, Lq, C).
# Grid over batch (>=2 steps for megacore); heads sliced in-kernel; the
# contraction is on the last (lane) dim so no relayout transposes are needed.
# --------------------------------------------------------------------------
def _cross_attn_kernel(q_ref, kv_ref, o_ref, *, n_heads, hc, scale):
    C = n_heads * hc
    q = q_ref[0]                                         # (Lq, C) f32
    kv = kv_ref[0]                                       # (Lk, 2C) f32
    outs = []
    for h in range(n_heads):
        qh = (q[:, h * hc:(h + 1) * hc] * scale).astype(jnp.bfloat16)
        kh = kv[:, h * hc:(h + 1) * hc].astype(jnp.bfloat16)
        vh = kv[:, C + h * hc:C + (h + 1) * hc].astype(jnp.bfloat16)
        s = lax.dot_general(qh, kh, (((1,), (1,)), ((), ())),
                            preferred_element_type=jnp.float32)   # (Lq, Lk)
        s = s - jnp.max(s, axis=-1, keepdims=True)
        p = jnp.exp(s)
        p = p * pl.reciprocal(jnp.sum(p, axis=-1, keepdims=True), approx=False)
        outs.append(jnp.dot(p.astype(jnp.bfloat16), vh,
                            preferred_element_type=jnp.float32))  # (Lq, hc)
    o_ref[0] = jnp.concatenate(outs, axis=-1)


def cross_attention(q, kv, scale, n_heads, hc):
    """q:(B,Lq,C), kv:(B,Lk,2C) [k|v fused] -> (B,Lq,C) f32; softmax over Lk."""
    B, Lq, C = q.shape
    Lk = kv.shape[1]
    # TODO(synk): for very large H*W a flash-style streamed softmax over an
    # extra Lk grid axis would keep the (Lq, Lk) scores out of VMEM.
    kern = functools.partial(_cross_attn_kernel, n_heads=n_heads, hc=hc,
                             scale=scale)
    return pl.pallas_call(
        kern,
        out_shape=jax.ShapeDtypeStruct((B, Lq, C), jnp.float32),
        grid=(B,),
        in_specs=[pl.BlockSpec((1, Lq, C), lambda b: (b, 0, 0)),
                  pl.BlockSpec((1, Lk, 2 * C), lambda b: (b, 0, 0))],
        out_specs=pl.BlockSpec((1, Lq, C), lambda b: (b, 0, 0)),
        compiler_params=pltpu.CompilerParams(
            dimension_semantics=("parallel",),
            vmem_limit_bytes=_VMEM_LIMIT),
    )(q.astype(jnp.float32), kv.astype(jnp.float32))


# --------------------------------------------------------------------------
# ModalityNorm core, channels-last, tiled over (batch, channel, spatial).
# Pass 1: per-(b,c) sum / sumsq of lr and ref (spatial axis 'arbitrary').
# Pass 2: ref_normed * (gamma + lr_std) + (beta + lr_mean).
# --------------------------------------------------------------------------
def _mn_stats_kernel(lr_ref, ref_ref, o_ref):
    @pl.when(pl.program_id(2) == 0)
    def _init():
        o_ref[...] = jnp.zeros_like(o_ref)

    lr = lr_ref[0]
    rf = ref_ref[0]
    o_ref[0] += jnp.concatenate(
        [jnp.sum(lr, axis=0, keepdims=True),
         jnp.sum(lr * lr, axis=0, keepdims=True),
         jnp.sum(rf, axis=0, keepdims=True),
         jnp.sum(rf * rf, axis=0, keepdims=True)], axis=0)


def _mn_apply_kernel(ref_ref, g_ref, b_ref, st_ref, o_ref, *, n, eps):
    st = st_ref[0]                                       # (4, TC)
    lr_mean = st[0:1] / n
    lr_var = (st[1:2] / n - lr_mean * lr_mean) * (n / (n - 1.0))   # unbiased
    lr_std = jnp.sqrt(jnp.maximum(lr_var, 0.0))
    ref_mean = st[2:3] / n
    ref_var = jnp.maximum(st[3:4] / n - ref_mean * ref_mean, 0.0)  # biased (IN)
    inv = lax.rsqrt(ref_var + eps)
    o_ref[0] = ((ref_ref[0] - ref_mean) * inv * (g_ref[0] + lr_std)
                + (b_ref[0] + lr_mean))


def _spatial_tile(HW, cap=2048):
    if HW <= cap:
        return HW
    for t in range(cap, 7, -1):
        if t % 8 == 0 and HW % t == 0:
            return t
    return HW


def modality_norm_core(lr, ref, gamma, beta, eps=1e-5):
    """All inputs (B, H*W, C) channels-last; per-(b, c) stats over H*W."""
    B, HW, C = lr.shape
    TC = 128 if (C > 128 and C % 128 == 0) else C
    THW = _spatial_tile(HW)
    grid = (B, C // TC, HW // THW)

    stats = pl.pallas_call(
        _mn_stats_kernel,
        out_shape=jax.ShapeDtypeStruct((B, 4, C), jnp.float32),
        grid=grid,
        in_specs=[pl.BlockSpec((1, THW, TC), lambda b, c, s: (b, s, c))] * 2,
        out_specs=pl.BlockSpec((1, 4, TC), lambda b, c, s: (b, 0, c)),
        compiler_params=pltpu.CompilerParams(
            dimension_semantics=("parallel", "parallel", "arbitrary"),
            vmem_limit_bytes=_VMEM_LIMIT),
    )(lr.astype(jnp.float32), ref.astype(jnp.float32))

    kern = functools.partial(_mn_apply_kernel, n=float(HW), eps=eps)
    return pl.pallas_call(
        kern,
        out_shape=jax.ShapeDtypeStruct((B, HW, C), jnp.float32),
        grid=grid,
        in_specs=[pl.BlockSpec((1, THW, TC), lambda b, c, s: (b, s, c))] * 3
                 + [pl.BlockSpec((1, 4, TC), lambda b, c, s: (b, 0, c))],
        out_specs=pl.BlockSpec((1, THW, TC), lambda b, c, s: (b, s, c)),
        compiler_params=pltpu.CompilerParams(
            dimension_semantics=("parallel", "parallel", "parallel"),
            vmem_limit_bytes=_VMEM_LIMIT),
    )(ref.astype(jnp.float32), gamma.astype(jnp.float32),
      beta.astype(jnp.float32), stats)


def modality_norm(p, prefix, lr, ref):
    """lr, ref: (B,H,W,C) channels-last."""
    x = conv3x3(lr, p[f"{prefix}_conv_w"], p[f"{prefix}_conv_b"], relu=True)
    gamma = conv3x3(x, p[f"{prefix}_gamma_w"], p[f"{prefix}_gamma_b"])
    beta = conv3x3(x, p[f"{prefix}_beta_w"], p[f"{prefix}_beta_b"])
    B, H, W, C = lr.shape
    out = modality_norm_core(lr.reshape(B, H * W, C), ref.reshape(B, H * W, C),
                             gamma.reshape(B, H * W, C), beta.reshape(B, H * W, C))
    return out.reshape(B, H, W, C)


# --------------------------------------------------------------------------
# JAX glue: grid_sample, reference points, LayerNorm over channels
# --------------------------------------------------------------------------
def grid_sample_bilinear_nhwc(x, grid):
    """F.grid_sample(mode='bilinear', padding_mode='zeros', align_corners=True).
    x:(N,H,W,C), grid:(N,Hg,Wg,2) with grid[...,0]=x, grid[...,1]=y in [-1,1]."""
    # TODO(synk): data-dependent gather kept in plain JAX; a Pallas DMA-gather
    # with scalar-prefetched indices would be needed at production n_sample.
    N, H, W, C = x.shape
    gx = (grid[..., 0] + 1.0) * 0.5 * (W - 1)
    gy = (grid[..., 1] + 1.0) * 0.5 * (H - 1)
    x0 = jnp.floor(gx)
    y0 = jnp.floor(gy)
    x1 = x0 + 1.0
    y1 = y0 + 1.0
    wx1 = gx - x0
    wx0 = 1.0 - wx1
    wy1 = gy - y0
    wy0 = 1.0 - wy1
    flat = x.reshape(N, H * W, C)

    def corner(ix, iy):
        valid = (ix >= 0) & (ix <= W - 1) & (iy >= 0) & (iy <= H - 1)
        ixc = jnp.clip(ix, 0, W - 1).astype(jnp.int32)
        iyc = jnp.clip(iy, 0, H - 1).astype(jnp.int32)
        idx = (iyc * W + ixc).reshape(N, -1, 1)
        vals = jnp.take_along_axis(flat, idx, axis=1)
        vals = vals.reshape(N, ix.shape[1], ix.shape[2], C)
        return vals * valid[..., None].astype(x.dtype)

    return (corner(x0, y0) * (wy0 * wx0)[..., None]
            + corner(x1, y0) * (wy0 * wx1)[..., None]
            + corner(x0, y1) * (wy1 * wx0)[..., None]
            + corner(x1, y1) * (wy1 * wx1)[..., None])


def get_ref_points(Hk, Wk, Bg, dtype=jnp.float32):
    ref_y = jnp.linspace(0.5, Hk - 0.5, Hk, dtype=dtype)
    ref_x = jnp.linspace(0.5, Wk - 0.5, Wk, dtype=dtype)
    ry, rx = jnp.meshgrid(ref_y, ref_x, indexing="ij")
    ref = jnp.stack([ry, rx], axis=-1)                   # (Hk, Wk, 2): (y, x)
    ref = ref.at[..., 1].set(ref[..., 1] / Wk * 2.0 - 1.0)
    ref = ref.at[..., 0].set(ref[..., 0] / Hk * 2.0 - 1.0)
    return jnp.broadcast_to(ref[None], (Bg, Hk, Wk, 2))


def layernorm_lastdim(x, w, b, eps=1e-5):
    m = jnp.mean(x, axis=-1, keepdims=True)
    v = jnp.mean((x - m) ** 2, axis=-1, keepdims=True)
    return (x - m) / jnp.sqrt(v + eps) * w + b


# --------------------------------------------------------------------------
# Layout helpers (channels-last <-> group layouts)
# --------------------------------------------------------------------------
def _split_groups_nhwc(x, n_groups):
    B, H, W, C = x.shape
    Cg = C // n_groups
    x = x.reshape(B, H, W, n_groups, Cg)
    return jnp.transpose(x, (0, 3, 1, 2, 4)).reshape(B * n_groups, H, W, Cg)


def _merge_groups_to_rows(x_g, B, n_groups):
    Bg, Hk, Wk, Cg = x_g.shape
    x = x_g.reshape(B, n_groups, Hk, Wk, Cg)
    x = jnp.transpose(x, (0, 2, 3, 1, 4))
    return x.reshape(B, Hk * Wk, n_groups * Cg)


# --------------------------------------------------------------------------
# Full forward
# --------------------------------------------------------------------------
def c2former_forward(p, vis_x, lwir_x, *, n_heads, n_head_channels, n_groups,
                     offset_range_factor, no_off, stride, kk):
    B, C, H, W = vis_x.shape
    hc = n_head_channels
    Cg = C // n_groups
    scale = hc ** (-0.5)

    # single NCHW -> NHWC conversion at the module boundary
    vis = jnp.transpose(vis_x, (0, 2, 3, 1)).astype(jnp.float32)
    lwir = jnp.transpose(lwir_x, (0, 2, 3, 1)).astype(jnp.float32)

    # combined query projection (1x1 conv, 2C -> C)
    x = jnp.concatenate([vis, lwir], axis=-1)
    combin_q = conv1x1(x, p["combinq_w"], p["combinq_b"])          # (B,H,W,C)
    q_off = _split_groups_nhwc(combin_q, n_groups)                 # (Bg,H,W,Cg)

    # conv_offset: depthwise conv -> LayerNorm(channels) -> GELU -> 1x1 (no bias)
    # TODO(synk): grouped/depthwise conv kept in lax.conv_general_dilated (no
    # clean matmul-style Pallas mapping at this size).
    w_dw = jnp.transpose(p["off_dw_w"], (2, 3, 1, 0))              # (kk,kk,1,Cg)
    off = lax.conv_general_dilated(
        q_off, w_dw, window_strides=(stride, stride),
        padding=[(kk // 2, kk // 2)] * 2,
        dimension_numbers=("NHWC", "HWIO", "NHWC"),
        feature_group_count=Cg)
    off = off + p["off_dw_b"]
    off = layernorm_lastdim(off, p["off_ln_w"], p["off_ln_b"])
    off = jax.nn.gelu(off, approximate=False)
    offset = conv1x1(off, p["off_proj_w"], None)                   # (Bg,Hk,Wk,2)=(y,x)

    Hk, Wk = offset.shape[1], offset.shape[2]
    n_sample = Hk * Wk

    if offset_range_factor > 0:
        offset_range = jnp.array([1.0 / Hk, 1.0 / Wk], jnp.float32)
        offset = jnp.tanh(offset) * offset_range * offset_range_factor
    if no_off:
        offset = jnp.zeros_like(offset)

    vis_ref_pts = get_ref_points(Hk, Wk, B * n_groups)
    lwir_ref_pts = get_ref_points(Hk, Wk, B * n_groups)
    if offset_range_factor >= 0:
        vis_pos = vis_ref_pts + offset
        lwir_pos = lwir_ref_pts
    else:
        vis_pos = jnp.tanh(vis_ref_pts + offset)
        lwir_pos = jnp.tanh(lwir_ref_pts)

    vis_grid = jnp.stack([vis_pos[..., 1], vis_pos[..., 0]], axis=-1)   # (x, y)
    lwir_grid = jnp.stack([lwir_pos[..., 1], lwir_pos[..., 0]], axis=-1)

    vis_s = grid_sample_bilinear_nhwc(_split_groups_nhwc(vis, n_groups), vis_grid)
    lwir_s = grid_sample_bilinear_nhwc(_split_groups_nhwc(lwir, n_groups), lwir_grid)
    vis_rows = _merge_groups_to_rows(vis_s, B, n_groups)           # (B, n_sample, C)
    lwir_rows = _merge_groups_to_rows(lwir_s, B, n_groups)

    HWl = H * W
    # cross-modality normalized queries (Pallas matmuls / norm kernels)
    q_lwir = conv1x1(modality_norm(p, "vis_MN", vis, lwir),
                     p["proj_q_lwir_w"], p["proj_q_lwir_b"]).reshape(B, HWl, C)
    q_vis = conv1x1(modality_norm(p, "lwir_MN", lwir, vis),
                    p["proj_q_vis_w"], p["proj_q_vis_b"]).reshape(B, HWl, C)

    # fused k/v projections: one matmul per modality producing (B, n_sample, 2C)
    def fused_kv(rows, kw, kb, vw, vb):
        wm = jnp.concatenate([jnp.transpose(kw), jnp.transpose(vw)], axis=1)
        bb = jnp.concatenate([kb, vb], axis=0)
        flat = rows.reshape(-1, rows.shape[-1])
        return matmul_bias(flat, wm, bb).reshape(rows.shape[0], rows.shape[1], 2 * C)

    kv_vis = fused_kv(vis_rows, p["proj_k_vis_w"], p["proj_k_vis_b"],
                      p["proj_v_vis_w"], p["proj_v_vis_b"])
    kv_lwir = fused_kv(lwir_rows, p["proj_k_lwir_w"], p["proj_k_lwir_b"],
                       p["proj_v_lwir_w"], p["proj_v_lwir_b"])

    # attention (softmax over sampled positions) -- Pallas kernels
    out_vis_rows = cross_attention(q_lwir, kv_vis, scale, n_heads, hc)   # (B,HW,C)
    out_lwir_rows = cross_attention(q_vis, kv_lwir, scale, n_heads, hc)

    out_vis = conv1x1(out_vis_rows, p["proj_out_vis_w"],
                      p["proj_out_vis_b"]).reshape(B, H, W, C)
    out_lwir = conv1x1(out_lwir_rows, p["proj_out_lwir_w"],
                       p["proj_out_lwir_b"]).reshape(B, H, W, C)

    # dropouts are identity (inference); single NHWC -> NCHW conversion back
    return (jnp.transpose(out_vis, (0, 3, 1, 2)),
            jnp.transpose(out_lwir, (0, 3, 1, 2)))


# --------------------------------------------------------------------------
# Deterministic parameter init (synthetic; shapes from __init__)
# --------------------------------------------------------------------------
def init_params(key, nc, qnc, n_group_channels, kk):
    ks = jax.random.split(key, 16)

    def w(k, shape):
        return 0.02 * jax.random.normal(k, shape, jnp.float32)

    p = {}
    p["combinq_w"] = w(ks[0], (nc, qnc))
    p["combinq_b"] = jnp.zeros((nc,), jnp.float32)
    p["off_dw_w"] = w(ks[1], (n_group_channels, 1, kk, kk))
    p["off_dw_b"] = jnp.zeros((n_group_channels,), jnp.float32)
    p["off_ln_w"] = jnp.ones((n_group_channels,), jnp.float32)
    p["off_ln_b"] = jnp.zeros((n_group_channels,), jnp.float32)
    p["off_proj_w"] = w(ks[2], (2, n_group_channels))

    names = ["q_lwir", "q_vis", "k_lwir", "k_vis", "v_lwir", "v_vis",
             "out_lwir", "out_vis"]
    for i, nm in enumerate(names):
        p[f"proj_{nm}_w"] = w(ks[3 + i], (nc, nc))
        p[f"proj_{nm}_b"] = 0.01 * jnp.arange(nc, dtype=jnp.float32)

    for j, nm in enumerate(["vis_MN", "lwir_MN"]):
        p[f"{nm}_conv_w"] = w(ks[11 + j], (nc, nc, 3, 3))
        p[f"{nm}_conv_b"] = jnp.zeros((nc,), jnp.float32)
        # zero-initialized per the module's __init__
        p[f"{nm}_gamma_w"] = jnp.zeros((nc, nc, 3, 3), jnp.float32)
        p[f"{nm}_gamma_b"] = jnp.zeros((nc,), jnp.float32)
        p[f"{nm}_beta_w"] = jnp.zeros((nc, nc, 3, 3), jnp.float32)
        p[f"{nm}_beta_b"] = jnp.zeros((nc,), jnp.float32)
    return p


if __name__ == "__main__":
    # small config: stage_idx=3 -> kk=3, stride=1
    B = 2
    n_heads = 2
    n_head_channels = 4
    n_groups = 2
    H = W = 16
    nc = n_heads * n_head_channels          # 8
    qnc = 2 * nc                            # 16
    n_group_channels = nc // n_groups       # 4
    kk = 3
    stride = 1
    offset_range_factor = 2
    no_off = False

    key = jax.random.PRNGKey(0)
    k_vis, k_lwir, k_par = jax.random.split(key, 3)
    vis_x = jax.random.normal(k_vis, (B, nc, H, W), dtype=jnp.float32)
    lwir_x = jax.random.normal(k_lwir, (B, nc, H, W), dtype=jnp.float32)

    params = init_params(k_par, nc, qnc, n_group_channels, kk)

    fwd = jax.jit(functools.partial(
        c2former_forward,
        n_heads=n_heads, n_head_channels=n_head_channels, n_groups=n_groups,
        offset_range_factor=offset_range_factor, no_off=no_off,
        stride=stride, kk=kk))

    out_vis, out_lwir = fwd(params, vis_x, lwir_x)
    jax.block_until_ready((out_vis, out_lwir))

    assert out_vis.shape == (B, nc, H, W) and out_lwir.shape == (B, nc, H, W)
    assert bool(jnp.all(jnp.isfinite(out_vis))) and bool(jnp.all(jnp.isfinite(out_lwir)))
    print("KERNEL_OK")
</pallas_src>

<mosaic_0001>
module attributes {stable_mosaic.version = 11 : i64} {
  func.func @_mn_stats_kernel(%arg0: i32, %arg1: i32, %arg2: i32, %arg3: memref<1x256x8xf32, #tpu.memory_space<vmem>>, %arg4: memref<1x256x8xf32, #tpu.memory_space<vmem>>, %arg5: memref<1x4x8xf32, #tpu.memory_space<vmem>>) attributes {dimension_semantics = [#tpu.dimension_semantics<parallel>, #tpu.dimension_semantics<parallel>, #tpu.dimension_semantics<arbitrary>], iteration_bounds = array<i64: 2, 1, 1>, scalar_prefetch = 0 : i64, scratch_operands = 0 : i64, tpu.core_type = #tpu.core_type<tc>, window_params = [{transform_indices = @transform_0, window_bounds = array<i64: 1, 256, 8>}, {transform_indices = @transform_1, window_bounds = array<i64: 1, 256, 8>}, {transform_indices = @transform_2, window_bounds = array<i64: 1, 4, 8>}]} {
    %c0_i32 = arith.constant 0 : i32
    %0 = arith.cmpi eq, %arg2, %c0_i32 : i32
    %1 = arith.extui %0 : i1 to i32
    %c0_i32_0 = arith.constant 0 : i32
    %2 = arith.cmpi ne, %1, %c0_i32_0 : i32
    scf.if %2 {
      %cst_15 = arith.constant 0.000000e+00 : f32
      %24 = vector.broadcast %cst_15 : f32 to vector<1x4x8xf32>
      %c0_16 = arith.constant 0 : index
      %c0_17 = arith.constant 0 : index
      %c0_18 = arith.constant 0 : index
      %25 = vector.load %arg5[%c0_16, %c0_17, %c0_18] : memref<1x4x8xf32, #tpu.memory_space<vmem>>, vector<1x4x8xf32>
      tpu.vector_store %arg5[%c0_16, %c0_17, %c0_18], %24 {strides = array<i32>} : memref<1x4x8xf32, #tpu.memory_space<vmem>>, vector<1x4x8xf32>,
    } else {
    }
    %c0 = arith.constant 0 : index
    %c0_1 = arith.constant 0 : index
    %c0_2 = arith.constant 0 : index
    %3 = vector.load %arg3[%c0, %c0_1, %c0_2] : memref<1x256x8xf32, #tpu.memory_space<vmem>>, vector<1x256x8xf32>
    %4 = vector.shape_cast %3 : vector<1x256x8xf32> to vector<256x8xf32>
    %c0_3 = arith.constant 0 : index
    %c0_4 = arith.constant 0 : index
    %c0_5 = arith.constant 0 : index
    %5 = vector.load %arg4[%c0_3, %c0_4, %c0_5] : memref<1x256x8xf32, #tpu.memory_space<vmem>>, vector<1x256x8xf32>
    %6 = vector.shape_cast %5 : vector<1x256x8xf32> to vector<256x8xf32>
    %c0_6 = arith.constant 0 : index
    %c0_7 = arith.constant 0 : index
    %c0_8 = arith.constant 0 : index
    %7 = vector.load %arg5[%c0_6, %c0_7, %c0_8] : memref<1x4x8xf32, #tpu.memory_space<vmem>>, vector<1x4x8xf32>
    %8 = vector.shape_cast %7 : vector<1x4x8xf32> to vector<4x8xf32>
    %cst = arith.constant dense<0.000000e+00> : vector<8xf32>
    %9 = vector.multi_reduction <add>, %4, %cst [0] : vector<256x8xf32> to vector<8xf32>
    %10 = vector.shape_cast %9 : vector<8xf32> to vector<1x8xf32>
    %11 = arith.mulf %4, %4 : vector<256x8xf32>
    %cst_9 = arith.constant dense<0.000000e+00> : vector<8xf32>
    %12 = vector.multi_reduction <add>, %11, %cst_9 [0] : vector<256x8xf32> to vector<8xf32>
    %13 = vector.shape_cast %12 : vector<8xf32> to vector<1x8xf32>
    %cst_10 = arith.constant dense<0.000000e+00> : vector<8xf32>
    %14 = vector.multi_reduction <add>, %6, %cst_10 [0] : vector<256x8xf32> to vector<8xf32>
    %15 = vector.shape_cast %14 : vector<8xf32> to vector<1x8xf32>
    %16 = arith.mulf %6, %6 : vector<256x8xf32>
    %cst_11 = arith.constant dense<0.000000e+00> : vector<8xf32>
    %17 = vector.multi_reduction <add>, %16, %cst_11 [0] : vector<256x8xf32> to vector<8xf32>
    %18 = vector.shape_cast %17 : vector<8xf32> to vector<1x8xf32>
    %19 = tpu.concatenate %10, %13, %15, %18 in 0 : vector<1x8xf32>, vector<1x8xf32>, vector<1x8xf32>, vector<1x8xf32> -> vector<4x8xf32>
    %20 = arith.addf %8, %19 : vector<4x8xf32>
    %c0_12 = arith.constant 0 : index
    %c0_13 = arith.constant 0 : index
    %c0_14 = arith.constant 0 : index
    %21 = vector.load %arg5[%c0_12, %c0_13, %c0_14] : memref<1x4x8xf32, #tpu.memory_space<vmem>>, vector<1x4x8xf32>
    %22 = vector.shape_cast %21 : vector<1x4x8xf32> to vector<4x8xf32>
    %23 = vector.shape_cast %20 : vector<4x8xf32> to vector<1x4x8xf32>
    tpu.vector_store %arg5[%c0_12, %c0_13, %c0_14], %23 {strides = array<i32>} : memref<1x4x8xf32, #tpu.memory_space<vmem>>, vector<1x4x8xf32>,
    return
  }
  func.func @transform_0(%arg0: i32, %arg1: i32, %arg2: i32) -> (i32, i32, i32) {
    %c0_i32 = arith.constant 0 : i32
    return %arg0, %arg2, %arg1 : i32, i32, i32
  }
  func.func @transform_1(%arg0: i32, %arg1: i32, %arg2: i32) -> (i32, i32, i32) {
    %c0_i32 = arith.constant 0 : i32
    return %arg0, %arg2, %arg1 : i32, i32, i32
  }
  func.func @transform_2(%arg0: i32, %arg1: i32, %arg2: i32) -> (i32, i32, i32) {
    %c0_i32 = arith.constant 0 : i32
    %c0_i32_0 = arith.constant 0 : i32
    return %arg0, %c0_i32, %arg1 : i32, i32, i32
  }
}

module attributes {stable_mosaic.version = 11 : i64} {
  func.func @_matmul_bias_kernel(%arg0: i32, %arg1: i32, %arg2: memref<512x8xf32, #tpu.memory_space<vmem>>, %arg3: memref<8x16xf32, #tpu.memory_space<vmem>>, %arg4: memref<1x16xf32, #tpu.memory_space<vmem>>, %arg5: memref<512x16xf32, #tpu.memory_space<vmem>>) attributes {dimension_semantics = [#tpu.dimension_semantics<parallel>, #tpu.dimension_semantics<parallel>], iteration_bounds = array<i64: 1, 1>, scalar_prefetch = 0 : i64, scratch_operands = 0 : i64, tpu.core_type = #tpu.core_type<tc>, window_params = [{transform_indices = @transform_0, window_bounds = array<i64: 512, 8>}, {transform_indices = @transform_1, window_bounds = array<i64: 8, 16>}, {transform_indices = @transform_2, window_bounds = array<i64: 1, 16>}, {transform_indices = @transform_3, window_bounds = array<i64: 512, 16>}]} {
    %c0 = arith.constant 0 : index
    %c0_0 = arith.constant 0 : index
    %0 = vector.load %arg2[%c0, %c0_0] : memref<512x8xf32, #tpu.memory_space<vmem>>, vector<512x8xf32>
    %1 = arith.truncf %0 : vector<512x8xf32> to vector<512x8xbf16>
    %c0_1 = arith.constant 0 : index
    %c0_2 = arith.constant 0 : index
    %2 = vector.load %arg3[%c0_1, %c0_2] : memref<8x16xf32, #tpu.memory_space<vmem>>, vector<8x16xf32>
    %3 = arith.truncf %2 : vector<8x16xf32> to vector<8x16xbf16>
    %cst = arith.constant dense<0.000000e+00> : vector<512x16xf32>
    %4 = tpu.matmul %1, %3, %cst {dimension_numbers = #tpu.dot_dimension_numbers<[1], [0], [0], [1], [0, 0, 1, 1], [], []>} : vector<512x8xbf16>, vector<8x16xbf16>, vector<512x16xf32> -> vector<512x16xf32>
    %c0_3 = arith.constant 0 : index
    %c0_4 = arith.constant 0 : index
    %5 = vector.load %arg4[%c0_3, %c0_4] : memref<1x16xf32, #tpu.memory_space<vmem>>, vector<1x16xf32>
    %6 = vector.broadcast %5 : vector<1x16xf32> to vector<512x16xf32>
    %7 = arith.addf %4, %6 : vector<512x16xf32>
    %c0_5 = arith.constant 0 : index
    %c0_6 = arith.constant 0 : index
    %8 = vector.load %arg5[%c0_5, %c0_6] : memref<512x16xf32, #tpu.memory_space<vmem>>, vector<512x16xf32>
    tpu.vector_store %arg5[%c0_5, %c0_6], %7 {strides = array<i32>} : memref<512x16xf32, #tpu.memory_space<vmem>>, vector<512x16xf32>,
    return
  }
  func.func @transform_0(%arg0: i32, %arg1: i32) -> (i32, i32) {
    %c0_i32 = arith.constant 0 : i32
    %c0_i32_0 = arith.constant 0 : i32
    return %arg0, %c0_i32 : i32, i32
  }
  func.func @transform_1(%arg0: i32, %arg1: i32) -> (i32, i32) {
    %c0_i32 = arith.constant 0 : i32
    %c0_i32_0 = arith.constant 0 : i32
    return %c0_i32, %arg1 : i32, i32
  }
  func.func @transform_2(%arg0: i32, %arg1: i32) -> (i32, i32) {
    %c0_i32 = arith.constant 0 : i32
    %c0_i32_0 = arith.constant 0 : i32
    return %c0_i32, %arg1 : i32, i32
  }
  func.func @transform_3(%arg0: i32, %arg1: i32) -> (i32, i32) {
    %c0_i32 = arith.constant 0 : i32
    return %arg0, %arg1 : i32, i32
  }
}

module attributes {stable_mosaic.version = 11 : i64} {
  func.func @_conv3x3_row_kernel(%arg0: i32, %arg1: i32, %arg2: memref<1x1x18x8xf32, #tpu.memory_space<vmem>>, %arg3: memref<1x1x18x8xf32, #tpu.memory_space<vmem>>, %arg4: memref<1x1x18x8xf32, #tpu.memory_space<vmem>>, %arg5: memref<9x8x8xbf16, #tpu.memory_space<vmem>>, %arg6: memref<1x8xf32, #tpu.memory_space<vmem>>, %arg7: memref<1x1x16x8xf32, #tpu.memory_space<vmem>>) attributes {dimension_semantics = [#tpu.dimension_semantics<parallel>, #tpu.dimension_semantics<parallel>], iteration_bounds = array<i64: 2, 16>, scalar_prefetch = 0 : i64, scratch_operands = 0 : i64, tpu.core_type = #tpu.core_type<tc>, window_params = [{transform_indices = @transform_0, window_bounds = array<i64: 1, 1, 18, 8>}, {transform_indices = @transform_1, window_bounds = array<i64: 1, 1, 18, 8>}, {transform_indices = @transform_2, window_bounds = array<i64: 1, 1, 18, 8>}, {pipeline_mode = #tpu.pipeline_mode<synchronous>, transform_indices = @transform_3, window_bounds = array<i64: 9, 8, 8>}, {pipeline_mode = #tpu.pipeline_mode<synchronous>, transform_indices = @transform_4, window_bounds = array<i64: 1, 8>}, {transform_indices = @transform_5, window_bounds = array<i64: 1, 1, 16, 8>}]} {
    %cst = arith.constant 0.000000e+00 : f32
    %0 = vector.broadcast %cst : f32 to vector<16x8xf32>
    %c0 = arith.constant 0 : index
    %c0_0 = arith.constant 0 : index
    %c0_1 = arith.constant 0 : index
    %c0_2 = arith.constant 0 : index
    %1 = vector.load %arg2[%c0, %c0_0, %c0_1, %c0_2] : memref<1x1x18x8xf32, #tpu.memory_space<vmem>>, vector<1x1x18x8xf32>
    %2 = vector.shape_cast %1 : vector<1x1x18x8xf32> to vector<18x8xf32>
    %3 = arith.truncf %2 : vector<18x8xf32> to vector<18x8xbf16>
    %4 = vector.extract_strided_slice %3 {offsets = [0, 0], sizes = [16, 8], strides = [1, 1]} : vector<18x8xbf16> to vector<16x8xbf16>
    %c0_3 = arith.constant 0 : index
    %c0_4 = arith.constant 0 : index
    %c0_5 = arith.constant 0 : index
    %5 = vector.load %arg5[%c0_3, %c0_4, %c0_5] : memref<9x8x8xbf16, #tpu.memory_space<vmem>>, vector<1x8x8xbf16>
    %6 = vector.shape_cast %5 : vector<1x8x8xbf16> to vector<8x8xbf16>
    %cst_6 = arith.constant dense<0.000000e+00> : vector<16x8xf32>
    %7 = tpu.matmul %4, %6, %cst_6 {dimension_numbers = #tpu.dot_dimension_numbers<[1], [0], [0], [1], [0, 0, 1, 1], [], []>} : vector<16x8xbf16>, vector<8x8xbf16>, vector<16x8xf32> -> vector<16x8xf32>
    %8 = arith.addf %0, %7 : vector<16x8xf32>
    %9 = vector.extract_strided_slice %3 {offsets = [1, 0], sizes = [16, 8], strides = [1, 1]} : vector<18x8xbf16> to vector<16x8xbf16>
    %c1 = arith.constant 1 : index
    %c0_7 = arith.constant 0 : index
    %c0_8 = arith.constant 0 : index
    %10 = vector.load %arg5[%c1, %c0_7, %c0_8] : memref<9x8x8xbf16, #tpu.memory_space<vmem>>, vector<1x8x8xbf16>
    %11 = vector.shape_cast %10 : vector<1x8x8xbf16> to vector<8x8xbf16>
    %cst_9 = arith.constant dense<0.000000e+00> : vector<16x8xf32>
    %12 = tpu.matmul %9, %11, %cst_9 {dimension_numbers = #tpu.dot_dimension_numbers<[1], [0], [0], [1], [0, 0, 1, 1], [], []>} : vector<16x8xbf16>, vector<8x8xbf16>, vector<16x8xf32> -> vector<16x8xf32>
    %13 = arith.addf %8, %12 : vector<16x8xf32>
    %14 = vector.extract_strided_slice %3 {offsets = [2, 0], sizes = [16, 8], strides = [1, 1]} : vector<18x8xbf16> to vector<16x8xbf16>
    %c2 = arith.constant 2 : index
    %c0_10 = arith.constant 0 : index
    %c0_11 = arith.constant 0 : index
    %15 = vector.load %arg5[%c2, %c0_10, %c0_11] : memref<9x8x8xbf16, #tpu.memory_space<vmem>>, vector<1x8x8xbf16>
    %16 = vector.shape_cast %15 : vector<1x8x8xbf16> to vector<8x8xbf16>
    %cst_12 = arith.constant dense<0.000000e+00> : vector<16x8xf32>
    %17 = tpu.matmul %14, %16, %cst_12 {dimension_numbers = #tpu.dot_dimension_numbers<[1], [0], [0], [1], [0, 0, 1, 1], [], []>} : vector<16x8xbf16>, vector<8x8xbf16>, vector<16x8xf32> -> vector<16x8xf32>
    %18 = arith.addf %13, %17 : vector<16x8xf32>
    %c0_13 = arith.constant 0 : index
    %c0_14 = arith.constant 0 : index
    %c0_15 = arith.constant 0 : index
    %c0_16 = arith.constant 0 : index
    %19 = vector.load %arg3[%c0_13, %c0_14, %c0_15, %c0_16] : memref<1x1x18x8xf32, #tpu.memory_space<vmem>>, vector<1x1x18x8xf32>
    %20 = vector.shape_cast %19 : vector<1x1x18x8xf32> to vector<18x8xf32>
    %21 = arith.truncf %20 : vector<18x8xf32> to vector<18x8xbf16>
    %22 = vector.extract_strided_slice %21 {offsets = [0, 0], sizes = [16, 8], strides = [1, 1]} : vector<18x8xbf16> to vector<16x8xbf16>
    %c3 = arith.constant 3 : index
    %c0_17 = arith.constant 0 : index
    %c0_18 = arith.constant 0 : index
    %23 = vector.load %arg5[%c3, %c0_17, %c0_18] : memref<9x8x8xbf16, #tpu.memory_space<vmem>>, vector<1x8x8xbf16>
    %24 = vector.shape_cast %23 : vector<1x8x8xbf16> to vector<8x8xbf16>
    %cst_19 = arith.constant dense<0.000000e+00> : vector<16x8xf32>
    %25 = tpu.matmul %22, %24, %cst_19 {dimension_numbers = #tpu.dot_dimension_numbers<[1], [0], [0], [1], [0, 0, 1, 1], [], []>} : vector<16x8xbf16>, vector<8x8xbf16>, vector<16x8xf32> -> vector<16x8xf32>
    %26 = arith.addf %18, %25 : vector<16x8xf32>
    %27 = vector.extract_strided_slice %21 {offsets = [1, 0], sizes = [16, 8], strides = [1, 1]} : vector<18x8xbf16> to vector<16x8xbf16>
    %c4 = arith.constant 4 : index
    %c0_20 = arith.constant 0 : index
    %c0_21 = arith.constant 0 : index
    %28 = vector.load %arg5[%c4, %c0_20, %c0_21] : memref<9x8x8xbf16, #tpu.memory_space<vmem>>, vector<1x8x8xbf16>
    %29 = vector.shape_cast %28 : vector<1x8x8xbf16> to vector<8x8xbf16>
    %cst_22 = arith.constant dense<0.000000e+00> : vector<16x8xf32>
    %30 = tpu.matmul %27, %29, %cst_22 {dimension_numbers = #tpu.dot_dimension_numbers<[1], [0], [0], [1], [0, 0, 1, 1], [], []>} : vector<16x8xbf16>, vector<8x8xbf16>, vector<16x8xf32> -> vector<16x8xf32>
    %31 = arith.addf %26, %30 : vector<16x8xf32>
    %32 = vector.extract_strided_slice %21 {offsets = [2, 0], sizes = [16, 8], strides = [1, 1]} : vector<18x8xbf16> to vector<16x8xbf16>
    %c5 = arith.constant 5 : index
    %c0_23 = arith.constant 0 : index
    %c0_24 = arith.constant 0 : index
    %33 = vector.load %arg5[%c5, %c0_23, %c0_24] : memref<9x8x8xbf16, #tpu.memory_space<vmem>>, vector<1x8x8xbf16>
    %34 = vector.shape_cast %33 : vector<1x8x8xbf16> to vector<8x8xbf16>
    %cst_25 = arith.constant dense<0.000000e+00> : vector<16x8xf32>
    %35 = tpu.matmul %32, %34, %cst_25 {dimension_numbers = #tpu.dot_dimension_numbers<[1], [0], [0], [1], [0, 0, 1, 1], [], []>} : vector<16x8xbf16>, vector<8x8xbf16>, vector<16x8xf32> -> vector<16x8xf32>
    %36 = arith.addf %31, %35 : vector<16x8xf32>
    %c0_26 = arith.constant 0 : index
    %c0_27 = arith.constant 0 : index
    %c0_28 = arith.constant 0 : index
    %c0_29 = arith.constant 0 : index
    %37 = vector.load %arg4[%c0_26, %c0_27, %c0_28, %c0_29] : memref<1x1x18x8xf32, #tpu.memory_space<vmem>>, vector<1x1x18x8xf32>
    %38 = vector.shape_cast %37 : vector<1x1x18x8xf32> to vector<18x8xf32>
    %39 = arith.truncf %38 : vector<18x8xf32> to vector<18x8xbf16>
    %40 = vector.extract_strided_slice %39 {offsets = [0, 0], sizes = [16, 8], strides = [1, 1]} : vector<18x8xbf16> to vector<16x8xbf16>
    %c6 = arith.constant 6 : index
    %c0_30 = arith.constant 0 : index
    %c0_31 = arith.constant 0 : index
    %41 = vector.load %arg5[%c6, %c0_30, %c0_31] : memref<9x8x8xbf16, #tpu.memory_space<vmem>>, vector<1x8x8xbf16>
    %42 = vector.shape_cast %41 : vector<1x8x8xbf16> to vector<8x8xbf16>
    %cst_32 = arith.constant dense<0.000000e+00> : vector<16x8xf32>
    %43 = tpu.matmul %40, %42, %cst_32 {dimension_numbers = #tpu.dot_dimension_numbers<[1], [0], [0], [1], [0, 0, 1, 1], [], []>} : vector<16x8xbf16>, vector<8x8xbf16>, vector<16x8xf32> -> vector<16x8xf32>
    %44 = arith.addf %36, %43 : vector<16x8xf32>
    %45 = vector.extract_strided_slice %39 {offsets = [1, 0], sizes = [16, 8], strides = [1, 1]} : vector<18x8xbf16> to vector<16x8xbf16>
    %c7 = arith.constant 7 : index
    %c0_33 = arith.constant 0 : index
    %c0_34 = arith.constant 0 : index
    %46 = vector.load %arg5[%c7, %c0_33, %c0_34] : memref<9x8x8xbf16, #tpu.memory_space<vmem>>, vector<1x8x8xbf16>
    %47 = vector.shape_cast %46 : vector<1x8x8xbf16> to vector<8x8xbf16>
    %cst_35 = arith.constant dense<0.000000e+00> : vector<16x8xf32>
    %48 = tpu.matmul %45, %47, %cst_35 {dimension_numbers = #tpu.dot_dimension_numbers<[1], [0], [0], [1], [0, 0, 1, 1], [], []>} : vector<16x8xbf16>, vector<8x8xbf16>, vector<16x8xf32> -> vector<16x8xf32>
    %49 = arith.addf %44, %48 : vector<16x8xf32>
    %50 = vector.extract_strided_slice %39 {offsets = [2, 0], sizes = [16, 8], strides = [1, 1]} : vector<18x8xbf16> to vector<16x8xbf16>
    %c8 = arith.constant 8 : index
    %c0_36 = arith.constant 0 : index
    %c0_37 = arith.constant 0 : index
    %51 = vector.load %arg5[%c8, %c0_36, %c0_37] : memref<9x8x8xbf16, #tpu.memory_space<vmem>>, vector<1x8x8xbf16>
    %52 = vector.shape_cast %51 : vector<1x8x8xbf16> to vector<8x8xbf16>
    %cst_38 = arith.constant dense<0.000000e+00> : vector<16x8xf32>
    %53 = tpu.matmul %50, %52, %cst_38 {dimension_numbers = #tpu.dot_dimension_numbers<[1], [0], [0], [1], [0, 0, 1, 1], [], []>} : vector<16x8xbf16>, vector<8x8xbf16>, vector<16x8xf32> -> vector<16x8xf32>
    %54 = arith.addf %49, %53 : vector<16x8xf32>
    %c0_39 = arith.constant 0 : index
    %c0_40 = arith.constant 0 : index
    %55 = vector.load %arg6[%c0_39, %c0_40] : memref<1x8xf32, #tpu.memory_space<vmem>>, vector<1x8xf32>
    %56 = vector.broadcast %55 : vector<1x8xf32> to vector<16x8xf32>
    %57 = arith.addf %54, %56 : vector<16x8xf32>
    %cst_41 = arith.constant 0.000000e+00 : f32
    %58 = vector.broadcast %cst_41 : f32 to vector<16x8xf32>
    %59 = arith.maximumf %57, %58 : vector<16x8xf32>
    %c0_42 = arith.constant 0 : index
    %c0_43 = arith.constant 0 : index
    %c0_44 = arith.constant 0 : index
    %c0_45 = arith.constant 0 : index
    %60 = vector.load %arg7[%c0_42, %c0_43, %c0_44, %c0_45] : memref<1x1x16x8xf32, #tpu.memory_space<vmem>>, vector<1x1x16x8xf32>
    %61 = vector.shape_cast %60 : vector<1x1x16x8xf32> to vector<16x8xf32>
    %62 = vector.shape_cast %59 : vector<16x8xf32> to vector<1x1x16x8xf32>
    tpu.vector_store %arg7[%c0_42, %c0_43, %c0_44, %c0_45], %62 {strides = array<i32>} : memref<1x1x16x8xf32, #tpu.memory_space<vmem>>, vector<1x1x16x8xf32>,
    return
  }
  func.func @transform_0(%arg0: i32, %arg1: i32) -> (i32, i32, i32, i32) {
    %c0_i32 = arith.constant 0 : i32
    %0 = arith.addi %arg1, %c0_i32 : i32
    %c0_i32_0 = arith.constant 0 : i32
    %c0_i32_1 = arith.constant 0 : i32
    %c0_i32_2 = arith.constant 0 : i32
    return %arg0, %0, %c0_i32_0, %c0_i32_1 : i32, i32, i32, i32
  }
  func.func @transform_1(%arg0: i32, %arg1: i32) -> (i32, i32, i32, i32) {
    %c1_i32 = arith.constant 1 : i32
    %0 = arith.addi %arg1, %c1_i32 : i32
    %c0_i32 = arith.constant 0 : i32
    %c0_i32_0 = arith.constant 0 : i32
    %c0_i32_1 = arith.constant 0 : i32
    return %arg0, %0, %c0_i32, %c0_i32_0 : i32, i32, i32, i32
  }
  func.func @transform_2(%arg0: i32, %arg1: i32) -> (i32, i32, i32, i32) {
    %c2_i32 = arith.constant 2 : i32
    %0 = arith.addi %arg1, %c2_i32 : i32
    %c0_i32 = arith.constant 0 : i32
    %c0_i32_0 = arith.constant 0 : i32
    %c0_i32_1 = arith.constant 0 : i32
    return %arg0, %0, %c0_i32, %c0_i32_0 : i32, i32, i32, i32
  }
  func.func @transform_3(%arg0: i32, %arg1: i32) -> (i32, i32, i32) {
    %c0_i32 = arith.constant 0 : i32
    %c0_i32_0 = arith.constant 0 : i32
    %c0_i32_1 = arith.constant 0 : i32
    %c0_i32_2 = arith.constant 0 : i32
    return %c0_i32, %c0_i32_0, %c0_i32_1 : i32, i32, i32
  }
  func.func @transform_4(%arg0: i32, %arg1: i32) -> (i32, i32) {
    %c0_i32 = arith.constant 0 : i32
    %c0_i32_0 = arith.constant 0 : i32
    %c0_i32_1 = arith.constant 0 : i32
    return %c0_i32, %c0_i32_0 : i32, i32
  }
  func.func @transform_5(%arg0: i32, %arg1: i32) -> (i32, i32, i32, i32) {
    %c0_i32 = arith.constant 0 : i32
    %c0_i32_0 = arith.constant 0 : i32
    %c0_i32_1 = arith.constant 0 : i32
    return %arg0, %arg1, %c0_i32, %c0_i32_0 : i32, i32, i32, i32
  }
}

module attributes {stable_mosaic.version = 11 : i64} {
  func.func @_conv3x3_row_kernel(%arg0: i32, %arg1: i32, %arg2: memref<1x1x18x8xf32, #tpu.memory_space<vmem>>, %arg3: memref<1x1x18x8xf32, #tpu.memory_space<vmem>>, %arg4: memref<1x1x18x8xf32, #tpu.memory_space<vmem>>, %arg5: memref<9x8x8xbf16, #tpu.memory_space<vmem>>, %arg6: memref<1x8xf32, #tpu.memory_space<vmem>>, %arg7: memref<1x1x16x8xf32, #tpu.memory_space<vmem>>) attributes {dimension_semantics = [#tpu.dimension_semantics<parallel>, #tpu.dimension_semantics<parallel>], iteration_bounds = array<i64: 2, 16>, scalar_prefetch = 0 : i64, scratch_operands = 0 : i64, tpu.core_type = #tpu.core_type<tc>, window_params = [{transform_indices = @transform_0, window_bounds = array<i64: 1, 1, 18, 8>}, {transform_indices = @transform_1, window_bounds = array<i64: 1, 1, 18, 8>}, {transform_indices = @transform_2, window_bounds = array<i64: 1, 1, 18, 8>}, {pipeline_mode = #tpu.pipeline_mode<synchronous>, transform_indices = @transform_3, window_bounds = array<i64: 9, 8, 8>}, {pipeline_mode = #tpu.pipeline_mode<synchronous>, transform_indices = @transform_4, window_bounds = array<i64: 1, 8>}, {transform_indices = @transform_5, window_bounds = array<i64: 1, 1, 16, 8>}]} {
    %cst = arith.constant 0.000000e+00 : f32
    %0 = vector.broadcast %cst : f32 to vector<16x8xf32>
    %c0 = arith.constant 0 : index
    %c0_0 = arith.constant 0 : index
    %c0_1 = arith.constant 0 : index
    %c0_2 = arith.constant 0 : index
    %1 = vector.load %arg2[%c0, %c0_0, %c0_1, %c0_2] : memref<1x1x18x8xf32, #tpu.memory_space<vmem>>, vector<1x1x18x8xf32>
    %2 = vector.shape_cast %1 : vector<1x1x18x8xf32> to vector<18x8xf32>
    %3 = arith.truncf %2 : vector<18x8xf32> to vector<18x8xbf16>
    %4 = vector.extract_strided_slice %3 {offsets = [0, 0], sizes = [16, 8], strides = [1, 1]} : vector<18x8xbf16> to vector<16x8xbf16>
    %c0_3 = arith.constant 0 : index
    %c0_4 = arith.constant 0 : index
    %c0_5 = arith.constant 0 : index
    %5 = vector.load %arg5[%c0_3, %c0_4, %c0_5] : memref<9x8x8xbf16, #tpu.memory_space<vmem>>, vector<1x8x8xbf16>
    %6 = vector.shape_cast %5 : vector<1x8x8xbf16> to vector<8x8xbf16>
    %cst_6 = arith.constant dense<0.000000e+00> : vector<16x8xf32>
    %7 = tpu.matmul %4, %6, %cst_6 {dimension_numbers = #tpu.dot_dimension_numbers<[1], [0], [0], [1], [0, 0, 1, 1], [], []>} : vector<16x8xbf16>, vector<8x8xbf16>, vector<16x8xf32> -> vector<16x8xf32>
    %8 = arith.addf %0, %7 : vector<16x8xf32>
    %9 = vector.extract_strided_slice %3 {offsets = [1, 0], sizes = [16, 8], strides = [1, 1]} : vector<18x8xbf16> to vector<16x8xbf16>
    %c1 = arith.constant 1 : index
    %c0_7 = arith.constant 0 : index
    %c0_8 = arith.constant 0 : index
    %10 = vector.load %arg5[%c1, %c0_7, %c0_8] : memref<9x8x8xbf16, #tpu.memory_space<vmem>>, vector<1x8x8xbf16>
    %11 = vector.shape_cast %10 : vector<1x8x8xbf16> to vector<8x8xbf16>
    %cst_9 = arith.constant dense<0.000000e+00> : vector<16x8xf32>
    %12 = tpu.matmul %9, %11, %cst_9 {dimension_numbers = #tpu.dot_dimension_numbers<[1], [0], [0], [1], [0, 0, 1, 1], [], []>} : vector<16x8xbf16>, vector<8x8xbf16>, vector<16x8xf32> -> vector<16x8xf32>
    %13 = arith.addf %8, %12 : vector<16x8xf32>
    %14 = vector.extract_strided_slice %3 {offsets = [2, 0], sizes = [16, 8], strides = [1, 1]} : vector<18x8xbf16> to vector<16x8xbf16>
    %c2 = arith.constant 2 : index
    %c0_10 = arith.constant 0 : index
    %c0_11 = arith.constant 0 : index
    %15 = vector.load %arg5[%c2, %c0_10, %c0_11] : memref<9x8x8xbf16, #tpu.memory_space<vmem>>, vector<1x8x8xbf16>
    %16 = vector.shape_cast %15 : vector<1x8x8xbf16> to vector<8x8xbf16>
    %cst_12 = arith.constant dense<0.000000e+00> : vector<16x8xf32>
    %17 = tpu.matmul %14, %16, %cst_12 {dimension_numbers = #tpu.dot_dimension_numbers<[1], [0], [0], [1], [0, 0, 1, 1], [], []>} : vector<16x8xbf16>, vector<8x8xbf16>, vector<16x8xf32> -> vector<16x8xf32>
    %18 = arith.addf %13, %17 : vector<16x8xf32>
    %c0_13 = arith.constant 0 : index
    %c0_14 = arith.constant 0 : index
    %c0_15 = arith.constant 0 : index
    %c0_16 = arith.constant 0 : index
    %19 = vector.load %arg3[%c0_13, %c0_14, %c0_15, %c0_16] : memref<1x1x18x8xf32, #tpu.memory_space<vmem>>, vector<1x1x18x8xf32>
    %20 = vector.shape_cast %19 : vector<1x1x18x8xf32> to vector<18x8xf32>
    %21 = arith.truncf %20 : vector<18x8xf32> to vector<18x8xbf16>
    %22 = vector.extract_strided_slice %21 {offsets = [0, 0], sizes = [16, 8], strides = [1, 1]} : vector<18x8xbf16> to vector<16x8xbf16>
    %c3 = arith.constant 3 : index
    %c0_17 = arith.constant 0 : index
    %c0_18 = arith.constant 0 : index
    %23 = vector.load %arg5[%c3, %c0_17, %c0_18] : memref<9x8x8xbf16, #tpu.memory_space<vmem>>, vector<1x8x8xbf16>
    %24 = vector.shape_cast %23 : vector<1x8x8xbf16> to vector<8x8xbf16>
    %cst_19 = arith.constant dense<0.000000e+00> : vector<16x8xf32>
    %25 = tpu.matmul %22, %24, %cst_19 {dimension_numbers = #tpu.dot_dimension_numbers<[1], [0], [0], [1], [0, 0, 1, 1], [], []>} : vector<16x8xbf16>, vector<8x8xbf16>, vector<16x8xf32> -> vector<16x8xf32>
    %26 = arith.addf %18, %25 : vector<16x8xf32>
    %27 = vector.extract_strided_slice %21 {offsets = [1, 0], sizes = [16, 8], strides = [1, 1]} : vector<18x8xbf16> to vector<16x8xbf16>
    %c4 = arith.constant 4 : index
    %c0_20 = arith.constant 0 : index
    %c0_21 = arith.constant 0 : index
    %28 = vector.load %arg5[%c4, %c0_20, %c0_21] : memref<9x8x8xbf16, #tpu.memory_space<vmem>>, vector<1x8x8xbf16>
    %29 = vector.shape_cast %28 : vector<1x8x8xbf16> to vector<8x8xbf16>
    %cst_22 = arith.constant dense<0.000000e+00> : vector<16x8xf32>
    %30 = tpu.matmul %27, %29, %cst_22 {dimension_numbers = #tpu.dot_dimension_numbers<[1], [0], [0], [1], [0, 0, 1, 1], [], []>} : vector<16x8xbf16>, vector<8x8xbf16>, vector<16x8xf32> -> vector<16x8xf32>
    %31 = arith.addf %26, %30 : vector<16x8xf32>
    %32 = vector.extract_strided_slice %21 {offsets = [2, 0], sizes = [16, 8], strides = [1, 1]} : vector<18x8xbf16> to vector<16x8xbf16>
    %c5 = arith.constant 5 : index
    %c0_23 = arith.constant 0 : index
    %c0_24 = arith.constant 0 : index
    %33 = vector.load %arg5[%c5, %c0_23, %c0_24] : memref<9x8x8xbf16, #tpu.memory_space<vmem>>, vector<1x8x8xbf16>
    %34 = vector.shape_cast %33 : vector<1x8x8xbf16> to vector<8x8xbf16>
    %cst_25 = arith.constant dense<0.000000e+00> : vector<16x8xf32>
    %35 = tpu.matmul %32, %34, %cst_25 {dimension_numbers = #tpu.dot_dimension_numbers<[1], [0], [0], [1], [0, 0, 1, 1], [], []>} : vector<16x8xbf16>, vector<8x8xbf16>, vector<16x8xf32> -> vector<16x8xf32>
    %36 = arith.addf %31, %35 : vector<16x8xf32>
    %c0_26 = arith.constant 0 : index
    %c0_27 = arith.constant 0 : index
    %c0_28 = arith.constant 0 : index
    %c0_29 = arith.constant 0 : index
    %37 = vector.load %arg4[%c0_26, %c0_27, %c0_28, %c0_29] : memref<1x1x18x8xf32, #tpu.memory_space<vmem>>, vector<1x1x18x8xf32>
    %38 = vector.shape_cast %37 : vector<1x1x18x8xf32> to vector<18x8xf32>
    %39 = arith.truncf %38 : vector<18x8xf32> to vector<18x8xbf16>
    %40 = vector.extract_strided_slice %39 {offsets = [0, 0], sizes = [16, 8], strides = [1, 1]} : vector<18x8xbf16> to vector<16x8xbf16>
    %c6 = arith.constant 6 : index
    %c0_30 = arith.constant 0 : index
    %c0_31 = arith.constant 0 : index
    %41 = vector.load %arg5[%c6, %c0_30, %c0_31] : memref<9x8x8xbf16, #tpu.memory_space<vmem>>, vector<1x8x8xbf16>
    %42 = vector.shape_cast %41 : vector<1x8x8xbf16> to vector<8x8xbf16>
    %cst_32 = arith.constant dense<0.000000e+00> : vector<16x8xf32>
    %43 = tpu.matmul %40, %42, %cst_32 {dimension_numbers = #tpu.dot_dimension_numbers<[1], [0], [0], [1], [0, 0, 1, 1], [], []>} : vector<16x8xbf16>, vector<8x8xbf16>, vector<16x8xf32> -> vector<16x8xf32>
    %44 = arith.addf %36, %43 : vector<16x8xf32>
    %45 = vector.extract_strided_slice %39 {offsets = [1, 0], sizes = [16, 8], strides = [1, 1]} : vector<18x8xbf16> to vector<16x8xbf16>
    %c7 = arith.constant 7 : index
    %c0_33 = arith.constant 0 : index
    %c0_34 = arith.constant 0 : index
    %46 = vector.load %arg5[%c7, %c0_33, %c0_34] : memref<9x8x8xbf16, #tpu.memory_space<vmem>>, vector<1x8x8xbf16>
    %47 = vector.shape_cast %46 : vector<1x8x8xbf16> to vector<8x8xbf16>
    %cst_35 = arith.constant dense<0.000000e+00> : vector<16x8xf32>
    %48 = tpu.matmul %45, %47, %cst_35 {dimension_numbers = #tpu.dot_dimension_numbers<[1], [0], [0], [1], [0, 0, 1, 1], [], []>} : vector<16x8xbf16>, vector<8x8xbf16>, vector<16x8xf32> -> vector<16x8xf32>
    %49 = arith.addf %44, %48 : vector<16x8xf32>
    %50 = vector.extract_strided_slice %39 {offsets = [2, 0], sizes = [16, 8], strides = [1, 1]} : vector<18x8xbf16> to vector<16x8xbf16>
    %c8 = arith.constant 8 : index
    %c0_36 = arith.constant 0 : index
    %c0_37 = arith.constant 0 : index
    %51 = vector.load %arg5[%c8, %c0_36, %c0_37] : memref<9x8x8xbf16, #tpu.memory_space<vmem>>, vector<1x8x8xbf16>
    %52 = vector.shape_cast %51 : vector<1x8x8xbf16> to vector<8x8xbf16>
    %cst_38 = arith.constant dense<0.000000e+00> : vector<16x8xf32>
    %53 = tpu.matmul %50, %52, %cst_38 {dimension_numbers = #tpu.dot_dimension_numbers<[1], [0], [0], [1], [0, 0, 1, 1], [], []>} : vector<16x8xbf16>, vector<8x8xbf16>, vector<16x8xf32> -> vector<16x8xf32>
    %54 = arith.addf %49, %53 : vector<16x8xf32>
    %c0_39 = arith.constant 0 : index
    %c0_40 = arith.constant 0 : index
    %55 = vector.load %arg6[%c0_39, %c0_40] : memref<1x8xf32, #tpu.memory_space<vmem>>, vector<1x8xf32>
    %56 = vector.broadcast %55 : vector<1x8xf32> to vector<16x8xf32>
    %57 = arith.addf %54, %56 : vector<16x8xf32>
    %c0_41 = arith.constant 0 : index
    %c0_42 = arith.constant 0 : index
    %c0_43 = arith.constant 0 : index
    %c0_44 = arith.constant 0 : index
    %58 = vector.load %arg7[%c0_41, %c0_42, %c0_43, %c0_44] : memref<1x1x16x8xf32, #tpu.memory_space<vmem>>, vector<1x1x16x8xf32>
    %59 = vector.shape_cast %58 : vector<1x1x16x8xf32> to vector<16x8xf32>
    %60 = vector.shape_cast %57 : vector<16x8xf32> to vector<1x1x16x8xf32>
    tpu.vector_store %arg7[%c0_41, %c0_42, %c0_43, %c0_44], %60 {strides = array<i32>} : memref<1x1x16x8xf32, #tpu.memory_space<vmem>>, vector<1x1x16x8xf32>,
    return
  }
  func.func @transform_0(%arg0: i32, %arg1: i32) -> (i32, i32, i32, i32) {
    %c0_i32 = arith.constant 0 : i32
    %0 = arith.addi %arg1, %c0_i32 : i32
    %c0_i32_0 = arith.constant 0 : i32
    %c0_i32_1 = arith.constant 0 : i32
    %c0_i32_2 = arith.constant 0 : i32
    return %arg0, %0, %c0_i32_0, %c0_i32_1 : i32, i32, i32, i32
  }
  func.func @transform_1(%arg0: i32, %arg1: i32) -> (i32, i32, i32, i32) {
    %c1_i32 = arith.constant 1 : i32
    %0 = arith.addi %arg1, %c1_i32 : i32
    %c0_i32 = arith.constant 0 : i32
    %c0_i32_0 = arith.constant 0 : i32
    %c0_i32_1 = arith.constant 0 : i32
    return %arg0, %0, %c0_i32, %c0_i32_0 : i32, i32, i32, i32
  }
  func.func @transform_2(%arg0: i32, %arg1: i32) -> (i32, i32, i32, i32) {
    %c2_i32 = arith.constant 2 : i32
    %0 = arith.addi %arg1, %c2_i32 : i32
    %c0_i32 = arith.constant 0 : i32
    %c0_i32_0 = arith.constant 0 : i32
    %c0_i32_1 = arith.constant 0 : i32
    return %arg0, %0, %c0_i32, %c0_i32_0 : i32, i32, i32, i32
  }
  func.func @transform_3(%arg0: i32, %arg1: i32) -> (i32, i32, i32) {
    %c0_i32 = arith.constant 0 : i32
    %c0_i32_0 = arith.constant 0 : i32
    %c0_i32_1 = arith.constant 0 : i32
    %c0_i32_2 = arith.constant 0 : i32
    return %c0_i32, %c0_i32_0, %c0_i32_1 : i32, i32, i32
  }
  func.func @transform_4(%arg0: i32, %arg1: i32) -> (i32, i32) {
    %c0_i32 = arith.constant 0 : i32
    %c0_i32_0 = arith.constant 0 : i32
    %c0_i32_1 = arith.constant 0 : i32
    return %c0_i32, %c0_i32_0 : i32, i32
  }
  func.func @transform_5(%arg0: i32, %arg1: i32) -> (i32, i32, i32, i32) {
    %c0_i32 = arith.constant 0 : i32
    %c0_i32_0 = arith.constant 0 : i32
    %c0_i32_1 = arith.constant 0 : i32
    return %arg0, %arg1, %c0_i32, %c0_i32_0 : i32, i32, i32, i32
  }
}

module attributes {stable_mosaic.version = 11 : i64} {
  func.func @_cross_attn_kernel(%arg0: i32, %arg1: memref<1x256x8xf32, #tpu.memory_space<vmem>>, %arg2: memref<1x256x16xf32, #tpu.memory_space<vmem>>, %arg3: memref<1x256x8xf32, #tpu.memory_space<vmem>>) attributes {dimension_semantics = [#tpu.dimension_semantics<parallel>], iteration_bounds = array<i64: 2>, scalar_prefetch = 0 : i64, scratch_operands = 0 : i64, tpu.core_type = #tpu.core_type<tc>, window_params = [{transform_indices = @transform_0, window_bounds = array<i64: 1, 256, 8>}, {transform_indices = @transform_1, window_bounds = array<i64: 1, 256, 16>}, {transform_indices = @transform_2, window_bounds = array<i64: 1, 256, 8>}]} {
    %c0 = arith.constant 0 : index
    %c0_0 = arith.constant 0 : index
    %c0_1 = arith.constant 0 : index
    %0 = vector.load %arg1[%c0, %c0_0, %c0_1] : memref<1x256x8xf32, #tpu.memory_space<vmem>>, vector<1x256x8xf32>
    %1 = vector.shape_cast %0 : vector<1x256x8xf32> to vector<256x8xf32>
    %c0_2 = arith.constant 0 : index
    %c0_3 = arith.constant 0 : index
    %c0_4 = arith.constant 0 : index
    %2 = vector.load %arg2[%c0_2, %c0_3, %c0_4] : memref<1x256x16xf32, #tpu.memory_space<vmem>>, vector<1x256x16xf32>
    %3 = vector.shape_cast %2 : vector<1x256x16xf32> to vector<256x16xf32>
    %4 = vector.extract_strided_slice %1 {offsets = [0, 0], sizes = [256, 4], strides = [1, 1]} : vector<256x8xf32> to vector<256x4xf32>
    %cst = arith.constant 5.000000e-01 : f32
    %5 = vector.broadcast %cst : f32 to vector<256x4xf32>
    %6 = arith.mulf %4, %5 : vector<256x4xf32>
    %7 = arith.truncf %6 : vector<256x4xf32> to vector<256x4xbf16>
    %8 = vector.extract_strided_slice %3 {offsets = [0, 0], sizes = [256, 4], strides = [1, 1]} : vector<256x16xf32> to vector<256x4xf32>
    %9 = arith.truncf %8 : vector<256x4xf32> to vector<256x4xbf16>
    %10 = vector.extract_strided_slice %3 {offsets = [0, 8], sizes = [256, 4], strides = [1, 1]} : vector<256x16xf32> to vector<256x4xf32>
    %11 = arith.truncf %10 : vector<256x4xf32> to vector<256x4xbf16>
    %cst_5 = arith.constant dense<0.000000e+00> : vector<256x256xf32>
    %12 = tpu.matmul %7, %9, %cst_5 {dimension_numbers = #tpu.dot_dimension_numbers<[1], [1], [0], [0], [0, 0, 1, 0], [], []>} : vector<256x4xbf16>, vector<256x4xbf16>, vector<256x256xf32> -> vector<256x256xf32>
    %cst_6 = arith.constant dense<0xFF800000> : vector<256xf32>
    %13 = vector.multi_reduction <maximumf>, %12, %cst_6 [1] : vector<256x256xf32> to vector<256xf32>
    %14 = vector.shape_cast %13 : vector<256xf32> to vector<256x1xf32>
    %15 = vector.broadcast %14 : vector<256x1xf32> to vector<256x256xf32>
    %16 = arith.subf %12, %15 : vector<256x256xf32>
    %17 = math.exp %16 : vector<256x256xf32>
    %cst_7 = arith.constant dense<0.000000e+00> : vector<256xf32>
    %18 = vector.multi_reduction <add>, %17, %cst_7 [1] : vector<256x256xf32> to vector<256xf32>
    %19 = vector.shape_cast %18 : vector<256xf32> to vector<256x1xf32>
    %20 = tpu.reciprocal %19 : vector<256x1xf32> -> vector<256x1xf32>
    %21 = vector.broadcast %20 : vector<256x1xf32> to vector<256x256xf32>
    %22 = arith.mulf %17, %21 : vector<256x256xf32>
    %23 = arith.truncf %22 : vector<256x256xf32> to vector<256x256xbf16>
    %cst_8 = arith.constant dense<0.000000e+00> : vector<256x4xf32>
    %24 = tpu.matmul %23, %11, %cst_8 {dimension_numbers = #tpu.dot_dimension_numbers<[1], [0], [0], [1], [0, 0, 1, 1], [], []>} : vector<256x256xbf16>, vector<256x4xbf16>, vector<256x4xf32> -> vector<256x4xf32>
    %25 = vector.extract_strided_slice %1 {offsets = [0, 4], sizes = [256, 4], strides = [1, 1]} : vector<256x8xf32> to vector<256x4xf32>
    %cst_9 = arith.constant 5.000000e-01 : f32
    %26 = vector.broadcast %cst_9 : f32 to vector<256x4xf32>
    %27 = arith.mulf %25, %26 : vector<256x4xf32>
    %28 = arith.truncf %27 : vector<256x4xf32> to vector<256x4xbf16>
    %29 = vector.extract_strided_slice %3 {offsets = [0, 4], sizes = [256, 4], strides = [1, 1]} : vector<256x16xf32> to vector<256x4xf32>
    %30 = arith.truncf %29 : vector<256x4xf32> to vector<256x4xbf16>
    %31 = vector.extract_strided_slice %3 {offsets = [0, 12], sizes = [256, 4], strides = [1, 1]} : vector<256x16xf32> to vector<256x4xf32>
    %32 = arith.truncf %31 : vector<256x4xf32> to vector<256x4xbf16>
    %cst_10 = arith.constant dense<0.000000e+00> : vector<256x256xf32>
    %33 = tpu.matmul %28, %30, %cst_10 {dimension_numbers = #tpu.dot_dimension_numbers<[1], [1], [0], [0], [0, 0, 1, 0], [], []>} : vector<256x4xbf16>, vector<256x4xbf16>, vector<256x256xf32> -> vector<256x256xf32>
    %cst_11 = arith.constant dense<0xFF800000> : vector<256xf32>
    %34 = vector.multi_reduction <maximumf>, %33, %cst_11 [1] : vector<256x256xf32> to vector<256xf32>
    %35 = vector.shape_cast %34 : vector<256xf32> to vector<256x1xf32>
    %36 = vector.broadcast %35 : vector<256x1xf32> to vector<256x256xf32>
    %37 = arith.subf %33, %36 : vector<256x256xf32>
    %38 = math.exp %37 : vector<256x256xf32>
    %cst_12 = arith.constant dense<0.000000e+00> : vector<256xf32>
    %39 = vector.multi_reduction <add>, %38, %cst_12 [1] : vector<256x256xf32> to vector<256xf32>
    %40 = vector.shape_cast %39 : vector<256xf32> to vector<256x1xf32>
    %41 = tpu.reciprocal %40 : vector<256x1xf32> -> vector<256x1xf32>
    %42 = vector.broadcast %41 : vector<256x1xf32> to vector<256x256xf32>
    %43 = arith.mulf %38, %42 : vector<256x256xf32>
    %44 = arith.truncf %43 : vector<256x256xf32> to vector<256x256xbf16>
    %cst_13 = arith.constant dense<0.000000e+00> : vector<256x4xf32>
    %45 = tpu.matmul %44, %32, %cst_13 {dimension_numbers = #tpu.dot_dimension_numbers<[1], [0], [0], [1], [0, 0, 1, 1], [], []>} : vector<256x256xbf16>, vector<256x4xbf16>, vector<256x4xf32> -> vector<256x4xf32>
    %46 = tpu.concatenate %24, %45 in 1 : vector<256x4xf32>, vector<256x4xf32> -> vector<256x8xf32>
    %c0_14 = arith.constant 0 : index
    %c0_15 = arith.constant 0 : index
    %c0_16 = arith.constant 0 : index
    %47 = vector.load %arg3[%c0_14, %c0_15, %c0_16] : memref<1x256x8xf32, #tpu.memory_space<vmem>>, vector<1x256x8xf32>
    %48 = vector.shape_cast %47 : vector<1x256x8xf32> to vector<256x8xf32>
    %49 = vector.shape_cast %46 : vector<256x8xf32> to vector<1x256x8xf32>
    tpu.vector_store %arg3[%c0_14, %c0_15, %c0_16], %49 {strides = array<i32>} : memref<1x256x8xf32, #tpu.memory_space<vmem>>, vector<1x256x8xf32>,
    return
  }
  func.func @transform_0(%arg0: i32) -> (i32, i32, i32) {
    %c0_i32 = arith.constant 0 : i32
    %c0_i32_0 = arith.constant 0 : i32
    %c0_i32_1 = arith.constant 0 : i32
    return %arg0, %c0_i32, %c0_i32_0 : i32, i32, i32
  }
  func.func @transform_1(%arg0: i32) -> (i32, i32, i32) {
    %c0_i32 = arith.constant 0 : i32
    %c0_i32_0 = arith.constant 0 : i32
    %c0_i32_1 = arith.constant 0 : i32
    return %arg0, %c0_i32, %c0_i32_0 : i32, i32, i32
  }
  func.func @transform_2(%arg0: i32) -> (i32, i32, i32) {
    %c0_i32 = arith.constant 0 : i32
    %c0_i32_0 = arith.constant 0 : i32
    %c0_i32_1 = arith.constant 0 : i32
    return %arg0, %c0_i32, %c0_i32_0 : i32, i32, i32
  }
}

module attributes {stable_mosaic.version = 11 : i64} {
  func.func @_matmul_bias_kernel(%arg0: i32, %arg1: i32, %arg2: memref<512x8xf32, #tpu.memory_space<vmem>>, %arg3: memref<8x8xf32, #tpu.memory_space<vmem>>, %arg4: memref<1x8xf32, #tpu.memory_space<vmem>>, %arg5: memref<512x8xf32, #tpu.memory_space<vmem>>) attributes {dimension_semantics = [#tpu.dimension_semantics<parallel>, #tpu.dimension_semantics<parallel>], iteration_bounds = array<i64: 1, 1>, scalar_prefetch = 0 : i64, scratch_operands = 0 : i64, tpu.core_type = #tpu.core_type<tc>, window_params = [{transform_indices = @transform_0, window_bounds = array<i64: 512, 8>}, {transform_indices = @transform_1, window_bounds = array<i64: 8, 8>}, {transform_indices = @transform_2, window_bounds = array<i64: 1, 8>}, {transform_indices = @transform_3, window_bounds = array<i64: 512, 8>}]} {
    %c0 = arith.constant 0 : index
    %c0_0 = arith.constant 0 : index
    %0 = vector.load %arg2[%c0, %c0_0] : memref<512x8xf32, #tpu.memory_space<vmem>>, vector<512x8xf32>
    %1 = arith.truncf %0 : vector<512x8xf32> to vector<512x8xbf16>
    %c0_1 = arith.constant 0 : index
    %c0_2 = arith.constant 0 : index
    %2 = vector.load %arg3[%c0_1, %c0_2] : memref<8x8xf32, #tpu.memory_space<vmem>>, vector<8x8xf32>
    %3 = arith.truncf %2 : vector<8x8xf32> to vector<8x8xbf16>
    %cst = arith.constant dense<0.000000e+00> : vector<512x8xf32>
    %4 = tpu.matmul %1, %3, %cst {dimension_numbers = #tpu.dot_dimension_numbers<[1], [0], [0], [1], [0, 0, 1, 1], [], []>} : vector<512x8xbf16>, vector<8x8xbf16>, vector<512x8xf32> -> vector<512x8xf32>
    %c0_3 = arith.constant 0 : index
    %c0_4 = arith.constant 0 : index
    %5 = vector.load %arg4[%c0_3, %c0_4] : memref<1x8xf32, #tpu.memory_space<vmem>>, vector<1x8xf32>
    %6 = vector.broadcast %5 : vector<1x8xf32> to vector<512x8xf32>
    %7 = arith.addf %4, %6 : vector<512x8xf32>
    %c0_5 = arith.constant 0 : index
    %c0_6 = arith.constant 0 : index
    %8 = vector.load %arg5[%c0_5, %c0_6] : memref<512x8xf32, #tpu.memory_space<vmem>>, vector<512x8xf32>
    tpu.vector_store %arg5[%c0_5, %c0_6], %7 {strides = array<i32>} : memref<512x8xf32, #tpu.memory_space<vmem>>, vector<512x8xf32>,
    return
  }
  func.func @transform_0(%arg0: i32, %arg1: i32) -> (i32, i32) {
    %c0_i32 = arith.constant 0 : i32
    %c0_i32_0 = arith.constant 0 : i32
    return %arg0, %c0_i32 : i32, i32
  }
  func.func @transform_1(%arg0: i32, %arg1: i32) -> (i32, i32) {
    %c0_i32 = arith.constant 0 : i32
    %c0_i32_0 = arith.constant 0 : i32
    return %c0_i32, %arg1 : i32, i32
  }
  func.func @transform_2(%arg0: i32, %arg1: i32) -> (i32, i32) {
    %c0_i32 = arith.constant 0 : i32
    %c0_i32_0 = arith.constant 0 : i32
    return %c0_i32, %arg1 : i32, i32
  }
  func.func @transform_3(%arg0: i32, %arg1: i32) -> (i32, i32) {
    %c0_i32 = arith.constant 0 : i32
    return %arg0, %arg1 : i32, i32
  }
}

module attributes {stable_mosaic.version = 11 : i64} {
  func.func @_mn_apply_kernel(%arg0: i32, %arg1: i32, %arg2: i32, %arg3: memref<1x256x8xf32, #tpu.memory_space<vmem>>, %arg4: memref<1x256x8xf32, #tpu.memory_space<vmem>>, %arg5: memref<1x256x8xf32, #tpu.memory_space<vmem>>, %arg6: memref<1x4x8xf32, #tpu.memory_space<vmem>>, %arg7: memref<1x256x8xf32, #tpu.memory_space<vmem>>) attributes {dimension_semantics = [#tpu.dimension_semantics<parallel>, #tpu.dimension_semantics<parallel>, #tpu.dimension_semantics<parallel>], iteration_bounds = array<i64: 2, 1, 1>, scalar_prefetch = 0 : i64, scratch_operands = 0 : i64, tpu.core_type = #tpu.core_type<tc>, window_params = [{transform_indices = @transform_0, window_bounds = array<i64: 1, 256, 8>}, {transform_indices = @transform_1, window_bounds = array<i64: 1, 256, 8>}, {transform_indices = @transform_2, window_bounds = array<i64: 1, 256, 8>}, {transform_indices = @transform_3, window_bounds = array<i64: 1, 4, 8>}, {transform_indices = @transform_4, window_bounds = array<i64: 1, 256, 8>}]} {
    %c0 = arith.constant 0 : index
    %c0_0 = arith.constant 0 : index
    %c0_1 = arith.constant 0 : index
    %0 = vector.load %arg6[%c0, %c0_0, %c0_1] : memref<1x4x8xf32, #tpu.memory_space<vmem>>, vector<1x4x8xf32>
    %1 = vector.shape_cast %0 : vector<1x4x8xf32> to vector<4x8xf32>
    %2 = vector.extract_strided_slice %1 {offsets = [0, 0], sizes = [1, 8], strides = [1, 1]} : vector<4x8xf32> to vector<1x8xf32>
    %cst = arith.constant 2.560000e+02 : f32
    %3 = vector.broadcast %cst : f32 to vector<1x8xf32>
    %4 = arith.divf %2, %3 : vector<1x8xf32>
    %5 = vector.extract_strided_slice %1 {offsets = [1, 0], sizes = [1, 8], strides = [1, 1]} : vector<4x8xf32> to vector<1x8xf32>
    %cst_2 = arith.constant 2.560000e+02 : f32
    %6 = vector.broadcast %cst_2 : f32 to vector<1x8xf32>
    %7 = arith.divf %5, %6 : vector<1x8xf32>
    %8 = arith.mulf %4, %4 : vector<1x8xf32>
    %9 = arith.subf %7, %8 : vector<1x8xf32>
    %cst_3 = arith.constant 1.00392163 : f32
    %10 = vector.broadcast %cst_3 : f32 to vector<1x8xf32>
    %11 = arith.mulf %9, %10 : vector<1x8xf32>
    %cst_4 = arith.constant 0.000000e+00 : f32
    %12 = vector.broadcast %cst_4 : f32 to vector<1x8xf32>
    %13 = arith.maximumf %11, %12 : vector<1x8xf32>
    %14 = math.sqrt %13 : vector<1x8xf32>
    %15 = vector.extract_strided_slice %1 {offsets = [2, 0], sizes = [1, 8], strides = [1, 1]} : vector<4x8xf32> to vector<1x8xf32>
    %cst_5 = arith.constant 2.560000e+02 : f32
    %16 = vector.broadcast %cst_5 : f32 to vector<1x8xf32>
    %17 = arith.divf %15, %16 : vector<1x8xf32>
    %18 = vector.extract_strided_slice %1 {offsets = [3, 0], sizes = [1, 8], strides = [1, 1]} : vector<4x8xf32> to vector<1x8xf32>
    %cst_6 = arith.constant 2.560000e+02 : f32
    %19 = vector.broadcast %cst_6 : f32 to vector<1x8xf32>
    %20 = arith.divf %18, %19 : vector<1x8xf32>
    %21 = arith.mulf %17, %17 : vector<1x8xf32>
    %22 = arith.subf %20, %21 : vector<1x8xf32>
    %cst_7 = arith.constant 0.000000e+00 : f32
    %23 = vector.broadcast %cst_7 : f32 to vector<1x8xf32>
    %24 = arith.maximumf %22, %23 : vector<1x8xf32>
    %cst_8 = arith.constant 9.99999974E-6 : f32
    %25 = vector.broadcast %cst_8 : f32 to vector<1x8xf32>
    %26 = arith.addf %24, %25 : vector<1x8xf32>
    %27 = math.rsqrt %26 : vector<1x8xf32>
    %c0_9 = arith.constant 0 : index
    %c0_10 = arith.constant 0 : index
    %c0_11 = arith.constant 0 : index
    %28 = vector.load %arg3[%c0_9, %c0_10, %c0_11] : memref<1x256x8xf32, #tpu.memory_space<vmem>>, vector<1x256x8xf32>
    %29 = vector.shape_cast %28 : vector<1x256x8xf32> to vector<256x8xf32>
    %30 = vector.broadcast %17 : vector<1x8xf32> to vector<256x8xf32>
    %31 = arith.subf %29, %30 : vector<256x8xf32>
    %32 = vector.broadcast %27 : vector<1x8xf32> to vector<256x8xf32>
    %33 = arith.mulf %31, %32 : vector<256x8xf32>
    %c0_12 = arith.constant 0 : index
    %c0_13 = arith.constant 0 : index
    %c0_14 = arith.constant 0 : index
    %34 = vector.load %arg4[%c0_12, %c0_13, %c0_14] : memref<1x256x8xf32, #tpu.memory_space<vmem>>, vector<1x256x8xf32>
    %35 = vector.shape_cast %34 : vector<1x256x8xf32> to vector<256x8xf32>
    %36 = vector.broadcast %14 : vector<1x8xf32> to vector<256x8xf32>
    %37 = arith.addf %35, %36 : vector<256x8xf32>
    %38 = arith.mulf %33, %37 : vector<256x8xf32>
    %c0_15 = arith.constant 0 : index
    %c0_16 = arith.constant 0 : index
    %c0_17 = arith.constant 0 : index
    %39 = vector.load %arg5[%c0_15, %c0_16, %c0_17] : memref<1x256x8xf32, #tpu.memory_space<vmem>>, vector<1x256x8xf32>
    %40 = vector.shape_cast %39 : vector<1x256x8xf32> to vector<256x8xf32>
    %41 = vector.broadcast %4 : vector<1x8xf32> to vector<256x8xf32>
    %42 = arith.addf %40, %41 : vector<256x8xf32>
    %43 = arith.addf %38, %42 : vector<256x8xf32>
    %c0_18 = arith.constant 0 : index
    %c0_19 = arith.constant 0 : index
    %c0_20 = arith.constant 0 : index
    %44 = vector.load %arg7[%c0_18, %c0_19, %c0_20] : memref<1x256x8xf32, #tpu.memory_space<vmem>>, vector<1x256x8xf32>
    %45 = vector.shape_cast %44 : vector<1x256x8xf32> to vector<256x8xf32>
    %46 = vector.shape_cast %43 : vector<256x8xf32> to vector<1x256x8xf32>
    tpu.vector_store %arg7[%c0_18, %c0_19, %c0_20], %46 {strides = array<i32>} : memref<1x256x8xf32, #tpu.memory_space<vmem>>, vector<1x256x8xf32>,
    return
  }
  func.func @transform_0(%arg0: i32, %arg1: i32, %arg2: i32) -> (i32, i32, i32) {
    %c0_i32 = arith.constant 0 : i32
    return %arg0, %arg2, %arg1 : i32, i32, i32
  }
  func.func @transform_1(%arg0: i32, %arg1: i32, %arg2: i32) -> (i32, i32, i32) {
    %c0_i32 = arith.constant 0 : i32
    return %arg0, %arg2, %arg1 : i32, i32, i32
  }
  func.func @transform_2(%arg0: i32, %arg1: i32, %arg2: i32) -> (i32, i32, i32) {
    %c0_i32 = arith.constant 0 : i32
    return %arg0, %arg2, %arg1 : i32, i32, i32
  }
  func.func @transform_3(%arg0: i32, %arg1: i32, %arg2: i32) -> (i32, i32, i32) {
    %c0_i32 = arith.constant 0 : i32
    %c0_i32_0 = arith.constant 0 : i32
    return %arg0, %c0_i32, %arg1 : i32, i32, i32
  }
  func.func @transform_4(%arg0: i32, %arg1: i32, %arg2: i32) -> (i32, i32, i32) {
    %c0_i32 = arith.constant 0 : i32
    return %arg0, %arg2, %arg1 : i32, i32, i32
  }
}

module attributes {stable_mosaic.version = 11 : i64} {
  func.func @_matmul_bias_kernel(%arg0: i32, %arg1: i32, %arg2: memref<512x16xf32, #tpu.memory_space<vmem>>, %arg3: memref<16x8xf32, #tpu.memory_space<vmem>>, %arg4: memref<1x8xf32, #tpu.memory_space<vmem>>, %arg5: memref<512x8xf32, #tpu.memory_space<vmem>>) attributes {dimension_semantics = [#tpu.dimension_semantics<parallel>, #tpu.dimension_semantics<parallel>], iteration_bounds = array<i64: 1, 1>, scalar_prefetch = 0 : i64, scratch_operands = 0 : i64, tpu.core_type = #tpu.core_type<tc>, window_params = [{transform_indices = @transform_0, window_bounds = array<i64: 512, 16>}, {transform_indices = @transform_1, window_bounds = array<i64: 16, 8>}, {transform_indices = @transform_2, window_bounds = array<i64: 1, 8>}, {transform_indices = @transform_3, window_bounds = array<i64: 512, 8>}]} {
    %c0 = arith.constant 0 : index
    %c0_0 = arith.constant 0 : index
    %0 = vector.load %arg2[%c0, %c0_0] : memref<512x16xf32, #tpu.memory_space<vmem>>, vector<512x16xf32>
    %1 = arith.truncf %0 : vector<512x16xf32> to vector<512x16xbf16>
    %c0_1 = arith.constant 0 : index
    %c0_2 = arith.constant 0 : index
    %2 = vector.load %arg3[%c0_1, %c0_2] : memref<16x8xf32, #tpu.memory_space<vmem>>, vector<16x8xf32>
    %3 = arith.truncf %2 : vector<16x8xf32> to vector<16x8xbf16>
    %cst = arith.constant dense<0.000000e+00> : vector<512x8xf32>
    %4 = tpu.matmul %1, %3, %cst {dimension_numbers = #tpu.dot_dimension_numbers<[1], [0], [0], [1], [0, 0, 1, 1], [], []>} : vector<512x16xbf16>, vector<16x8xbf16>, vector<512x8xf32> -> vector<512x8xf32>
    %c0_3 = arith.constant 0 : index
    %c0_4 = arith.constant 0 : index
    %5 = vector.load %arg4[%c0_3, %c0_4] : memref<1x8xf32, #tpu.memory_space<vmem>>, vector<1x8xf32>
    %6 = vector.broadcast %5 : vector<1x8xf32> to vector<512x8xf32>
    %7 = arith.addf %4, %6 : vector<512x8xf32>
    %c0_5 = arith.constant 0 : index
    %c0_6 = arith.constant 0 : index
    %8 = vector.load %arg5[%c0_5, %c0_6] : memref<512x8xf32, #tpu.memory_space<vmem>>, vector<512x8xf32>
    tpu.vector_store %arg5[%c0_5, %c0_6], %7 {strides = array<i32>} : memref<512x8xf32, #tpu.memory_space<vmem>>, vector<512x8xf32>,
    return
  }
  func.func @transform_0(%arg0: i32, %arg1: i32) -> (i32, i32) {
    %c0_i32 = arith.constant 0 : i32
    %c0_i32_0 = arith.constant 0 : i32
    return %arg0, %c0_i32 : i32, i32
  }
  func.func @transform_1(%arg0: i32, %arg1: i32) -> (i32, i32) {
    %c0_i32 = arith.constant 0 : i32
    %c0_i32_0 = arith.constant 0 : i32
    return %c0_i32, %arg1 : i32, i32
  }
  func.func @transform_2(%arg0: i32, %arg1: i32) -> (i32, i32) {
    %c0_i32 = arith.constant 0 : i32
    %c0_i32_0 = arith.constant 0 : i32
    return %c0_i32, %arg1 : i32, i32
  }
  func.func @transform_3(%arg0: i32, %arg1: i32) -> (i32, i32) {
    %c0_i32 = arith.constant 0 : i32
    return %arg0, %arg1 : i32, i32
  }
}

module attributes {stable_mosaic.version = 11 : i64} {
  func.func @_matmul_bias_kernel(%arg0: i32, %arg1: i32, %arg2: memref<512x4xf32, #tpu.memory_space<vmem>>, %arg3: memref<4x2xf32, #tpu.memory_space<vmem>>, %arg4: memref<1x2xf32, #tpu.memory_space<vmem>>, %arg5: memref<512x2xf32, #tpu.memory_space<vmem>>) attributes {dimension_semantics = [#tpu.dimension_semantics<parallel>, #tpu.dimension_semantics<parallel>], iteration_bounds = array<i64: 2, 1>, scalar_prefetch = 0 : i64, scratch_operands = 0 : i64, tpu.core_type = #tpu.core_type<tc>, window_params = [{transform_indices = @transform_0, window_bounds = array<i64: 512, 4>}, {transform_indices = @transform_1, window_bounds = array<i64: 4, 2>}, {transform_indices = @transform_2, window_bounds = array<i64: 1, 2>}, {transform_indices = @transform_3, window_bounds = array<i64: 512, 2>}]} {
    %c0 = arith.constant 0 : index
    %c0_0 = arith.constant 0 : index
    %0 = vector.load %arg2[%c0, %c0_0] : memref<512x4xf32, #tpu.memory_space<vmem>>, vector<512x4xf32>
    %1 = arith.truncf %0 : vector<512x4xf32> to vector<512x4xbf16>
    %c0_1 = arith.constant 0 : index
    %c0_2 = arith.constant 0 : index
    %2 = vector.load %arg3[%c0_1, %c0_2] : memref<4x2xf32, #tpu.memory_space<vmem>>, vector<4x2xf32>
    %3 = arith.truncf %2 : vector<4x2xf32> to vector<4x2xbf16>
    %cst = arith.constant dense<0.000000e+00> : vector<512x2xf32>
    %4 = tpu.matmul %1, %3, %cst {dimension_numbers = #tpu.dot_dimension_numbers<[1], [0], [0], [1], [0, 0, 1, 1], [], []>} : vector<512x4xbf16>, vector<4x2xbf16>, vector<512x2xf32> -> vector<512x2xf32>
    %c0_3 = arith.constant 0 : index
    %c0_4 = arith.constant 0 : index
    %5 = vector.load %arg4[%c0_3, %c0_4] : memref<1x2xf32, #tpu.memory_space<vmem>>, vector<1x2xf32>
    %6 = vector.broadcast %5 : vector<1x2xf32> to vector<512x2xf32>
    %7 = arith.addf %4, %6 : vector<512x2xf32>
    %c0_5 = arith.constant 0 : index
    %c0_6 = arith.constant 0 : index
    %8 = vector.load %arg5[%c0_5, %c0_6] : memref<512x2xf32, #tpu.memory_space<vmem>>, vector<512x2xf32>
    tpu.vector_store %arg5[%c0_5, %c0_6], %7 {strides = array<i32>} : memref<512x2xf32, #tpu.memory_space<vmem>>, vector<512x2xf32>,
    return
  }
  func.func @transform_0(%arg0: i32, %arg1: i32) -> (i32, i32) {
    %c0_i32 = arith.constant 0 : i32
    %c0_i32_0 = arith.constant 0 : i32
    return %arg0, %c0_i32 : i32, i32
  }
  func.func @transform_1(%arg0: i32, %arg1: i32) -> (i32, i32) {
    %c0_i32 = arith.constant 0 : i32
    %c0_i32_0 = arith.constant 0 : i32
    return %c0_i32, %arg1 : i32, i32
  }
  func.func @transform_2(%arg0: i32, %arg1: i32) -> (i32, i32) {
    %c0_i32 = arith.constant 0 : i32
    %c0_i32_0 = arith.constant 0 : i32
    return %c0_i32, %arg1 : i32, i32
  }
  func.func @transform_3(%arg0: i32, %arg1: i32) -> (i32, i32) {
    %c0_i32 = arith.constant 0 : i32
    return %arg0, %arg1 : i32, i32
  }
}

</mosaic_0001>

<bundles_post_ra>
// kernel: c2former_forward.31
= control target key start
LH: loop header
LB: loop body
LE: loop exit
PB: predicated region body
PF: predicated region fallthrough
CT: control target
= control target key end

     0   :  { %s847_s9 = smov 0   ;;  %s849_s10 = smov 0   ;;  %s1242_s0 = inlined_call_operand.vmem [shape: f32[2,256,8], index: 0, kind: input, shape index: {}]   ;;  %s1243_s1 = inlined_call_operand.vmem [shape: f32[2,256,8], index: 1, kind: input, shape index: {}]   ;;  %s1244_s2 = inlined_call_operand.vmem [shape: f32[2,4,8], index: 2, kind: output, shape index: {}]  }
   0x1   :  { %s851_s11 = smov 0  }
   0x2 LB: > { %s31_s12 = sadd.s32 1, %s825_s10  ;;  %p772_p0 = scmp.ge.s32.totalorder %s829_s11, 1  ;;  %s829_s11 = sphi %s851_s11, %s12_s11   ;;  %s825_s10 = sphi %s849_s10, %s1246_s10   ;;  %s821_s9 = sphi %s847_s9, %s1245_s9  }
   0x3   : > { %p33_p1 = scmp.ge.s32.totalorder %s31_s12, 2  ;;  %p167_p2 = scmp.lt.s32.totalorder %s829_s11, 3 }
   0x5   : > { %s1248_s12 = smov (%p33_p1, %s31_s12), 0  ;;  %p168_p3 = pnand %p772_p0, %p167_p2 }
   0x6   : > { %p211_p4 = scmp.lt.s32.totalorder (!%p168_p3), %s821_s9, 1  ;;  %vm247_vm0 = vcmask (!%p168_p3), 60416   ;;  %vm314_vm1 = vcmask (!%p168_p3), 64512   ;;  %v831_v3 = vmov (!%p168_p3), 0.0   ;;  %vm655_vm2 = vcmask (!%p168_p3), 1040384  }
   0x7   : > { %171 = sbr.rel (%p168_p3) target bundleno = 134 (0x86), region = 28  ;;  %vm657_vm3 = vcmask (!%p168_p3), 1041408   ;;  %vm659_vm4 = vcmask (!%p168_p3), 1042432  }
   0xe   : > { %s1250_s9 = smov (!%p211_p4, %s821_s9), 1 }
   0xf   : > { %s780_s13 = sshll.u32 %s1250_s9, 8  ;;  %s777_s14 = sshll.u32 %s1250_s9, 2 }
  0x10   : > { %s874_s17 = scalar_lea.vmem %s1242_s0, %s780_s13  ;;  %s879_s20 = scalar_lea.vmem %s1244_s2, %s777_s14 }
  0x11   : > { %v249_v0 = vld [vmem:[%s874_s17] sm:$0xff]  ;;  %v250_v1 = vld [vmem:[%s874_s17 + $0x8] sm:$0xff]  ;;  %v251_v2 = vld [vmem:[%s874_s17 + $0x10] sm:$0xff]  ;;  %248 = vst.msk [vmem:[%s879_s20] sm:$0xf] %vm247_vm0, %v831_v3  ;;  %s921_s23 = scalar_lea.vmem %s1243_s1, %s780_s13 }
  0x12   : > { %v315_v4 = vsel %vm314_vm1, %v249_v0, 0.0  ;;  %v316_v5 = vsel %vm314_vm1, %v250_v1, 0.0  ;;  %v318_v6 = vsel %vm314_vm1, %v251_v2, 0.0  ;;  %v252_v7 = vld [vmem:[%s874_s17 + $0x18] sm:$0xff]  ;;  %v253_v10 = vld [vmem:[%s874_s17 + $0x20] sm:$0xff]  ;;  %v254_v13 = vld [vmem:[%s874_s17 + $0x28] sm:$0xff]  ;;  %v384_v28 = vmul.f32 %v249_v0, %v249_v0 }
  0x13   : > { %v317_v8 = vadd.f32 %v316_v5, %v315_v4  ;;  %v320_v9 = vsel %vm314_vm1, %v252_v7, 0.0  ;;  %v322_v12 = vsel %vm314_vm1, %v253_v10, 0.0  ;;  %v324_v15 = vsel %vm314_vm1, %v254_v13, 0.0  ;;  %v255_v16 = vld [vmem:[%s874_s17 + $0x30] sm:$0xff]  ;;  %v256_v19 = vld [vmem:[%s874_s17 + $0x38] sm:$0xff]  ;;  %v257_v22 = vld [vmem:[%s874_s17 + $0x40] sm:$0xff] }
  0x14   : > { %v326_v18 = vsel %vm314_vm1, %v255_v16, 0.0  ;;  %v328_v21 = vsel %vm314_vm1, %v256_v19, 0.0  ;;  %v330_v24 = vsel %vm314_vm1, %v257_v22, 0.0  ;;  %v258_v25 = vld [vmem:[%s874_s17 + $0x48] sm:$0xff]  ;;  %v385_v29 = vmul.f32 %v250_v1, %v250_v1  ;;  %v259_v31 = vld [vmem:[%s874_s17 + $0x50] sm:$0xff]  ;;  %v260_v33 = vld [vmem:[%s874_s17 + $0x58] sm:$0xff] }
  0x15   : > { %v319_v11 = vadd.f32 %v318_v6, %v317_v8  ;;  %v332_v27 = vsel %vm314_vm1, %v258_v25, 0.0  ;;  %v386_v30 = vmul.f32 %v251_v2, %v251_v2  ;;  %v334_v34 = vsel %vm314_vm1, %v259_v31, 0.0  ;;  %v261_v42 = vld [vmem:[%s874_s17 + $0x60] sm:$0xff]  ;;  %v262_v48 = vld [vmem:[%s874_s17 + $0x68] sm:$0xff]  ;;  %v263_v54 = vld [vmem:[%s874_s17 + $0x70] sm:$0xff] }
  0x16   : > { %v387_v35 = vmul.f32 %v252_v7, %v252_v7  ;;  %v336_v37 = vsel %vm314_vm1, %v260_v33, 0.0  ;;  %v388_v38 = vmul.f32 %v253_v10, %v253_v10  ;;  %v416_v39 = vsel %vm314_vm1, %v384_v28, 0.0  ;;  %v927_v62 = vld [vmem:[%s921_s23] sm:$0xff]  ;;  %v930_v63 = vld [vmem:[%s921_s23 + $0x8] sm:$0xff]  ;;  %v264_v2 = vld [vmem:[%s874_s17 + $0x78] sm:$0xff] }
  0x17   : > { %v321_v14 = vadd.f32 %v320_v9, %v319_v11  ;;  %v417_v40 = vsel %vm314_vm1, %v385_v29, 0.0  ;;  %v419_v41 = vsel %vm314_vm1, %v386_v30, 0.0  ;;  %v338_v45 = vsel %vm314_vm1, %v261_v42, 0.0  ;;  %v935_v3 = vld [vmem:[%s921_s23 + $0x10] sm:$0xff]  ;;  %v938_v6 = vld [vmem:[%s921_s23 + $0x18] sm:$0xff] }
  0x18   : > { %v418_v44 = vadd.f32 %v417_v40, %v416_v39  ;;  %v389_v46 = vmul.f32 %v254_v13, %v254_v13  ;;  %v421_v47 = vsel %vm314_vm1, %v387_v35, 0.0  ;;  %v340_v51 = vsel %vm314_vm1, %v262_v48, 0.0  ;;  %v947_v13 = vld [vmem:[%s921_s23 + $0x20] sm:$0xff]  ;;  %v963_v29 = vld [vmem:[%s921_s23 + $0x30] sm:$0xff] }
  0x19   : > { %v323_v17 = vadd.f32 %v322_v12, %v321_v14  ;;  %v390_v52 = vmul.f32 %v255_v16, %v255_v16  ;;  %v423_v53 = vsel %vm314_vm1, %v388_v38, 0.0  ;;  %v342_v57 = vsel %vm314_vm1, %v263_v54, 0.0 }
  0x1a   : > { %v420_v50 = vadd.f32 %v419_v41, %v418_v44  ;;  %v391_v58 = vmul.f32 %v256_v19, %v256_v19  ;;  %v425_v59 = vsel %vm314_vm1, %v389_v46, 0.0  ;;  %v392_v0 = vmul.f32 %v257_v22, %v257_v22  ;;  %v956_v22 = vld [vmem:[%s921_s23 + $0x28] sm:$0xff]  ;;  %v977_v44 = vld [vmem:[%s921_s23 + $0x40] sm:$0xff] }
  0x1b   : > { %v325_v20 = vadd.f32 %v324_v15, %v323_v17  ;;  %v427_v1 = vsel %vm314_vm1, %v390_v52, 0.0  ;;  %v344_v7 = vsel %vm314_vm1, %v264_v2, 0.0  ;;  %v393_v8 = vmul.f32 %v258_v25, %v258_v25  ;;  %v984_v52 = vld [vmem:[%s921_s23 + $0x48] sm:$0xff] }
  0x1c   : > { %v422_v56 = vadd.f32 %v421_v47, %v420_v50  ;;  %v429_v9 = vsel %vm314_vm1, %v391_v58, 0.0  ;;  %v485_v11 = vsel %vm314_vm1, %v927_v62, 0.0  ;;  %v486_v12 = vsel %vm314_vm1, %v930_v63, 0.0 }
  0x1d   : > { %v327_v23 = vadd.f32 %v326_v18, %v325_v20  ;;  %v394_v14 = vmul.f32 %v259_v31, %v259_v31  ;;  %v431_v15 = vsel %vm314_vm1, %v392_v0, 0.0  ;;  %v487_v16 = vadd.f32 %v486_v12, %v485_v11  ;;  %v265_v18 = vld [vmem:[%s874_s17 + $0x80] sm:$0xff] }
  0x1e   : > { %v424_v61 = vadd.f32 %v423_v53, %v422_v56  ;;  %v488_v17 = vsel %vm314_vm1, %v935_v3, 0.0  ;;  %v433_v25 = vsel %vm314_vm1, %v393_v8, 0.0  ;;  %v492_v28 = vsel %vm314_vm1, %v947_v13, 0.0  ;;  %v270_v8 = vld [vmem:[%s874_s17 + $0xa8] sm:$0xff] }
  0x1f   : > { %v329_v26 = vadd.f32 %v328_v21, %v327_v23  ;;  %v490_v21 = vsel %vm314_vm1, %v938_v6, 0.0  ;;  %v346_v23 = vsel %vm314_vm1, %v265_v18, 0.0  ;;  %v396_v30 = vmul.f32 %v261_v42, %v261_v42 }
  0x20   : > { %v426_v5 = vadd.f32 %v425_v59, %v424_v61  ;;  %v435_v31 = vsel %vm314_vm1, %v394_v14, 0.0  ;;  %v397_v39 = vmul.f32 %v262_v48, %v262_v48  ;;  %v500_v58 = vsel %vm314_vm1, %v977_v44, 0.0  ;;  %v991_v59 = vld [vmem:[%s921_s23 + $0x50] sm:$0xff] }
  0x21   : > { %v331_v32 = vadd.f32 %v330_v24, %v329_v26  ;;  %v395_v24 = vmul.f32 %v260_v33, %v260_v33  ;;  %v489_v26 = vadd.f32 %v488_v17, %v487_v16  ;;  %v494_v33 = vsel %vm314_vm1, %v956_v22, 0.0 }
  0x22   : > { %v428_v10 = vadd.f32 %v427_v1, %v426_v5  ;;  %v439_v46 = vsel %vm314_vm1, %v396_v30, 0.0  ;;  %v268_v1 = vld [vmem:[%s874_s17 + $0x98] sm:$0xff]  ;;  %v356_v17 = vsel %vm314_vm1, %v270_v8, 0.0 }
  0x23   : > { %v333_v36 = vadd.f32 %v332_v27, %v331_v32  ;;  %v491_v32 = vadd.f32 %v490_v21, %v489_v26  ;;  %v437_v40 = vsel %vm314_vm1, %v395_v24, 0.0  ;;  %v1011_v21 = vld [vmem:[%s921_s23 + $0x60] sm:$0xff] }
  0x24   : > { %v430_v20 = vadd.f32 %v429_v9, %v428_v10  ;;  %v1000_v9 = vld [vmem:[%s921_s23 + $0x58] sm:$0xff]  ;;  %v352_v10 = vsel %vm314_vm1, %v268_v1, 0.0 }
  0x25   : > { %v335_v43 = vadd.f32 %v334_v34, %v333_v36  ;;  %v266_v34 = vld [vmem:[%s874_s17 + $0x88] sm:$0xff]  ;;  %v493_v41 = vadd.f32 %v492_v28, %v491_v32 }
  0x26   : > { %v432_v27 = vadd.f32 %v431_v15, %v430_v20  ;;  %v348_v38 = vsel %vm314_vm1, %v266_v34, 0.0  ;;  %v401_v11 = vmul.f32 %v266_v34, %v266_v34  ;;  %v271_v15 = vld [vmem:[%s874_s17 + $0xb0] sm:$0xff]  ;;  %v272_v20 = vld [vmem:[%s874_s17 + $0xb8] sm:$0xff]  ;;  %v1021_v32 = vld [vmem:[%s921_s23 + $0x68] sm:$0xff]  ;;  %v403_v34 = vmul.f32 %v268_v1, %v268_v1 }
  0x27   : > { %v337_v49 = vadd.f32 %v336_v37, %v335_v43  ;;  %v970_v37 = vld [vmem:[%s921_s23 + $0x38] sm:$0xff]  ;;  %v496_v43 = vsel %vm314_vm1, %v963_v29, 0.0  ;;  %v495_v47 = vadd.f32 %v494_v33, %v493_v41  ;;  %v1016_v28 = vsel %vm314_vm1, %v272_v20, 0.0 }
  0x28   : > { %v434_v36 = vadd.f32 %v433_v25, %v432_v27  ;;  %v498_v48 = vsel %vm314_vm1, %v970_v37, 0.0  ;;  %v508_v41 = vsel %vm314_vm1, %v1011_v21, 0.0  ;;  %v558_v1 = vmul.f32 %v947_v13, %v947_v13 }
  0x29   : > { %v339_v55 = vadd.f32 %v338_v45, %v337_v49  ;;  %v398_v45 = vmul.f32 %v263_v54, %v263_v54  ;;  %v267_v49 = vld [vmem:[%s874_s17 + $0x90] sm:$0xff]  ;;  %v441_v54 = vsel %vm314_vm1, %v397_v39, 0.0  ;;  %v497_v56 = vadd.f32 %v496_v43, %v495_v47  ;;  %v1030_v43 = vld [vmem:[%s921_s23 + $0x78] sm:$0xff] }
  0x2a   : > { %v436_v42 = vadd.f32 %v435_v31, %v434_v36  ;;  %v350_v53 = vsel %vm314_vm1, %v267_v49, 0.0  ;;  %v402_v24 = vmul.f32 %v267_v49, %v267_v49  ;;  %v506_v31 = vsel %vm314_vm1, %v1000_v9, 0.0 }
  0x2b   : > { %v341_v60 = vadd.f32 %v340_v51, %v339_v55  ;;  %v399_v55 = vmul.f32 %v264_v2, %v264_v2  ;;  %v443_v61 = vsel %vm314_vm1, %v398_v45, 0.0  ;;  %v499_v0 = vadd.f32 %v498_v48, %v497_v56 }
  0x2c   : > { %v438_v51 = vadd.f32 %v437_v40, %v436_v42  ;;  %v502_v2 = vsel %vm314_vm1, %v984_v52, 0.0  ;;  %v449_v36 = vsel %vm314_vm1, %v401_v11, 0.0  ;;  %v406_v39 = vmul.f32 %v271_v15, %v271_v15  ;;  %v1027_v42 = vld [vmem:[%s921_s23 + $0x70] sm:$0xff] }
  0x2d   : > { %v343_v4 = vadd.f32 %v342_v57, %v341_v60  ;;  %v400_v60 = vmul.f32 %v265_v18, %v265_v18  ;;  %v445_v12 = vsel %vm314_vm1, %v399_v55, 0.0  ;;  %v501_v14 = vadd.f32 %v500_v58, %v499_v0  ;;  %v1051_v0 = vld [vmem:[%s921_s23 + $0x80] sm:$0xff] }
  0x2e   : > { %v440_v57 = vadd.f32 %v439_v46, %v438_v51  ;;  %v451_v45 = vsel %vm314_vm1, %v402_v24, 0.0  ;;  %v554_v47 = vmul.f32 %v927_v62, %v927_v62  ;;  %v555_v49 = vmul.f32 %v930_v63, %v930_v63 }
  0x2f   : > { %v345_v19 = vadd.f32 %v344_v7, %v343_v4  ;;  %v269_v7 = vld [vmem:[%s874_s17 + $0xa0] sm:$0xff]  ;;  %v447_v25 = vsel %vm314_vm1, %v400_v60, 0.0  ;;  %v503_v26 = vadd.f32 %v502_v2, %v501_v14  ;;  %v510_v48 = vsel %vm314_vm1, %v1021_v32, 0.0 }
  0x30   : > { %v442_v5 = vadd.f32 %v441_v54, %v440_v57  ;;  %v354_v16 = vsel %vm314_vm1, %v269_v7, 0.0  ;;  %v407_v55 = vmul.f32 %v272_v20, %v272_v20  ;;  %v453_v54 = vsel %vm314_vm1, %v403_v34, 0.0 }
  0x31   : > { %v347_v35 = vadd.f32 %v346_v23, %v345_v19  ;;  %v504_v19 = vsel %vm314_vm1, %v991_v59, 0.0  ;;  %v358_v23 = vsel %vm314_vm1, %v271_v15, 0.0  ;;  %v557_v57 = vmul.f32 %v938_v6, %v938_v6 }
  0x32   : > { %v444_v18 = vadd.f32 %v443_v61, %v442_v5  ;;  %v505_v33 = vadd.f32 %v504_v19, %v503_v26  ;;  %v512_v63 = vsel %vm314_vm1, %v1027_v42, 0.0  ;;  %v514_v60 = vsel %vm314_vm1, %v1030_v43, 0.0  ;;  %v273_v61 = vld [vmem:[%s874_s17 + $0xc0] sm:$0xff]  ;;  %v1068_v19 = vld [vmem:[%s921_s23 + $0x90] sm:$0xff]  ;;  %v274_v26 = vld [vmem:[%s874_s17 + $0xc8] sm:$0xff] }
  0x33   : > { %v349_v50 = vadd.f32 %v348_v38, %v347_v35  ;;  %v404_v35 = vmul.f32 %v269_v7, %v269_v7  ;;  %v405_v38 = vmul.f32 %v270_v8, %v270_v8  ;;  %v587_v6 = vsel %vm314_vm1, %v555_v49, 0.0 }
  0x34   : > { %v446_v30 = vadd.f32 %v445_v12, %v444_v18  ;;  %v507_v46 = vadd.f32 %v506_v31, %v505_v33  ;;  %v559_v14 = vmul.f32 %v956_v22, %v956_v22  ;;  %v591_v13 = vsel %vm314_vm1, %v557_v57, 0.0 }
  0x35   : > { %v351_v4 = vadd.f32 %v350_v53, %v349_v50  ;;  %v556_v53 = vmul.f32 %v935_v3, %v935_v3  ;;  %v455_v58 = vsel %vm314_vm1, %v404_v35, 0.0  ;;  %v457_v11 = vsel %vm314_vm1, %v405_v38, 0.0  ;;  %v1078_v35 = vld [vmem:[%s921_s23 + $0x98] sm:$0xff] }
  0x36   : > { %v448_v40 = vadd.f32 %v447_v25, %v446_v30  ;;  %v509_v56 = vadd.f32 %v508_v41, %v507_v46  ;;  %v408_v15 = vmul.f32 %v273_v61, %v273_v61  ;;  %v459_v20 = vsel %vm314_vm1, %v406_v39, 0.0 }
  0x37   : > { %v353_v27 = vadd.f32 %v352_v10, %v351_v4  ;;  %v586_v4 = vsel %vm314_vm1, %v554_v47, 0.0  ;;  %v589_v8 = vsel %vm314_vm1, %v556_v53, 0.0  ;;  %v1059_v10 = vld [vmem:[%s921_s23 + $0x88] sm:$0xff]  ;;  %v560_v25 = vmul.f32 %v963_v29, %v963_v29 }
  0x38   : > { %v450_v51 = vadd.f32 %v449_v36, %v448_v40  ;;  %v511_v3 = vadd.f32 %v510_v48, %v509_v56  ;;  %v588_v7 = vadd.f32 %v587_v6, %v586_v4  ;;  %v593_v22 = vsel %vm314_vm1, %v558_v1, 0.0  ;;  %v276_v6 = vld [vmem:[%s874_s17 + $0xd8] sm:$0xff] }
  0x39   : > { %v355_v50 = vadd.f32 %v354_v16, %v353_v27  ;;  %v518_v31 = vsel %vm314_vm1, %v1059_v10, 0.0  ;;  %v461_v36 = vsel %vm314_vm1, %v407_v55, 0.0  ;;  %v561_v38 = vmul.f32 %v970_v37, %v970_v37 }
  0x3a   : > { %v452_v62 = vadd.f32 %v451_v45, %v450_v51  ;;  %v513_v12 = vadd.f32 %v512_v63, %v511_v3  ;;  %v590_v18 = vadd.f32 %v589_v8, %v588_v7  ;;  %v595_v29 = vsel %vm314_vm1, %v559_v14, 0.0  ;;  %v1088_v45 = vld [vmem:[%s921_s23 + $0xa0] sm:$0xff]  ;;  %v1117_v8 = vld [vmem:[%s921_s23 + $0xb8] sm:$0xff] }
  0x3b   : > { %v357_v5 = vadd.f32 %v356_v17, %v355_v50  ;;  %v516_v17 = vsel %vm314_vm1, %v1051_v0, 0.0  ;;  %v362_v39 = vsel %vm314_vm1, %v273_v61, 0.0  ;;  %v520_v40 = vsel %vm314_vm1, %v1068_v19, 0.0  ;;  %v275_v50 = vld [vmem:[%s874_s17 + $0xd0] sm:$0xff] }
  0x3c   : > { %v454_v2 = vadd.f32 %v453_v54, %v452_v62  ;;  %v515_v24 = vadd.f32 %v514_v60, %v513_v12  ;;  %v592_v34 = vadd.f32 %v591_v13, %v590_v18  ;;  %v409_v46 = vmul.f32 %v274_v26, %v274_v26  ;;  %v1098_v54 = vld [vmem:[%s921_s23 + $0xa8] sm:$0xff]  ;;  %v1108_v60 = vld [vmem:[%s921_s23 + $0xb0] sm:$0xff] }
  0x3d   : > { %v359_v27 = vadd.f32 %v358_v23, %v357_v5  ;;  %v562_v49 = vmul.f32 %v977_v44, %v977_v44  ;;  %v597_v37 = vsel %vm314_vm1, %v560_v25, 0.0  ;;  %v522_v53 = vsel %vm314_vm1, %v1078_v35, 0.0 }
  0x3e   : > { %v456_v16 = vadd.f32 %v455_v58, %v454_v2  ;;  %v517_v33 = vadd.f32 %v516_v17, %v515_v24  ;;  %v594_v41 = vadd.f32 %v593_v22, %v592_v34  ;;  %v463_v56 = vsel %vm314_vm1, %v408_v15, 0.0  ;;  %v1127_v17 = vld [vmem:[%s921_s23 + $0xc0] sm:$0xff] }
  0x3f   : > { %v361_v51 = vadd.f32 %v1016_v28, %v359_v27  ;;  %v563_v44 = vmul.f32 %v984_v52, %v984_v52  ;;  %v599_v62 = vsel %vm314_vm1, %v561_v38, 0.0  ;;  %v364_v58 = vsel %vm314_vm1, %v274_v26, 0.0  ;;  %v277_v22 = vld [vmem:[%s874_s17 + $0xe0] sm:$0xff] }
  0x40   : > { %v458_v30 = vadd.f32 %v457_v11, %v456_v16  ;;  %v519_v47 = vadd.f32 %v518_v31, %v517_v33  ;;  %v596_v55 = vadd.f32 %v595_v29, %v594_v41  ;;  %v524_v28 = vsel %vm314_vm1, %v1088_v45, 0.0  ;;  %v1136_v31 = vld [vmem:[%s921_s23 + $0xc8] sm:$0xff] }
  0x41   : > { %v410_v61 = vmul.f32 %v275_v50, %v275_v50  ;;  %v564_v1 = vmul.f32 %v991_v59, %v991_v59  ;;  %v601_v4 = vsel %vm314_vm1, %v562_v49, 0.0  ;;  %v363_v52 = vadd.f32 %v362_v39, %v361_v51  ;;  %v278_v49 = vld [vmem:[%s874_s17 + $0xe8] sm:$0xff] }
  0x42   : > { %v460_v23 = vadd.f32 %v459_v20, %v458_v30  ;;  %v521_v57 = vadd.f32 %v520_v40, %v519_v47  ;;  %v598_v63 = vadd.f32 %v597_v37, %v596_v55  ;;  %v526_v2 = vsel %vm314_vm1, %v1098_v54, 0.0 }
  0x43   : > { %v465_v11 = vsel %vm314_vm1, %v409_v46, 0.0  ;;  %v565_v14 = vmul.f32 %v1000_v9, %v1000_v9  ;;  %v603_v59 = vsel %vm314_vm1, %v563_v44, 0.0  ;;  %v366_v13 = vsel %vm314_vm1, %v275_v50, 0.0 }
  0x44   : > { %v462_v48 = vadd.f32 %v461_v36, %v460_v23  ;;  %v523_v3 = vadd.f32 %v522_v53, %v521_v57  ;;  %v600_v7 = vadd.f32 %v599_v62, %v598_v63  ;;  %v528_v15 = vsel %vm314_vm1, %v1108_v60, 0.0  ;;  %v1146_v23 = vld [vmem:[%s921_s23 + $0xd0] sm:$0xff] }
  0x45   : > { %v411_v18 = vmul.f32 %v276_v6, %v276_v6  ;;  %v566_v24 = vmul.f32 %v1011_v21, %v1011_v21  ;;  %v605_v25 = vsel %vm314_vm1, %v564_v1, 0.0  ;;  %v365_v9 = vadd.f32 %v364_v58, %v363_v52 }
  0x46   : > { %v464_v5 = vadd.f32 %v463_v56, %v462_v48  ;;  %v525_v12 = vadd.f32 %v524_v28, %v523_v3  ;;  %v602_v16 = vadd.f32 %v601_v4, %v600_v7  ;;  %v530_v27 = vsel %vm314_vm1, %v1117_v8, 0.0  ;;  %v1155_v48 = vld [vmem:[%s921_s23 + $0xd8] sm:$0xff] }
  0x47   : > { %v467_v34 = vsel %vm314_vm1, %v410_v61, 0.0  ;;  %v567_v33 = vmul.f32 %v1021_v32, %v1021_v32  ;;  %v607_v21 = vsel %vm314_vm1, %v565_v14, 0.0  ;;  %v368_v38 = vsel %vm314_vm1, %v276_v6, 0.0  ;;  %v1170_v6 = vld [vmem:[%s921_s23 + $0xe0] sm:$0xff] }
  0x48   : > { %v527_v20 = vadd.f32 %v526_v2, %v525_v12  ;;  %v466_v26 = vadd.f32 %v465_v11, %v464_v5  ;;  %v604_v30 = vadd.f32 %v603_v59, %v602_v16  ;;  %v532_v29 = vsel %vm314_vm1, %v1127_v17, 0.0 }
  0x49   : > { %v412_v40 = vmul.f32 %v277_v22, %v277_v22  ;;  %v568_v46 = vmul.f32 %v1027_v42, %v1027_v42  ;;  %v609_v47 = vsel %vm314_vm1, %v566_v24, 0.0  ;;  %v367_v37 = vadd.f32 %v366_v13, %v365_v9 }
  0x4a   : > { %v529_v36 = vadd.f32 %v528_v15, %v527_v20  ;;  %v606_v39 = vadd.f32 %v605_v25, %v604_v30  ;;  %v468_v32 = vadd.f32 %v467_v34, %v466_v26  ;;  %v534_v50 = vsel %vm314_vm1, %v1136_v31, 0.0  ;;  %v280_v26 = vld [vmem:[%s874_s17 + $0xf8] sm:$0xff] }
  0x4b   : > { %v469_v53 = vsel %vm314_vm1, %v411_v18, 0.0  ;;  %v569_v56 = vmul.f32 %v1030_v43, %v1030_v43  ;;  %v611_v42 = vsel %vm314_vm1, %v567_v33, 0.0  ;;  %v370_v57 = vsel %vm314_vm1, %v277_v22, 0.0 }
  0x4c   : > { %v531_v41 = vadd.f32 %v530_v27, %v529_v36  ;;  %v608_v51 = vadd.f32 %v607_v21, %v606_v39  ;;  %v536_v44 = vsel %vm314_vm1, %v1146_v23, 0.0  ;;  %v413_v58 = vmul.f32 %v278_v49, %v278_v49  ;;  %v311_v39 = vld [vmem:[%s921_s23 + $0xf0] sm:$0xff] }
  0x4d   : > { %v570_v63 = vmul.f32 %v1051_v0, %v1051_v0  ;;  %v613_v61 = vsel %vm314_vm1, %v568_v46, 0.0  ;;  %v369_v3 = vadd.f32 %v368_v38, %v367_v37  ;;  %v470_v1 = vadd.f32 %v469_v53, %v468_v32  ;;  %v279_v0 = vld [vmem:[%s874_s17 + $0xf0] sm:$0xff] }
  0x4e   : > { %v533_v55 = vadd.f32 %v532_v29, %v531_v41  ;;  %v610_v62 = vadd.f32 %v609_v47, %v608_v51  ;;  %v538_v43 = vsel %vm314_vm1, %v1155_v48, 0.0  ;;  %v471_v52 = vsel %vm314_vm1, %v412_v40, 0.0 }
  0x4f   : > { %v571_v2 = vmul.f32 %v1059_v10, %v1059_v10  ;;  %v615_v7 = vsel %vm314_vm1, %v569_v56, 0.0  ;;  %v372_v12 = vsel %vm314_vm1, %v278_v49, 0.0  ;;  %v572_v59 = vmul.f32 %v1068_v19, %v1068_v19  ;;  %v310_v10 = vld [vmem:[%s921_s23 + $0xe8] sm:$0xff] }
  0x50   : > { %v535_v28 = vadd.f32 %v534_v50, %v533_v55  ;;  %v612_v4 = vadd.f32 %v611_v42, %v610_v62  ;;  %v617_v13 = vsel %vm314_vm1, %v570_v63, 0.0  ;;  %v371_v15 = vadd.f32 %v370_v57, %v369_v3  ;;  %v312_v55 = vld [vmem:[%s921_s23 + $0xf8] sm:$0xff] }
  0x51   : > { %v472_v16 = vadd.f32 %v471_v52, %v470_v1  ;;  %v540_v18 = vsel %vm314_vm1, %v1170_v6, 0.0  ;;  %v414_v24 = vmul.f32 %v279_v0, %v279_v0  ;;  %v473_v25 = vsel %vm314_vm1, %v413_v58, 0.0 }
  0x52   : > { %v537_v5 = vadd.f32 %v536_v44, %v535_v28  ;;  %v614_v11 = vadd.f32 %v613_v61, %v612_v4  ;;  %v573_v22 = vmul.f32 %v1078_v35, %v1078_v35  ;;  %v619_v9 = vsel %vm314_vm1, %v571_v2, 0.0 }
  0x53   : > { %v374_v27 = vsel %vm314_vm1, %v279_v0, 0.0  ;;  %v574_v34 = vmul.f32 %v1088_v45, %v1088_v45  ;;  %v621_v36 = vsel %vm314_vm1, %v572_v59, 0.0  ;;  %v373_v33 = vadd.f32 %v372_v12, %v371_v15 }
  0x54   : > { %v539_v14 = vadd.f32 %v538_v43, %v537_v5  ;;  %v616_v20 = vadd.f32 %v615_v7, %v614_v11  ;;  %v474_v21 = vadd.f32 %v473_v25, %v472_v16  ;;  %v542_v38 = vsel %vm314_vm1, %v310_v10, 0.0 }
  0x55   : > { %v415_v35 = vmul.f32 %v280_v26, %v280_v26  ;;  %v475_v40 = vsel %vm314_vm1, %v414_v24, 0.0  ;;  %v575_v41 = vmul.f32 %v1098_v54, %v1098_v54  ;;  %v623_v46 = vsel %vm314_vm1, %v573_v22, 0.0 }
  0x56   : > { %v618_v19 = vadd.f32 %v617_v13, %v616_v20  ;;  %v541_v30 = vadd.f32 %v540_v18, %v539_v14  ;;  %v576_v45 = vmul.f32 %v1108_v60, %v1108_v60  ;;  %v625_v37 = vsel %vm314_vm1, %v574_v34, 0.0 }
  0x57   : > { %v375_v32 = vadd.f32 %v374_v27, %v373_v33  ;;  %v476_v50 = vadd.f32 %v475_v40, %v474_v21  ;;  %v544_v51 = vsel %vm314_vm1, %v311_v39, 0.0  ;;  %v376_v56 = vsel %vm314_vm1, %v280_v26, 0.0 }
  0x58   : > { %v620_v29 = vadd.f32 %v619_v9, %v618_v19  ;;  %v543_v49 = vadd.f32 %v542_v38, %v541_v30  ;;  %v477_v42 = vsel %vm314_vm1, %v415_v35, 0.0  ;;  %v577_v54 = vmul.f32 %v1117_v8, %v1117_v8 }
  0x59   : > { %v627_v57 = vsel %vm314_vm1, %v575_v41, 0.0  ;;  %v578_v60 = vmul.f32 %v1127_v17, %v1127_v17  ;;  %v629_v58 = vsel %vm314_vm1, %v576_v45, 0.0  ;;  %v377_v28 = vadd.f32 %v376_v56, %v375_v32  ;;  %v313_v56 = vld [vmem:[%s879_s20] sm:$0xf] }
  0x5a   : > { %v622_v47 = vadd.f32 %v621_v36, %v620_v29  ;;  %v545_v62 = vadd.f32 %v544_v51, %v543_v49  ;;  %v478_v63 = vadd.f32 %v477_v42, %v476_v50  ;;  %v546_v61 = vsel %vm314_vm1, %v312_v55, 0.0 }
  0x5b   : > { %v579_v1 = vmul.f32 %v1136_v31, %v1136_v31  ;;  %v631_v43 = vsel %vm314_vm1, %v577_v54, 0.0  ;;  %v580_v52 = vmul.f32 %v1146_v23, %v1146_v23  ;;  %v633_v5 = vsel %vm314_vm1, %v578_v60, 0.0 }
  0x5c   : > { %v624_v53 = vadd.f32 %v623_v46, %v622_v47  ;;  %v547_v4 = vadd.f32 %v546_v61, %v545_v62  ;;  %v378_v17 = vrot.slane %v377_v28, 4  ;;  %v479_v2 = vrot.slane %v478_v63, 4 }
  0x5d   : > { %v581_v0 = vmul.f32 %v1155_v48, %v1155_v48  ;;  %v635_v11 = vsel %vm314_vm1, %v579_v1, 0.0  ;;  %v582_v31 = vmul.f32 %v1170_v6, %v1170_v6  ;;  %v637_v59 = vsel %vm314_vm1, %v580_v52, 0.0 }
  0x5e   : > { %v626_v44 = vadd.f32 %v625_v37, %v624_v53  ;;  %v548_v14 = vrot.slane %v547_v4, 4  ;;  %v379_v13 = vadd.f32 %v378_v17, %v377_v28  ;;  %v480_v15 = vadd.f32 %v479_v2, %v478_v63 }
  0x5f   : > { %v583_v16 = vmul.f32 %v310_v10, %v310_v10  ;;  %v639_v18 = vsel %vm314_vm1, %v581_v0, 0.0  ;;  %v584_v25 = vmul.f32 %v311_v39, %v311_v39  ;;  %v641_v48 = vsel %vm314_vm1, %v582_v31, 0.0 }
  0x60   : > { %v628_v3 = vadd.f32 %v627_v57, %v626_v44  ;;  %v549_v24 = vadd.f32 %v548_v14, %v547_v4  ;;  %v380_v22 = vrot.slane %v379_v13, 2  ;;  %v481_v9 = vrot.slane %v480_v15, 2 }
  0x61   : > { %v585_v19 = vmul.f32 %v312_v55, %v312_v55  ;;  %v643_v27 = vsel %vm314_vm1, %v583_v16, 0.0  ;;  %v645_v34 = vsel %vm314_vm1, %v584_v25, 0.0 }
  0x62   : > { %v630_v8 = vadd.f32 %v629_v58, %v628_v3  ;;  %v550_v30 = vrot.slane %v549_v24, 2  ;;  %v381_v36 = vadd.f32 %v380_v22, %v379_v13  ;;  %v482_v33 = vadd.f32 %v481_v9, %v480_v15 }
  0x63   : > { %v647_v21 = vsel %vm314_vm1, %v585_v19, 0.0 }
  0x64   : > { %v632_v7 = vadd.f32 %v631_v43, %v630_v8  ;;  %v551_v29 = vadd.f32 %v550_v30, %v549_v24  ;;  %v382_v39 = vrot.slane %v381_v36, 1  ;;  %v483_v35 = vrot.slane %v482_v33, 1 }
  0x66   : > { %v634_v12 = vadd.f32 %v633_v5, %v632_v7  ;;  %v552_v46 = vrot.slane %v551_v29, 1  ;;  %v383_v47 = vadd.f32 %v382_v39, %v381_v36  ;;  %v484_v49 = vadd.f32 %v483_v35, %v482_v33 }
  0x68   : > { %v636_v23 = vadd.f32 %v635_v11, %v634_v12  ;;  %v553_v32 = vadd.f32 %v552_v46, %v551_v29  ;;  %v656_v51 = vsel %vm655_vm2, %v383_v47, %v484_v49 }
  0x6a   : > { %v638_v20 = vadd.f32 %v637_v59, %v636_v23  ;;  %v658_v55 = vsel %vm657_vm3, %v656_v51, %v553_v32 }
  0x6c   : > { %v640_v26 = vadd.f32 %v639_v18, %v638_v20 }
  0x6e   : > { %v642_v6 = vadd.f32 %v641_v48, %v640_v26 }
  0x70   : > { %v644_v10 = vadd.f32 %v643_v27, %v642_v6 }
  0x72   : > { %v646_v38 = vadd.f32 %v645_v34, %v644_v10 }
  0x74   : > { %v648_v40 = vadd.f32 %v647_v21, %v646_v38 }
  0x76   : > { %v649_v41 = vrot.slane %v648_v40, 4 }
  0x78   : > { %v650_v45 = vadd.f32 %v649_v41, %v648_v40 }
  0x7a   : > { %v651_v37 = vrot.slane %v650_v45, 2 }
  0x7c   : > { %v652_v50 = vadd.f32 %v651_v37, %v650_v45 }
  0x7e   : > { %v653_v53 = vrot.slane %v652_v50, 1 }
  0x80   : > { %v654_v42 = vadd.f32 %v653_v53, %v652_v50 }
  0x82   : > { %v660_v54 = vsel %vm659_vm4, %v658_v55, %v654_v42 }
  0x83   : > { %v661_v57 = vadd.f32 %v660_v54, %v313_v56 }
  0x85   : > { %663 = vst.msk [vmem:[%s879_s20] sm:$0xf] %vm247_vm0, %v661_v57 }
  0x86 PF: > { %s12_s11 = sadd.s32 1, %s829_s11   ;;  %s1245_s9 = smov %s825_s10 }
  0x87   : > { %p9_p5 = scmp.ge.s32.totalorder %s12_s11, 4   ;;  %s1246_s10 = smov %s1248_s12 }
  0x89   :  { %11 = sbr.rel (!%p9_p5) target bundleno = 2 (0x2), region = 65 }

// kernel: c2former_forward.28
= control target key start
LH: loop header
LB: loop body
LE: loop exit
PB: predicated region body
PF: predicated region fallthrough
CT: control target
= control target key end

     0   :  { %s1236_s18 = smov 0   ;;  %s1238_s19 = smov 0   ;;  %s1397_s0 = inlined_call_operand.vmem [shape: f32[2,18,18,8], index: 0, kind: input, shape index: {}, may-alias: {0,1,2}]   ;;  %s1398_s1 = inlined_call_operand.vmem [shape: f32[2,18,18,8], index: 1, kind: input, shape index: {}, may-alias: {0,1,2}]   ;;  %s1399_s2 = inlined_call_operand.vmem [shape: f32[2,18,18,8], index: 2, kind: input, shape index: {}, may-alias: {0,1,2}]   ;;  %s1400_s3 = inlined_call_operand.vmem [shape: bf16[9,8,8], index: 3, kind: input, shape index: {}]   ;;  %s1401_s4 = inlined_call_operand.vmem [shape: f32[1,8], index: 4, kind: input, shape index: {}]   ;;  %s1402_s5 = inlined_call_operand.vmem [shape: f32[2,16,16,8], index: 5, kind: output, shape index: {}]  }
   0x1   :  { %s1240_s20 = smov 0   ;;  %s1242_s21 = smov 0  }
   0x2   :  { %s1244_s22 = smov 0  }
   0x3 LB: > { %s24_s23 = sadd.s32 1, %s1194_s20  ;;  %s27_s24 = sadd.s32 1, %s1198_s21  ;;  %s1202_s22 = sphi %s1244_s22, %s15_s22   ;;  %s1198_s21 = sphi %s1242_s21, %s1406_s21   ;;  %s1194_s20 = sphi %s1240_s20, %s1405_s20   ;;  %s1190_s19 = sphi %s1238_s19, %s1404_s19   ;;  %s1186_s18 = sphi %s1236_s18, %s1403_s18  }
   0x4   : > { %p25_p0 = scmp.ge.s32.totalorder %s24_s23, 16  ;;  %p1019_p1 = scmp.ge.s32.totalorder %s1202_s22, 1 }
   0x5   : > { %p247_p2 = scmp.lt.s32.totalorder %s1202_s22, 33 }
   0x6   : > { %s1408_s23 = smov (%p25_p0, %s24_s23), 0  ;;  %s1410_s24 = smov (!%p25_p0, %s27_s24), %s1198_s21 }
   0x7   : > { %p248_p3 = pnand %p1019_p1, %p247_p2  ;;  %p29_p4 = scmp.ge.s32.totalorder %s1410_s24, 2 }
   0x8   : > { %v1026_v0 = vld [vmem:[%s1400_s3 + $0x4] sm:$0xf] (!%p248_p3)  ;;  %vm369_vm0 = vcmask (!%p248_p3), 1043456   ;;  %v349_v1 = vld [vmem:[%s1400_s3] sm:$0xf] (!%p248_p3)  ;;  %v1204_v2 = vmov (!%p248_p3), 0.0  }
   0x9   : > { %s1412_s24 = smov (%p29_p4, %s1410_s24), 0  ;;  %251 = sbr.rel (%p248_p3) target bundleno = 287 (0x11f), region = 40 }
   0xa   : > { %1064 = vmatprep.subr.bf16.mxu0 (!%p248_p3), %v1204_v2  ;;  %v371_v3 = vsel (!%p248_p3), %vm369_vm0, %v1026_v0, 0  ;;  %1070 = vmatprep.subr.bf16.mxu1 (!%p248_p3), %v1204_v2  ;;  %v417_v4 = vsel (!%p248_p3), %vm369_vm0, %v349_v1, 0  ;;  %p303_p5 = scmp.lt.s32.totalorder (!%p248_p3), %s1190_s19, 1  ;;  %p305_p6 = scmp.lt.s32.totalorder (!%p248_p3), %s1186_s18, 17  ;;  %vm1205_vm1 = vmmov (!%p248_p3), 0   ;;  %vm365_vm2 = vcmask (!%p248_p3), 64512  }
   0xb   : > { %1065 = vmatpush3.bf16.msra.mxu0 (!%p248_p3), %v371_v3  ;;  %1071 = vmatpush3.bf16.msra.mxu1 (!%p248_p3), %v417_v4  ;;  %s312_s6 = sadd.s32 (!%p248_p3), 1, %s1186_s18  ;;  %s323_s8 = sadd.s32 (!%p248_p3), 2, %s1186_s18  ;;  %v1031_v5 = vld [vmem:[%s1400_s3 + $0xc] sm:$0xf] (!%p248_p3)  ;;  %v1029_v17 = vld [vmem:[%s1400_s3 + $0x8] sm:$0xf] (!%p248_p3) }
   0xc   : > { %1066 = vmatprep.mubr.msk.bf16.mxu0 (!%p248_p3), %vm1205_vm1, %v1204_v2  ;;  %1072 = vmatprep.mubr.msk.bf16.mxu1 (!%p248_p3), %vm1205_vm1, %v1204_v2  ;;  %p315_p7 = scmp.lt.s32.totalorder (!%p248_p3), %s312_s6, 17  ;;  %p326_p8 = scmp.lt.s32.totalorder (!%p248_p3), %s323_s8, 17  ;;  %v528_v11 = vsel (!%p248_p3), %vm369_vm0, %v1031_v5, 0  ;;  %vm352_vm3 = vsmask.f32 (!%p248_p3), 7424  ;;  %v472_v22 = vsel (!%p248_p3), %vm369_vm0, %v1029_v17, 0 }
   0xd   : > { %1076 = vmatprep.subr.bf16.mxu0 (!%p248_p3), %v1204_v2  ;;  %1082 = vmatprep.subr.bf16.mxu1 (!%p248_p3), %v1204_v2  ;;  %v1035_v21 = vld [vmem:[%s1400_s3 + $0x14] sm:$0xf] (!%p248_p3)  ;;  %vm464_vm4 = vcmask (!%p248_p3), 1046528   ;;  %v1033_v35 = vld [vmem:[%s1400_s3 + $0x10] sm:$0xf] (!%p248_p3)  ;;  %p336_p9 = scmp.lt.s32.totalorder (!%p248_p3), %s1186_s18, 15 }
   0xe   : > { %v646_v29 = vsel (!%p248_p3), %vm369_vm0, %v1035_v21, 0  ;;  %v1039_v44 = vld [vmem:[%s1400_s3 + $0x1c] sm:$0xf] (!%p248_p3)  ;;  %v590_v45 = vsel (!%p248_p3), %vm369_vm0, %v1033_v35, 0  ;;  %v1037_v53 = vld [vmem:[%s1400_s3 + $0x18] sm:$0xf] (!%p248_p3) }
   0xf   : > { %v764_v50 = vsel (!%p248_p3), %vm369_vm0, %v1039_v44, 0  ;;  %v702_v57 = vsel (!%p248_p3), %vm369_vm0, %v1037_v53, 0  ;;  %v1041_v59 = vld [vmem:[%s1400_s3 + $0x20] sm:$0xf] (!%p248_p3) }
  0x10   : > { %s1414_s19 = smov (!%p303_p5, %s1190_s19), 1  ;;  %s1416_s6 = smov (!%p315_p7, %s312_s6), 17  ;;  %v820_v60 = vsel %vm369_vm0, %v1041_v59, 0 }
  0x11   : > { %s306_s29 = scalar_select %p305_p6, %s1186_s18, 17 }
  0x12   : > { %s1293_s30 = smul.u32 54, %s1414_s19  ;;  %s1418_s8 = smov (!%p326_p8, %s323_s8), 17 }
  0x13   : > { %s1118_s7 = smul.u32 3, %s306_s29  ;;  %s1420_s18 = smov (!%p336_p9, %s1186_s18), 15 }
  0x14   : > { %s1120_s16 = smul.u32 3, %s1416_s6  ;;  %s1024_s6 = sshll.u32 %s1414_s19, 5 }
  0x15   : > { %s309_s9 = sadd.s32 %s1293_s30, %s1118_s7  ;;  %s1121_s17 = smul.u32 3, %s1418_s8 }
  0x16   : > { %s1020_s10 = sshll.u32 %s309_s9, 3  ;;  %s319_s25 = sadd.s32 %s1120_s16, %s1293_s30 }
  0x17   : > { %s311_s15 = scalar_lea.vmem %s1397_s0, %s1020_s10  ;;  %s1021_s28 = sshll.u32 %s319_s25, 3 }
  0x18   : > { %v344_v6 = vld [vmem:[%s311_s15] sm:$0xff]  ;;  %v345_v7 = vld [vmem:[%s311_s15 + $0x8] sm:$0xff]  ;;  %v346_v8 = vld [vmem:[%s311_s15 + $0x10] sm:$0x3]  ;;  %s330_s29 = sadd.s32 %s1121_s17, %s1293_s30  ;;  %s321_s8 = scalar_lea.vmem %s1398_s1, %s1021_s28 }
  0x19   : > { %v347_v9 = vpack.c.bf16 %v345_v7, %v344_v6  ;;  %v348_v10 = vpack.c.bf16 %v346_v8, %v346_v8  ;;  %s1022_s9 = sshll.u32 %s330_s29, 3  ;;  %v517_v19 = vld [vmem:[%s321_s8] sm:$0xff]  ;;  %v518_v20 = vld [vmem:[%s321_s8 + $0x8] sm:$0xff]  ;;  %v519_v24 = vld [vmem:[%s321_s8 + $0x10] sm:$0x3]  ;;  %s1023_s29 = sshll.u32 %s1420_s18, 1 }
  0x1a   : > { %s332_s14 = scalar_lea.vmem %s1399_s2, %s1022_s9  ;;  %v520_v23 = vpack.c.bf16 %v518_v20, %v517_v19  ;;  %v521_v33 = vpack.c.bf16 %v519_v24, %v519_v24  ;;  %s340_s7 = sadd.s32 %s1024_s6, %s1023_s29 }
  0x1b   : > { %v354_v12 = vshrl.u32 %v347_v9, 16  ;;  %v356_v13 = vshll.u32 %v347_v9, 16  ;;  %v361_v14 = vshll.u32 %v348_v10, 16  ;;  %1073 = vmatmul.mubr.msk.bf16.vlgmr.msra.gmra.mrb[0].mxu1 %vm365_vm2, %v347_v9  ;;  %v691_v25 = vld [vmem:[%s332_s14] sm:$0xff]  ;;  %v692_v26 = vld [vmem:[%s332_s14 + $0x8] sm:$0xff]  ;;  %v465_v31 = vrot.slane %v347_v9, 1 }
  0x1c   : > { %1083 = vmatpush3.bf16.msra.mxu1 %v528_v11  ;;  %1084 = vmatprep.mubr.msk.bf16.mxu1 %vm1205_vm1, %v1204_v2  ;;  %v694_v28 = vpack.c.bf16 %v692_v26, %v691_v25  ;;  %v693_v30 = vld [vmem:[%s332_s14 + $0x10] sm:$0x3]  ;;  %v466_v32 = vrot.slane %v348_v10, 1  ;;  %v577_v34 = vshll.u32 %v520_v23, 16  ;;  %v639_v36 = vrot.slane %v520_v23, 1  ;;  %s1025_s10 = sshll.u32 %s340_s7, 3 }
  0x1d   : > { %v358_v15 = vrot.slane %v356_v13, 1  ;;  %v363_v16 = vrot.slane %v361_v14, 1  ;;  %1094 = vmatprep.subr.bf16.mxu1 %v1204_v2  ;;  %v640_v37 = vrot.slane %v521_v33, 1  ;;  %v695_v38 = vpack.c.bf16 %v693_v30, %v693_v30  ;;  %s342_s13 = scalar_lea.vmem %s1402_s5, %s1025_s10 }
  0x1e   : > { %v751_v39 = vshll.u32 %v694_v28, 16  ;;  %v467_v40 = vsel %vm464_vm4, %v465_v31, %v466_v32  ;;  %v575_v41 = vshrl.u32 %v520_v23, 16  ;;  %v579_v42 = vrot.slane %v577_v34, 1 }
  0x1f   : > { %v359_v18 = vor.u32 %v358_v15, %v354_v12  ;;  %v582_v43 = vshll.u32 %v521_v33, 16  ;;  %v641_v46 = vsel %vm464_vm4, %v639_v36, %v640_v37  ;;  %v749_v47 = vshrl.u32 %v694_v28, 16 }
  0x20   : > { %v753_v48 = vrot.slane %v751_v39, 1  ;;  %v756_v49 = vshll.u32 %v695_v38, 16  ;;  %v580_v51 = vor.u32 %v579_v42, %v575_v41  ;;  %v813_v61 = vrot.slane %v694_v28, 1 }
  0x21   : > { %v364_v27 = vsel %vm352_vm3, %v359_v18, %v363_v16  ;;  %v584_v52 = vrot.slane %v582_v43, 1  ;;  %v814_v62 = vrot.slane %v695_v38, 1 }
  0x22   : > { %1067 = vmatmul.mubr.msk.bf16.vlgmr.msra.gmra.mrb[0].mxu0 %vm365_vm2, %v364_v27  ;;  %v754_v54 = vor.u32 %v753_v48, %v749_v47  ;;  %v758_v55 = vrot.slane %v756_v49, 1  ;;  %v1043_v47 = vld [vmem:[%s1401_s4] ss:$0 sm:$0xff] }
  0x23   : > { %1077 = vmatpush3.bf16.msra.mxu0 %v472_v22  ;;  %1078 = vmatprep.mubr.msk.bf16.mxu0 %vm1205_vm1, %v1204_v2  ;;  %v585_v56 = vsel %vm352_vm3, %v580_v51, %v584_v52  ;;  %v815_v63 = vsel %vm464_vm4, %v813_v61, %v814_v62 }
  0x24   : > { %1088 = vmatprep.subr.bf16.mxu0 %v1204_v2  ;;  %1085 = vmatmul.mubr.msk.bf16.vlgmr.msra.gmra.mrb[4].mxu1 %vm365_vm2, %v520_v23  ;;  %v759_v58 = vsel %vm352_vm3, %v754_v54, %v758_v55 }
  0x25   : > { %1095 = vmatpush3.bf16.msra.mxu1 %v646_v29  ;;  %1096 = vmatprep.mubr.msk.bf16.mxu1 %vm1205_vm1, %v1204_v2 }
  0x26   : > { %1106 = vmatprep.subr.bf16.mxu1 %v1204_v2 }
  0x2a   : > { %1079 = vmatmul.mubr.msk.bf16.vlgmr.msra.gmra.mrb[4].mxu0 %vm365_vm2, %v467_v40 }
  0x2b   : > { %1089 = vmatpush3.bf16.msra.mxu0 %v590_v45  ;;  %1090 = vmatprep.mubr.msk.bf16.mxu0 %vm1205_vm1, %v1204_v2 }
  0x2c   : > { %1100 = vmatprep.subr.bf16.mxu0 %v1204_v2  ;;  %1097 = vmatmul.mubr.msk.bf16.vlgmr.msra.gmra.mrb[8].mxu1 %vm365_vm2, %v641_v46 }
  0x2d   : > { %1107 = vmatpush3.bf16.msra.mxu1 %v764_v50  ;;  %1108 = vmatprep.mubr.msk.bf16.mxu1 %vm1205_vm1, %v1204_v2 }
  0x32   : > { %1091 = vmatmul.mubr.msk.bf16.vlgmr.msra.gmra.mrb[8].mxu0 %vm365_vm2, %v585_v56 }
  0x33   : > { %1101 = vmatpush3.bf16.msra.mxu0 %v702_v57  ;;  %1102 = vmatprep.mubr.msk.bf16.mxu0 %vm1205_vm1, %v1204_v2 }
  0x34   : > { %1112 = vmatprep.subr.bf16.mxu0 %v1204_v2  ;;  %1109 = vmatmul.mubr.msk.bf16.vlgmr.msra.gmra.mrb[12].mxu1 %vm365_vm2, %v759_v58 }
  0x3a   : > { %1103 = vmatmul.mubr.msk.bf16.vlgmr.msra.gmra.mrb[12].mxu0 %vm365_vm2, %v694_v28 }
  0x3b   : > { %1113 = vmatpush3.bf16.msra.mxu0 %v820_v60  ;;  %1114 = vmatprep.mubr.msk.bf16.mxu0 %vm1205_vm1, %v1204_v2 }
  0x42   : > { %1115 = vmatmul.mubr.msk.bf16.vlgmr.msra.gmra.mrb[16].mxu0 %vm365_vm2, %v815_v63 }
  0xee   : > { %v453_v0 = vpop.f32.mrb[0].mxu1 }
  0xef   : > { %v1074_v1 = vpop.f32.mrb[1].mxu1 }
  0xf0   : > { %v456_v3 = vpop.f32.mrb[2].mxu1 }
  0xf1   : > { %v1075_v4 = vpop.f32.mrb[3].mxu1 }
  0xf5   : > { %v407_v5 = vpop.f32.mrb[0].mxu0 }
  0xf6   : > { %v454_v6 = vadd.f32 %v453_v0, %v407_v5  ;;  %v1068_v7 = vpop.f32.mrb[1].mxu0 }
  0xf7   : > { %v410_v8 = vpop.f32.mrb[2].mxu0  ;;  %v564_v9 = vpop.f32.mrb[4].mxu1 }
  0xf8   : > { %v457_v10 = vadd.f32 %v456_v3, %v410_v8  ;;  %v1069_v11 = vpop.f32.mrb[3].mxu0  ;;  %v1086_v12 = vpop.f32.mrb[5].mxu1 }
  0xf9   : > { %v567_v13 = vpop.f32.mrb[6].mxu1 }
  0xfa   : > { %v1087_v2 = vpop.f32.mrb[7].mxu1 }
  0xfd   : > { %v508_v14 = vpop.f32.mrb[4].mxu0 }
  0xfe   : > { %v515_v15 = vadd.f32 %v508_v14, %v454_v6  ;;  %v1080_v16 = vpop.f32.mrb[5].mxu0 }
  0xff   : > { %v511_v17 = vpop.f32.mrb[6].mxu0  ;;  %v682_v18 = vpop.f32.mrb[8].mxu1 }
 0x100   : > { %v516_v19 = vadd.f32 %v511_v17, %v457_v10  ;;  %v571_v20 = vadd.f32 %v564_v9, %v515_v15  ;;  %v1081_v21 = vpop.f32.mrb[7].mxu0  ;;  %v1098_v22 = vpop.f32.mrb[9].mxu1 }
 0x101   : > { %v685_v23 = vpop.f32.mrb[10].mxu1 }
 0x102   : > { %v572_v24 = vadd.f32 %v567_v13, %v516_v19  ;;  %v1099_v25 = vpop.f32.mrb[11].mxu1 }
 0x105   : > { %v626_v26 = vpop.f32.mrb[8].mxu0 }
 0x106   : > { %v633_v27 = vadd.f32 %v626_v26, %v571_v20  ;;  %v1092_v28 = vpop.f32.mrb[9].mxu0 }
 0x107   : > { %v629_v29 = vpop.f32.mrb[10].mxu0  ;;  %v800_v30 = vpop.f32.mrb[12].mxu1 }
 0x108   : > { %v634_v31 = vadd.f32 %v629_v29, %v572_v24  ;;  %v689_v32 = vadd.f32 %v682_v18, %v633_v27  ;;  %v1093_v33 = vpop.f32.mrb[11].mxu0  ;;  %v1110_v34 = vpop.f32.mrb[13].mxu1 }
 0x109   : > { %v803_v35 = vpop.f32.mrb[14].mxu1 }
 0x10a   : > { %v690_v36 = vadd.f32 %v685_v23, %v634_v31  ;;  %v1111_v37 = vpop.f32.mrb[15].mxu1 }
 0x10d   : > { %v738_v38 = vpop.f32.mrb[12].mxu0 }
 0x10e   : > { %v745_v39 = vadd.f32 %v738_v38, %v689_v32  ;;  %v1104_v40 = vpop.f32.mrb[13].mxu0 }
 0x10f   : > { %v741_v41 = vpop.f32.mrb[14].mxu0 }
 0x110   : > { %v746_v42 = vadd.f32 %v741_v41, %v690_v36  ;;  %v807_v43 = vadd.f32 %v800_v30, %v745_v39  ;;  %v1105_v44 = vpop.f32.mrb[15].mxu0 }
 0x112   : > { %v808_v45 = vadd.f32 %v803_v35, %v746_v42 }
 0x115   : > { %v856_v46 = vpop.f32.mrb[16].mxu0 }
 0x116   : > { %v863_v48 = vadd.f32 %v856_v46, %v807_v43  ;;  %v1116_v49 = vpop.f32.mrb[17].mxu0 }
 0x117   : > { %v859_v50 = vpop.f32.mrb[18].mxu0 }
 0x118   : > { %v872_v51 = vadd.f32 %v1043_v47, %v863_v48  ;;  %v864_v52 = vadd.f32 %v859_v50, %v808_v45  ;;  %v1117_v53 = vpop.f32.mrb[19].mxu0 }
 0x11a   : > { %v874_v54 = vmax.f32 %v872_v51, 0.0  ;;  %v873_v55 = vadd.f32 %v1043_v47, %v864_v52 }
 0x11c   : > { %876 = vst.msk [vmem:[%s342_s13] sm:$0xff] %vm365_vm2, %v874_v54  ;;  %v875_v56 = vmax.f32 %v873_v55, 0.0 }
 0x11e   : > { %877 = vst.msk [vmem:[%s342_s13 + $0x8] sm:$0xff] %vm365_vm2, %v875_v56 }
 0x11f PF: > { %s15_s22 = sadd.s32 1, %s1202_s22   ;;  %s1403_s18 = smov %s1194_s20 }
 0x120   : > { %p12_p10 = scmp.ge.s32.totalorder %s15_s22, 34   ;;  %s1404_s19 = smov %s1198_s21 }
 0x121   : > { %s1405_s20 = smov %s1408_s23  ;;  %s1406_s21 = smov %s1412_s24 }
 0x122   :  { %14 = sbr.rel (!%p12_p10) target bundleno = 3 (0x3), region = 84 }

// kernel: c2former_forward.35
= control target key start
LH: loop header
LB: loop body
LE: loop exit
PB: predicated region body
PF: predicated region fallthrough
CT: control target
= control target key end

     0   :  { %vm217_vm0 = vcmask 1043456   ;;  %vm120_vm1 = vcmask 64512   ;;  %vm510_vm2 = vcmask 130048   ;;  %s1287_s1 = inlined_call_operand.vmem [shape: f32[8,16], index: 1, kind: input, shape index: {}]   ;;  %s1288_s0 = inlined_call_operand.vmem [shape: f32[512,8], index: 0, kind: input, shape index: {}]   ;;  %s1289_s2 = inlined_call_operand.vmem [shape: f32[1,16], index: 2, kind: input, shape index: {}]   ;;  %s1290_s3 = inlined_call_operand.vmem [shape: f32[512,16], index: 3, kind: output, shape index: {}]  }
   0x1   :  { %v111_v0 = vld [vmem:[%s1287_s1] sm:$0xff]  ;;  %v16_v2 = vld [vmem:[%s1288_s0 + $0x8] sm:$0xff]  ;;  %v17_v7 = vld [vmem:[%s1288_s0 + $0x10] sm:$0xff] }
   0x2   :  { %v15_v1 = vld [vmem:[%s1288_s0] sm:$0xff]  ;;  %v112_v3 = vpack.c.bf16 %v111_v0, %v111_v0  ;;  %v48_v6 = vld [vmem:[%s1288_s0 + $0x108] sm:$0xff]  ;;  %v18_v9 = vld [vmem:[%s1288_s0 + $0x18] sm:$0xff] }
   0x3   :  { %v79_v4 = vpack.c.bf16 %v16_v2, %v15_v1  ;;  %v47_v5 = vld [vmem:[%s1288_s0 + $0x100] sm:$0xff]  ;;  %v49_v10 = vld [vmem:[%s1288_s0 + $0x110] sm:$0xff]  ;;  %v50_v11 = vld [vmem:[%s1288_s0 + $0x118] sm:$0xff]  ;;  %v80_v13 = vpack.c.bf16 %v18_v9, %v17_v7 }
   0x4   :  { %v95_v8 = vpack.c.bf16 %v48_v6, %v47_v5  ;;  %713 = vmatprep.subr.msk.bf16.mxu0 %vm217_vm0, %v112_v3  ;;  %714 = vmatprep.subr.msk.bf16.mxu1 %vm217_vm0, %v112_v3  ;;  %v219_v12 = vsel %vm217_vm0, %v112_v3, 0  ;;  %v96_v14 = vpack.c.bf16 %v50_v11, %v49_v10  ;;  %v19_v15 = vld [vmem:[%s1288_s0 + $0x20] sm:$0xff]  ;;  %v20_v16 = vld [vmem:[%s1288_s0 + $0x28] sm:$0xff]  ;;  %v21_v21 = vld [vmem:[%s1288_s0 + $0x30] sm:$0xff] }
   0x5   :  { %v51_v17 = vld [vmem:[%s1288_s0 + $0x120] sm:$0xff]  ;;  %646 = vmatpush3.bf16.msra.mxu0 %v219_v12  ;;  %712 = vmatpush3.bf16.msra.mxu1 %v219_v12  ;;  %v81_v18 = vpack.c.bf16 %v20_v16, %v19_v15  ;;  %v52_v19 = vld [vmem:[%s1288_s0 + $0x128] sm:$0xff]  ;;  %v22_v22 = vld [vmem:[%s1288_s0 + $0x38] sm:$0xff] }
   0x6   :  { %647 = vmatprep.mubr.msk.bf16.mxu0 %vm120_vm1, %v79_v4  ;;  %679 = vmatprep.mubr.msk.bf16.mxu1 %vm120_vm1, %v95_v8  ;;  %v97_v20 = vpack.c.bf16 %v52_v19, %v51_v17  ;;  %v53_v23 = vld [vmem:[%s1288_s0 + $0x130] sm:$0xff]  ;;  %v54_v24 = vld [vmem:[%s1288_s0 + $0x138] sm:$0xff]  ;;  %v23_v25 = vld [vmem:[%s1288_s0 + $0x40] sm:$0xff]  ;;  %v82_v29 = vpack.c.bf16 %v22_v22, %v21_v21 }
   0x7   :  { %v24_v26 = vld [vmem:[%s1288_s0 + $0x48] sm:$0xff]  ;;  %v55_v27 = vld [vmem:[%s1288_s0 + $0x140] sm:$0xff]  ;;  %v98_v30 = vpack.c.bf16 %v54_v24, %v53_v23  ;;  %v25_v33 = vld [vmem:[%s1288_s0 + $0x50] sm:$0xff] }
   0x8   :  { %648 = vmatmul.mubr.msk.bf16.vlgmr.msra.gmra.mrb[0].mxu0 %vm120_vm1, %v80_v13  ;;  %680 = vmatmul.mubr.msk.bf16.vlgmr.msra.gmra.mrb[0].mxu1 %vm120_vm1, %v96_v14  ;;  %v56_v28 = vld [vmem:[%s1288_s0 + $0x148] sm:$0xff]  ;;  %v83_v31 = vpack.c.bf16 %v24_v26, %v23_v25  ;;  %v26_v34 = vld [vmem:[%s1288_s0 + $0x58] sm:$0xff]  ;;  %v57_v35 = vld [vmem:[%s1288_s0 + $0x150] sm:$0xff] }
   0x9   :  { %651 = vmatprep.mubr.msk.bf16.mxu0 %vm120_vm1, %v81_v18  ;;  %683 = vmatprep.mubr.msk.bf16.mxu1 %vm120_vm1, %v97_v20  ;;  %v99_v32 = vpack.c.bf16 %v56_v28, %v55_v27  ;;  %v58_v36 = vld [vmem:[%s1288_s0 + $0x158] sm:$0xff]  ;;  %v27_v37 = vld [vmem:[%s1288_s0 + $0x60] sm:$0xff]  ;;  %v28_v38 = vld [vmem:[%s1288_s0 + $0x68] sm:$0xff]  ;;  %v84_v41 = vpack.c.bf16 %v26_v34, %v25_v33 }
   0xa   :  { %v59_v39 = vld [vmem:[%s1288_s0 + $0x160] sm:$0xff]  ;;  %v60_v40 = vld [vmem:[%s1288_s0 + $0x168] sm:$0xff]  ;;  %v100_v42 = vpack.c.bf16 %v58_v36, %v57_v35  ;;  %v85_v43 = vpack.c.bf16 %v28_v38, %v27_v37  ;;  %v29_v45 = vld [vmem:[%s1288_s0 + $0x70] sm:$0xff] }
   0xb   :  { %v101_v44 = vpack.c.bf16 %v60_v40, %v59_v39  ;;  %v30_v46 = vld [vmem:[%s1288_s0 + $0x78] sm:$0xff]  ;;  %v61_v47 = vld [vmem:[%s1288_s0 + $0x170] sm:$0xff]  ;;  %v31_v49 = vld [vmem:[%s1288_s0 + $0x80] sm:$0xff] }
   0xc   :  { %v62_v48 = vld [vmem:[%s1288_s0 + $0x178] sm:$0xff]  ;;  %v32_v50 = vld [vmem:[%s1288_s0 + $0x88] sm:$0xff]  ;;  %v63_v51 = vld [vmem:[%s1288_s0 + $0x180] sm:$0xff]  ;;  %v86_v53 = vpack.c.bf16 %v30_v46, %v29_v45 }
   0xd   :  { %v64_v52 = vld [vmem:[%s1288_s0 + $0x188] sm:$0xff]  ;;  %v102_v54 = vpack.c.bf16 %v62_v48, %v61_v47  ;;  %v87_v55 = vpack.c.bf16 %v32_v50, %v31_v49  ;;  %v33_v57 = vld [vmem:[%s1288_s0 + $0x90] sm:$0xff]  ;;  %v34_v58 = vld [vmem:[%s1288_s0 + $0x98] sm:$0xff] }
   0xe   :  { %v103_v56 = vpack.c.bf16 %v64_v52, %v63_v51  ;;  %v65_v59 = vld [vmem:[%s1288_s0 + $0x190] sm:$0xff]  ;;  %v66_v60 = vld [vmem:[%s1288_s0 + $0x198] sm:$0xff]  ;;  %v35_v61 = vld [vmem:[%s1288_s0 + $0xa0] sm:$0xff]  ;;  %v88_v1 = vpack.c.bf16 %v34_v58, %v33_v57 }
   0xf   :  { %v36_v62 = vld [vmem:[%s1288_s0 + $0xa8] sm:$0xff]  ;;  %v67_v63 = vld [vmem:[%s1288_s0 + $0x1a0] sm:$0xff]  ;;  %v104_v2 = vpack.c.bf16 %v66_v60, %v65_v59  ;;  %v37_v5 = vld [vmem:[%s1288_s0 + $0xb0] sm:$0xff] }
  0x10   :  { %652 = vmatmul.mubr.msk.bf16.gmra.mrb[4].mxu0 %vm120_vm1, %v82_v29  ;;  %684 = vmatmul.mubr.msk.bf16.gmra.mrb[4].mxu1 %vm120_vm1, %v98_v30  ;;  %v68_v0 = vld [vmem:[%s1288_s0 + $0x1a8] sm:$0xff]  ;;  %v89_v3 = vpack.c.bf16 %v36_v62, %v35_v61  ;;  %v38_v6 = vld [vmem:[%s1288_s0 + $0xb8] sm:$0xff]  ;;  %v69_v7 = vld [vmem:[%s1288_s0 + $0x1b0] sm:$0xff] }
  0x11   :  { %655 = vmatprep.mubr.msk.bf16.mxu0 %vm120_vm1, %v83_v31  ;;  %687 = vmatprep.mubr.msk.bf16.mxu1 %vm120_vm1, %v99_v32  ;;  %v105_v4 = vpack.c.bf16 %v68_v0, %v67_v63  ;;  %v70_v8 = vld [vmem:[%s1288_s0 + $0x1b8] sm:$0xff]  ;;  %v39_v9 = vld [vmem:[%s1288_s0 + $0xc0] sm:$0xff]  ;;  %v40_v10 = vld [vmem:[%s1288_s0 + $0xc8] sm:$0xff]  ;;  %v90_v13 = vpack.c.bf16 %v38_v6, %v37_v5 }
  0x12   :  { %v71_v11 = vld [vmem:[%s1288_s0 + $0x1c0] sm:$0xff]  ;;  %v72_v12 = vld [vmem:[%s1288_s0 + $0x1c8] sm:$0xff]  ;;  %v106_v14 = vpack.c.bf16 %v70_v8, %v69_v7  ;;  %v91_v15 = vpack.c.bf16 %v40_v10, %v39_v9  ;;  %v41_v17 = vld [vmem:[%s1288_s0 + $0xd0] sm:$0xff] }
  0x13   :  { %v107_v16 = vpack.c.bf16 %v72_v12, %v71_v11  ;;  %v42_v18 = vld [vmem:[%s1288_s0 + $0xd8] sm:$0xff]  ;;  %v73_v19 = vld [vmem:[%s1288_s0 + $0x1d0] sm:$0xff]  ;;  %v43_v21 = vld [vmem:[%s1288_s0 + $0xe0] sm:$0xff] }
  0x14   :  { %v74_v20 = vld [vmem:[%s1288_s0 + $0x1d8] sm:$0xff]  ;;  %v44_v22 = vld [vmem:[%s1288_s0 + $0xe8] sm:$0xff]  ;;  %v75_v23 = vld [vmem:[%s1288_s0 + $0x1e0] sm:$0xff]  ;;  %v92_v25 = vpack.c.bf16 %v42_v18, %v41_v17 }
  0x15   :  { %v76_v24 = vld [vmem:[%s1288_s0 + $0x1e8] sm:$0xff]  ;;  %v108_v26 = vpack.c.bf16 %v74_v20, %v73_v19  ;;  %v93_v27 = vpack.c.bf16 %v44_v22, %v43_v21  ;;  %v45_v29 = vld [vmem:[%s1288_s0 + $0xf0] sm:$0xff]  ;;  %v46_v30 = vld [vmem:[%s1288_s0 + $0xf8] sm:$0xff] }
  0x16   :  { %v109_v28 = vpack.c.bf16 %v76_v24, %v75_v23  ;;  %v77_v31 = vld [vmem:[%s1288_s0 + $0x1f0] sm:$0xff]  ;;  %v78_v32 = vld [vmem:[%s1288_s0 + $0x1f8] sm:$0xff]  ;;  %v94_v33 = vpack.c.bf16 %v46_v30, %v45_v29  ;;  %v965_v35 = vld [vmem:[%s1289_s2] ss:$0 sm:$0xff] }
  0x17   :  { %v110_v34 = vpack.c.bf16 %v78_v32, %v77_v31 }
  0x18   :  { %656 = vmatmul.mubr.msk.bf16.gmra.mrb[8].mxu0 %vm120_vm1, %v84_v41  ;;  %688 = vmatmul.mubr.msk.bf16.gmra.mrb[8].mxu1 %vm120_vm1, %v100_v42 }
  0x19   :  { %659 = vmatprep.mubr.msk.bf16.mxu0 %vm120_vm1, %v85_v43  ;;  %691 = vmatprep.mubr.msk.bf16.mxu1 %vm120_vm1, %v101_v44 }
  0x20   :  { %660 = vmatmul.mubr.msk.bf16.gmra.mrb[12].mxu0 %vm120_vm1, %v86_v53  ;;  %692 = vmatmul.mubr.msk.bf16.gmra.mrb[12].mxu1 %vm120_vm1, %v102_v54 }
  0x21   :  { %663 = vmatprep.mubr.msk.bf16.mxu0 %vm120_vm1, %v87_v55  ;;  %695 = vmatprep.mubr.msk.bf16.mxu1 %vm120_vm1, %v103_v56 }
  0x28   :  { %664 = vmatmul.mubr.msk.bf16.gmra.mrb[16].mxu0 %vm120_vm1, %v88_v1  ;;  %696 = vmatmul.mubr.msk.bf16.gmra.mrb[16].mxu1 %vm120_vm1, %v104_v2 }
  0x29   :  { %667 = vmatprep.mubr.msk.bf16.mxu0 %vm120_vm1, %v89_v3  ;;  %699 = vmatprep.mubr.msk.bf16.mxu1 %vm120_vm1, %v105_v4 }
  0x30   :  { %668 = vmatmul.mubr.msk.bf16.gmra.mrb[20].mxu0 %vm120_vm1, %v90_v13  ;;  %700 = vmatmul.mubr.msk.bf16.gmra.mrb[20].mxu1 %vm120_vm1, %v106_v14 }
  0x31   :  { %671 = vmatprep.mubr.msk.bf16.mxu0 %vm120_vm1, %v91_v15  ;;  %703 = vmatprep.mubr.msk.bf16.mxu1 %vm120_vm1, %v107_v16 }
  0x38   :  { %672 = vmatmul.mubr.msk.bf16.gmra.mrb[24].mxu0 %vm120_vm1, %v92_v25  ;;  %704 = vmatmul.mubr.msk.bf16.gmra.mrb[24].mxu1 %vm120_vm1, %v108_v26 }
  0x39   :  { %675 = vmatprep.mubr.msk.bf16.mxu0 %vm120_vm1, %v93_v27  ;;  %707 = vmatprep.mubr.msk.bf16.mxu1 %vm120_vm1, %v109_v28 }
  0x40   :  { %676 = vmatmul.mubr.msk.bf16.gmra.mrb[28].mxu0 %vm120_vm1, %v94_v33  ;;  %708 = vmatmul.mubr.msk.bf16.gmra.mrb[28].mxu1 %vm120_vm1, %v110_v34 }
  0xdb   :  { %v649_v36 = vpop.f32.mrb[0].mxu0  ;;  %v681_v37 = vpop.f32.mrb[0].mxu1 }
  0xdc   :  { %v264_v38 = vadd.f32 %v649_v36, %v965_v35  ;;  %v392_v39 = vadd.f32 %v681_v37, %v965_v35  ;;  %v255_v40 = vpop.f32.mrb[1].mxu0  ;;  %v383_v41 = vpop.f32.mrb[1].mxu1 }
  0xdd   :  { %v256_v42 = vadd.f32 %v965_v35, %v255_v40  ;;  %v384_v43 = vadd.f32 %v965_v35, %v383_v41  ;;  %v650_v44 = vpop.f32.mrb[2].mxu0  ;;  %v682_v45 = vpop.f32.mrb[2].mxu1 }
  0xde   :  { %513 = vst.msk [vmem:[%s1290_s3 + $0x10] sm:$0xff] %vm510_vm2, %v264_v38  ;;  %545 = vst.msk [vmem:[%s1290_s3 + $0x110] sm:$0xff] %vm510_vm2, %v392_v39  ;;  %v267_v46 = vadd.f32 %v650_v44, %v965_v35  ;;  %v395_v47 = vadd.f32 %v682_v45, %v965_v35  ;;  %v258_v48 = vpop.f32.mrb[3].mxu0  ;;  %v386_v49 = vpop.f32.mrb[3].mxu1 }
  0xdf   :  { %511 = vst.msk [vmem:[%s1290_s3] sm:$0xff] %vm510_vm2, %v256_v42  ;;  %543 = vst.msk [vmem:[%s1290_s3 + $0x100] sm:$0xff] %vm510_vm2, %v384_v43  ;;  %v259_v50 = vadd.f32 %v965_v35, %v258_v48  ;;  %v387_v51 = vadd.f32 %v965_v35, %v386_v49 }
  0xe0   :  { %514 = vst.msk [vmem:[%s1290_s3 + $0x18] sm:$0xff] %vm510_vm2, %v267_v46  ;;  %546 = vst.msk [vmem:[%s1290_s3 + $0x118] sm:$0xff] %vm510_vm2, %v395_v47 }
  0xe1   :  { %512 = vst.msk [vmem:[%s1290_s3 + $0x8] sm:$0xff] %vm510_vm2, %v259_v50  ;;  %544 = vst.msk [vmem:[%s1290_s3 + $0x108] sm:$0xff] %vm510_vm2, %v387_v51 }
  0xe3   :  { %v653_v52 = vpop.f32.mrb[4].mxu0  ;;  %v685_v53 = vpop.f32.mrb[4].mxu1 }
  0xe4   :  { %v280_v54 = vadd.f32 %v653_v52, %v965_v35  ;;  %v408_v55 = vadd.f32 %v685_v53, %v965_v35  ;;  %v271_v56 = vpop.f32.mrb[5].mxu0  ;;  %v399_v57 = vpop.f32.mrb[5].mxu1 }
  0xe5   :  { %v272_v58 = vadd.f32 %v965_v35, %v271_v56  ;;  %v400_v59 = vadd.f32 %v965_v35, %v399_v57  ;;  %v654_v60 = vpop.f32.mrb[6].mxu0  ;;  %v686_v61 = vpop.f32.mrb[6].mxu1 }
  0xe6   :  { %517 = vst.msk [vmem:[%s1290_s3 + $0x30] sm:$0xff] %vm510_vm2, %v280_v54  ;;  %549 = vst.msk [vmem:[%s1290_s3 + $0x130] sm:$0xff] %vm510_vm2, %v408_v55  ;;  %v283_v62 = vadd.f32 %v654_v60, %v965_v35  ;;  %v411_v63 = vadd.f32 %v686_v61, %v965_v35  ;;  %v274_v0 = vpop.f32.mrb[7].mxu0  ;;  %v402_v1 = vpop.f32.mrb[7].mxu1 }
  0xe7   :  { %515 = vst.msk [vmem:[%s1290_s3 + $0x20] sm:$0xff] %vm510_vm2, %v272_v58  ;;  %547 = vst.msk [vmem:[%s1290_s3 + $0x120] sm:$0xff] %vm510_vm2, %v400_v59  ;;  %v275_v2 = vadd.f32 %v965_v35, %v274_v0  ;;  %v403_v3 = vadd.f32 %v965_v35, %v402_v1 }
  0xe8   :  { %518 = vst.msk [vmem:[%s1290_s3 + $0x38] sm:$0xff] %vm510_vm2, %v283_v62  ;;  %550 = vst.msk [vmem:[%s1290_s3 + $0x138] sm:$0xff] %vm510_vm2, %v411_v63 }
  0xe9   :  { %516 = vst.msk [vmem:[%s1290_s3 + $0x28] sm:$0xff] %vm510_vm2, %v275_v2  ;;  %548 = vst.msk [vmem:[%s1290_s3 + $0x128] sm:$0xff] %vm510_vm2, %v403_v3 }
  0xeb   :  { %v657_v4 = vpop.f32.mrb[8].mxu0  ;;  %v689_v5 = vpop.f32.mrb[8].mxu1 }
  0xec   :  { %v296_v6 = vadd.f32 %v657_v4, %v965_v35  ;;  %v424_v7 = vadd.f32 %v689_v5, %v965_v35  ;;  %v287_v8 = vpop.f32.mrb[9].mxu0  ;;  %v415_v9 = vpop.f32.mrb[9].mxu1 }
  0xed   :  { %v288_v10 = vadd.f32 %v965_v35, %v287_v8  ;;  %v416_v11 = vadd.f32 %v965_v35, %v415_v9  ;;  %v658_v12 = vpop.f32.mrb[10].mxu0  ;;  %v690_v13 = vpop.f32.mrb[10].mxu1 }
  0xee   :  { %521 = vst.msk [vmem:[%s1290_s3 + $0x50] sm:$0xff] %vm510_vm2, %v296_v6  ;;  %553 = vst.msk [vmem:[%s1290_s3 + $0x150] sm:$0xff] %vm510_vm2, %v424_v7  ;;  %v299_v14 = vadd.f32 %v658_v12, %v965_v35  ;;  %v427_v15 = vadd.f32 %v690_v13, %v965_v35  ;;  %v290_v16 = vpop.f32.mrb[11].mxu0  ;;  %v418_v17 = vpop.f32.mrb[11].mxu1 }
  0xef   :  { %519 = vst.msk [vmem:[%s1290_s3 + $0x40] sm:$0xff] %vm510_vm2, %v288_v10  ;;  %551 = vst.msk [vmem:[%s1290_s3 + $0x140] sm:$0xff] %vm510_vm2, %v416_v11  ;;  %v291_v18 = vadd.f32 %v965_v35, %v290_v16  ;;  %v419_v19 = vadd.f32 %v965_v35, %v418_v17 }
  0xf0   :  { %522 = vst.msk [vmem:[%s1290_s3 + $0x58] sm:$0xff] %vm510_vm2, %v299_v14  ;;  %554 = vst.msk [vmem:[%s1290_s3 + $0x158] sm:$0xff] %vm510_vm2, %v427_v15 }
  0xf1   :  { %520 = vst.msk [vmem:[%s1290_s3 + $0x48] sm:$0xff] %vm510_vm2, %v291_v18  ;;  %552 = vst.msk [vmem:[%s1290_s3 + $0x148] sm:$0xff] %vm510_vm2, %v419_v19 }
  0xf3   :  { %v661_v20 = vpop.f32.mrb[12].mxu0  ;;  %v693_v21 = vpop.f32.mrb[12].mxu1 }
  0xf4   :  { %v312_v22 = vadd.f32 %v661_v20, %v965_v35  ;;  %v440_v23 = vadd.f32 %v693_v21, %v965_v35  ;;  %v303_v24 = vpop.f32.mrb[13].mxu0  ;;  %v431_v25 = vpop.f32.mrb[13].mxu1 }
  0xf5   :  { %v304_v26 = vadd.f32 %v965_v35, %v303_v24  ;;  %v432_v27 = vadd.f32 %v965_v35, %v431_v25  ;;  %v662_v28 = vpop.f32.mrb[14].mxu0  ;;  %v694_v29 = vpop.f32.mrb[14].mxu1 }
  0xf6   :  { %525 = vst.msk [vmem:[%s1290_s3 + $0x70] sm:$0xff] %vm510_vm2, %v312_v22  ;;  %557 = vst.msk [vmem:[%s1290_s3 + $0x170] sm:$0xff] %vm510_vm2, %v440_v23  ;;  %v315_v30 = vadd.f32 %v662_v28, %v965_v35  ;;  %v443_v31 = vadd.f32 %v694_v29, %v965_v35  ;;  %v306_v32 = vpop.f32.mrb[15].mxu0  ;;  %v434_v33 = vpop.f32.mrb[15].mxu1 }
  0xf7   :  { %523 = vst.msk [vmem:[%s1290_s3 + $0x60] sm:$0xff] %vm510_vm2, %v304_v26  ;;  %555 = vst.msk [vmem:[%s1290_s3 + $0x160] sm:$0xff] %vm510_vm2, %v432_v27  ;;  %v307_v34 = vadd.f32 %v965_v35, %v306_v32  ;;  %v435_v36 = vadd.f32 %v965_v35, %v434_v33 }
  0xf8   :  { %526 = vst.msk [vmem:[%s1290_s3 + $0x78] sm:$0xff] %vm510_vm2, %v315_v30  ;;  %558 = vst.msk [vmem:[%s1290_s3 + $0x178] sm:$0xff] %vm510_vm2, %v443_v31 }
  0xf9   :  { %524 = vst.msk [vmem:[%s1290_s3 + $0x68] sm:$0xff] %vm510_vm2, %v307_v34  ;;  %556 = vst.msk [vmem:[%s1290_s3 + $0x168] sm:$0xff] %vm510_vm2, %v435_v36 }
  0xfb   :  { %v665_v37 = vpop.f32.mrb[16].mxu0  ;;  %v697_v38 = vpop.f32.mrb[16].mxu1 }
  0xfc   :  { %v328_v39 = vadd.f32 %v665_v37, %v965_v35  ;;  %v456_v40 = vadd.f32 %v697_v38, %v965_v35  ;;  %v319_v41 = vpop.f32.mrb[17].mxu0  ;;  %v447_v42 = vpop.f32.mrb[17].mxu1 }
  0xfd   :  { %v320_v43 = vadd.f32 %v965_v35, %v319_v41  ;;  %v448_v44 = vadd.f32 %v965_v35, %v447_v42  ;;  %v666_v45 = vpop.f32.mrb[18].mxu0  ;;  %v698_v46 = vpop.f32.mrb[18].mxu1 }
  0xfe   :  { %529 = vst.msk [vmem:[%s1290_s3 + $0x90] sm:$0xff] %vm510_vm2, %v328_v39  ;;  %561 = vst.msk [vmem:[%s1290_s3 + $0x190] sm:$0xff] %vm510_vm2, %v456_v40  ;;  %v331_v47 = vadd.f32 %v666_v45, %v965_v35  ;;  %v459_v48 = vadd.f32 %v698_v46, %v965_v35  ;;  %v322_v49 = vpop.f32.mrb[19].mxu0  ;;  %v450_v50 = vpop.f32.mrb[19].mxu1 }
  0xff   :  { %527 = vst.msk [vmem:[%s1290_s3 + $0x80] sm:$0xff] %vm510_vm2, %v320_v43  ;;  %559 = vst.msk [vmem:[%s1290_s3 + $0x180] sm:$0xff] %vm510_vm2, %v448_v44  ;;  %v323_v51 = vadd.f32 %v965_v35, %v322_v49  ;;  %v451_v52 = vadd.f32 %v965_v35, %v450_v50 }
 0x100   :  { %530 = vst.msk [vmem:[%s1290_s3 + $0x98] sm:$0xff] %vm510_vm2, %v331_v47  ;;  %562 = vst.msk [vmem:[%s1290_s3 + $0x198] sm:$0xff] %vm510_vm2, %v459_v48 }
 0x101   :  { %528 = vst.msk [vmem:[%s1290_s3 + $0x88] sm:$0xff] %vm510_vm2, %v323_v51  ;;  %560 = vst.msk [vmem:[%s1290_s3 + $0x188] sm:$0xff] %vm510_vm2, %v451_v52 }
 0x103   :  { %v669_v53 = vpop.f32.mrb[20].mxu0  ;;  %v701_v54 = vpop.f32.mrb[20].mxu1 }
 0x104   :  { %v344_v55 = vadd.f32 %v669_v53, %v965_v35  ;;  %v472_v56 = vadd.f32 %v701_v54, %v965_v35  ;;  %v335_v57 = vpop.f32.mrb[21].mxu0  ;;  %v463_v58 = vpop.f32.mrb[21].mxu1 }
 0x105   :  { %v336_v59 = vadd.f32 %v965_v35, %v335_v57  ;;  %v464_v60 = vadd.f32 %v965_v35, %v463_v58  ;;  %v670_v61 = vpop.f32.mrb[22].mxu0  ;;  %v702_v62 = vpop.f32.mrb[22].mxu1 }
 0x106   :  { %533 = vst.msk [vmem:[%s1290_s3 + $0xb0] sm:$0xff] %vm510_vm2, %v344_v55  ;;  %565 = vst.msk [vmem:[%s1290_s3 + $0x1b0] sm:$0xff] %vm510_vm2, %v472_v56  ;;  %v347_v63 = vadd.f32 %v670_v61, %v965_v35  ;;  %v475_v0 = vadd.f32 %v702_v62, %v965_v35  ;;  %v338_v1 = vpop.f32.mrb[23].mxu0  ;;  %v466_v2 = vpop.f32.mrb[23].mxu1 }
 0x107   :  { %531 = vst.msk [vmem:[%s1290_s3 + $0xa0] sm:$0xff] %vm510_vm2, %v336_v59  ;;  %563 = vst.msk [vmem:[%s1290_s3 + $0x1a0] sm:$0xff] %vm510_vm2, %v464_v60  ;;  %v339_v3 = vadd.f32 %v965_v35, %v338_v1  ;;  %v467_v4 = vadd.f32 %v965_v35, %v466_v2 }
 0x108   :  { %534 = vst.msk [vmem:[%s1290_s3 + $0xb8] sm:$0xff] %vm510_vm2, %v347_v63  ;;  %566 = vst.msk [vmem:[%s1290_s3 + $0x1b8] sm:$0xff] %vm510_vm2, %v475_v0 }
 0x109   :  { %532 = vst.msk [vmem:[%s1290_s3 + $0xa8] sm:$0xff] %vm510_vm2, %v339_v3  ;;  %564 = vst.msk [vmem:[%s1290_s3 + $0x1a8] sm:$0xff] %vm510_vm2, %v467_v4 }
 0x10b   :  { %v673_v5 = vpop.f32.mrb[24].mxu0  ;;  %v705_v6 = vpop.f32.mrb[24].mxu1 }
 0x10c   :  { %v360_v7 = vadd.f32 %v673_v5, %v965_v35  ;;  %v488_v8 = vadd.f32 %v705_v6, %v965_v35  ;;  %v351_v9 = vpop.f32.mrb[25].mxu0  ;;  %v479_v10 = vpop.f32.mrb[25].mxu1 }
 0x10d   :  { %v352_v11 = vadd.f32 %v965_v35, %v351_v9  ;;  %v480_v12 = vadd.f32 %v965_v35, %v479_v10  ;;  %v674_v13 = vpop.f32.mrb[26].mxu0  ;;  %v706_v14 = vpop.f32.mrb[26].mxu1 }
 0x10e   :  { %537 = vst.msk [vmem:[%s1290_s3 + $0xd0] sm:$0xff] %vm510_vm2, %v360_v7  ;;  %569 = vst.msk [vmem:[%s1290_s3 + $0x1d0] sm:$0xff] %vm510_vm2, %v488_v8  ;;  %v363_v15 = vadd.f32 %v674_v13, %v965_v35  ;;  %v491_v16 = vadd.f32 %v706_v14, %v965_v35  ;;  %v354_v17 = vpop.f32.mrb[27].mxu0  ;;  %v482_v18 = vpop.f32.mrb[27].mxu1 }
 0x10f   :  { %535 = vst.msk [vmem:[%s1290_s3 + $0xc0] sm:$0xff] %vm510_vm2, %v352_v11  ;;  %567 = vst.msk [vmem:[%s1290_s3 + $0x1c0] sm:$0xff] %vm510_vm2, %v480_v12  ;;  %v355_v19 = vadd.f32 %v965_v35, %v354_v17  ;;  %v483_v20 = vadd.f32 %v965_v35, %v482_v18 }
 0x110   :  { %538 = vst.msk [vmem:[%s1290_s3 + $0xd8] sm:$0xff] %vm510_vm2, %v363_v15  ;;  %570 = vst.msk [vmem:[%s1290_s3 + $0x1d8] sm:$0xff] %vm510_vm2, %v491_v16 }
 0x111   :  { %536 = vst.msk [vmem:[%s1290_s3 + $0xc8] sm:$0xff] %vm510_vm2, %v355_v19  ;;  %568 = vst.msk [vmem:[%s1290_s3 + $0x1c8] sm:$0xff] %vm510_vm2, %v483_v20 }
 0x113   :  { %v677_v21 = vpop.f32.mrb[28].mxu0  ;;  %v709_v22 = vpop.f32.mrb[28].mxu1 }
 0x114   :  { %v376_v23 = vadd.f32 %v677_v21, %v965_v35  ;;  %v504_v24 = vadd.f32 %v709_v22, %v965_v35  ;;  %v367_v25 = vpop.f32.mrb[29].mxu0  ;;  %v495_v26 = vpop.f32.mrb[29].mxu1 }
 0x115   :  { %v368_v27 = vadd.f32 %v965_v35, %v367_v25  ;;  %v496_v28 = vadd.f32 %v965_v35, %v495_v26  ;;  %v678_v29 = vpop.f32.mrb[30].mxu0  ;;  %v710_v30 = vpop.f32.mrb[30].mxu1 }
 0x116   :  { %541 = vst.msk [vmem:[%s1290_s3 + $0xf0] sm:$0xff] %vm510_vm2, %v376_v23  ;;  %573 = vst.msk [vmem:[%s1290_s3 + $0x1f0] sm:$0xff] %vm510_vm2, %v504_v24  ;;  %v379_v31 = vadd.f32 %v678_v29, %v965_v35  ;;  %v507_v32 = vadd.f32 %v710_v30, %v965_v35  ;;  %v370_v33 = vpop.f32.mrb[31].mxu0  ;;  %v498_v34 = vpop.f32.mrb[31].mxu1 }
 0x117   :  { %539 = vst.msk [vmem:[%s1290_s3 + $0xe0] sm:$0xff] %vm510_vm2, %v368_v27  ;;  %571 = vst.msk [vmem:[%s1290_s3 + $0x1e0] sm:$0xff] %vm510_vm2, %v496_v28  ;;  %v371_v36 = vadd.f32 %v965_v35, %v370_v33  ;;  %v499_v37 = vadd.f32 %v965_v35, %v498_v34 }
 0x118   :  { %542 = vst.msk [vmem:[%s1290_s3 + $0xf8] sm:$0xff] %vm510_vm2, %v379_v31  ;;  %574 = vst.msk [vmem:[%s1290_s3 + $0x1f8] sm:$0xff] %vm510_vm2, %v507_v32 }
 0x119   :  { %540 = vst.msk [vmem:[%s1290_s3 + $0xe8] sm:$0xff] %vm510_vm2, %v371_v36  ;;  %572 = vst.msk [vmem:[%s1290_s3 + $0x1e8] sm:$0xff] %vm510_vm2, %v499_v37 }

// kernel: c2former_forward.29
= control target key start
LH: loop header
LB: loop body
LE: loop exit
PB: predicated region body
PF: predicated region fallthrough
CT: control target
= control target key end

     0   :  { %s1234_s18 = smov 0   ;;  %s1236_s19 = smov 0   ;;  %s1395_s0 = inlined_call_operand.vmem [shape: f32[2,18,18,8], index: 0, kind: input, shape index: {}, may-alias: {0,1,2}]   ;;  %s1396_s1 = inlined_call_operand.vmem [shape: f32[2,18,18,8], index: 1, kind: input, shape index: {}, may-alias: {0,1,2}]   ;;  %s1397_s2 = inlined_call_operand.vmem [shape: f32[2,18,18,8], index: 2, kind: input, shape index: {}, may-alias: {0,1,2}]   ;;  %s1398_s3 = inlined_call_operand.vmem [shape: bf16[9,8,8], index: 3, kind: input, shape index: {}]   ;;  %s1399_s4 = inlined_call_operand.vmem [shape: f32[1,8], index: 4, kind: input, shape index: {}]   ;;  %s1400_s5 = inlined_call_operand.vmem [shape: f32[2,16,16,8], index: 5, kind: output, shape index: {}]  }
   0x1   :  { %s1238_s20 = smov 0   ;;  %s1240_s21 = smov 0  }
   0x2   :  { %s1242_s22 = smov 0  }
   0x3 LB: > { %s24_s23 = sadd.s32 1, %s1192_s20  ;;  %s27_s24 = sadd.s32 1, %s1196_s21  ;;  %s1200_s22 = sphi %s1242_s22, %s15_s22   ;;  %s1196_s21 = sphi %s1240_s21, %s1404_s21   ;;  %s1192_s20 = sphi %s1238_s20, %s1403_s20   ;;  %s1188_s19 = sphi %s1236_s19, %s1402_s19   ;;  %s1184_s18 = sphi %s1234_s18, %s1401_s18  }
   0x4   : > { %p25_p0 = scmp.ge.s32.totalorder %s24_s23, 16  ;;  %p1017_p1 = scmp.ge.s32.totalorder %s1200_s22, 1 }
   0x5   : > { %p247_p2 = scmp.lt.s32.totalorder %s1200_s22, 33 }
   0x6   : > { %s1406_s23 = smov (%p25_p0, %s24_s23), 0  ;;  %s1408_s24 = smov (!%p25_p0, %s27_s24), %s1196_s21 }
   0x7   : > { %p248_p3 = pnand %p1017_p1, %p247_p2  ;;  %p29_p4 = scmp.ge.s32.totalorder %s1408_s24, 2 }
   0x8   : > { %v1024_v0 = vld [vmem:[%s1398_s3 + $0x4] sm:$0xf] (!%p248_p3)  ;;  %vm369_vm0 = vcmask (!%p248_p3), 1043456   ;;  %v349_v1 = vld [vmem:[%s1398_s3] sm:$0xf] (!%p248_p3)  ;;  %v1202_v2 = vmov (!%p248_p3), 0.0  }
   0x9   : > { %s1410_s24 = smov (%p29_p4, %s1408_s24), 0  ;;  %251 = sbr.rel (%p248_p3) target bundleno = 285 (0x11d), region = 40 }
   0xa   : > { %1062 = vmatprep.subr.bf16.mxu0 (!%p248_p3), %v1202_v2  ;;  %v371_v3 = vsel (!%p248_p3), %vm369_vm0, %v1024_v0, 0  ;;  %1068 = vmatprep.subr.bf16.mxu1 (!%p248_p3), %v1202_v2  ;;  %v417_v4 = vsel (!%p248_p3), %vm369_vm0, %v349_v1, 0  ;;  %p303_p5 = scmp.lt.s32.totalorder (!%p248_p3), %s1188_s19, 1  ;;  %p305_p6 = scmp.lt.s32.totalorder (!%p248_p3), %s1184_s18, 17  ;;  %vm1203_vm1 = vmmov (!%p248_p3), 0   ;;  %vm365_vm2 = vcmask (!%p248_p3), 64512  }
   0xb   : > { %1063 = vmatpush3.bf16.msra.mxu0 (!%p248_p3), %v371_v3  ;;  %1069 = vmatpush3.bf16.msra.mxu1 (!%p248_p3), %v417_v4  ;;  %s312_s6 = sadd.s32 (!%p248_p3), 1, %s1184_s18  ;;  %s323_s8 = sadd.s32 (!%p248_p3), 2, %s1184_s18  ;;  %v1029_v5 = vld [vmem:[%s1398_s3 + $0xc] sm:$0xf] (!%p248_p3)  ;;  %v1027_v17 = vld [vmem:[%s1398_s3 + $0x8] sm:$0xf] (!%p248_p3) }
   0xc   : > { %1064 = vmatprep.mubr.msk.bf16.mxu0 (!%p248_p3), %vm1203_vm1, %v1202_v2  ;;  %1070 = vmatprep.mubr.msk.bf16.mxu1 (!%p248_p3), %vm1203_vm1, %v1202_v2  ;;  %p315_p7 = scmp.lt.s32.totalorder (!%p248_p3), %s312_s6, 17  ;;  %p326_p8 = scmp.lt.s32.totalorder (!%p248_p3), %s323_s8, 17  ;;  %v528_v11 = vsel (!%p248_p3), %vm369_vm0, %v1029_v5, 0  ;;  %vm352_vm3 = vsmask.f32 (!%p248_p3), 7424  ;;  %v472_v22 = vsel (!%p248_p3), %vm369_vm0, %v1027_v17, 0 }
   0xd   : > { %1074 = vmatprep.subr.bf16.mxu0 (!%p248_p3), %v1202_v2  ;;  %1080 = vmatprep.subr.bf16.mxu1 (!%p248_p3), %v1202_v2  ;;  %v1033_v21 = vld [vmem:[%s1398_s3 + $0x14] sm:$0xf] (!%p248_p3)  ;;  %vm464_vm4 = vcmask (!%p248_p3), 1046528   ;;  %v1031_v35 = vld [vmem:[%s1398_s3 + $0x10] sm:$0xf] (!%p248_p3)  ;;  %p336_p9 = scmp.lt.s32.totalorder (!%p248_p3), %s1184_s18, 15 }
   0xe   : > { %v646_v29 = vsel (!%p248_p3), %vm369_vm0, %v1033_v21, 0  ;;  %v1037_v44 = vld [vmem:[%s1398_s3 + $0x1c] sm:$0xf] (!%p248_p3)  ;;  %v590_v45 = vsel (!%p248_p3), %vm369_vm0, %v1031_v35, 0  ;;  %v1035_v53 = vld [vmem:[%s1398_s3 + $0x18] sm:$0xf] (!%p248_p3) }
   0xf   : > { %v764_v50 = vsel (!%p248_p3), %vm369_vm0, %v1037_v44, 0  ;;  %v702_v57 = vsel (!%p248_p3), %vm369_vm0, %v1035_v53, 0  ;;  %v1039_v59 = vld [vmem:[%s1398_s3 + $0x20] sm:$0xf] (!%p248_p3) }
  0x10   : > { %s1412_s19 = smov (!%p303_p5, %s1188_s19), 1  ;;  %s1414_s6 = smov (!%p315_p7, %s312_s6), 17  ;;  %v820_v60 = vsel %vm369_vm0, %v1039_v59, 0 }
  0x11   : > { %s306_s29 = scalar_select %p305_p6, %s1184_s18, 17 }
  0x12   : > { %s1291_s30 = smul.u32 54, %s1412_s19  ;;  %s1416_s8 = smov (!%p326_p8, %s323_s8), 17 }
  0x13   : > { %s1116_s7 = smul.u32 3, %s306_s29  ;;  %s1418_s18 = smov (!%p336_p9, %s1184_s18), 15 }
  0x14   : > { %s1118_s16 = smul.u32 3, %s1414_s6  ;;  %s1022_s6 = sshll.u32 %s1412_s19, 5 }
  0x15   : > { %s309_s9 = sadd.s32 %s1291_s30, %s1116_s7  ;;  %s1119_s17 = smul.u32 3, %s1416_s8 }
  0x16   : > { %s1018_s10 = sshll.u32 %s309_s9, 3  ;;  %s319_s25 = sadd.s32 %s1118_s16, %s1291_s30 }
  0x17   : > { %s311_s15 = scalar_lea.vmem %s1395_s0, %s1018_s10  ;;  %s1019_s28 = sshll.u32 %s319_s25, 3 }
  0x18   : > { %v344_v6 = vld [vmem:[%s311_s15] sm:$0xff]  ;;  %v345_v7 = vld [vmem:[%s311_s15 + $0x8] sm:$0xff]  ;;  %v346_v8 = vld [vmem:[%s311_s15 + $0x10] sm:$0x3]  ;;  %s330_s29 = sadd.s32 %s1119_s17, %s1291_s30  ;;  %s321_s8 = scalar_lea.vmem %s1396_s1, %s1019_s28 }
  0x19   : > { %v347_v9 = vpack.c.bf16 %v345_v7, %v344_v6  ;;  %v348_v10 = vpack.c.bf16 %v346_v8, %v346_v8  ;;  %s1020_s9 = sshll.u32 %s330_s29, 3  ;;  %v517_v19 = vld [vmem:[%s321_s8] sm:$0xff]  ;;  %v518_v20 = vld [vmem:[%s321_s8 + $0x8] sm:$0xff]  ;;  %v519_v24 = vld [vmem:[%s321_s8 + $0x10] sm:$0x3]  ;;  %s1021_s29 = sshll.u32 %s1418_s18, 1 }
  0x1a   : > { %s332_s14 = scalar_lea.vmem %s1397_s2, %s1020_s9  ;;  %v520_v23 = vpack.c.bf16 %v518_v20, %v517_v19  ;;  %v521_v33 = vpack.c.bf16 %v519_v24, %v519_v24  ;;  %s340_s7 = sadd.s32 %s1022_s6, %s1021_s29 }
  0x1b   : > { %v354_v12 = vshrl.u32 %v347_v9, 16  ;;  %v356_v13 = vshll.u32 %v347_v9, 16  ;;  %v361_v14 = vshll.u32 %v348_v10, 16  ;;  %1071 = vmatmul.mubr.msk.bf16.vlgmr.msra.gmra.mrb[0].mxu1 %vm365_vm2, %v347_v9  ;;  %v691_v25 = vld [vmem:[%s332_s14] sm:$0xff]  ;;  %v692_v26 = vld [vmem:[%s332_s14 + $0x8] sm:$0xff]  ;;  %v465_v31 = vrot.slane %v347_v9, 1 }
  0x1c   : > { %1081 = vmatpush3.bf16.msra.mxu1 %v528_v11  ;;  %1082 = vmatprep.mubr.msk.bf16.mxu1 %vm1203_vm1, %v1202_v2  ;;  %v694_v28 = vpack.c.bf16 %v692_v26, %v691_v25  ;;  %v693_v30 = vld [vmem:[%s332_s14 + $0x10] sm:$0x3]  ;;  %v466_v32 = vrot.slane %v348_v10, 1  ;;  %v577_v34 = vshll.u32 %v520_v23, 16  ;;  %v639_v36 = vrot.slane %v520_v23, 1  ;;  %s1023_s8 = sshll.u32 %s340_s7, 3 }
  0x1d   : > { %v358_v15 = vrot.slane %v356_v13, 1  ;;  %v363_v16 = vrot.slane %v361_v14, 1  ;;  %1092 = vmatprep.subr.bf16.mxu1 %v1202_v2  ;;  %v640_v37 = vrot.slane %v521_v33, 1  ;;  %v695_v38 = vpack.c.bf16 %v693_v30, %v693_v30  ;;  %s342_s13 = scalar_lea.vmem %s1400_s5, %s1023_s8 }
  0x1e   : > { %v751_v39 = vshll.u32 %v694_v28, 16  ;;  %v467_v40 = vsel %vm464_vm4, %v465_v31, %v466_v32  ;;  %v575_v41 = vshrl.u32 %v520_v23, 16  ;;  %v579_v42 = vrot.slane %v577_v34, 1 }
  0x1f   : > { %v359_v18 = vor.u32 %v358_v15, %v354_v12  ;;  %v582_v43 = vshll.u32 %v521_v33, 16  ;;  %v641_v46 = vsel %vm464_vm4, %v639_v36, %v640_v37  ;;  %v749_v47 = vshrl.u32 %v694_v28, 16 }
  0x20   : > { %v753_v48 = vrot.slane %v751_v39, 1  ;;  %v756_v49 = vshll.u32 %v695_v38, 16  ;;  %v580_v51 = vor.u32 %v579_v42, %v575_v41  ;;  %v813_v61 = vrot.slane %v694_v28, 1 }
  0x21   : > { %v364_v27 = vsel %vm352_vm3, %v359_v18, %v363_v16  ;;  %v584_v52 = vrot.slane %v582_v43, 1  ;;  %v814_v62 = vrot.slane %v695_v38, 1 }
  0x22   : > { %1065 = vmatmul.mubr.msk.bf16.vlgmr.msra.gmra.mrb[0].mxu0 %vm365_vm2, %v364_v27  ;;  %v754_v54 = vor.u32 %v753_v48, %v749_v47  ;;  %v758_v55 = vrot.slane %v756_v49, 1  ;;  %v1041_v47 = vld [vmem:[%s1399_s4] ss:$0 sm:$0xff] }
  0x23   : > { %1075 = vmatpush3.bf16.msra.mxu0 %v472_v22  ;;  %1076 = vmatprep.mubr.msk.bf16.mxu0 %vm1203_vm1, %v1202_v2  ;;  %v585_v56 = vsel %vm352_vm3, %v580_v51, %v584_v52  ;;  %v815_v63 = vsel %vm464_vm4, %v813_v61, %v814_v62 }
  0x24   : > { %1086 = vmatprep.subr.bf16.mxu0 %v1202_v2  ;;  %1083 = vmatmul.mubr.msk.bf16.vlgmr.msra.gmra.mrb[4].mxu1 %vm365_vm2, %v520_v23  ;;  %v759_v58 = vsel %vm352_vm3, %v754_v54, %v758_v55 }
  0x25   : > { %1093 = vmatpush3.bf16.msra.mxu1 %v646_v29  ;;  %1094 = vmatprep.mubr.msk.bf16.mxu1 %vm1203_vm1, %v1202_v2 }
  0x26   : > { %1104 = vmatprep.subr.bf16.mxu1 %v1202_v2 }
  0x2a   : > { %1077 = vmatmul.mubr.msk.bf16.vlgmr.msra.gmra.mrb[4].mxu0 %vm365_vm2, %v467_v40 }
  0x2b   : > { %1087 = vmatpush3.bf16.msra.mxu0 %v590_v45  ;;  %1088 = vmatprep.mubr.msk.bf16.mxu0 %vm1203_vm1, %v1202_v2 }
  0x2c   : > { %1098 = vmatprep.subr.bf16.mxu0 %v1202_v2  ;;  %1095 = vmatmul.mubr.msk.bf16.vlgmr.msra.gmra.mrb[8].mxu1 %vm365_vm2, %v641_v46 }
  0x2d   : > { %1105 = vmatpush3.bf16.msra.mxu1 %v764_v50  ;;  %1106 = vmatprep.mubr.msk.bf16.mxu1 %vm1203_vm1, %v1202_v2 }
  0x32   : > { %1089 = vmatmul.mubr.msk.bf16.vlgmr.msra.gmra.mrb[8].mxu0 %vm365_vm2, %v585_v56 }
  0x33   : > { %1099 = vmatpush3.bf16.msra.mxu0 %v702_v57  ;;  %1100 = vmatprep.mubr.msk.bf16.mxu0 %vm1203_vm1, %v1202_v2 }
  0x34   : > { %1110 = vmatprep.subr.bf16.mxu0 %v1202_v2  ;;  %1107 = vmatmul.mubr.msk.bf16.vlgmr.msra.gmra.mrb[12].mxu1 %vm365_vm2, %v759_v58 }
  0x3a   : > { %1101 = vmatmul.mubr.msk.bf16.vlgmr.msra.gmra.mrb[12].mxu0 %vm365_vm2, %v694_v28 }
  0x3b   : > { %1111 = vmatpush3.bf16.msra.mxu0 %v820_v60  ;;  %1112 = vmatprep.mubr.msk.bf16.mxu0 %vm1203_vm1, %v1202_v2 }
  0x42   : > { %1113 = vmatmul.mubr.msk.bf16.vlgmr.msra.gmra.mrb[16].mxu0 %vm365_vm2, %v815_v63 }
  0xee   : > { %v453_v0 = vpop.f32.mrb[0].mxu1 }
  0xef   : > { %v1072_v1 = vpop.f32.mrb[1].mxu1 }
  0xf0   : > { %v456_v3 = vpop.f32.mrb[2].mxu1 }
  0xf1   : > { %v1073_v4 = vpop.f32.mrb[3].mxu1 }
  0xf5   : > { %v407_v5 = vpop.f32.mrb[0].mxu0 }
  0xf6   : > { %v454_v6 = vadd.f32 %v453_v0, %v407_v5  ;;  %v1066_v7 = vpop.f32.mrb[1].mxu0 }
  0xf7   : > { %v410_v8 = vpop.f32.mrb[2].mxu0  ;;  %v564_v9 = vpop.f32.mrb[4].mxu1 }
  0xf8   : > { %v457_v10 = vadd.f32 %v456_v3, %v410_v8  ;;  %v1067_v11 = vpop.f32.mrb[3].mxu0  ;;  %v1084_v12 = vpop.f32.mrb[5].mxu1 }
  0xf9   : > { %v567_v13 = vpop.f32.mrb[6].mxu1 }
  0xfa   : > { %v1085_v2 = vpop.f32.mrb[7].mxu1 }
  0xfd   : > { %v508_v14 = vpop.f32.mrb[4].mxu0 }
  0xfe   : > { %v515_v15 = vadd.f32 %v508_v14, %v454_v6  ;;  %v1078_v16 = vpop.f32.mrb[5].mxu0 }
  0xff   : > { %v511_v17 = vpop.f32.mrb[6].mxu0  ;;  %v682_v18 = vpop.f32.mrb[8].mxu1 }
 0x100   : > { %v516_v19 = vadd.f32 %v511_v17, %v457_v10  ;;  %v571_v20 = vadd.f32 %v564_v9, %v515_v15  ;;  %v1079_v21 = vpop.f32.mrb[7].mxu0  ;;  %v1096_v22 = vpop.f32.mrb[9].mxu1 }
 0x101   : > { %v685_v23 = vpop.f32.mrb[10].mxu1 }
 0x102   : > { %v572_v24 = vadd.f32 %v567_v13, %v516_v19  ;;  %v1097_v25 = vpop.f32.mrb[11].mxu1 }
 0x105   : > { %v626_v26 = vpop.f32.mrb[8].mxu0 }
 0x106   : > { %v633_v27 = vadd.f32 %v626_v26, %v571_v20  ;;  %v1090_v28 = vpop.f32.mrb[9].mxu0 }
 0x107   : > { %v629_v29 = vpop.f32.mrb[10].mxu0  ;;  %v800_v30 = vpop.f32.mrb[12].mxu1 }
 0x108   : > { %v634_v31 = vadd.f32 %v629_v29, %v572_v24  ;;  %v689_v32 = vadd.f32 %v682_v18, %v633_v27  ;;  %v1091_v33 = vpop.f32.mrb[11].mxu0  ;;  %v1108_v34 = vpop.f32.mrb[13].mxu1 }
 0x109   : > { %v803_v35 = vpop.f32.mrb[14].mxu1 }
 0x10a   : > { %v690_v36 = vadd.f32 %v685_v23, %v634_v31  ;;  %v1109_v37 = vpop.f32.mrb[15].mxu1 }
 0x10d   : > { %v738_v38 = vpop.f32.mrb[12].mxu0 }
 0x10e   : > { %v745_v39 = vadd.f32 %v738_v38, %v689_v32  ;;  %v1102_v40 = vpop.f32.mrb[13].mxu0 }
 0x10f   : > { %v741_v41 = vpop.f32.mrb[14].mxu0 }
 0x110   : > { %v746_v42 = vadd.f32 %v741_v41, %v690_v36  ;;  %v807_v43 = vadd.f32 %v800_v30, %v745_v39  ;;  %v1103_v44 = vpop.f32.mrb[15].mxu0 }
 0x112   : > { %v808_v45 = vadd.f32 %v803_v35, %v746_v42 }
 0x115   : > { %v856_v46 = vpop.f32.mrb[16].mxu0 }
 0x116   : > { %v863_v48 = vadd.f32 %v856_v46, %v807_v43  ;;  %v1114_v49 = vpop.f32.mrb[17].mxu0 }
 0x117   : > { %v859_v50 = vpop.f32.mrb[18].mxu0 }
 0x118   : > { %v872_v51 = vadd.f32 %v1041_v47, %v863_v48  ;;  %v864_v52 = vadd.f32 %v859_v50, %v808_v45  ;;  %v1115_v53 = vpop.f32.mrb[19].mxu0 }
 0x11a   : > { %874 = vst.msk [vmem:[%s342_s13] sm:$0xff] %vm365_vm2, %v872_v51  ;;  %v873_v54 = vadd.f32 %v1041_v47, %v864_v52 }
 0x11c   : > { %875 = vst.msk [vmem:[%s342_s13 + $0x8] sm:$0xff] %vm365_vm2, %v873_v54 }
 0x11d PF: > { %s15_s22 = sadd.s32 1, %s1200_s22   ;;  %s1401_s18 = smov %s1192_s20 }
 0x11e   : > { %p12_p10 = scmp.ge.s32.totalorder %s15_s22, 34   ;;  %s1402_s19 = smov %s1196_s21 }
 0x11f   : > { %s1403_s20 = smov %s1406_s23  ;;  %s1404_s21 = smov %s1410_s24 }
 0x120   :  { %14 = sbr.rel (!%p12_p10) target bundleno = 3 (0x3), region = 84 }

// kernel: c2former_forward.33
= control target key start
LH: loop header
LB: loop body
LE: loop exit
PB: predicated region body
PF: predicated region fallthrough
CT: control target
= control target key end

     0   :  { %vm217_vm0 = vcmask 1043456   ;;  %vm120_vm1 = vcmask 64512   ;;  %s1286_s1 = inlined_call_operand.vmem [shape: f32[8,8], index: 1, kind: input, shape index: {}]   ;;  %s1287_s0 = inlined_call_operand.vmem [shape: f32[512,8], index: 0, kind: input, shape index: {}]   ;;  %s1288_s2 = inlined_call_operand.vmem [shape: f32[1,8], index: 2, kind: input, shape index: {}]   ;;  %s1289_s3 = inlined_call_operand.vmem [shape: f32[512,8], index: 3, kind: output, shape index: {}]  }
   0x1   :  { %v111_v0 = vld [vmem:[%s1286_s1] sm:$0xff]  ;;  %v16_v2 = vld [vmem:[%s1287_s0 + $0x8] sm:$0xff]  ;;  %v17_v7 = vld [vmem:[%s1287_s0 + $0x10] sm:$0xff] }
   0x2   :  { %v15_v1 = vld [vmem:[%s1287_s0] sm:$0xff]  ;;  %v112_v3 = vpack.c.bf16 %v111_v0, %v111_v0  ;;  %v48_v6 = vld [vmem:[%s1287_s0 + $0x108] sm:$0xff]  ;;  %v18_v9 = vld [vmem:[%s1287_s0 + $0x18] sm:$0xff] }
   0x3   :  { %v79_v4 = vpack.c.bf16 %v16_v2, %v15_v1  ;;  %v47_v5 = vld [vmem:[%s1287_s0 + $0x100] sm:$0xff]  ;;  %v49_v10 = vld [vmem:[%s1287_s0 + $0x110] sm:$0xff]  ;;  %v50_v11 = vld [vmem:[%s1287_s0 + $0x118] sm:$0xff]  ;;  %v80_v13 = vpack.c.bf16 %v18_v9, %v17_v7 }
   0x4   :  { %v95_v8 = vpack.c.bf16 %v48_v6, %v47_v5  ;;  %712 = vmatprep.subr.msk.bf16.mxu0 %vm217_vm0, %v112_v3  ;;  %713 = vmatprep.subr.msk.bf16.mxu1 %vm217_vm0, %v112_v3  ;;  %v219_v12 = vsel %vm217_vm0, %v112_v3, 0  ;;  %v96_v14 = vpack.c.bf16 %v50_v11, %v49_v10  ;;  %v19_v15 = vld [vmem:[%s1287_s0 + $0x20] sm:$0xff]  ;;  %v20_v16 = vld [vmem:[%s1287_s0 + $0x28] sm:$0xff]  ;;  %v21_v21 = vld [vmem:[%s1287_s0 + $0x30] sm:$0xff] }
   0x5   :  { %v51_v17 = vld [vmem:[%s1287_s0 + $0x120] sm:$0xff]  ;;  %645 = vmatpush3.bf16.msra.mxu0 %v219_v12  ;;  %711 = vmatpush3.bf16.msra.mxu1 %v219_v12  ;;  %v81_v18 = vpack.c.bf16 %v20_v16, %v19_v15  ;;  %v52_v19 = vld [vmem:[%s1287_s0 + $0x128] sm:$0xff]  ;;  %v22_v22 = vld [vmem:[%s1287_s0 + $0x38] sm:$0xff] }
   0x6   :  { %646 = vmatprep.mubr.msk.bf16.mxu0 %vm120_vm1, %v79_v4  ;;  %678 = vmatprep.mubr.msk.bf16.mxu1 %vm120_vm1, %v95_v8  ;;  %v97_v20 = vpack.c.bf16 %v52_v19, %v51_v17  ;;  %v53_v23 = vld [vmem:[%s1287_s0 + $0x130] sm:$0xff]  ;;  %v54_v24 = vld [vmem:[%s1287_s0 + $0x138] sm:$0xff]  ;;  %v23_v25 = vld [vmem:[%s1287_s0 + $0x40] sm:$0xff]  ;;  %v82_v29 = vpack.c.bf16 %v22_v22, %v21_v21 }
   0x7   :  { %v24_v26 = vld [vmem:[%s1287_s0 + $0x48] sm:$0xff]  ;;  %v55_v27 = vld [vmem:[%s1287_s0 + $0x140] sm:$0xff]  ;;  %v98_v30 = vpack.c.bf16 %v54_v24, %v53_v23  ;;  %v25_v33 = vld [vmem:[%s1287_s0 + $0x50] sm:$0xff] }
   0x8   :  { %647 = vmatmul.mubr.msk.bf16.vlgmr.msra.gmra.mrb[0].mxu0 %vm120_vm1, %v80_v13  ;;  %679 = vmatmul.mubr.msk.bf16.vlgmr.msra.gmra.mrb[0].mxu1 %vm120_vm1, %v96_v14  ;;  %v56_v28 = vld [vmem:[%s1287_s0 + $0x148] sm:$0xff]  ;;  %v83_v31 = vpack.c.bf16 %v24_v26, %v23_v25  ;;  %v26_v34 = vld [vmem:[%s1287_s0 + $0x58] sm:$0xff]  ;;  %v57_v35 = vld [vmem:[%s1287_s0 + $0x150] sm:$0xff] }
   0x9   :  { %650 = vmatprep.mubr.msk.bf16.mxu0 %vm120_vm1, %v81_v18  ;;  %682 = vmatprep.mubr.msk.bf16.mxu1 %vm120_vm1, %v97_v20  ;;  %v99_v32 = vpack.c.bf16 %v56_v28, %v55_v27  ;;  %v58_v36 = vld [vmem:[%s1287_s0 + $0x158] sm:$0xff]  ;;  %v27_v37 = vld [vmem:[%s1287_s0 + $0x60] sm:$0xff]  ;;  %v28_v38 = vld [vmem:[%s1287_s0 + $0x68] sm:$0xff]  ;;  %v84_v41 = vpack.c.bf16 %v26_v34, %v25_v33 }
   0xa   :  { %v59_v39 = vld [vmem:[%s1287_s0 + $0x160] sm:$0xff]  ;;  %v60_v40 = vld [vmem:[%s1287_s0 + $0x168] sm:$0xff]  ;;  %v100_v42 = vpack.c.bf16 %v58_v36, %v57_v35  ;;  %v85_v43 = vpack.c.bf16 %v28_v38, %v27_v37  ;;  %v29_v45 = vld [vmem:[%s1287_s0 + $0x70] sm:$0xff] }
   0xb   :  { %v101_v44 = vpack.c.bf16 %v60_v40, %v59_v39  ;;  %v30_v46 = vld [vmem:[%s1287_s0 + $0x78] sm:$0xff]  ;;  %v61_v47 = vld [vmem:[%s1287_s0 + $0x170] sm:$0xff]  ;;  %v31_v49 = vld [vmem:[%s1287_s0 + $0x80] sm:$0xff] }
   0xc   :  { %v62_v48 = vld [vmem:[%s1287_s0 + $0x178] sm:$0xff]  ;;  %v32_v50 = vld [vmem:[%s1287_s0 + $0x88] sm:$0xff]  ;;  %v63_v51 = vld [vmem:[%s1287_s0 + $0x180] sm:$0xff]  ;;  %v86_v53 = vpack.c.bf16 %v30_v46, %v29_v45 }
   0xd   :  { %v64_v52 = vld [vmem:[%s1287_s0 + $0x188] sm:$0xff]  ;;  %v102_v54 = vpack.c.bf16 %v62_v48, %v61_v47  ;;  %v87_v55 = vpack.c.bf16 %v32_v50, %v31_v49  ;;  %v33_v57 = vld [vmem:[%s1287_s0 + $0x90] sm:$0xff]  ;;  %v34_v58 = vld [vmem:[%s1287_s0 + $0x98] sm:$0xff] }
   0xe   :  { %v103_v56 = vpack.c.bf16 %v64_v52, %v63_v51  ;;  %v65_v59 = vld [vmem:[%s1287_s0 + $0x190] sm:$0xff]  ;;  %v66_v60 = vld [vmem:[%s1287_s0 + $0x198] sm:$0xff]  ;;  %v35_v61 = vld [vmem:[%s1287_s0 + $0xa0] sm:$0xff]  ;;  %v88_v1 = vpack.c.bf16 %v34_v58, %v33_v57 }
   0xf   :  { %v36_v62 = vld [vmem:[%s1287_s0 + $0xa8] sm:$0xff]  ;;  %v67_v63 = vld [vmem:[%s1287_s0 + $0x1a0] sm:$0xff]  ;;  %v104_v2 = vpack.c.bf16 %v66_v60, %v65_v59  ;;  %v37_v5 = vld [vmem:[%s1287_s0 + $0xb0] sm:$0xff] }
  0x10   :  { %651 = vmatmul.mubr.msk.bf16.gmra.mrb[4].mxu0 %vm120_vm1, %v82_v29  ;;  %683 = vmatmul.mubr.msk.bf16.gmra.mrb[4].mxu1 %vm120_vm1, %v98_v30  ;;  %v68_v0 = vld [vmem:[%s1287_s0 + $0x1a8] sm:$0xff]  ;;  %v89_v3 = vpack.c.bf16 %v36_v62, %v35_v61  ;;  %v38_v6 = vld [vmem:[%s1287_s0 + $0xb8] sm:$0xff]  ;;  %v69_v7 = vld [vmem:[%s1287_s0 + $0x1b0] sm:$0xff] }
  0x11   :  { %654 = vmatprep.mubr.msk.bf16.mxu0 %vm120_vm1, %v83_v31  ;;  %686 = vmatprep.mubr.msk.bf16.mxu1 %vm120_vm1, %v99_v32  ;;  %v105_v4 = vpack.c.bf16 %v68_v0, %v67_v63  ;;  %v70_v8 = vld [vmem:[%s1287_s0 + $0x1b8] sm:$0xff]  ;;  %v39_v9 = vld [vmem:[%s1287_s0 + $0xc0] sm:$0xff]  ;;  %v40_v10 = vld [vmem:[%s1287_s0 + $0xc8] sm:$0xff]  ;;  %v90_v13 = vpack.c.bf16 %v38_v6, %v37_v5 }
  0x12   :  { %v71_v11 = vld [vmem:[%s1287_s0 + $0x1c0] sm:$0xff]  ;;  %v72_v12 = vld [vmem:[%s1287_s0 + $0x1c8] sm:$0xff]  ;;  %v106_v14 = vpack.c.bf16 %v70_v8, %v69_v7  ;;  %v91_v15 = vpack.c.bf16 %v40_v10, %v39_v9  ;;  %v41_v17 = vld [vmem:[%s1287_s0 + $0xd0] sm:$0xff] }
  0x13   :  { %v107_v16 = vpack.c.bf16 %v72_v12, %v71_v11  ;;  %v42_v18 = vld [vmem:[%s1287_s0 + $0xd8] sm:$0xff]  ;;  %v73_v19 = vld [vmem:[%s1287_s0 + $0x1d0] sm:$0xff]  ;;  %v43_v21 = vld [vmem:[%s1287_s0 + $0xe0] sm:$0xff] }
  0x14   :  { %v74_v20 = vld [vmem:[%s1287_s0 + $0x1d8] sm:$0xff]  ;;  %v44_v22 = vld [vmem:[%s1287_s0 + $0xe8] sm:$0xff]  ;;  %v75_v23 = vld [vmem:[%s1287_s0 + $0x1e0] sm:$0xff]  ;;  %v92_v25 = vpack.c.bf16 %v42_v18, %v41_v17 }
  0x15   :  { %v76_v24 = vld [vmem:[%s1287_s0 + $0x1e8] sm:$0xff]  ;;  %v108_v26 = vpack.c.bf16 %v74_v20, %v73_v19  ;;  %v93_v27 = vpack.c.bf16 %v44_v22, %v43_v21  ;;  %v45_v29 = vld [vmem:[%s1287_s0 + $0xf0] sm:$0xff]  ;;  %v46_v30 = vld [vmem:[%s1287_s0 + $0xf8] sm:$0xff] }
  0x16   :  { %v109_v28 = vpack.c.bf16 %v76_v24, %v75_v23  ;;  %v77_v31 = vld [vmem:[%s1287_s0 + $0x1f0] sm:$0xff]  ;;  %v78_v32 = vld [vmem:[%s1287_s0 + $0x1f8] sm:$0xff]  ;;  %v94_v33 = vpack.c.bf16 %v46_v30, %v45_v29  ;;  %v964_v35 = vld [vmem:[%s1288_s2] ss:$0 sm:$0xff] }
  0x17   :  { %v110_v34 = vpack.c.bf16 %v78_v32, %v77_v31 }
  0x18   :  { %655 = vmatmul.mubr.msk.bf16.gmra.mrb[8].mxu0 %vm120_vm1, %v84_v41  ;;  %687 = vmatmul.mubr.msk.bf16.gmra.mrb[8].mxu1 %vm120_vm1, %v100_v42 }
  0x19   :  { %658 = vmatprep.mubr.msk.bf16.mxu0 %vm120_vm1, %v85_v43  ;;  %690 = vmatprep.mubr.msk.bf16.mxu1 %vm120_vm1, %v101_v44 }
  0x20   :  { %659 = vmatmul.mubr.msk.bf16.gmra.mrb[12].mxu0 %vm120_vm1, %v86_v53  ;;  %691 = vmatmul.mubr.msk.bf16.gmra.mrb[12].mxu1 %vm120_vm1, %v102_v54 }
  0x21   :  { %662 = vmatprep.mubr.msk.bf16.mxu0 %vm120_vm1, %v87_v55  ;;  %694 = vmatprep.mubr.msk.bf16.mxu1 %vm120_vm1, %v103_v56 }
  0x28   :  { %663 = vmatmul.mubr.msk.bf16.gmra.mrb[16].mxu0 %vm120_vm1, %v88_v1  ;;  %695 = vmatmul.mubr.msk.bf16.gmra.mrb[16].mxu1 %vm120_vm1, %v104_v2 }
  0x29   :  { %666 = vmatprep.mubr.msk.bf16.mxu0 %vm120_vm1, %v89_v3  ;;  %698 = vmatprep.mubr.msk.bf16.mxu1 %vm120_vm1, %v105_v4 }
  0x30   :  { %667 = vmatmul.mubr.msk.bf16.gmra.mrb[20].mxu0 %vm120_vm1, %v90_v13  ;;  %699 = vmatmul.mubr.msk.bf16.gmra.mrb[20].mxu1 %vm120_vm1, %v106_v14 }
  0x31   :  { %670 = vmatprep.mubr.msk.bf16.mxu0 %vm120_vm1, %v91_v15  ;;  %702 = vmatprep.mubr.msk.bf16.mxu1 %vm120_vm1, %v107_v16 }
  0x38   :  { %671 = vmatmul.mubr.msk.bf16.gmra.mrb[24].mxu0 %vm120_vm1, %v92_v25  ;;  %703 = vmatmul.mubr.msk.bf16.gmra.mrb[24].mxu1 %vm120_vm1, %v108_v26 }
  0x39   :  { %674 = vmatprep.mubr.msk.bf16.mxu0 %vm120_vm1, %v93_v27  ;;  %706 = vmatprep.mubr.msk.bf16.mxu1 %vm120_vm1, %v109_v28 }
  0x40   :  { %675 = vmatmul.mubr.msk.bf16.gmra.mrb[28].mxu0 %vm120_vm1, %v94_v33  ;;  %707 = vmatmul.mubr.msk.bf16.gmra.mrb[28].mxu1 %vm120_vm1, %v110_v34 }
  0xdb   :  { %v648_v36 = vpop.f32.mrb[0].mxu0  ;;  %v680_v37 = vpop.f32.mrb[0].mxu1 }
  0xdc   :  { %v264_v38 = vadd.f32 %v648_v36, %v964_v35  ;;  %v392_v39 = vadd.f32 %v680_v37, %v964_v35  ;;  %v255_v40 = vpop.f32.mrb[1].mxu0  ;;  %v383_v41 = vpop.f32.mrb[1].mxu1 }
  0xdd   :  { %v256_v42 = vadd.f32 %v964_v35, %v255_v40  ;;  %v384_v43 = vadd.f32 %v964_v35, %v383_v41  ;;  %v649_v44 = vpop.f32.mrb[2].mxu0  ;;  %v681_v45 = vpop.f32.mrb[2].mxu1 }
  0xde   :  { %512 = vst.msk [vmem:[%s1289_s3 + $0x10] sm:$0xff] %vm120_vm1, %v264_v38  ;;  %544 = vst.msk [vmem:[%s1289_s3 + $0x110] sm:$0xff] %vm120_vm1, %v392_v39  ;;  %v267_v46 = vadd.f32 %v649_v44, %v964_v35  ;;  %v395_v47 = vadd.f32 %v681_v45, %v964_v35  ;;  %v258_v48 = vpop.f32.mrb[3].mxu0  ;;  %v386_v49 = vpop.f32.mrb[3].mxu1 }
  0xdf   :  { %510 = vst.msk [vmem:[%s1289_s3] sm:$0xff] %vm120_vm1, %v256_v42  ;;  %542 = vst.msk [vmem:[%s1289_s3 + $0x100] sm:$0xff] %vm120_vm1, %v384_v43  ;;  %v259_v50 = vadd.f32 %v964_v35, %v258_v48  ;;  %v387_v51 = vadd.f32 %v964_v35, %v386_v49 }
  0xe0   :  { %513 = vst.msk [vmem:[%s1289_s3 + $0x18] sm:$0xff] %vm120_vm1, %v267_v46  ;;  %545 = vst.msk [vmem:[%s1289_s3 + $0x118] sm:$0xff] %vm120_vm1, %v395_v47 }
  0xe1   :  { %511 = vst.msk [vmem:[%s1289_s3 + $0x8] sm:$0xff] %vm120_vm1, %v259_v50  ;;  %543 = vst.msk [vmem:[%s1289_s3 + $0x108] sm:$0xff] %vm120_vm1, %v387_v51 }
  0xe3   :  { %v652_v52 = vpop.f32.mrb[4].mxu0  ;;  %v684_v53 = vpop.f32.mrb[4].mxu1 }
  0xe4   :  { %v280_v54 = vadd.f32 %v652_v52, %v964_v35  ;;  %v408_v55 = vadd.f32 %v684_v53, %v964_v35  ;;  %v271_v56 = vpop.f32.mrb[5].mxu0  ;;  %v399_v57 = vpop.f32.mrb[5].mxu1 }
  0xe5   :  { %v272_v58 = vadd.f32 %v964_v35, %v271_v56  ;;  %v400_v59 = vadd.f32 %v964_v35, %v399_v57  ;;  %v653_v60 = vpop.f32.mrb[6].mxu0  ;;  %v685_v61 = vpop.f32.mrb[6].mxu1 }
  0xe6   :  { %516 = vst.msk [vmem:[%s1289_s3 + $0x30] sm:$0xff] %vm120_vm1, %v280_v54  ;;  %548 = vst.msk [vmem:[%s1289_s3 + $0x130] sm:$0xff] %vm120_vm1, %v408_v55  ;;  %v283_v62 = vadd.f32 %v653_v60, %v964_v35  ;;  %v411_v63 = vadd.f32 %v685_v61, %v964_v35  ;;  %v274_v0 = vpop.f32.mrb[7].mxu0  ;;  %v402_v1 = vpop.f32.mrb[7].mxu1 }
  0xe7   :  { %514 = vst.msk [vmem:[%s1289_s3 + $0x20] sm:$0xff] %vm120_vm1, %v272_v58  ;;  %546 = vst.msk [vmem:[%s1289_s3 + $0x120] sm:$0xff] %vm120_vm1, %v400_v59  ;;  %v275_v2 = vadd.f32 %v964_v35, %v274_v0  ;;  %v403_v3 = vadd.f32 %v964_v35, %v402_v1 }
  0xe8   :  { %517 = vst.msk [vmem:[%s1289_s3 + $0x38] sm:$0xff] %vm120_vm1, %v283_v62  ;;  %549 = vst.msk [vmem:[%s1289_s3 + $0x138] sm:$0xff] %vm120_vm1, %v411_v63 }
  0xe9   :  { %515 = vst.msk [vmem:[%s1289_s3 + $0x28] sm:$0xff] %vm120_vm1, %v275_v2  ;;  %547 = vst.msk [vmem:[%s1289_s3 + $0x128] sm:$0xff] %vm120_vm1, %v403_v3 }
  0xeb   :  { %v656_v4 = vpop.f32.mrb[8].mxu0  ;;  %v688_v5 = vpop.f32.mrb[8].mxu1 }
  0xec   :  { %v296_v6 = vadd.f32 %v656_v4, %v964_v35  ;;  %v424_v7 = vadd.f32 %v688_v5, %v964_v35  ;;  %v287_v8 = vpop.f32.mrb[9].mxu0  ;;  %v415_v9 = vpop.f32.mrb[9].mxu1 }
  0xed   :  { %v288_v10 = vadd.f32 %v964_v35, %v287_v8  ;;  %v416_v11 = vadd.f32 %v964_v35, %v415_v9  ;;  %v657_v12 = vpop.f32.mrb[10].mxu0  ;;  %v689_v13 = vpop.f32.mrb[10].mxu1 }
  0xee   :  { %520 = vst.msk [vmem:[%s1289_s3 + $0x50] sm:$0xff] %vm120_vm1, %v296_v6  ;;  %552 = vst.msk [vmem:[%s1289_s3 + $0x150] sm:$0xff] %vm120_vm1, %v424_v7  ;;  %v299_v14 = vadd.f32 %v657_v12, %v964_v35  ;;  %v427_v15 = vadd.f32 %v689_v13, %v964_v35  ;;  %v290_v16 = vpop.f32.mrb[11].mxu0  ;;  %v418_v17 = vpop.f32.mrb[11].mxu1 }
  0xef   :  { %518 = vst.msk [vmem:[%s1289_s3 + $0x40] sm:$0xff] %vm120_vm1, %v288_v10  ;;  %550 = vst.msk [vmem:[%s1289_s3 + $0x140] sm:$0xff] %vm120_vm1, %v416_v11  ;;  %v291_v18 = vadd.f32 %v964_v35, %v290_v16  ;;  %v419_v19 = vadd.f32 %v964_v35, %v418_v17 }
  0xf0   :  { %521 = vst.msk [vmem:[%s1289_s3 + $0x58] sm:$0xff] %vm120_vm1, %v299_v14  ;;  %553 = vst.msk [vmem:[%s1289_s3 + $0x158] sm:$0xff] %vm120_vm1, %v427_v15 }
  0xf1   :  { %519 = vst.msk [vmem:[%s1289_s3 + $0x48] sm:$0xff] %vm120_vm1, %v291_v18  ;;  %551 = vst.msk [vmem:[%s1289_s3 + $0x148] sm:$0xff] %vm120_vm1, %v419_v19 }
  0xf3   :  { %v660_v20 = vpop.f32.mrb[12].mxu0  ;;  %v692_v21 = vpop.f32.mrb[12].mxu1 }
  0xf4   :  { %v312_v22 = vadd.f32 %v660_v20, %v964_v35  ;;  %v440_v23 = vadd.f32 %v692_v21, %v964_v35  ;;  %v303_v24 = vpop.f32.mrb[13].mxu0  ;;  %v431_v25 = vpop.f32.mrb[13].mxu1 }
  0xf5   :  { %v304_v26 = vadd.f32 %v964_v35, %v303_v24  ;;  %v432_v27 = vadd.f32 %v964_v35, %v431_v25  ;;  %v661_v28 = vpop.f32.mrb[14].mxu0  ;;  %v693_v29 = vpop.f32.mrb[14].mxu1 }
  0xf6   :  { %524 = vst.msk [vmem:[%s1289_s3 + $0x70] sm:$0xff] %vm120_vm1, %v312_v22  ;;  %556 = vst.msk [vmem:[%s1289_s3 + $0x170] sm:$0xff] %vm120_vm1, %v440_v23  ;;  %v315_v30 = vadd.f32 %v661_v28, %v964_v35  ;;  %v443_v31 = vadd.f32 %v693_v29, %v964_v35  ;;  %v306_v32 = vpop.f32.mrb[15].mxu0  ;;  %v434_v33 = vpop.f32.mrb[15].mxu1 }
  0xf7   :  { %522 = vst.msk [vmem:[%s1289_s3 + $0x60] sm:$0xff] %vm120_vm1, %v304_v26  ;;  %554 = vst.msk [vmem:[%s1289_s3 + $0x160] sm:$0xff] %vm120_vm1, %v432_v27  ;;  %v307_v34 = vadd.f32 %v964_v35, %v306_v32  ;;  %v435_v36 = vadd.f32 %v964_v35, %v434_v33 }
  0xf8   :  { %525 = vst.msk [vmem:[%s1289_s3 + $0x78] sm:$0xff] %vm120_vm1, %v315_v30  ;;  %557 = vst.msk [vmem:[%s1289_s3 + $0x178] sm:$0xff] %vm120_vm1, %v443_v31 }
  0xf9   :  { %523 = vst.msk [vmem:[%s1289_s3 + $0x68] sm:$0xff] %vm120_vm1, %v307_v34  ;;  %555 = vst.msk [vmem:[%s1289_s3 + $0x168] sm:$0xff] %vm120_vm1, %v435_v36 }
  0xfb   :  { %v664_v37 = vpop.f32.mrb[16].mxu0  ;;  %v696_v38 = vpop.f32.mrb[16].mxu1 }
  0xfc   :  { %v328_v39 = vadd.f32 %v664_v37, %v964_v35  ;;  %v456_v40 = vadd.f32 %v696_v38, %v964_v35  ;;  %v319_v41 = vpop.f32.mrb[17].mxu0  ;;  %v447_v42 = vpop.f32.mrb[17].mxu1 }
  0xfd   :  { %v320_v43 = vadd.f32 %v964_v35, %v319_v41  ;;  %v448_v44 = vadd.f32 %v964_v35, %v447_v42  ;;  %v665_v45 = vpop.f32.mrb[18].mxu0  ;;  %v697_v46 = vpop.f32.mrb[18].mxu1 }
  0xfe   :  { %528 = vst.msk [vmem:[%s1289_s3 + $0x90] sm:$0xff] %vm120_vm1, %v328_v39  ;;  %560 = vst.msk [vmem:[%s1289_s3 + $0x190] sm:$0xff] %vm120_vm1, %v456_v40  ;;  %v331_v47 = vadd.f32 %v665_v45, %v964_v35  ;;  %v459_v48 = vadd.f32 %v697_v46, %v964_v35  ;;  %v322_v49 = vpop.f32.mrb[19].mxu0  ;;  %v450_v50 = vpop.f32.mrb[19].mxu1 }
  0xff   :  { %526 = vst.msk [vmem:[%s1289_s3 + $0x80] sm:$0xff] %vm120_vm1, %v320_v43  ;;  %558 = vst.msk [vmem:[%s1289_s3 + $0x180] sm:$0xff] %vm120_vm1, %v448_v44  ;;  %v323_v51 = vadd.f32 %v964_v35, %v322_v49  ;;  %v451_v52 = vadd.f32 %v964_v35, %v450_v50 }
 0x100   :  { %529 = vst.msk [vmem:[%s1289_s3 + $0x98] sm:$0xff] %vm120_vm1, %v331_v47  ;;  %561 = vst.msk [vmem:[%s1289_s3 + $0x198] sm:$0xff] %vm120_vm1, %v459_v48 }
 0x101   :  { %527 = vst.msk [vmem:[%s1289_s3 + $0x88] sm:$0xff] %vm120_vm1, %v323_v51  ;;  %559 = vst.msk [vmem:[%s1289_s3 + $0x188] sm:$0xff] %vm120_vm1, %v451_v52 }
 0x103   :  { %v668_v53 = vpop.f32.mrb[20].mxu0  ;;  %v700_v54 = vpop.f32.mrb[20].mxu1 }
 0x104   :  { %v344_v55 = vadd.f32 %v668_v53, %v964_v35  ;;  %v472_v56 = vadd.f32 %v700_v54, %v964_v35  ;;  %v335_v57 = vpop.f32.mrb[21].mxu0  ;;  %v463_v58 = vpop.f32.mrb[21].mxu1 }
 0x105   :  { %v336_v59 = vadd.f32 %v964_v35, %v335_v57  ;;  %v464_v60 = vadd.f32 %v964_v35, %v463_v58  ;;  %v669_v61 = vpop.f32.mrb[22].mxu0  ;;  %v701_v62 = vpop.f32.mrb[22].mxu1 }
 0x106   :  { %532 = vst.msk [vmem:[%s1289_s3 + $0xb0] sm:$0xff] %vm120_vm1, %v344_v55  ;;  %564 = vst.msk [vmem:[%s1289_s3 + $0x1b0] sm:$0xff] %vm120_vm1, %v472_v56  ;;  %v347_v63 = vadd.f32 %v669_v61, %v964_v35  ;;  %v475_v0 = vadd.f32 %v701_v62, %v964_v35  ;;  %v338_v1 = vpop.f32.mrb[23].mxu0  ;;  %v466_v2 = vpop.f32.mrb[23].mxu1 }
 0x107   :  { %530 = vst.msk [vmem:[%s1289_s3 + $0xa0] sm:$0xff] %vm120_vm1, %v336_v59  ;;  %562 = vst.msk [vmem:[%s1289_s3 + $0x1a0] sm:$0xff] %vm120_vm1, %v464_v60  ;;  %v339_v3 = vadd.f32 %v964_v35, %v338_v1  ;;  %v467_v4 = vadd.f32 %v964_v35, %v466_v2 }
 0x108   :  { %533 = vst.msk [vmem:[%s1289_s3 + $0xb8] sm:$0xff] %vm120_vm1, %v347_v63  ;;  %565 = vst.msk [vmem:[%s1289_s3 + $0x1b8] sm:$0xff] %vm120_vm1, %v475_v0 }
 0x109   :  { %531 = vst.msk [vmem:[%s1289_s3 + $0xa8] sm:$0xff] %vm120_vm1, %v339_v3  ;;  %563 = vst.msk [vmem:[%s1289_s3 + $0x1a8] sm:$0xff] %vm120_vm1, %v467_v4 }
 0x10b   :  { %v672_v5 = vpop.f32.mrb[24].mxu0  ;;  %v704_v6 = vpop.f32.mrb[24].mxu1 }
 0x10c   :  { %v360_v7 = vadd.f32 %v672_v5, %v964_v35  ;;  %v488_v8 = vadd.f32 %v704_v6, %v964_v35  ;;  %v351_v9 = vpop.f32.mrb[25].mxu0  ;;  %v479_v10 = vpop.f32.mrb[25].mxu1 }
 0x10d   :  { %v352_v11 = vadd.f32 %v964_v35, %v351_v9  ;;  %v480_v12 = vadd.f32 %v964_v35, %v479_v10  ;;  %v673_v13 = vpop.f32.mrb[26].mxu0  ;;  %v705_v14 = vpop.f32.mrb[26].mxu1 }
 0x10e   :  { %536 = vst.msk [vmem:[%s1289_s3 + $0xd0] sm:$0xff] %vm120_vm1, %v360_v7  ;;  %568 = vst.msk [vmem:[%s1289_s3 + $0x1d0] sm:$0xff] %vm120_vm1, %v488_v8  ;;  %v363_v15 = vadd.f32 %v673_v13, %v964_v35  ;;  %v491_v16 = vadd.f32 %v705_v14, %v964_v35  ;;  %v354_v17 = vpop.f32.mrb[27].mxu0  ;;  %v482_v18 = vpop.f32.mrb[27].mxu1 }
 0x10f   :  { %534 = vst.msk [vmem:[%s1289_s3 + $0xc0] sm:$0xff] %vm120_vm1, %v352_v11  ;;  %566 = vst.msk [vmem:[%s1289_s3 + $0x1c0] sm:$0xff] %vm120_vm1, %v480_v12  ;;  %v355_v19 = vadd.f32 %v964_v35, %v354_v17  ;;  %v483_v20 = vadd.f32 %v964_v35, %v482_v18 }
 0x110   :  { %537 = vst.msk [vmem:[%s1289_s3 + $0xd8] sm:$0xff] %vm120_vm1, %v363_v15  ;;  %569 = vst.msk [vmem:[%s1289_s3 + $0x1d8] sm:$0xff] %vm120_vm1, %v491_v16 }
 0x111   :  { %535 = vst.msk [vmem:[%s1289_s3 + $0xc8] sm:$0xff] %vm120_vm1, %v355_v19  ;;  %567 = vst.msk [vmem:[%s1289_s3 + $0x1c8] sm:$0xff] %vm120_vm1, %v483_v20 }
 0x113   :  { %v676_v21 = vpop.f32.mrb[28].mxu0  ;;  %v708_v22 = vpop.f32.mrb[28].mxu1 }
 0x114   :  { %v376_v23 = vadd.f32 %v676_v21, %v964_v35  ;;  %v504_v24 = vadd.f32 %v708_v22, %v964_v35  ;;  %v367_v25 = vpop.f32.mrb[29].mxu0  ;;  %v495_v26 = vpop.f32.mrb[29].mxu1 }
 0x115   :  { %v368_v27 = vadd.f32 %v964_v35, %v367_v25  ;;  %v496_v28 = vadd.f32 %v964_v35, %v495_v26  ;;  %v677_v29 = vpop.f32.mrb[30].mxu0  ;;  %v709_v30 = vpop.f32.mrb[30].mxu1 }
 0x116   :  { %540 = vst.msk [vmem:[%s1289_s3 + $0xf0] sm:$0xff] %vm120_vm1, %v376_v23  ;;  %572 = vst.msk [vmem:[%s1289_s3 + $0x1f0] sm:$0xff] %vm120_vm1, %v504_v24  ;;  %v379_v31 = vadd.f32 %v677_v29, %v964_v35  ;;  %v507_v32 = vadd.f32 %v709_v30, %v964_v35  ;;  %v370_v33 = vpop.f32.mrb[31].mxu0  ;;  %v498_v34 = vpop.f32.mrb[31].mxu1 }
 0x117   :  { %538 = vst.msk [vmem:[%s1289_s3 + $0xe0] sm:$0xff] %vm120_vm1, %v368_v27  ;;  %570 = vst.msk [vmem:[%s1289_s3 + $0x1e0] sm:$0xff] %vm120_vm1, %v496_v28  ;;  %v371_v36 = vadd.f32 %v964_v35, %v370_v33  ;;  %v499_v37 = vadd.f32 %v964_v35, %v498_v34 }
 0x118   :  { %541 = vst.msk [vmem:[%s1289_s3 + $0xf8] sm:$0xff] %vm120_vm1, %v379_v31  ;;  %573 = vst.msk [vmem:[%s1289_s3 + $0x1f8] sm:$0xff] %vm120_vm1, %v507_v32 }
 0x119   :  { %539 = vst.msk [vmem:[%s1289_s3 + $0xe8] sm:$0xff] %vm120_vm1, %v371_v36  ;;  %571 = vst.msk [vmem:[%s1289_s3 + $0x1e8] sm:$0xff] %vm120_vm1, %v499_v37 }

// kernel: c2former_forward.37
= control target key start
LH: loop header
LB: loop body
LE: loop exit
PB: predicated region body
PF: predicated region fallthrough
CT: control target
= control target key end

     0   :  { %s3493_s9 = smov 0   ;;  %s5264_s0 = inlined_call_operand.vmem [shape: f32[2,256,8], index: 0, kind: input, shape index: {}]   ;;  %s5265_s1 = inlined_call_operand.vmem [shape: f32[2,256,16], index: 1, kind: input, shape index: {}]   ;;  %s5266_s2 = inlined_call_operand.vmem [shape: f32[2,256,8], index: 2, kind: output, shape index: {}]  }
   0x1 LB: > { %s2670_s10 = sadd.s32 4294967295, %s3472_s9   ;;  %p2674_p0 = scmp.ge.s32.totalorder %s3472_s9, 1  ;;  %s3472_s9 = sphi %s3493_s9, %s12_s9  }
   0x2   : > { %p122_p1 = scmp.lt.s32.totalorder %s3472_s9, 3 }
   0x4   : > { %p123_p2 = pnand %p2674_p0, %p122_p1 }
   0x6   : > { %126 = sbr.rel (%p123_p2) target bundleno = 1890 (0x762), region = 28 }
   0xd   : > { %p149_p3 = scmp.lt.s32.totalorder %s2670_s10, 1  ;;  %vm293_vm0 = vcmask 31744   ;;  %s3474_s18 = smov 120   ;;  %vm2570_vm1 = vcmask 64512  }
   0xe   : > { %s3475_s19 = smov 124   ;;  %s3476_s20 = smov 116  }
   0xf   : > { %s5612_s10 = smov (!%p149_p3, %s2670_s10), 1  ;;  %s3477_s21 = smov 4  }
  0x10   : > { %s3501_s11 = sshll.u32 %s5612_s10, 8 }
  0x11   : > { %s3507_s14 = scalar_lea.vmem %s5265_s1, %s3501_s11  ;;  %s3537_s17 = scalar_lea.vmem %s5264_s0, %s3501_s11 }
  0x12   : > { %v213_v0 = vld [vmem:[%s3507_s14 + $0x80] sm:$0xff]  ;;  %v214_v1 = vld [vmem:[%s3507_s14 + $0x88] sm:$0xff]  ;;  %v215_v5 = vld [vmem:[%s3507_s14 + $0x90] sm:$0xff]  ;;  %s5118_s24 = scalar_lea.vmem %s5266_s2, %s3501_s11 }
  0x13   : > { %v197_v2 = vld [vmem:[%s3507_s14] sm:$0xff]  ;;  %v3512_v3 = vpack.c.bf16 %v214_v1, %v213_v0  ;;  %v198_v4 = vld [vmem:[%s3507_s14 + $0x8] sm:$0xff]  ;;  %v216_v6 = vld [vmem:[%s3507_s14 + $0x98] sm:$0xff] }
  0x14   : > { %v3517_v7 = vpack.c.bf16 %v198_v4, %v197_v2  ;;  %v3519_v8 = vpack.c.bf16 %v216_v6, %v215_v5  ;;  %v199_v9 = vld [vmem:[%s3507_s14 + $0x10] sm:$0xff]  ;;  %v200_v10 = vld [vmem:[%s3507_s14 + $0x18] sm:$0xff]  ;;  %v217_v13 = vld [vmem:[%s3507_s14 + $0xa0] sm:$0xff] }
  0x15   : > { %5365 = vst [vmem:[#allocation2_spill] sm:$0xff] %v3512_v3  ;;  %3054 = vmatprep.subr.msk.bf16.mxu0 %vm293_vm0, %v3512_v3  ;;  %v3529_v12 = vpack.c.bf16 %v200_v10, %v199_v9  ;;  %v218_v14 = vld [vmem:[%s3507_s14 + $0xa8] sm:$0xff]  ;;  %v165_v17 = vld [vmem:[%s3537_s17] sm:$0xff]  ;;  %v219_v25 = vld [vmem:[%s3507_s14 + $0xb0] sm:$0xff]  ;;  %1127 = vrot.lane.b32.xlu0 %v3512_v3, %s3474_s18 }
  0x16   : > { %5366 = vst [vmem:[#allocation3_spill] sm:$0xff] %v3517_v7  ;;  %5367 = vst [vmem:[#allocation4_spill] sm:$0xff] %v3519_v8  ;;  %v343_v11 = vsel %vm293_vm0, %v3517_v7, 0  ;;  %v3541_v16 = vpack.c.bf16 %v218_v14, %v217_v13  ;;  %v201_v18 = vld [vmem:[%s3507_s14 + $0x20] sm:$0xff]  ;;  %v202_v19 = vld [vmem:[%s3507_s14 + $0x28] sm:$0xff]  ;;  %v229_v21 = vmul.f32 0.5, %v165_v17  ;;  %1111 = vrot.lane.b32.xlu1 %v3517_v7, %s3474_s18 }
  0x17   : > { %2719 = vmatpush3.bf16.xpose.msra.mxu0 %v343_v11  ;;  %5368 = vst [vmem:[#allocation5_spill] sm:$0xff] %v3529_v12  ;;  %v346_v15 = vsel %vm293_vm0, %v3529_v12, 0  ;;  %v166_v20 = vld [vmem:[%s3537_s17 + $0x8] sm:$0xff]  ;;  %v3549_v23 = vpack.c.bf16 %v202_v19, %v201_v18  ;;  %v220_v26 = vld [vmem:[%s3507_s14 + $0xb8] sm:$0xff]  ;;  %v203_v29 = vld [vmem:[%s3507_s14 + $0x30] sm:$0xff] }
  0x18   : > { %3055 = vmatprep.subr.msk.bf16.mxu0 %vm293_vm0, %v3519_v8  ;;  %5369 = vst [vmem:[#allocation6_spill] sm:$0xff] %v3541_v16  ;;  %v230_v22 = vmul.f32 0.5, %v166_v20  ;;  %v3559_v28 = vpack.c.bf16 %v220_v26, %v219_v25  ;;  %v204_v30 = vld [vmem:[%s3507_s14 + $0x38] sm:$0xff]  ;;  %v221_v32 = vld [vmem:[%s3507_s14 + $0xc0] sm:$0xff]  ;;  %v222_v33 = vld [vmem:[%s3507_s14 + $0xc8] sm:$0xff] }
  0x19   : > { %5370 = vst [vmem:[#allocation7_spill] sm:$0xff] %v3549_v23  ;;  %v349_v27 = vsel %vm293_vm0, %v3549_v23, 0  ;;  %v3565_v31 = vpack.c.bf16 %v204_v30, %v203_v29  ;;  %v3571_v35 = vpack.c.bf16 %v222_v33, %v221_v32  ;;  %v205_v36 = vld [vmem:[%s3507_s14 + $0x40] sm:$0xff]  ;;  %v206_v37 = vld [vmem:[%s3507_s14 + $0x48] sm:$0xff]  ;;  %v223_v39 = vld [vmem:[%s3507_s14 + $0xd0] sm:$0xff]  ;;  %1129 = vrot.lane.b32.xlu0 %v3519_v8, %s3474_s18 }
  0x1a   : > { %v3551_v24 = vpack.c.bf16 %v230_v22, %v229_v21  ;;  %5372 = vst [vmem:[#allocation9_spill] sm:$0xff] %v3559_v28  ;;  %v3577_v38 = vpack.c.bf16 %v206_v37, %v205_v36  ;;  %v224_v40 = vld [vmem:[%s3507_s14 + $0xd8] sm:$0xff]  ;;  %v207_v43 = vld [vmem:[%s3507_s14 + $0x50] sm:$0xff]  ;;  %v225_v46 = vld [vmem:[%s3507_s14 + $0xe0] sm:$0xff]  ;;  %1113 = vrot.lane.b32.xlu1 %v3529_v12, %s3474_s18 }
  0x1b   : > { %5373 = vst [vmem:[#allocation10_spill] sm:$0xff] %v3565_v31  ;;  %v352_v34 = vsel %vm293_vm0, %v3565_v31, 0  ;;  %5374 = vst [vmem:[#allocation11_spill] sm:$0xff] %v3571_v35  ;;  %v3583_v42 = vpack.c.bf16 %v224_v40, %v223_v39  ;;  %v208_v44 = vld [vmem:[%s3507_s14 + $0x58] sm:$0xff]  ;;  %v226_v47 = vld [vmem:[%s3507_s14 + $0xe8] sm:$0xff] }
  0x1c   : > { %5371 = vst [vmem:[#allocation8_spill] sm:$0xff] %v3551_v24  ;;  %2734 = vmatprep.mubr.msk.bf16.mxu0 %vm293_vm0, %v3551_v24  ;;  %5375 = vst [vmem:[#allocation12_spill] sm:$0xff] %v3577_v38  ;;  %v355_v41 = vsel %vm293_vm0, %v3577_v38, 0  ;;  %v3589_v45 = vpack.c.bf16 %v208_v44, %v207_v43  ;;  %v3595_v49 = vpack.c.bf16 %v226_v47, %v225_v46  ;;  %v209_v50 = vld [vmem:[%s3507_s14 + $0x60] sm:$0xff]  ;;  %v210_v51 = vld [vmem:[%s3507_s14 + $0x68] sm:$0xff] }
  0x1d   : > { %5376 = vst [vmem:[#allocation13_spill] sm:$0xff] %v3583_v42  ;;  %v3601_v52 = vpack.c.bf16 %v210_v51, %v209_v50  ;;  %v227_v53 = vld [vmem:[%s3507_s14 + $0xf0] sm:$0xff]  ;;  %v228_v54 = vld [vmem:[%s3507_s14 + $0xf8] sm:$0xff]  ;;  %v169_v2 = vld [vmem:[%s3537_s17 + $0x20] sm:$0xff]  ;;  %1131 = vrot.lane.b32.xlu0 %v3541_v16, %s3474_s18 }
  0x1e   : > { %5377 = vst [vmem:[#allocation14_spill] sm:$0xff] %v3589_v45  ;;  %v358_v48 = vsel %vm293_vm0, %v3589_v45, 0  ;;  %5378 = vst [vmem:[#allocation15_spill] sm:$0xff] %v3595_v49  ;;  %v3607_v56 = vpack.c.bf16 %v228_v54, %v227_v53  ;;  %v211_v57 = vld [vmem:[%s3507_s14 + $0x70] sm:$0xff]  ;;  %v212_v58 = vld [vmem:[%s3507_s14 + $0x78] sm:$0xff]  ;;  %v233_v5 = vmul.f32 0.5, %v169_v2  ;;  %1133 = vrot.lane.b32.xlu1 %v3559_v28, %s3474_s18 }
  0x1f   : > { %2721 = vmatpush3.bf16.xpose.msra.mxu0 %v346_v15  ;;  %5379 = vst [vmem:[#allocation16_spill] sm:$0xff] %v3601_v52  ;;  %v361_v55 = vsel %vm293_vm0, %v3601_v52, 0  ;;  %v3613_v59 = vpack.c.bf16 %v212_v58, %v211_v57  ;;  %v167_v61 = vld [vmem:[%s3537_s17 + $0x10] sm:$0xff]  ;;  %v168_v62 = vld [vmem:[%s3537_s17 + $0x18] sm:$0xff]  ;;  %v170_v4 = vld [vmem:[%s3537_s17 + $0x28] sm:$0xff] }
  0x20   : > { %3056 = vmatprep.subr.msk.bf16.mxu0 %vm293_vm0, %v3541_v16  ;;  %5380 = vst [vmem:[#allocation17_spill] sm:$0xff] %v3607_v56  ;;  %v231_v63 = vmul.f32 0.5, %v167_v61  ;;  %v232_v0 = vmul.f32 0.5, %v168_v62  ;;  %v234_v6 = vmul.f32 0.5, %v170_v4  ;;  %v171_v10 = vld [vmem:[%s3537_s17 + $0x30] sm:$0xff]  ;;  %v172_v11 = vld [vmem:[%s3537_s17 + $0x38] sm:$0xff] }
  0x21   : > { %5381 = vst [vmem:[#allocation18_spill] sm:$0xff] %v3613_v59  ;;  %v364_v60 = vsel %vm293_vm0, %v3613_v59, 0  ;;  %1115 = vrot.lane.b32.xlu0 %v3549_v23, %s3474_s18  ;;  %v235_v13 = vmul.f32 0.5, %v171_v10  ;;  %v236_v14 = vmul.f32 0.5, %v172_v11  ;;  %v173_v17 = vld [vmem:[%s3537_s17 + $0x40] sm:$0xff]  ;;  %v174_v18 = vld [vmem:[%s3537_s17 + $0x48] sm:$0xff] }
  0x22   : > { %v3623_v1 = vpack.c.bf16 %v232_v0, %v231_v63  ;;  %v3639_v9 = vpack.c.bf16 %v234_v6, %v233_v5  ;;  %1137 = vrot.lane.b32.xlu1 %v3583_v42, %s3474_s18  ;;  %v237_v19 = vmul.f32 0.5, %v173_v17  ;;  %v238_v20 = vmul.f32 0.5, %v174_v18  ;;  %v175_v22 = vld [vmem:[%s3537_s17 + $0x50] sm:$0xff]  ;;  %v176_v25 = vld [vmem:[%s3537_s17 + $0x58] sm:$0xff]  ;;  %v177_v30 = vld [vmem:[%s3537_s17 + $0x60] sm:$0xff] }
  0x23   : > { %v3655_v15 = vpack.c.bf16 %v236_v14, %v235_v13  ;;  %v239_v26 = vmul.f32 0.5, %v175_v22  ;;  %v178_v32 = vld [vmem:[%s3537_s17 + $0x68] sm:$0xff]  ;;  %v241_v33 = vmul.f32 0.5, %v177_v30  ;;  %v179_v37 = vld [vmem:[%s3537_s17 + $0x70] sm:$0xff]  ;;  %v180_v39 = vld [vmem:[%s3537_s17 + $0x78] sm:$0xff] }
  0x24   : > { %5382 = vst [vmem:[#allocation19_spill] sm:$0xff] %v3623_v1  ;;  %5383 = vst [vmem:[#allocation20_spill] sm:$0xff] %v3639_v9  ;;  %v3671_v21 = vpack.c.bf16 %v238_v20, %v237_v19  ;;  %v243_v40 = vmul.f32 0.5, %v179_v37  ;;  %v181_v44 = vld [vmem:[%s3537_s17 + $0x80] sm:$0xff]  ;;  %v182_v46 = vld [vmem:[%s3537_s17 + $0x88] sm:$0xff] }
  0x25   : > { %1117 = vrot.lane.b32.xlu0 %v3565_v31, %s3474_s18  ;;  %5384 = vst [vmem:[#allocation21_spill] sm:$0xff] %v3655_v15  ;;  %v245_v47 = vmul.f32 0.5, %v181_v44  ;;  %v183_v51 = vld [vmem:[%s3537_s17 + $0x90] sm:$0xff]  ;;  %v184_v53 = vld [vmem:[%s3537_s17 + $0x98] sm:$0xff]  ;;  %v185_v58 = vld [vmem:[%s3537_s17 + $0xa0] sm:$0xff] }
  0x26   : > { %1141 = vrot.lane.b32.xlu1 %v3607_v56, %s3474_s18  ;;  %5385 = vst [vmem:[#allocation22_spill] sm:$0xff] %v3671_v21  ;;  %v247_v54 = vmul.f32 0.5, %v183_v51  ;;  %v249_v61 = vmul.f32 0.5, %v185_v58  ;;  %v187_v0 = vld [vmem:[%s3537_s17 + $0xb0] sm:$0xff]  ;;  %v188_v2 = vld [vmem:[%s3537_s17 + $0xb8] sm:$0xff]  ;;  %v189_v10 = vld [vmem:[%s3537_s17 + $0xc0] sm:$0xff] }
  0x27   : > { %2723 = vmatpush3.bf16.xpose.msra.mxu0 %v349_v27  ;;  %v240_v27 = vmul.f32 0.5, %v176_v25  ;;  %v251_v4 = vmul.f32 0.5, %v187_v0  ;;  %v252_v5 = vmul.f32 0.5, %v188_v2  ;;  %v190_v11 = vld [vmem:[%s3537_s17 + $0xc8] sm:$0xff]  ;;  %v253_v13 = vmul.f32 0.5, %v189_v10  ;;  %v191_v18 = vld [vmem:[%s3537_s17 + $0xd0] sm:$0xff] }
  0x28   : > { %3057 = vmatprep.subr.msk.bf16.mxu0 %vm293_vm0, %v3559_v28  ;;  %v254_v14 = vmul.f32 0.5, %v190_v11  ;;  %v192_v19 = vld [vmem:[%s3537_s17 + $0xd8] sm:$0xff]  ;;  %v255_v20 = vmul.f32 0.5, %v191_v18 }
  0x29   : > { %1135 = vrot.lane.b32.xlu0 %v3571_v35, %s3474_s18  ;;  %v3683_v29 = vpack.c.bf16 %v240_v27, %v239_v26  ;;  %v3739_v6 = vpack.c.bf16 %v252_v5, %v251_v4  ;;  %v256_v22 = vmul.f32 0.5, %v192_v19  ;;  %v193_v26 = vld [vmem:[%s3537_s17 + $0xe0] sm:$0xff]  ;;  %v194_v27 = vld [vmem:[%s3537_s17 + $0xe8] sm:$0xff]  ;;  %v196_v37 = vld [vmem:[%s3537_s17 + $0xf8] sm:$0xff] }
  0x2a   : > { %1384 = vrot.lane.b32.xlu1 %v3512_v3, %s3475_s19  ;;  %v3747_v17 = vpack.c.bf16 %v254_v14, %v253_v13  ;;  %v257_v30 = vmul.f32 0.5, %v193_v26 }
  0x2b   : > { %5386 = vst [vmem:[#allocation23_spill] sm:$0xff] %v3683_v29  ;;  %5392 = vst [vmem:[#allocation29_spill] sm:$0xff] %v3739_v6  ;;  %v3755_v25 = vpack.c.bf16 %v256_v22, %v255_v20 }
  0x2c   : > { %5393 = vst [vmem:[#allocation30_spill] sm:$0xff] %v3747_v17 }
  0x2d   : > { %1119 = vrot.lane.b32.xlu0 %v3577_v38, %s3474_s18  ;;  %5394 = vst [vmem:[#allocation31_spill] sm:$0xff] %v3755_v25 }
  0x2e   : > { %1386 = vrot.lane.b32.xlu1 %v3519_v8, %s3475_s19 }
  0x2f   : > { %2725 = vmatpush3.bf16.xpose.msra.mxu0 %v352_v34  ;;  %v242_v34 = vmul.f32 0.5, %v178_v32  ;;  %v258_v32 = vmul.f32 0.5, %v194_v27 }
  0x30   : > { %3058 = vmatprep.subr.msk.bf16.mxu0 %vm293_vm0, %v3571_v35 }
  0x31   : > { %1121 = vrot.lane.b32.xlu0 %v3589_v45, %s3474_s18  ;;  %v3695_v36 = vpack.c.bf16 %v242_v34, %v241_v33  ;;  %v3763_v33 = vpack.c.bf16 %v258_v32, %v257_v30  ;;  %v195_v34 = vld [vmem:[%s3537_s17 + $0xf0] sm:$0xff] }
  0x33   : > { %5387 = vst [vmem:[#allocation24_spill] sm:$0xff] %v3695_v36  ;;  %5395 = vst [vmem:[#allocation32_spill] sm:$0xff] %v3763_v33 }
  0x35   : > { %1139 = vrot.lane.b32.xlu0 %v3595_v49, %s3474_s18 }
  0x37   : > { %2727 = vmatpush3.bf16.xpose.msra.mxu0 %v355_v41  ;;  %v244_v41 = vmul.f32 0.5, %v180_v39  ;;  %v259_v39 = vmul.f32 0.5, %v195_v34 }
  0x38   : > { %3059 = vmatprep.subr.msk.bf16.mxu0 %vm293_vm0, %v3583_v42 }
  0x39   : > { %1123 = vrot.lane.b32.xlu0 %v3601_v52, %s3474_s18  ;;  %v3707_v43 = vpack.c.bf16 %v244_v41, %v243_v40  ;;  %v260_v40 = vmul.f32 0.5, %v196_v37 }
  0x3b   : > { %5388 = vst [vmem:[#allocation25_spill] sm:$0xff] %v3707_v43  ;;  %v3771_v41 = vpack.c.bf16 %v260_v40, %v259_v39 }
  0x3d   : > { %1125 = vrot.lane.b32.xlu0 %v3613_v59, %s3474_s18  ;;  %5396 = vst [vmem:[#allocation33_spill] sm:$0xff] %v3771_v41 }
  0x3f   : > { %2729 = vmatpush3.bf16.xpose.msra.mxu0 %v358_v48  ;;  %v246_v48 = vmul.f32 0.5, %v182_v46 }
  0x40   : > { %3060 = vmatprep.subr.msk.bf16.mxu0 %vm293_vm0, %v3595_v49 }
  0x41   : > { %1368 = vrot.lane.b32.xlu0 %v3517_v7, %s3475_s19  ;;  %v3715_v50 = vpack.c.bf16 %v246_v48, %v245_v47 }
  0x43   : > { %5389 = vst [vmem:[#allocation26_spill] sm:$0xff] %v3715_v50 }
  0x45   : > { %1370 = vrot.lane.b32.xlu0 %v3529_v12, %s3475_s19 }
  0x47   : > { %2731 = vmatpush3.bf16.xpose.msra.mxu0 %v361_v55  ;;  %v248_v55 = vmul.f32 0.5, %v184_v53 }
  0x48   : > { %3061 = vmatprep.subr.msk.bf16.mxu0 %vm293_vm0, %v3607_v56 }
  0x49   : > { %v3723_v57 = vpack.c.bf16 %v248_v55, %v247_v54 }
  0x4b   : > { %5390 = vst [vmem:[#allocation27_spill] sm:$0xff] %v3723_v57 }
  0x4f   : > { %2733 = vmatpush3.bf16.xpose.msra.mxu0 %v364_v60  ;;  %v186_v60 = vld [vmem:[%s3537_s17 + $0xa8] sm:$0xff] }
  0x50   : > { %v250_v62 = vmul.f32 0.5, %v186_v60 }
  0x52   : > { %v3731_v63 = vpack.c.bf16 %v250_v62, %v249_v61 }
  0x54   : > { %5391 = vst [vmem:[#allocation28_spill] sm:$0xff] %v3731_v63 }
  0x56   : > { %2735 = vmatmul.mubr.msk.bf16.vlgmr.msra.gmra.mrb[0].mxu0 %vm293_vm0, %v3551_v24 }
  0x57   : > { %2736 = vmatprep.mubr.msk.bf16.mxu0 %vm293_vm0, %v3623_v1 }
  0x5e   : > { %2737 = vmatmul.mubr.msk.bf16.gmra.mrb[4].mxu0 %vm293_vm0, %v3623_v1 }
  0x5f   : > { %2738 = vmatprep.mubr.msk.bf16.mxu0 %vm293_vm0, %v3639_v9 }
  0x66   : > { %2739 = vmatmul.mubr.msk.bf16.gmra.mrb[8].mxu0 %vm293_vm0, %v3639_v9 }
  0x67   : > { %2740 = vmatprep.mubr.msk.bf16.mxu0 %vm293_vm0, %v3655_v15 }
  0x6e   : > { %2741 = vmatmul.mubr.msk.bf16.gmra.mrb[12].mxu0 %vm293_vm0, %v3655_v15 }
  0x6f   : > { %2742 = vmatprep.mubr.msk.bf16.mxu0 %vm293_vm0, %v3671_v21 }
  0x76   : > { %2743 = vmatmul.mubr.msk.bf16.gmra.mrb[16].mxu0 %vm293_vm0, %v3671_v21 }
  0x77   : > { %2744 = vmatprep.mubr.msk.bf16.mxu0 %vm293_vm0, %v3683_v29 }
  0x7e   : > { %2745 = vmatmul.mubr.msk.bf16.gmra.mrb[20].mxu0 %vm293_vm0, %v3683_v29 }
  0x7f   : > { %2746 = vmatprep.mubr.msk.bf16.mxu0 %vm293_vm0, %v3695_v36 }
  0x86   : > { %2747 = vmatmul.mubr.msk.bf16.gmra.mrb[24].mxu0 %vm293_vm0, %v3695_v36 }
  0x87   : > { %2748 = vmatprep.mubr.msk.bf16.mxu0 %vm293_vm0, %v3707_v43  ;;  %v1128_v44 = vpop.permute.xlu0 %1127 }
  0x88   : > { %v1112_v46 = vpop.permute.xlu1 %1111  ;;  %2766 = vmatprep.subr.bf16.mxu1 %v1128_v44 }
  0x89   : > { %2767 = vmatpush3.bf16.msra.mxu1 %v1112_v46 }
  0x8b   : > { %v1130_v47 = vpop.permute.xlu0 %1129 }
  0x8c   : > { %v1114_v48 = vpop.permute.xlu1 %1113  ;;  %2768 = vmatprep.subr.bf16.mxu1 %v1130_v47 }
  0x8d   : > { %2769 = vmatpush3.bf16.msra.mxu1 %v1114_v48 }
  0x8e   : > { %2749 = vmatmul.mubr.msk.bf16.gmra.mrb[28].mxu0 %vm293_vm0, %v3707_v43 }
  0x8f   : > { %2750 = vmatprep.mubr.msk.bf16.mxu0 %vm293_vm0, %v3715_v50  ;;  %v1132_v51 = vpop.permute.xlu0 %1131 }
  0x90   : > { %2770 = vmatprep.subr.bf16.mxu1 %v1132_v51  ;;  %v1134_v53 = vpop.permute.xlu1 %1133 }
  0x93   : > { %v1116_v54 = vpop.permute.xlu0 %1115 }
  0x94   : > { %2771 = vmatpush3.bf16.msra.mxu1 %v1116_v54  ;;  %v1138_v60 = vpop.permute.xlu1 %1137 }
  0x95   : > { %2772 = vmatprep.subr.bf16.mxu1 %v1134_v53 }
  0x96   : > { %2751 = vmatmul.mubr.msk.bf16.gmra.mrb[32].mxu0 %vm293_vm0, %v3715_v50 }
  0x97   : > { %2752 = vmatprep.mubr.msk.bf16.mxu0 %vm293_vm0, %v3723_v57  ;;  %v1118_v55 = vpop.permute.xlu0 %1117 }
  0x98   : > { %2773 = vmatpush3.bf16.msra.mxu1 %v1118_v55  ;;  %v1142_v4 = vpop.permute.xlu1 %1141 }
  0x9b   : > { %v1136_v58 = vpop.permute.xlu0 %1135 }
  0x9c   : > { %2774 = vmatprep.subr.bf16.mxu1 %v1136_v58  ;;  %v1385_v10 = vpop.permute.xlu1 %1384 }
  0x9e   : > { %2753 = vmatmul.mubr.msk.bf16.gmra.mrb[36].mxu0 %vm293_vm0, %v3723_v57 }
  0x9f   : > { %2754 = vmatprep.mubr.msk.bf16.mxu0 %vm293_vm0, %v3731_v63  ;;  %v1120_v61 = vpop.permute.xlu0 %1119 }
  0xa0   : > { %2775 = vmatpush3.bf16.msra.mxu1 %v1120_v61 }
  0xa1   : > { %2776 = vmatprep.subr.bf16.mxu1 %v1138_v60 }
  0xa3   : > { %v1122_v62 = vpop.permute.xlu0 %1121 }
  0xa4   : > { %2777 = vmatpush3.bf16.msra.mxu1 %v1122_v62 }
  0xa6   : > { %2755 = vmatmul.mubr.msk.bf16.gmra.mrb[40].mxu0 %vm293_vm0, %v3731_v63 }
  0xa7   : > { %2756 = vmatprep.mubr.msk.bf16.mxu0 %vm293_vm0, %v3739_v6  ;;  %v1140_v0 = vpop.permute.xlu0 %1139 }
  0xa8   : > { %2778 = vmatprep.subr.bf16.mxu1 %v1140_v0 }
  0xab   : > { %v1124_v2 = vpop.permute.xlu0 %1123 }
  0xac   : > { %2779 = vmatpush3.bf16.msra.mxu1 %v1124_v2 }
  0xad   : > { %2780 = vmatprep.subr.bf16.mxu1 %v1142_v4 }
  0xae   : > { %2757 = vmatmul.mubr.msk.bf16.gmra.mrb[44].mxu0 %vm293_vm0, %v3739_v6 }
  0xaf   : > { %2758 = vmatprep.mubr.msk.bf16.mxu0 %vm293_vm0, %v3747_v17  ;;  %v1126_v5 = vpop.permute.xlu0 %1125 }
  0xb0   : > { %2781 = vmatpush3.bf16.msra.mxu1 %v1126_v5 }
  0xb1   : > { %3062 = vmatprep.subr.msk.bf16.mxu1 %vm293_vm0, %v1385_v10 }
  0xb6   : > { %2759 = vmatmul.mubr.msk.bf16.gmra.mrb[48].mxu0 %vm293_vm0, %v3747_v17 }
  0xb7   : > { %2760 = vmatprep.mubr.msk.bf16.mxu0 %vm293_vm0, %v3755_v25 }
  0xbe   : > { %2761 = vmatmul.mubr.msk.bf16.gmra.mrb[52].mxu0 %vm293_vm0, %v3755_v25 }
  0xbf   : > { %2762 = vmatprep.mubr.msk.bf16.mxu0 %vm293_vm0, %v3763_v33 }
  0xc6   : > { %2763 = vmatmul.mubr.msk.bf16.gmra.mrb[56].mxu0 %vm293_vm0, %v3763_v33 }
  0xc7   : > { %2764 = vmatprep.mubr.msk.bf16.mxu0 %vm293_vm0, %v3771_v41 }
  0xce   : > { %2765 = vmatmul.mubr.msk.bf16.gmra.mrb[60].mxu0 %vm293_vm0, %v3771_v41 }
 0x129   : > { %v3780_v11 = vpop.f32.mrb[0].mxu0 }
 0x12a   : > { %v3782_v13 = vpop.f32.mrb[1].mxu0 }
 0x12b   : > { %v3784_v14 = vpop.f32.mrb[2].mxu0  ;;  %v583_v18 = vmax.f32 %v3780_v11, %v3782_v13 }
 0x12c   : > { %v3788_v19 = vpop.f32.mrb[3].mxu0 }
 0x12d   : > { %584 = vmax.xlane.f32.xlu0 %v583_v18  ;;  %v586_v20 = vmax.f32 %v3784_v14, %v3788_v19 }
 0x131   : > { %587 = vmax.xlane.f32.xlu0 %v586_v20  ;;  %v3792_v22 = vpop.f32.mrb[4].mxu0 }
 0x132   : > { %v3794_v26 = vpop.f32.mrb[5].mxu0 }
 0x133   : > { %v3796_v27 = vpop.f32.mrb[6].mxu0  ;;  %v589_v30 = vmax.f32 %v3792_v22, %v3794_v26 }
 0x134   : > { %v3800_v32 = vpop.f32.mrb[7].mxu0 }
 0x135   : > { %590 = vmax.xlane.f32.xlu1 %v589_v30  ;;  %v592_v34 = vmax.f32 %v3796_v27, %v3800_v32 }
 0x139   : > { %593 = vmax.xlane.f32.xlu1 %v592_v34  ;;  %v3804_v37 = vpop.f32.mrb[8].mxu0 }
 0x13a   : > { %v3806_v39 = vpop.f32.mrb[9].mxu0 }
 0x13b   : > { %v3808_v40 = vpop.f32.mrb[10].mxu0  ;;  %v595_v44 = vmax.f32 %v3804_v37, %v3806_v39 }
 0x13c   : > { %v3812_v46 = vpop.f32.mrb[11].mxu0 }
 0x13d   : > { %596 = vmax.xlane.f32.xlu0 %v595_v44  ;;  %v598_v47 = vmax.f32 %v3808_v40, %v3812_v46 }
 0x13f   : > { %599 = vmax.xlane.f32.xlu1 %v598_v47 }
 0x141   : > { %v3816_v48 = vpop.f32.mrb[12].mxu0 }
 0x142   : > { %v3818_v51 = vpop.f32.mrb[13].mxu0 }
 0x143   : > { %v3820_v53 = vpop.f32.mrb[14].mxu0  ;;  %v601_v54 = vmax.f32 %v3816_v48, %v3818_v51 }
 0x144   : > { %v3824_v55 = vpop.f32.mrb[15].mxu0 }
 0x145   : > { %602 = vmax.xlane.f32.xlu0 %v601_v54  ;;  %v604_v58 = vmax.f32 %v3820_v53, %v3824_v55 }
 0x147   : > { %605 = vmax.xlane.f32.xlu1 %v604_v58 }
 0x149   : > { %v3828_v60 = vpop.f32.mrb[16].mxu0 }
 0x14a   : > { %v3830_v61 = vpop.f32.mrb[17].mxu0 }
 0x14b   : > { %v3832_v62 = vpop.f32.mrb[18].mxu0  ;;  %v607_v0 = vmax.f32 %v3828_v60, %v3830_v61 }
 0x14c   : > { %v3836_v2 = vpop.f32.mrb[19].mxu0 }
 0x14d   : > { %608 = vmax.xlane.f32.xlu0 %v607_v0  ;;  %v610_v4 = vmax.f32 %v3832_v62, %v3836_v2 }
 0x14f   : > { %611 = vmax.xlane.f32.xlu1 %v610_v4 }
 0x151   : > { %v3840_v5 = vpop.f32.mrb[20].mxu0 }
 0x152   : > { %v3842_v10 = vpop.f32.mrb[21].mxu0 }
 0x153   : > { %v3844_v18 = vpop.f32.mrb[22].mxu0  ;;  %v613_v20 = vmax.f32 %v3840_v5, %v3842_v10 }
 0x154   : > { %v3848_v30 = vpop.f32.mrb[23].mxu0 }
 0x155   : > { %614 = vmax.xlane.f32.xlu0 %v613_v20  ;;  %v616_v34 = vmax.f32 %v3844_v18, %v3848_v30 }
 0x159   : > { %v3852_v44 = vpop.f32.mrb[24].mxu0 }
 0x15a   : > { %v3854_v47 = vpop.f32.mrb[25].mxu0 }
 0x15b   : > { %v3856_v54 = vpop.f32.mrb[26].mxu0  ;;  %v619_v58 = vmax.f32 %v3852_v44, %v3854_v47 }
 0x15c   : > { %v3860_v0 = vpop.f32.mrb[27].mxu0 }
 0x15d   : > { %v622_v4 = vmax.f32 %v3856_v54, %v3860_v0 }
 0x160   : > { %1388 = vrot.lane.b32.xlu1 %v3541_v16, %s3475_s19 }
 0x161   : > { %v3866_v20 = vpop.f32.mrb[28].mxu0 }
 0x162   : > { %v3868_v8 = vpop.f32.mrb[29].mxu0 }
 0x163   : > { %v3870_v12 = vpop.f32.mrb[30].mxu0  ;;  %v625_v3 = vmax.f32 %v3866_v20, %v3868_v8 }
 0x164   : > { %v3874_v7 = vpop.f32.mrb[31].mxu0 }
 0x165   : > { %v628_v41 = vmax.f32 %v3870_v12, %v3874_v7 }
 0x169   : > { %v3878_v33 = vpop.f32.mrb[32].mxu0 }
 0x16a   : > { %v3880_v25 = vpop.f32.mrb[33].mxu0 }
 0x16b   : > { %1372 = vrot.lane.b32.xlu0 %v3549_v23, %s3475_s19  ;;  %v3884_v16 = vpop.f32.mrb[34].mxu0  ;;  %v631_v17 = vmax.f32 %v3878_v33, %v3880_v25 }
 0x16c   : > { %v3888_v6 = vpop.f32.mrb[35].mxu0 }
 0x16d   : > { %v634_v63 = vmax.f32 %v3884_v16, %v3888_v6 }
 0x171   : > { %v3892_v57 = vpop.f32.mrb[36].mxu0 }
 0x172   : > { %v3894_v50 = vpop.f32.mrb[37].mxu0 }
 0x173   : > { %v3896_v43 = vpop.f32.mrb[38].mxu0  ;;  %v637_v36 = vmax.f32 %v3892_v57, %v3894_v50 }
 0x174   : > { %v3900_v23 = vpop.f32.mrb[39].mxu0 }
 0x175   : > { %v640_v29 = vmax.f32 %v3896_v43, %v3900_v23 }
 0x179   : > { %v3904_v21 = vpop.f32.mrb[40].mxu0 }
 0x17a   : > { %5397 = vst [vmem:[#allocation34_spill] sm:$0xff] %v3904_v21  ;;  %v3906_v15 = vpop.f32.mrb[41].mxu0 }
 0x17b   : > { %5398 = vst [vmem:[#allocation35_spill] sm:$0xff] %v3906_v15  ;;  %v3908_v9 = vpop.f32.mrb[42].mxu0  ;;  %v643_v1 = vmax.f32 %v3904_v21, %v3906_v15 }
 0x17c   : > { %5399 = vst [vmem:[#allocation36_spill] sm:$0xff] %v3908_v9  ;;  %v3912_v24 = vpop.f32.mrb[43].mxu0 }
 0x17d   : > { %5400 = vst [vmem:[#allocation37_spill] sm:$0xff] %v3912_v24  ;;  %v646_v56 = vmax.f32 %v3908_v9, %v3912_v24 }
 0x181   : > { %v3916_v59 = vpop.f32.mrb[44].mxu0 }
 0x182   : > { %v3918_v49 = vpop.f32.mrb[45].mxu0 }
 0x183   : > { %v3920_v52 = vpop.f32.mrb[46].mxu0  ;;  %v649_v42 = vmax.f32 %v3916_v59, %v3918_v49 }
 0x184   : > { %5401 = vst [vmem:[#allocation38_spill] sm:$0xff] %v3920_v52  ;;  %617 = vmax.xlane.f32.xlu1 %v616_v34  ;;  %v3924_v38 = vpop.f32.mrb[47].mxu0 }
 0x185   : > { %5402 = vst [vmem:[#allocation39_spill] sm:$0xff] %v3924_v38  ;;  %v652_v45 = vmax.f32 %v3920_v52, %v3924_v38 }
 0x188   : > { %623 = vmax.xlane.f32.xlu1 %v622_v4 }
 0x189   : > { %v3928_v35 = vpop.f32.mrb[48].mxu0 }
 0x18a   : > { %5403 = vst [vmem:[#allocation40_spill] sm:$0xff] %v3928_v35  ;;  %620 = vmax.xlane.f32.xlu0 %v619_v58  ;;  %v3930_v15 = vpop.f32.mrb[49].mxu0 }
 0x18b   : > { %5404 = vst [vmem:[#allocation41_spill] sm:$0xff] %v3930_v15  ;;  %v3932_v21 = vpop.f32.mrb[50].mxu0  ;;  %v655_v24 = vmax.f32 %v3928_v35, %v3930_v15 }
 0x18c   : > { %629 = vmax.xlane.f32.xlu1 %v628_v41  ;;  %v3936_v9 = vpop.f32.mrb[51].mxu0 }
 0x18d   : > { %v658_v34 = vmax.f32 %v3932_v21, %v3936_v9 }
 0x18e   : > { %626 = vmax.xlane.f32.xlu0 %v625_v3 }
 0x190   : > { %635 = vmax.xlane.f32.xlu1 %v634_v63 }
 0x191   : > { %v3940_v38 = vpop.f32.mrb[52].mxu0 }
 0x192   : > { %5405 = vst [vmem:[#allocation42_spill] sm:$0xff] %v3940_v38  ;;  %632 = vmax.xlane.f32.xlu0 %v631_v17  ;;  %v3942_v4 = vpop.f32.mrb[53].mxu0 }
 0x193   : > { %5406 = vst [vmem:[#allocation43_spill] sm:$0xff] %v3942_v4  ;;  %v3944_v58 = vpop.f32.mrb[54].mxu0  ;;  %v661_v52 = vmax.f32 %v3940_v38, %v3942_v4 }
 0x194   : > { %641 = vmax.xlane.f32.xlu1 %v640_v29  ;;  %v3948_v15 = vpop.f32.mrb[55].mxu0 }
 0x195   : > { %v664_v41 = vmax.f32 %v3944_v58, %v3948_v15 }
 0x196   : > { %638 = vmax.xlane.f32.xlu0 %v637_v36 }
 0x198   : > { %647 = vmax.xlane.f32.xlu1 %v646_v56 }
 0x199   : > { %v3952_v3 = vpop.f32.mrb[56].mxu0 }
 0x19a   : > { %5407 = vst [vmem:[#allocation44_spill] sm:$0xff] %v3952_v3  ;;  %644 = vmax.xlane.f32.xlu0 %v643_v1  ;;  %v3954_v63 = vpop.f32.mrb[57].mxu0 }
 0x19b   : > { %5408 = vst [vmem:[#allocation45_spill] sm:$0xff] %v3954_v63  ;;  %v3956_v17 = vpop.f32.mrb[58].mxu0  ;;  %v667_v35 = vmax.f32 %v3952_v3, %v3954_v63 }
 0x19c   : > { %5409 = vst [vmem:[#allocation46_spill] sm:$0xff] %v3956_v17  ;;  %650 = vmax.xlane.f32.xlu1 %v649_v42  ;;  %v3960_v4 = vpop.f32.mrb[59].mxu0 }
 0x19d   : > { %5410 = vst [vmem:[#allocation47_spill] sm:$0xff] %v3960_v4  ;;  %v670_v29 = vmax.f32 %v3956_v17, %v3960_v4  ;;  %v3982_v4 = vpop.permute.xlu1 %1386 }
 0x19e   : > { %659 = vmax.xlane.f32.xlu0 %v658_v34 }
 0x1a0   : > { %653 = vmax.xlane.f32.xlu1 %v652_v45  ;;  %v3976_v45 = vpop.permute.xlu0 %1368 }
 0x1a1   : > { %v3964_v36 = vpop.f32.mrb[60].mxu0 }
 0x1a2   : > { %5411 = vst [vmem:[#allocation48_spill] sm:$0xff] %v3964_v36  ;;  %665 = vmax.xlane.f32.xlu0 %v664_v41  ;;  %v3966_v56 = vpop.f32.mrb[61].mxu0 }
 0x1a3   : > { %5412 = vst [vmem:[#allocation49_spill] sm:$0xff] %v3966_v56  ;;  %v673_v1 = vmax.f32 %v3964_v36, %v3966_v56  ;;  %v3970_v38 = vpop.f32.mrb[62].mxu0 }
 0x1a4   : > { %656 = vmax.xlane.f32.xlu1 %v655_v24  ;;  %v3972_v63 = vpop.f32.mrb[63].mxu0  ;;  %v3978_v34 = vpop.permute.xlu0 %1370 }
 0x1a5   : > { %v676_v42 = vmax.f32 %v3970_v38, %v3972_v63  ;;  %5413 = vst [vmem:[#allocation50_spill] sm:$0xff] %v3978_v34 }
 0x1a6   : > { %671 = vmax.xlane.f32.xlu0 %v670_v29 }
 0x1a8   : > { %662 = vmax.xlane.f32.xlu1 %v661_v52 }
 0x1aa   : > { %674 = vmax.xlane.f32.xlu0 %v673_v1 }
 0x1ac   : > { %668 = vmax.xlane.f32.xlu1 %v667_v35 }
 0x1b0   : > { %677 = vmax.xlane.f32.xlu1 %v676_v42 }
 0x1ba   : > { %v585_v41 = vpop.xlane.xlu0 %584 }
 0x1bb   : > { %v679_v56 = vsub.f32 %v3780_v11, %v585_v41  ;;  %v680_v3 = vsub.f32 %v3782_v13, %v585_v41 }
 0x1bd   : > { %v743_v24 = vmul.f32 1.442695, %v679_v56  ;;  %v745_v36 = vmul.f32 1.442695, %v680_v3 }
 0x1be   : > { %v588_v17 = vpop.xlane.xlu0 %587 }
 0x1bf   : > { %3082 = vpow2.f32 %v743_v24  ;;  %v681_v52 = vsub.f32 %v3784_v14, %v588_v17  ;;  %v682_v35 = vsub.f32 %v3788_v19, %v588_v17 }
 0x1c0   : > { %3084 = vpow2.f32 %v745_v36 }
 0x1c1   : > { %v747_v29 = vmul.f32 1.442695, %v681_v52  ;;  %v749_v1 = vmul.f32 1.442695, %v682_v35 }
 0x1c2   : > { %v591_v42 = vpop.xlane.xlu1 %590 }
 0x1c3   : > { %3086 = vpow2.f32 %v747_v29  ;;  %v683_v34 = vsub.f32 %v3792_v22, %v591_v42  ;;  %v684_v11 = vsub.f32 %v3794_v26, %v591_v42 }
 0x1c4   : > { %3088 = vpow2.f32 %v749_v1 }
 0x1c5   : > { %v751_v13 = vmul.f32 1.442695, %v683_v34  ;;  %v753_v3 = vmul.f32 1.442695, %v684_v11 }
 0x1c6   : > { %v594_v56 = vpop.xlane.xlu1 %593 }
 0x1c7   : > { %3090 = vpow2.f32 %v751_v13  ;;  %v685_v41 = vsub.f32 %v3796_v27, %v594_v56  ;;  %v686_v14 = vsub.f32 %v3800_v32, %v594_v56 }
 0x1c8   : > { %3092 = vpow2.f32 %v753_v3 }
 0x1c9   : > { %v3990_v19 = vpop.eup %3082  ;;  %v755_v17 = vmul.f32 1.442695, %v685_v41  ;;  %v757_v36 = vmul.f32 1.442695, %v686_v14 }
 0x1ca   : > { %v3992_v24 = vpop.eup %3084  ;;  %v597_v52 = vpop.xlane.xlu0 %596 }
 0x1cb   : > { %3094 = vpow2.f32 %v755_v17  ;;  %v687_v22 = vsub.f32 %v3804_v37, %v597_v52  ;;  %v688_v26 = vsub.f32 %v3806_v39, %v597_v52  ;;  %v871_v34 = vadd.f32 %v3992_v24, %v3990_v19 }
 0x1cc   : > { %3096 = vpow2.f32 %v757_v36  ;;  %v600_v27 = vpop.xlane.xlu1 %599 }
 0x1cd   : > { %v3998_v35 = vpop.eup %3086  ;;  %v759_v32 = vmul.f32 1.442695, %v687_v22  ;;  %v761_v29 = vmul.f32 1.442695, %v688_v26  ;;  %v689_v1 = vsub.f32 %v3808_v40, %v600_v27  ;;  %v690_v42 = vsub.f32 %v3812_v46, %v600_v27  ;;  %872 = vadd.xlane.f32.xlu0 %v871_v34 }
 0x1ce   : > { %v4002_v11 = vpop.eup %3088 }
 0x1cf   : > { %3098 = vpow2.f32 %v759_v32  ;;  %v763_v37 = vmul.f32 1.442695, %v689_v1  ;;  %v765_v13 = vmul.f32 1.442695, %v690_v42  ;;  %v874_v39 = vadd.f32 %v4002_v11, %v3998_v35 }
 0x1d0   : > { %3100 = vpow2.f32 %v761_v29 }
 0x1d1   : > { %v4006_v3 = vpop.eup %3090  ;;  %3102 = vpow2.f32 %v763_v37  ;;  %875 = vadd.xlane.f32.xlu1 %v874_v39 }
 0x1d2   : > { %v4008_v56 = vpop.eup %3092  ;;  %3104 = vpow2.f32 %v765_v13  ;;  %v603_v40 = vpop.xlane.xlu0 %602 }
 0x1d3   : > { %v691_v46 = vsub.f32 %v3816_v48, %v603_v40  ;;  %v692_v41 = vsub.f32 %v3818_v51, %v603_v40  ;;  %v877_v14 = vadd.f32 %v4008_v56, %v4006_v3 }
 0x1d4   : > { %v606_v17 = vpop.xlane.xlu1 %605 }
 0x1d5   : > { %v4014_v36 = vpop.eup %3094  ;;  %v767_v52 = vmul.f32 1.442695, %v691_v46  ;;  %v769_v22 = vmul.f32 1.442695, %v692_v41  ;;  %v693_v26 = vsub.f32 %v3820_v53, %v606_v17  ;;  %v694_v34 = vsub.f32 %v3824_v55, %v606_v17  ;;  %878 = vadd.xlane.f32.xlu1 %v877_v14 }
 0x1d6   : > { %v4018_v27 = vpop.eup %3096 }
 0x1d7   : > { %3106 = vpow2.f32 %v767_v52  ;;  %v771_v32 = vmul.f32 1.442695, %v693_v26  ;;  %v773_v48 = vmul.f32 1.442695, %v694_v34  ;;  %v880_v51 = vadd.f32 %v4018_v27, %v4014_v36 }
 0x1d8   : > { %3108 = vpow2.f32 %v769_v22 }
 0x1d9   : > { %v4022_v29 = vpop.eup %3098  ;;  %3110 = vpow2.f32 %v771_v32  ;;  %881 = vadd.xlane.f32.xlu1 %v880_v51 }
 0x1da   : > { %v4024_v1 = vpop.eup %3100  ;;  %3112 = vpow2.f32 %v773_v48  ;;  %v609_v53 = vpop.xlane.xlu0 %608 }
 0x1db   : > { %v4026_v42 = vpop.eup %3102  ;;  %v695_v55 = vsub.f32 %v3828_v60, %v609_v53  ;;  %v696_v37 = vsub.f32 %v3830_v61, %v609_v53  ;;  %v883_v13 = vadd.f32 %v4024_v1, %v4022_v29 }
 0x1dc   : > { %v4032_v39 = vpop.eup %3104  ;;  %v612_v40 = vpop.xlane.xlu1 %611 }
 0x1dd   : > { %v775_v46 = vmul.f32 1.442695, %v695_v55  ;;  %v777_v41 = vmul.f32 1.442695, %v696_v37  ;;  %v697_v14 = vsub.f32 %v3832_v62, %v612_v40  ;;  %v698_v17 = vsub.f32 %v3836_v2, %v612_v40  ;;  %884 = vadd.xlane.f32.xlu1 %v883_v13 }
 0x1de   : > { %v886_v60 = vadd.f32 %v4032_v39, %v4026_v42 }
 0x1df   : > { %3114 = vpow2.f32 %v775_v46  ;;  %v779_v52 = vmul.f32 1.442695, %v697_v14  ;;  %v781_v22 = vmul.f32 1.442695, %v698_v17 }
 0x1e0   : > { %3116 = vpow2.f32 %v777_v41 }
 0x1e1   : > { %v4038_v61 = vpop.eup %3106  ;;  %3118 = vpow2.f32 %v779_v52  ;;  %887 = vadd.xlane.f32.xlu1 %v886_v60 }
 0x1e2   : > { %v4040_v26 = vpop.eup %3108  ;;  %3120 = vpow2.f32 %v781_v22  ;;  %v615_v34 = vpop.xlane.xlu0 %614 }
 0x1e3   : > { %v4042_v32 = vpop.eup %3110  ;;  %v699_v62 = vsub.f32 %v3840_v5, %v615_v34  ;;  %v700_v2 = vsub.f32 %v3842_v10, %v615_v34  ;;  %v889_v48 = vadd.f32 %v4040_v26, %v4038_v61  ;;  %v4070_v22 = vpop.permute.xlu1 %1388 }
 0x1e4   : > { %v4048_v51 = vpop.eup %3112 }
 0x1e5   : > { %v783_v53 = vmul.f32 1.442695, %v699_v62  ;;  %v785_v55 = vmul.f32 1.442695, %v700_v2  ;;  %890 = vadd.xlane.f32.xlu1 %v889_v48  ;;  %v892_v37 = vadd.f32 %v4048_v51, %v4042_v32 }
 0x1e6   : > { %v4074_v2 = vpop.permute.xlu0 %1372 }
 0x1e7   : > { %3122 = vpow2.f32 %v783_v53 }
 0x1e8   : > { %3124 = vpow2.f32 %v785_v55 }
 0x1e9   : > { %v4052_v13 = vpop.eup %3114  ;;  %893 = vadd.xlane.f32.xlu1 %v892_v37 }
 0x1ea   : > { %v4054_v40 = vpop.eup %3116 }
 0x1eb   : > { %v4056_v5 = vpop.eup %3118  ;;  %v895_v10 = vadd.f32 %v4054_v40, %v4052_v13 }
 0x1ec   : > { %5414 = vst [vmem:[#allocation51_spill] sm:$0xff] %v4056_v5  ;;  %v4060_v46 = vpop.eup %3120 }
 0x1ed   : > { %896 = vadd.xlane.f32.xlu0 %v895_v10  ;;  %v898_v41 = vadd.f32 %v4060_v46, %v4056_v5 }
 0x1f1   : > { %v4064_v14 = vpop.eup %3122  ;;  %899 = vadd.xlane.f32.xlu0 %v898_v41 }
 0x1f2   : > { %5415 = vst [vmem:[#allocation52_spill] sm:$0xff] %v4064_v14  ;;  %v4066_v17 = vpop.eup %3124 }
 0x1f3   : > { %5416 = vst [vmem:[#allocation53_spill] sm:$0xff] %v4066_v17  ;;  %v901_v52 = vadd.f32 %v4066_v17, %v4064_v14 }
 0x1f5   : > { %902 = vadd.xlane.f32.xlu0 %v901_v52 }
 0x211   : > { %v618_v60 = vpop.xlane.xlu1 %617 }
 0x212   : > { %v701_v34 = vsub.f32 %v3844_v18, %v618_v60  ;;  %v702_v62 = vsub.f32 %v3848_v30, %v618_v60 }
 0x214   : > { %v787_v48 = vmul.f32 1.442695, %v701_v34  ;;  %v789_v53 = vmul.f32 1.442695, %v702_v62 }
 0x215   : > { %v624_v55 = vpop.xlane.xlu1 %623 }
 0x216   : > { %3126 = vpow2.f32 %v787_v48  ;;  %v705_v37 = vsub.f32 %v3856_v54, %v624_v55  ;;  %v706_v10 = vsub.f32 %v3860_v0, %v624_v55 }
 0x217   : > { %3128 = vpow2.f32 %v789_v53  ;;  %v621_v41 = vpop.xlane.xlu0 %620 }
 0x218   : > { %v795_v52 = vmul.f32 1.442695, %v705_v37  ;;  %v797_v14 = vmul.f32 1.442695, %v706_v10  ;;  %v703_v17 = vsub.f32 %v3852_v44, %v621_v41  ;;  %v704_v18 = vsub.f32 %v3854_v47, %v621_v41 }
 0x219   : > { %v630_v5 = vpop.xlane.xlu1 %629 }
 0x21a   : > { %3130 = vpow2.f32 %v795_v52  ;;  %v791_v30 = vmul.f32 1.442695, %v703_v17  ;;  %v793_v60 = vmul.f32 1.442695, %v704_v18  ;;  %v709_v34 = vsub.f32 %v3870_v12, %v630_v5 }
 0x21b   : > { %3132 = vpow2.f32 %v797_v14  ;;  %v710_v62 = vsub.f32 %v3874_v7, %v630_v5  ;;  %v627_v54 = vpop.xlane.xlu0 %626 }
 0x21c   : > { %3134 = vpow2.f32 %v791_v30  ;;  %v803_v0 = vmul.f32 1.442695, %v709_v34  ;;  %v707_v48 = vsub.f32 %v3866_v20, %v627_v54  ;;  %v708_v53 = vsub.f32 %v3868_v8, %v627_v54 }
 0x21d   : > { %3136 = vpow2.f32 %v793_v60  ;;  %v805_v44 = vmul.f32 1.442695, %v710_v62  ;;  %v636_v62 = vpop.xlane.xlu1 %635 }
 0x21e   : > { %3138 = vpow2.f32 %v803_v0  ;;  %v799_v47 = vmul.f32 1.442695, %v707_v48  ;;  %v801_v55 = vmul.f32 1.442695, %v708_v53 }
 0x21f   : > { %3140 = vpow2.f32 %v805_v44  ;;  %v633_v17 = vpop.xlane.xlu0 %632 }
 0x220   : > { %v4084_v37 = vpop.eup %3126  ;;  %3142 = vpow2.f32 %v799_v47  ;;  %v711_v12 = vsub.f32 %v3878_v33, %v633_v17  ;;  %v712_v7 = vsub.f32 %v3880_v25, %v633_v17 }
 0x221   : > { %v4088_v5 = vpop.eup %3128  ;;  %3144 = vpow2.f32 %v801_v55  ;;  %v642_v47 = vpop.xlane.xlu1 %641 }
 0x222   : > { %v807_v20 = vmul.f32 1.442695, %v711_v12  ;;  %v809_v14 = vmul.f32 1.442695, %v712_v7  ;;  %v904_v8 = vadd.f32 %v4088_v5, %v4084_v37 }
 0x223   : > { %v639_v12 = vpop.xlane.xlu0 %638 }
 0x224   : > { %v4092_v10 = vpop.eup %3130  ;;  %3146 = vpow2.f32 %v807_v20  ;;  %905 = vadd.xlane.f32.xlu1 %v904_v8  ;;  %v713_v8 = vsub.f32 %v3884_v16, %v636_v62  ;;  %v5424_v16 = vld [vmem:[#allocation36_spill] sm:$0xff] }
 0x225   : > { %5417 = vst [vmem:[#allocation54_spill] sm:$0xff] %v4092_v10  ;;  %v4094_v41 = vpop.eup %3132  ;;  %3148 = vpow2.f32 %v809_v14  ;;  %v648_v17 = vpop.xlane.xlu1 %647 }
 0x226   : > { %v4096_v52 = vpop.eup %3134  ;;  %v910_v25 = vadd.f32 %v4094_v41, %v4092_v10  ;;  %v5427_v10 = vld [vmem:[#allocation35_spill] sm:$0xff] }
 0x227   : > { %v4098_v33 = vpop.eup %3136  ;;  %v645_v20 = vpop.xlane.xlu0 %644 }
 0x228   : > { %v4102_v18 = vpop.eup %3138  ;;  %911 = vadd.xlane.f32.xlu1 %v910_v25  ;;  %v907_v60 = vadd.f32 %v4098_v33, %v4096_v52 }
 0x229   : > { %5418 = vst [vmem:[#allocation55_spill] sm:$0xff] %v4102_v18  ;;  %v4104_v30 = vpop.eup %3140  ;;  %v651_v7 = vpop.xlane.xlu1 %650 }
 0x22a   : > { %5419 = vst [vmem:[#allocation56_spill] sm:$0xff] %v4104_v30  ;;  %v4108_v34 = vpop.eup %3142  ;;  %908 = vadd.xlane.f32.xlu0 %v907_v60  ;;  %v916_v0 = vadd.f32 %v4104_v30, %v4102_v18  ;;  %v714_v60 = vsub.f32 %v3888_v6, %v636_v62  ;;  %v811_v18 = vmul.f32 1.442695, %v713_v8  ;;  %v721_v30 = vsub.f32 %v5424_v16, %v648_v17  ;;  %v5425_v62 = vld [vmem:[#allocation37_spill] sm:$0xff] }
 0x22b   : > { %5420 = vst [vmem:[#allocation57_spill] sm:$0xff] %v4108_v34  ;;  %v4110_v54 = vpop.eup %3144  ;;  %v660_v25 = vpop.xlane.xlu0 %659 }
 0x22c   : > { %5421 = vst [vmem:[#allocation58_spill] sm:$0xff] %v4110_v54  ;;  %917 = vadd.xlane.f32.xlu1 %v916_v0  ;;  %v913_v48 = vadd.f32 %v4110_v54, %v4108_v34  ;;  %v717_v0 = vsub.f32 %v3896_v43, %v642_v47  ;;  %v716_v34 = vsub.f32 %v3894_v50, %v639_v12  ;;  %3150 = vpow2.f32 %v811_v18 }
 0x22d   : > { %v654_v14 = vpop.xlane.xlu1 %653  ;;  %v722_v43 = vsub.f32 %v5425_v62, %v648_v17  ;;  %v827_v50 = vmul.f32 1.442695, %v721_v30  ;;  %v729_v18 = vsub.f32 %v3932_v21, %v660_v25 }
 0x22e   : > { %v4116_v53 = vpop.eup %3146  ;;  %914 = vadd.xlane.f32.xlu0 %v913_v48  ;;  %v718_v48 = vsub.f32 %v3900_v23, %v642_v47  ;;  %v5426_v47 = vld [vmem:[#allocation34_spill] sm:$0xff] }
 0x22f   : > { %5422 = vst [vmem:[#allocation59_spill] sm:$0xff] %v4116_v53  ;;  %v4118_v44 = vpop.eup %3148  ;;  %v666_v54 = vpop.xlane.xlu0 %665  ;;  %v719_v8 = vsub.f32 %v5426_v47, %v645_v20 }
 0x230   : > { %5423 = vst [vmem:[#allocation60_spill] sm:$0xff] %v4118_v44  ;;  %v919_v55 = vadd.f32 %v4118_v44, %v4116_v53  ;;  %v813_v44 = vmul.f32 1.442695, %v714_v60  ;;  %v821_v6 = vmul.f32 1.442695, %v718_v48  ;;  %v720_v60 = vsub.f32 %v5427_v10, %v645_v20  ;;  %v5428_v10 = vld [vmem:[#allocation38_spill] sm:$0xff] }
 0x231   : > { %v4129_v53 = vpop.xlane.xlu1 %656  ;;  %v724_v48 = vsub.f32 %v3918_v49, %v651_v7  ;;  %v823_v17 = vmul.f32 1.442695, %v719_v8  ;;  %v725_v30 = vsub.f32 %v5428_v10, %v654_v14  ;;  %v5429_v20 = vld [vmem:[#allocation39_spill] sm:$0xff]  ;;  %v733_v49 = vsub.f32 %v3944_v58, %v666_v54  ;;  %v5430_v8 = vld [vmem:[#allocation40_spill] sm:$0xff] }
 0x232   : > { %920 = vadd.xlane.f32.xlu0 %v919_v55  ;;  %v715_v55 = vsub.f32 %v3892_v57, %v639_v12  ;;  %3152 = vpow2.f32 %v813_v44  ;;  %v817_v57 = vmul.f32 1.442695, %v716_v34  ;;  %v723_v12 = vsub.f32 %v3916_v59, %v651_v7 }
 0x233   : > { %v825_v44 = vmul.f32 1.442695, %v720_v60  ;;  %v730_v34 = vsub.f32 %v3936_v9, %v660_v25  ;;  %v833_v59 = vmul.f32 1.442695, %v724_v48  ;;  %v726_v16 = vsub.f32 %v5429_v20, %v654_v14 }
 0x234   : > { %v815_v23 = vmul.f32 1.442695, %v715_v55  ;;  %v672_v55 = vpop.xlane.xlu0 %671  ;;  %v835_v9 = vmul.f32 1.442695, %v725_v30  ;;  %v734_v25 = vsub.f32 %v3948_v15, %v666_v54  ;;  %v851_v58 = vmul.f32 1.442695, %v733_v49 }
 0x235   : > { %v845_v21 = vmul.f32 1.442695, %v730_v34  ;;  %v837_v14 = vmul.f32 1.442695, %v726_v16  ;;  %v5433_v34 = vld [vmem:[#allocation47_spill] sm:$0xff] }
 0x236   : > { %v4149_v62 = vpop.eup %3150  ;;  %v853_v54 = vmul.f32 1.442695, %v734_v25 }
 0x23d   : > { %1390 = vrot.lane.b32.xlu1 %v3559_v28, %s3475_s19  ;;  %v819_v28 = vmul.f32 1.442695, %v717_v0  ;;  %v829_v0 = vmul.f32 1.442695, %v722_v43  ;;  %v4152_v43 = vpop.xlane.xlu0 %674 }
 0x23f   : > { %3154 = vpow2.f32 %v819_v28  ;;  %v831_v28 = vmul.f32 1.442695, %v723_v12 }
 0x240   : > { %3156 = vpow2.f32 %v821_v6  ;;  %v843_v6 = vmul.f32 1.442695, %v729_v18 }
 0x241   : > { %3158 = vpow2.f32 %v815_v23  ;;  %v4154_v23 = vpop.eup %3152 }
 0x242   : > { %3160 = vpow2.f32 %v817_v57  ;;  %v727_v57 = vsub.f32 %v5430_v8, %v4129_v53 }
 0x243   : > { %3162 = vpow2.f32 %v827_v50  ;;  %v5431_v50 = vld [vmem:[#allocation41_spill] sm:$0xff] }
 0x244   : > { %3164 = vpow2.f32 %v829_v0  ;;  %v728_v12 = vsub.f32 %v5431_v50, %v4129_v53  ;;  %v5432_v0 = vld [vmem:[#allocation46_spill] sm:$0xff]  ;;  %v839_v30 = vmul.f32 1.442695, %v727_v57  ;;  %v5438_v57 = vld [vmem:[#allocation48_spill] sm:$0xff] }
 0x245   : > { %3166 = vpow2.f32 %v823_v17  ;;  %v737_v48 = vsub.f32 %v5432_v0, %v672_v55  ;;  %v5435_v53 = vld [vmem:[#allocation42_spill] sm:$0xff]  ;;  %v739_v50 = vsub.f32 %v5438_v57, %v4152_v43 }
 0x246   : > { %3168 = vpow2.f32 %v825_v44  ;;  %v841_v16 = vmul.f32 1.442695, %v728_v12  ;;  %v922_v12 = vadd.f32 %v4154_v23, %v4149_v62 }
 0x247   : > { %3170 = vpow2.f32 %v831_v28  ;;  %v738_v28 = vsub.f32 %v5433_v34, %v672_v55  ;;  %v859_v49 = vmul.f32 1.442695, %v737_v48 }
 0x248   : > { %1374 = vrot.lane.b32.xlu0 %v3565_v31, %s3475_s19  ;;  %v4139_v31 = vpop.xlane.xlu1 %662  ;;  %3172 = vpow2.f32 %v833_v59 }
 0x249   : > { %v4156_v47 = vpop.eup %3154  ;;  %3174 = vpow2.f32 %v843_v6  ;;  %v731_v59 = vsub.f32 %v5435_v53, %v4139_v31 }
 0x24a   : > { %v4160_v60 = vpop.eup %3156  ;;  %3176 = vpow2.f32 %v845_v21  ;;  %v5437_v21 = vld [vmem:[#allocation43_spill] sm:$0xff] }
 0x24b   : > { %v4164_v15 = vpop.eup %3158  ;;  %3178 = vpow2.f32 %v835_v9  ;;  %v732_v9 = vsub.f32 %v5437_v21, %v4139_v31  ;;  %v847_v8 = vmul.f32 1.442695, %v731_v59  ;;  %v5439_v31 = vld [vmem:[#allocation44_spill] sm:$0xff]  ;;  %v863_v21 = vmul.f32 1.442695, %v739_v50 }
 0x24c   : > { %v4147_v7 = vpop.xlane.xlu1 %668  ;;  %v4169_v44 = vpop.eup %3160  ;;  %3180 = vpow2.f32 %v837_v14  ;;  %v861_v14 = vmul.f32 1.442695, %v738_v28 }
 0x24d   : > { %v4172_v10 = vpop.eup %3162  ;;  %3182 = vpow2.f32 %v851_v58  ;;  %v735_v0 = vsub.f32 %v5439_v31, %v4147_v7 }
 0x24e   : > { %5434 = vst [vmem:[#allocation36_spill] sm:$0xff] %v4172_v10  ;;  %v4176_v20 = vpop.eup %3164 }
 0x24f   : > { %v4178_v6 = vpop.eup %3166  ;;  %v855_v57 = vmul.f32 1.442695, %v735_v0 }
 0x250   : > { %v4167_v17 = vpop.xlane.xlu1 %677  ;;  %5436 = vst [vmem:[#allocation37_spill] sm:$0xff] %v4178_v6  ;;  %v4182_v55 = vpop.eup %3168 }
 0x251   : > { %v4184_v58 = vpop.eup %3170 }
 0x25a   : > { %v873_v18 = vpop.xlane.xlu0 %872 }
 0x25b   : > { %3184 = vrcp.f32 %v873_v18  ;;  %v849_v18 = vmul.f32 1.442695, %v732_v9 }
 0x25c   : > { %3186 = vpow2.f32 %v853_v54  ;;  %v4190_v54 = vpop.eup %3172 }
 0x25d   : > { %v4194_v48 = vpop.eup %3174 }
 0x25e   : > { %v876_v25 = vpop.xlane.xlu1 %875  ;;  %v4196_v28 = vpop.eup %3176 }
 0x25f   : > { %3188 = vrcp.f32 %v876_v25  ;;  %v4200_v59 = vpop.eup %3178 }
 0x260   : > { %3190 = vpow2.f32 %v839_v30  ;;  %v5440_v30 = vld [vmem:[#allocation45_spill] sm:$0xff]  ;;  %v4204_v25 = vpop.eup %3180 }
 0x261   : > { %3192 = vpow2.f32 %v841_v16  ;;  %923 = vadd.xlane.f32.xlu1 %v922_v12  ;;  %v736_v53 = vsub.f32 %v5440_v30, %v4147_v7  ;;  %v928_v16 = vadd.f32 %v4160_v60, %v4156_v47  ;;  %v4208_v12 = vpop.eup %3182  ;;  %v925_v7 = vadd.f32 %v4169_v44, %v4164_v15 }
 0x262   : > { %3194 = vpow2.f32 %v859_v49  ;;  %v879_v34 = vpop.xlane.xlu1 %878  ;;  %v5441_v49 = vld [vmem:[#allocation49_spill] sm:$0xff]  ;;  %v741_v30 = vsub.f32 %v3970_v38, %v4167_v17 }
 0x263   : > { %3196 = vpow2.f32 %v861_v14  ;;  %v740_v9 = vsub.f32 %v5441_v49, %v4152_v43  ;;  %v857_v50 = vmul.f32 1.442695, %v736_v53  ;;  %v934_v43 = vadd.f32 %v4176_v20, %v4172_v10 }
 0x264   : > { %3198 = vpow2.f32 %v847_v8  ;;  %v931_v53 = vadd.f32 %v4182_v55, %v4178_v6 }
 0x265   : > { %3200 = vrcp.f32 %v879_v34  ;;  %929 = vadd.xlane.f32.xlu1 %v928_v16  ;;  %v3185_v8 = vpop.eup %3184  ;;  %v742_v34 = vsub.f32 %v3972_v63, %v4167_v17  ;;  %v867_v63 = vmul.f32 1.442695, %v741_v30  ;;  %v940_v17 = vadd.f32 %v4204_v25, %v4200_v59 }
 0x266   : > { %3202 = vpow2.f32 %v849_v18  ;;  %v882_v14 = vpop.xlane.xlu1 %881  ;;  %v4212_v31 = vpop.eup %3186  ;;  %v865_v18 = vmul.f32 1.442695, %v740_v9  ;;  %v1000_v49 = vmul.f32 %v3185_v8, %v3992_v24 }
 0x267   : > { %3204 = vrcp.f32 %v882_v14  ;;  %926 = vadd.xlane.f32.xlu0 %v925_v7  ;;  %v999_v14 = vmul.f32 %v3185_v8, %v3990_v19  ;;  %v869_v24 = vmul.f32 1.442695, %v742_v34  ;;  %v946_v34 = vadd.f32 %v4196_v28, %v4194_v48 }
 0x268   : > { %3206 = vpow2.f32 %v863_v21 }
 0x269   : > { %v3189_v0 = vpop.eup %3188  ;;  %3208 = vpow2.f32 %v855_v57  ;;  %935 = vadd.xlane.f32.xlu1 %v934_v43 }
 0x26a   : > { %v4222_v16 = vpop.eup %3190  ;;  %v885_v21 = vpop.xlane.xlu1 %884  ;;  %v1002_v38 = vmul.f32 %v3189_v0, %v4002_v11  ;;  %v1001_v7 = vmul.f32 %v3189_v0, %v3998_v35  ;;  %3210 = vpow2.f32 %v857_v50  ;;  %v937_v35 = vadd.f32 %v4190_v54, %v4184_v58 }
 0x26b   : > { %v4228_v9 = vpop.eup %3192  ;;  %932 = vadd.xlane.f32.xlu0 %v931_v53  ;;  %3212 = vrcp.f32 %v885_v21  ;;  %v1449_v50 = vsel %vm293_vm0, %v3976_v45, 0 }
 0x26c   : > { %v4230_v57 = vpop.eup %3194  ;;  %v1064_v43 = vpack.c.bf16 %v1002_v38, %v1000_v49  ;;  %v1063_v10 = vpack.c.bf16 %v1001_v7, %v999_v14  ;;  %3214 = vpow2.f32 %v865_v18  ;;  %v943_v0 = vadd.f32 %v4228_v9, %v4222_v16 }
 0x26d   : > { %v4234_v6 = vpop.eup %3196  ;;  %941 = vadd.xlane.f32.xlu1 %v940_v17 }
 0x26e   : > { %v4236_v11 = vpop.eup %3198  ;;  %1191 = vmatprep.mubr.bf16.mxu1 %v1064_v43  ;;  %v888_v19 = vpop.xlane.xlu1 %887  ;;  %v5442_v43 = vld [vmem:[#allocation50_spill] sm:$0xff] }
 0x26f   : > { %v3201_v8 = vpop.eup %3200  ;;  %3216 = vrcp.f32 %v888_v19  ;;  %1192 = vmatmul.mubr.bf16.vlgmr.msra.gmra.mrb[0].mxu1 %v1063_v10  ;;  %938 = vadd.xlane.f32.xlu0 %v937_v35 }
 0x270   : > { %v4242_v30 = vpop.eup %3202  ;;  %3218 = vpow2.f32 %v867_v63  ;;  %2879 = vmatpush3.bf16.xpose.msra.mxu1 %v1449_v50  ;;  %v1004_v10 = vmul.f32 %v3201_v8, %v4008_v56  ;;  %v1003_v49 = vmul.f32 %v3201_v8, %v4006_v3  ;;  %v958_v8 = vadd.f32 %v4234_v6, %v4230_v57 }
 0x271   : > { %v3205_v18 = vpop.eup %3204  ;;  %3220 = vpow2.f32 %v869_v24  ;;  %3063 = vmatprep.subr.msk.bf16.mxu1 %vm293_vm0, %v3982_v4  ;;  %944 = vadd.xlane.f32.xlu1 %v943_v0  ;;  %v949_v4 = vadd.f32 %v4242_v30, %v4236_v11 }
 0x272   : > { %v4250_v53 = vpop.eup %3206  ;;  %v891_v45 = vpop.xlane.xlu1 %890  ;;  %v1006_v21 = vmul.f32 %v3205_v18, %v4018_v27  ;;  %v1005_v38 = vmul.f32 %v3205_v18, %v4014_v36  ;;  %v952_v27 = vadd.f32 %v4212_v31, %v4208_v12  ;;  %v1452_v36 = vsel %vm293_vm0, %v5442_v43, 0 }
 0x273   : > { %v4256_v14 = vpop.eup %3208  ;;  %947 = vadd.xlane.f32.xlu0 %v946_v34  ;;  %3222 = vrcp.f32 %v891_v45 }
 0x274   : > { %v1066_v7 = vpack.c.bf16 %v1006_v21, %v1004_v10  ;;  %v1065_v63 = vpack.c.bf16 %v1005_v38, %v1003_v49  ;;  %v4260_v17 = vpop.eup %3210 }
 0x275   : > { %950 = vadd.xlane.f32.xlu1 %v949_v4  ;;  %v3213_v3 = vpop.eup %3212  ;;  %v955_v19 = vadd.f32 %v4260_v17, %v4256_v14 }
 0x276   : > { %1199 = vmatprep.mubr.bf16.mxu1 %v1066_v7  ;;  %v894_v56 = vpop.xlane.xlu1 %893  ;;  %v4266_v24 = vpop.eup %3214  ;;  %v1008_v18 = vmul.f32 %v3213_v3, %v4024_v1  ;;  %v1007_v45 = vmul.f32 %v3213_v3, %v4022_v29  ;;  %v1455_v29 = vsel %vm293_vm0, %v4074_v2, 0 }
 0x277   : > { %3224 = vrcp.f32 %v894_v56  ;;  %1200 = vmatmul.mubr.bf16.gmra.mrb[4].mxu1 %v1065_v63  ;;  %953 = vadd.xlane.f32.xlu0 %v952_v27 }
 0x278   : > { %2881 = vmatpush3.bf16.xpose.msra.mxu1 %v1452_v36 }
 0x279   : > { %v3217_v35 = vpop.eup %3216  ;;  %3064 = vmatprep.subr.msk.bf16.mxu1 %vm293_vm0, %v4070_v22  ;;  %956 = vadd.xlane.f32.xlu1 %v955_v19  ;;  %v961_v22 = vadd.f32 %v4266_v24, %v4250_v53 }
 0x27a   : > { %v4274_v50 = vpop.eup %3218  ;;  %v897_v0 = vpop.xlane.xlu0 %896  ;;  %v1010_v34 = vmul.f32 %v3217_v35, %v4032_v39  ;;  %v1009_v10 = vmul.f32 %v3217_v35, %v4026_v42 }
 0x27b   : > { %v4280_v21 = vpop.eup %3220  ;;  %959 = vadd.xlane.f32.xlu0 %v958_v8  ;;  %3226 = vrcp.f32 %v897_v0  ;;  %v5443_v0 = vld [vmem:[#allocation51_spill] sm:$0xff] }
 0x27c   : > { %v1068_v49 = vpack.c.bf16 %v1010_v34, %v1008_v18  ;;  %v1067_v38 = vpack.c.bf16 %v1009_v10, %v1007_v45  ;;  %v964_v1 = vadd.f32 %v4280_v21, %v4274_v50  ;;  %v5446_v34 = vld [vmem:[#allocation12_spill] sm:$0xff]  ;;  %v5450_v45 = vld [vmem:[#allocation18_spill] sm:$0xff]  ;;  %v5451_v10 = vld [vmem:[#allocation17_spill] sm:$0xff] }
 0x27d   : > { %962 = vadd.xlane.f32.xlu1 %v961_v22  ;;  %v3223_v39 = vpop.eup %3222  ;;  %v5452_v22 = vld [vmem:[#allocation8_spill] sm:$0xff] }
 0x27e   : > { %v900_v4 = vpop.xlane.xlu0 %899  ;;  %1207 = vmatprep.mubr.bf16.mxu1 %v1068_v49  ;;  %v1012_v7 = vmul.f32 %v3223_v39, %v4040_v26  ;;  %v1011_v56 = vmul.f32 %v3223_v39, %v4038_v61  ;;  %v5444_v61 = vld [vmem:[#allocation11_spill] sm:$0xff] }
 0x27f   : > { %3228 = vrcp.f32 %v900_v4  ;;  %1208 = vmatmul.mubr.bf16.gmra.mrb[8].mxu1 %v1067_v38  ;;  %965 = vadd.xlane.f32.xlu0 %v964_v1  ;;  %v5453_v49 = vld [vmem:[#allocation19_spill] sm:$0xff]  ;;  %v5454_v38 = vld [vmem:[#allocation20_spill] sm:$0xff]  ;;  %v5455_v4 = vld [vmem:[#allocation21_spill] sm:$0xff] }
 0x280   : > { %2883 = vmatpush3.bf16.xpose.msra.mxu1 %v1455_v29  ;;  %v5456_v1 = vld [vmem:[#allocation22_spill] sm:$0xff]  ;;  %v5457_v39 = vld [vmem:[#allocation23_spill] sm:$0xff] }
 0x281   : > { %v3225_v42 = vpop.eup %3224 }
 0x282   : > { %v1014_v63 = vmul.f32 %v3225_v42, %v4048_v51  ;;  %v1013_v27 = vmul.f32 %v3225_v42, %v4042_v32  ;;  %v5445_v32 = vld [vmem:[#allocation14_spill] sm:$0xff]  ;;  %v903_v29 = vpop.xlane.xlu0 %902  ;;  %v5458_v42 = vld [vmem:[#allocation24_spill] sm:$0xff] }
 0x283   : > { %3230 = vrcp.f32 %v903_v29  ;;  %v5468_v29 = vld [vmem:[#allocation32_spill] sm:$0xff] }
 0x284   : > { %v1070_v3 = vpack.c.bf16 %v1014_v63, %v1012_v7  ;;  %v1069_v43 = vpack.c.bf16 %v1013_v27, %v1011_v56  ;;  %v5459_v7 = vld [vmem:[#allocation25_spill] sm:$0xff]  ;;  %v5460_v56 = vld [vmem:[#allocation26_spill] sm:$0xff]  ;;  %v5461_v27 = vld [vmem:[#allocation27_spill] sm:$0xff] }
 0x285   : > { %v3227_v36 = vpop.eup %3226 }
 0x286   : > { %1215 = vmatprep.mubr.bf16.mxu1 %v1070_v3  ;;  %v1016_v2 = vmul.f32 %v3227_v36, %v4054_v40  ;;  %v1015_v8 = vmul.f32 %v3227_v36, %v4052_v13  ;;  %v5447_v40 = vld [vmem:[#allocation13_spill] sm:$0xff]  ;;  %v5448_v13 = vld [vmem:[#allocation16_spill] sm:$0xff] }
 0x287   : > { %1216 = vmatmul.mubr.bf16.gmra.mrb[12].mxu1 %v1069_v43  ;;  %v5462_v43 = vld [vmem:[#allocation28_spill] sm:$0xff]  ;;  %v5463_v36 = vld [vmem:[#allocation29_spill] sm:$0xff] }
 0x289   : > { %v3229_v19 = vpop.eup %3228 }
 0x28a   : > { %v1018_v35 = vmul.f32 %v3229_v19, %v4060_v46  ;;  %v1017_v26 = vmul.f32 %v3229_v19, %v5443_v0  ;;  %v5449_v46 = vld [vmem:[#allocation15_spill] sm:$0xff] }
 0x28b   : > { %v5465_v0 = vld [vmem:[#allocation31_spill] sm:$0xff] }
 0x28c   : > { %v1072_v18 = vpack.c.bf16 %v1018_v35, %v1016_v2  ;;  %v1071_v51 = vpack.c.bf16 %v1017_v26, %v1015_v8  ;;  %v5464_v35 = vld [vmem:[#allocation30_spill] sm:$0xff] }
 0x28d   : > { %v3231_v8 = vpop.eup %3230 }
 0x28e   : > { %1223 = vmatprep.mubr.bf16.mxu1 %v1072_v18  ;;  %1392 = vrot.lane.b32.xlu1 %v5444_v61, %s3475_s19 }
 0x28f   : > { %1224 = vmatmul.mubr.bf16.gmra.mrb[16].mxu1 %v1071_v51 }
 0x292   : > { %1378 = vrot.lane.b32.xlu1 %v5445_v32, %s3475_s19 }
 0x295   : > { %1376 = vrot.lane.b32.xlu0 %v5446_v34, %s3475_s19 }
 0x296   : > { %1394 = vrot.lane.b32.xlu1 %v5447_v40, %s3475_s19 }
 0x299   : > { %1380 = vrot.lane.b32.xlu0 %v5448_v13, %s3475_s19 }
 0x29a   : > { %1396 = vrot.lane.b32.xlu1 %v5449_v46, %s3475_s19 }
 0x29d   : > { %1382 = vrot.lane.b32.xlu0 %v5450_v45, %s3475_s19 }
 0x29e   : > { %1398 = vrot.lane.b32.xlu1 %v5451_v10, %s3475_s19 }
 0x2a1   : > { %1336 = vrot.lane.b32.xlu0 %v5452_v22, %s3475_s19  ;;  %v5466_v22 = vld [vmem:[#allocation53_spill] sm:$0xff] }
 0x2a2   : > { %1338 = vrot.lane.b32.xlu1 %v5453_v49, %s3475_s19  ;;  %v1020_v49 = vmul.f32 %v3231_v8, %v5466_v22  ;;  %v5472_v22 = vld [vmem:[#allocation56_spill] sm:$0xff] }
 0x2a5   : > { %1340 = vrot.lane.b32.xlu0 %v5454_v38, %s3475_s19 }
 0x2a6   : > { %1342 = vrot.lane.b32.xlu1 %v5455_v4, %s3475_s19  ;;  %v5467_v4 = vld [vmem:[#allocation52_spill] sm:$0xff] }
 0x2a9   : > { %1344 = vrot.lane.b32.xlu0 %v5456_v1, %s3475_s19  ;;  %v1019_v1 = vmul.f32 %v3231_v8, %v5467_v4 }
 0x2aa   : > { %1346 = vrot.lane.b32.xlu1 %v5457_v39, %s3475_s19 }
 0x2ad   : > { %1348 = vrot.lane.b32.xlu0 %v5458_v42, %s3475_s19  ;;  %v5469_v42 = vld [vmem:[#allocation33_spill] sm:$0xff] }
 0x2ae   : > { %1350 = vrot.lane.b32.xlu1 %v5459_v7, %s3475_s19 }
 0x2b1   : > { %v906_v63 = vpop.xlane.xlu1 %905  ;;  %1352 = vrot.lane.b32.xlu0 %v5460_v56, %s3475_s19 }
 0x2b2   : > { %3232 = vrcp.f32 %v906_v63  ;;  %1354 = vrot.lane.b32.xlu1 %v5461_v27, %s3475_s19 }
 0x2b5   : > { %v912_v3 = vpop.xlane.xlu1 %911  ;;  %1356 = vrot.lane.b32.xlu0 %v5462_v43, %s3475_s19 }
 0x2b6   : > { %3234 = vrcp.f32 %v912_v3  ;;  %1358 = vrot.lane.b32.xlu1 %v5463_v36, %s3475_s19 }
 0x2b7   : > { %v909_v19 = vpop.xlane.xlu0 %908 }
 0x2b8   : > { %3236 = vrcp.f32 %v909_v19 }
 0x2b9   : > { %v918_v2 = vpop.xlane.xlu1 %917  ;;  %1360 = vrot.lane.b32.xlu0 %v5464_v35, %s3475_s19 }
 0x2ba   : > { %3238 = vrcp.f32 %v918_v2  ;;  %1362 = vrot.lane.b32.xlu1 %v5465_v0, %s3475_s19  ;;  %v5470_v0 = vld [vmem:[#allocation54_spill] sm:$0xff] }
 0x2bb   : > { %v915_v26 = vpop.xlane.xlu0 %914 }
 0x2bc   : > { %v3233_v18 = vpop.eup %3232  ;;  %3240 = vrcp.f32 %v915_v26 }
 0x2bd   : > { %v1391_v51 = vpop.permute.xlu1 %1390  ;;  %v1022_v38 = vmul.f32 %v3233_v18, %v4088_v5  ;;  %v1021_v39 = vmul.f32 %v3233_v18, %v4084_v37  ;;  %1364 = vrot.lane.b32.xlu0 %v5468_v29, %s3475_s19  ;;  %v5471_v18 = vld [vmem:[#allocation58_spill] sm:$0xff] }
 0x2be   : > { %3065 = vmatprep.subr.msk.bf16.mxu1 %vm293_vm0, %v1391_v51  ;;  %1366 = vrot.lane.b32.xlu1 %v5469_v42, %s3475_s19 }
 0x2bf   : > { %v921_v7 = vpop.xlane.xlu0 %920  ;;  %v1074_v63 = vpack.c.bf16 %v1022_v38, %v1020_v49  ;;  %v1073_v56 = vpack.c.bf16 %v1021_v39, %v1019_v1  ;;  %v5474_v1 = vld [vmem:[#allocation55_spill] sm:$0xff] }
 0x2c0   : > { %v3235_v27 = vpop.eup %3234  ;;  %3242 = vrcp.f32 %v921_v7 }
 0x2c1   : > { %1231 = vmatprep.mubr.bf16.mxu1 %v1074_v63  ;;  %v1026_v37 = vmul.f32 %v3235_v27, %v4094_v41  ;;  %v1025_v26 = vmul.f32 %v3235_v27, %v5470_v0  ;;  %v5473_v41 = vld [vmem:[#allocation57_spill] sm:$0xff] }
 0x2c2   : > { %v3237_v3 = vpop.eup %3236  ;;  %1232 = vmatmul.mubr.bf16.gmra.mrb[20].mxu1 %v1073_v56 }
 0x2c3   : > { %v1375_v5 = vpop.permute.xlu0 %1374  ;;  %v1024_v43 = vmul.f32 %v3237_v3, %v4098_v33  ;;  %v1023_v2 = vmul.f32 %v3237_v3, %v4096_v52 }
 0x2c4   : > { %v3239_v36 = vpop.eup %3238  ;;  %v1458_v19 = vsel %vm293_vm0, %v1375_v5, 0 }
 0x2c5   : > { %2885 = vmatpush3.bf16.xpose.msra.mxu1 %v1458_v19  ;;  %v1076_v35 = vpack.c.bf16 %v1026_v37, %v1024_v43  ;;  %v1030_v49 = vmul.f32 %v3239_v36, %v5472_v22  ;;  %v1075_v38 = vpack.c.bf16 %v1025_v26, %v1023_v2  ;;  %v1029_v39 = vmul.f32 %v3239_v36, %v5474_v1  ;;  %v5475_v37 = vld [vmem:[#allocation60_spill] sm:$0xff]  ;;  %v5476_v2 = vld [vmem:[#allocation59_spill] sm:$0xff] }
 0x2c6   : > { %v3241_v8 = vpop.eup %3240 }
 0x2c7   : > { %1239 = vmatprep.mubr.bf16.mxu1 %v1076_v35  ;;  %v1028_v51 = vmul.f32 %v3241_v8, %v5471_v18  ;;  %v1027_v33 = vmul.f32 %v3241_v8, %v5473_v41 }
 0x2c9   : > { %v1078_v4 = vpack.c.bf16 %v1030_v49, %v1028_v51  ;;  %v1077_v29 = vpack.c.bf16 %v1029_v39, %v1027_v33 }
 0x2ca   : > { %1240 = vmatmul.mubr.bf16.gmra.mrb[24].mxu1 %v1075_v38  ;;  %v3243_v27 = vpop.eup %3242 }
 0x2cb   : > { %1247 = vmatprep.mubr.bf16.mxu1 %v1078_v4  ;;  %v1032_v19 = vmul.f32 %v3243_v27, %v5475_v37  ;;  %v1031_v35 = vmul.f32 %v3243_v27, %v5476_v2  ;;  %v5478_v37 = vld [vmem:[#allocation36_spill] sm:$0xff] }
 0x2d2   : > { %1248 = vmatmul.mubr.bf16.gmra.mrb[28].mxu1 %v1077_v29 }
 0x2ee   : > { %v924_v52 = vpop.xlane.xlu1 %923 }
 0x2ef   : > { %3244 = vrcp.f32 %v924_v52 }
 0x2f2   : > { %v930_v42 = vpop.xlane.xlu1 %929 }
 0x2f3   : > { %3246 = vrcp.f32 %v930_v42 }
 0x2f4   : > { %v927_v63 = vpop.xlane.xlu0 %926 }
 0x2f5   : > { %3248 = vrcp.f32 %v927_v63 }
 0x2f6   : > { %v936_v56 = vpop.xlane.xlu1 %935 }
 0x2f7   : > { %3250 = vrcp.f32 %v936_v56 }
 0x2f8   : > { %v933_v3 = vpop.xlane.xlu0 %932 }
 0x2f9   : > { %v3245_v5 = vpop.eup %3244  ;;  %3252 = vrcp.f32 %v933_v3  ;;  %v5477_v3 = vld [vmem:[#allocation37_spill] sm:$0xff] }
 0x2fa   : > { %v942_v43 = vpop.xlane.xlu1 %941  ;;  %v1034_v36 = vmul.f32 %v3245_v5, %v4154_v23  ;;  %v1033_v7 = vmul.f32 %v3245_v5, %v4149_v62 }
 0x2fc   : > { %v939_v8 = vpop.xlane.xlu0 %938  ;;  %v1080_v0 = vpack.c.bf16 %v1034_v36, %v1032_v19  ;;  %v1079_v26 = vpack.c.bf16 %v1033_v7, %v1031_v35 }
 0x2fd   : > { %v3247_v18 = vpop.eup %3246  ;;  %3254 = vrcp.f32 %v939_v8 }
 0x2fe   : > { %1255 = vmatprep.mubr.bf16.mxu1 %v1080_v0  ;;  %v945_v51 = vpop.xlane.xlu1 %944  ;;  %3256 = vrcp.f32 %v942_v43  ;;  %v1038_v4 = vmul.f32 %v3247_v18, %v4160_v60  ;;  %v1037_v39 = vmul.f32 %v3247_v18, %v4156_v47 }
 0x2ff   : > { %v3249_v22 = vpop.eup %3248  ;;  %1256 = vmatmul.mubr.bf16.gmra.mrb[32].mxu1 %v1079_v26 }
 0x300   : > { %v948_v49 = vpop.xlane.xlu0 %947  ;;  %v1036_v38 = vmul.f32 %v3249_v22, %v4169_v44  ;;  %v1035_v41 = vmul.f32 %v3249_v22, %v4164_v15 }
 0x301   : > { %v3251_v23 = vpop.eup %3250  ;;  %3258 = vrcp.f32 %v948_v49 }
 0x302   : > { %v951_v33 = vpop.xlane.xlu1 %950  ;;  %v1082_v62 = vpack.c.bf16 %v1038_v4, %v1036_v38  ;;  %v1042_v42 = vmul.f32 %v3251_v23, %v4176_v20  ;;  %v1081_v63 = vpack.c.bf16 %v1037_v39, %v1035_v41  ;;  %3260 = vrcp.f32 %v945_v51 }
 0x303   : > { %v3253_v1 = vpop.eup %3252  ;;  %v1041_v19 = vmul.f32 %v3251_v23, %v5478_v37 }
 0x304   : > { %v954_v29 = vpop.xlane.xlu0 %953  ;;  %1263 = vmatprep.mubr.bf16.mxu1 %v1082_v62  ;;  %v1040_v52 = vmul.f32 %v3253_v1, %v4182_v55  ;;  %v1039_v5 = vmul.f32 %v3253_v1, %v5477_v3 }
 0x305   : > { %3262 = vrcp.f32 %v954_v29 }
 0x306   : > { %v957_v56 = vpop.xlane.xlu1 %956  ;;  %v1084_v44 = vpack.c.bf16 %v1042_v42, %v1040_v52  ;;  %v1083_v36 = vpack.c.bf16 %v1041_v19, %v1039_v5  ;;  %3264 = vrcp.f32 %v951_v33 }
 0x307   : > { %v3255_v27 = vpop.eup %3254  ;;  %1264 = vmatmul.mubr.bf16.gmra.mrb[36].mxu1 %v1081_v63 }
 0x308   : > { %v960_v60 = vpop.xlane.xlu0 %959  ;;  %1271 = vmatprep.mubr.bf16.mxu1 %v1084_v44  ;;  %v3257_v15 = vpop.eup %3256  ;;  %v1044_v47 = vmul.f32 %v3255_v27, %v4190_v54  ;;  %v1043_v54 = vmul.f32 %v3255_v27, %v4184_v58 }
 0x309   : > { %v1046_v20 = vmul.f32 %v3257_v15, %v4204_v25  ;;  %v1045_v51 = vmul.f32 %v3257_v15, %v4200_v59  ;;  %3266 = vrcp.f32 %v960_v60 }
 0x30a   : > { %v963_v43 = vpop.xlane.xlu1 %962  ;;  %3268 = vrcp.f32 %v957_v56 }
 0x30b   : > { %v1086_v2 = vpack.c.bf16 %v1046_v20, %v1044_v47  ;;  %v3259_v7 = vpop.eup %3258  ;;  %v1085_v49 = vpack.c.bf16 %v1045_v51, %v1043_v54 }
 0x30c   : > { %v966_v55 = vpop.xlane.xlu0 %965  ;;  %v3261_v0 = vpop.eup %3260  ;;  %v1050_v18 = vmul.f32 %v3259_v7, %v4196_v28  ;;  %v1049_v28 = vmul.f32 %v3259_v7, %v4194_v48 }
 0x30d   : > { %v1048_v22 = vmul.f32 %v3261_v0, %v4228_v9  ;;  %v1047_v9 = vmul.f32 %v3261_v0, %v4222_v16  ;;  %3270 = vrcp.f32 %v966_v55 }
 0x30e   : > { %v1393_v35 = vpop.permute.xlu1 %1392  ;;  %3272 = vrcp.f32 %v963_v43 }
 0x30f   : > { %1272 = vmatmul.mubr.bf16.gmra.mrb[40].mxu1 %v1083_v36  ;;  %3066 = vmatprep.subr.msk.bf16.mxu1 %vm293_vm0, %v1393_v35  ;;  %v1088_v38 = vpack.c.bf16 %v1050_v18, %v1048_v22  ;;  %v3263_v23 = vpop.eup %3262  ;;  %v1087_v39 = vpack.c.bf16 %v1049_v28, %v1047_v9 }
 0x310   : > { %v1377_v8 = vpop.permute.xlu0 %1376  ;;  %1279 = vmatprep.mubr.bf16.mxu1 %v1086_v2  ;;  %v3265_v58 = vpop.eup %3264  ;;  %v1054_v59 = vmul.f32 %v3263_v23, %v4212_v31  ;;  %v1053_v31 = vmul.f32 %v3263_v23, %v4208_v12 }
 0x311   : > { %v1461_v26 = vsel %vm293_vm0, %v1377_v8, 0  ;;  %v1052_v62 = vmul.f32 %v3265_v58, %v4242_v30  ;;  %v1051_v56 = vmul.f32 %v3265_v58, %v4236_v11  ;;  %v5486_v58 = vld [vmem:[#allocation2_spill] sm:$0xff] }
 0x312   : > { %2887 = vmatpush3.bf16.xpose.msra.mxu1 %v1461_v26  ;;  %v1379_v25 = vpop.permute.xlu1 %1378  ;;  %2217 = vrot.lane.b32.xlu0 %v5486_v58, %s3476_s20 }
 0x313   : > { %v1464_v41 = vsel %vm293_vm0, %v1379_v25, 0  ;;  %v1090_v29 = vpack.c.bf16 %v1054_v59, %v1052_v62  ;;  %v3267_v52 = vpop.eup %3266  ;;  %v1089_v27 = vpack.c.bf16 %v1053_v31, %v1051_v56  ;;  %v5488_v62 = vld [vmem:[#allocation5_spill] sm:$0xff] }
 0x314   : > { %v1381_v1 = vpop.permute.xlu0 %1380  ;;  %v3269_v63 = vpop.eup %3268  ;;  %v1058_v16 = vmul.f32 %v3267_v52, %v4234_v6  ;;  %v1057_v12 = vmul.f32 %v3267_v52, %v4230_v57 }
 0x315   : > { %v1467_v42 = vsel %vm293_vm0, %v1381_v1, 0  ;;  %v1056_v30 = vmul.f32 %v3269_v63, %v4260_v17  ;;  %v1055_v11 = vmul.f32 %v3269_v63, %v4256_v14 }
 0x316   : > { %v1395_v4 = vpop.permute.xlu1 %1394 }
 0x317   : > { %1280 = vmatmul.mubr.bf16.gmra.mrb[44].mxu1 %v1085_v49  ;;  %3067 = vmatprep.subr.msk.bf16.mxu1 %vm293_vm0, %v1395_v4  ;;  %v1092_v60 = vpack.c.bf16 %v1058_v16, %v1056_v30  ;;  %v3271_v15 = vpop.eup %3270  ;;  %v1091_v47 = vpack.c.bf16 %v1057_v12, %v1055_v11  ;;  %v5494_v30 = vld [vmem:[#allocation10_spill] sm:$0xff] }
 0x318   : > { %1287 = vmatprep.mubr.bf16.mxu1 %v1088_v38  ;;  %v1383_v44 = vpop.permute.xlu0 %1382  ;;  %v3273_v5 = vpop.eup %3272  ;;  %v1062_v6 = vmul.f32 %v3271_v15, %v4280_v21  ;;  %v1061_v37 = vmul.f32 %v3271_v15, %v4274_v50 }
 0x319   : > { %v1470_v3 = vsel %vm293_vm0, %v1383_v44, 0  ;;  %v1060_v43 = vmul.f32 %v3273_v5, %v4266_v24  ;;  %v1059_v19 = vmul.f32 %v3273_v5, %v4250_v53 }
 0x31a   : > { %2889 = vmatpush3.bf16.xpose.msra.mxu1 %v1464_v41  ;;  %v1397_v33 = vpop.permute.xlu1 %1396  ;;  %v5485_v41 = vld [vmem:[#allocation3_spill] sm:$0xff] }
 0x31b   : > { %3068 = vmatprep.subr.msk.bf16.mxu1 %vm293_vm0, %v1397_v33  ;;  %v1094_v17 = vpack.c.bf16 %v1062_v6, %v1060_v43  ;;  %v1093_v55 = vpack.c.bf16 %v1061_v37, %v1059_v19  ;;  %2201 = vrot.lane.b32.xlu1 %v5485_v41, %s3476_s20 }
 0x31c   : > { %v1337_v20 = vpop.permute.xlu0 %1336 }
 0x31e   : > { %v1399_v48 = vpop.permute.xlu1 %1398 }
 0x31f   : > { %1288 = vmatmul.mubr.bf16.gmra.mrb[48].mxu1 %v1087_v39  ;;  %2203 = vrot.lane.b32.xlu1 %v5488_v62, %s3476_s20  ;;  %v5489_v39 = vld [vmem:[#allocation4_spill] sm:$0xff] }
 0x320   : > { %1295 = vmatprep.mubr.bf16.mxu1 %v1090_v29  ;;  %v1341_v50 = vpop.permute.xlu0 %1340  ;;  %2219 = vrot.lane.b32.xlu0 %v5489_v39, %s3476_s20 }
 0x322   : > { %2891 = vmatpush3.bf16.xpose.msra.mxu1 %v1467_v42  ;;  %v1339_v57 = vpop.permute.xlu1 %1338  ;;  %v5491_v42 = vld [vmem:[#allocation7_spill] sm:$0xff] }
 0x323   : > { %3069 = vmatprep.subr.msk.bf16.mxu1 %vm293_vm0, %v1399_v48  ;;  %2205 = vrot.lane.b32.xlu1 %v5491_v42, %s3476_s20  ;;  %v5492_v48 = vld [vmem:[#allocation6_spill] sm:$0xff] }
 0x324   : > { %v1345_v23 = vpop.permute.xlu0 %1344  ;;  %2221 = vrot.lane.b32.xlu0 %v5492_v48, %s3476_s20 }
 0x326   : > { %v1343_v18 = vpop.permute.xlu1 %1342 }
 0x327   : > { %1296 = vmatmul.mubr.bf16.gmra.mrb[52].mxu1 %v1089_v27  ;;  %2207 = vrot.lane.b32.xlu1 %v5494_v30, %s3476_s20  ;;  %v5495_v27 = vld [vmem:[#allocation9_spill] sm:$0xff] }
 0x328   : > { %1303 = vmatprep.mubr.bf16.mxu1 %v1092_v60  ;;  %2223 = vrot.lane.b32.xlu0 %v5495_v27, %s3476_s20  ;;  %v1349_v15 = vpop.permute.xlu0 %1348 }
 0x32a   : > { %2893 = vmatpush3.bf16.xpose.msra.mxu1 %v1470_v3  ;;  %v1347_v52 = vpop.permute.xlu1 %1346 }
 0x32b   : > { %2225 = vrot.lane.b32.xlu1 %v5444_v61, %s3476_s20 }
 0x32c   : > { %2227 = vrot.lane.b32.xlu0 %v5447_v40, %s3476_s20  ;;  %v1353_v61 = vpop.permute.xlu0 %1352 }
 0x32e   : > { %v1351_v3 = vpop.permute.xlu1 %1350 }
 0x32f   : > { %1304 = vmatmul.mubr.bf16.gmra.mrb[56].mxu1 %v1091_v47  ;;  %2209 = vrot.lane.b32.xlu1 %v5446_v34, %s3476_s20 }
 0x330   : > { %1311 = vmatprep.mubr.bf16.mxu1 %v1094_v17  ;;  %v1357_v34 = vpop.permute.xlu0 %1356 }
 0x332   : > { %v1355_v40 = vpop.permute.xlu1 %1354 }
 0x333   : > { %2211 = vrot.lane.b32.xlu1 %v5445_v32, %s3476_s20 }
 0x334   : > { %v1361_v5 = vpop.permute.xlu0 %1360 }
 0x336   : > { %v1359_v32 = vpop.permute.xlu1 %1358 }
 0x337   : > { %1312 = vmatmul.mubr.bf16.gmra.mrb[60].mxu1 %v1093_v55  ;;  %2229 = vrot.lane.b32.xlu1 %v5449_v46, %s3476_s20 }
 0x338   : > { %2894 = vmatprep.mubr.msk.bf16.mxu1 %vm293_vm0, %v1337_v20 }
 0x33a   : > { %v1363_v37 = vpop.permute.xlu1 %1362 }
 0x33f   : > { %2895 = vmatmul.mubr.msk.bf16.vlgmr.msra.gmra.mrb[64].mxu1 %vm293_vm0, %v1337_v20 }
 0x340   : > { %2896 = vmatprep.mubr.msk.bf16.mxu1 %vm293_vm0, %v1339_v57 }
 0x342   : > { %v2782_v14 = vpop.f32.mrb[0].mxu1 }
 0x343   : > { %v2783_v24 = vpop.f32.mrb[1].mxu1 }
 0x344   : > { %v4401_v21 = vadd.f32 %v2783_v24, %v2782_v14  ;;  %v2785_v36 = vpop.f32.mrb[2].mxu1 }
 0x345   : > { %v2786_v2 = vpop.f32.mrb[3].mxu1 }
 0x346   : > { %5479 = vst [vmem:[#allocation34_spill] sm:$0xff] %v4401_v21  ;;  %v4403_v35 = vadd.f32 %v2786_v2, %v2785_v36  ;;  %v1365_v36 = vpop.permute.xlu0 %1364 }
 0x347   : > { %2897 = vmatmul.mubr.msk.bf16.gmra.mrb[68].mxu1 %vm293_vm0, %v1339_v57 }
 0x348   : > { %5480 = vst [vmem:[#allocation35_spill] sm:$0xff] %v4403_v35  ;;  %2898 = vmatprep.mubr.msk.bf16.mxu1 %vm293_vm0, %v1341_v50 }
 0x34a   : > { %v2788_v53 = vpop.f32.mrb[4].mxu1 }
 0x34b   : > { %v2789_v7 = vpop.f32.mrb[5].mxu1 }
 0x34c   : > { %v4407_v8 = vadd.f32 %v2789_v7, %v2788_v53  ;;  %v2791_v0 = vpop.f32.mrb[6].mxu1 }
 0x34d   : > { %v2792_v26 = vpop.f32.mrb[7].mxu1 }
 0x34e   : > { %5481 = vst [vmem:[#allocation38_spill] sm:$0xff] %v4407_v8  ;;  %v4409_v54 = vadd.f32 %v2792_v26, %v2791_v0  ;;  %v1367_v26 = vpop.permute.xlu1 %1366 }
 0x34f   : > { %2899 = vmatmul.mubr.msk.bf16.gmra.mrb[72].mxu1 %vm293_vm0, %v1341_v50 }
 0x350   : > { %5482 = vst [vmem:[#allocation39_spill] sm:$0xff] %v4409_v54  ;;  %2900 = vmatprep.mubr.msk.bf16.mxu1 %vm293_vm0, %v1343_v18 }
 0x352   : > { %v2794_v25 = vpop.f32.mrb[8].mxu1 }
 0x353   : > { %v2795_v51 = vpop.f32.mrb[9].mxu1 }
 0x354   : > { %v4413_v22 = vadd.f32 %v2795_v51, %v2794_v25  ;;  %v2797_v49 = vpop.f32.mrb[10].mxu1 }
 0x355   : > { %v2798_v38 = vpop.f32.mrb[11].mxu1 }
 0x356   : > { %5483 = vst [vmem:[#allocation40_spill] sm:$0xff] %v4413_v22  ;;  %v4415_v4 = vadd.f32 %v2798_v38, %v2797_v49 }
 0x357   : > { %2901 = vmatmul.mubr.msk.bf16.gmra.mrb[76].mxu1 %vm293_vm0, %v1343_v18 }
 0x358   : > { %5484 = vst [vmem:[#allocation41_spill] sm:$0xff] %v4415_v4  ;;  %2902 = vmatprep.mubr.msk.bf16.mxu1 %vm293_vm0, %v1345_v23 }
 0x35a   : > { %v2800_v28 = vpop.f32.mrb[12].mxu1 }
 0x35b   : > { %v2801_v59 = vpop.f32.mrb[13].mxu1 }
 0x35c   : > { %v4423_v33 = vadd.f32 %v2801_v59, %v2800_v28  ;;  %v2803_v9 = vpop.f32.mrb[14].mxu1 }
 0x35d   : > { %v2804_v1 = vpop.f32.mrb[15].mxu1 }
 0x35e   : > { %5487 = vst [vmem:[#allocation46_spill] sm:$0xff] %v4423_v33  ;;  %v4429_v29 = vadd.f32 %v2804_v1, %v2803_v9 }
 0x35f   : > { %2903 = vmatmul.mubr.msk.bf16.gmra.mrb[80].mxu1 %vm293_vm0, %v1345_v23 }
 0x360   : > { %5490 = vst [vmem:[#allocation47_spill] sm:$0xff] %v4429_v29  ;;  %2904 = vmatprep.mubr.msk.bf16.mxu1 %vm293_vm0, %v1347_v52 }
 0x362   : > { %v2806_v63 = vpop.f32.mrb[16].mxu1 }
 0x363   : > { %v2807_v31 = vpop.f32.mrb[17].mxu1 }
 0x364   : > { %v4437_v16 = vadd.f32 %v2807_v31, %v2806_v63  ;;  %v2809_v56 = vpop.f32.mrb[18].mxu1 }
 0x365   : > { %v2810_v44 = vpop.f32.mrb[19].mxu1 }
 0x366   : > { %5493 = vst [vmem:[#allocation42_spill] sm:$0xff] %v4437_v16  ;;  %v4443_v60 = vadd.f32 %v2810_v44, %v2809_v56 }
 0x367   : > { %2905 = vmatmul.mubr.msk.bf16.gmra.mrb[84].mxu1 %vm293_vm0, %v1347_v52 }
 0x368   : > { %5496 = vst [vmem:[#allocation43_spill] sm:$0xff] %v4443_v60  ;;  %2906 = vmatprep.mubr.msk.bf16.mxu1 %vm293_vm0, %v1349_v15 }
 0x36f   : > { %2907 = vmatmul.mubr.msk.bf16.gmra.mrb[88].mxu1 %vm293_vm0, %v1349_v15 }
 0x370   : > { %2908 = vmatprep.mubr.msk.bf16.mxu1 %vm293_vm0, %v1351_v3 }
 0x377   : > { %2909 = vmatmul.mubr.msk.bf16.gmra.mrb[92].mxu1 %vm293_vm0, %v1351_v3 }
 0x378   : > { %2910 = vmatprep.mubr.msk.bf16.mxu1 %vm293_vm0, %v1353_v61 }
 0x37f   : > { %2911 = vmatmul.mubr.msk.bf16.gmra.mrb[96].mxu1 %vm293_vm0, %v1353_v61 }
 0x380   : > { %2912 = vmatprep.mubr.msk.bf16.mxu1 %vm293_vm0, %v1355_v40 }
 0x384   : > { %v2218_v18 = vpop.permute.xlu0 %2217 }
 0x385   : > { %2926 = vmatprep.subr.bf16.mxu0 %v2218_v18  ;;  %3038 = vmatprep.subr.bf16.mxu1 %v2218_v18 }
 0x387   : > { %2913 = vmatmul.mubr.msk.bf16.gmra.mrb[100].mxu1 %vm293_vm0, %v1355_v40 }
 0x388   : > { %2914 = vmatprep.mubr.msk.bf16.mxu1 %vm293_vm0, %v1357_v34 }
 0x38d   : > { %v2202_v25 = vpop.permute.xlu1 %2201 }
 0x38e   : > { %2927 = vmatpush3.bf16.msra.mxu0 %v2202_v25  ;;  %3046 = vmatpush3.bf16.msra.mxu1 %v2202_v25 }
 0x38f   : > { %2915 = vmatmul.mubr.msk.bf16.gmra.mrb[104].mxu1 %vm293_vm0, %v1357_v34 }
 0x390   : > { %2916 = vmatprep.mubr.msk.bf16.mxu1 %vm293_vm0, %v1359_v32 }
 0x391   : > { %v2204_v49 = vpop.permute.xlu1 %2203 }
 0x392   : > { %v2220_v51 = vpop.permute.xlu0 %2219 }
 0x393   : > { %2928 = vmatprep.subr.bf16.mxu0 %v2220_v51  ;;  %3039 = vmatprep.subr.bf16.mxu1 %v2220_v51 }
 0x394   : > { %2929 = vmatpush3.bf16.msra.mxu0 %v2204_v49  ;;  %3047 = vmatpush3.bf16.msra.mxu1 %v2204_v49 }
 0x395   : > { %v2812_v46 = vpop.f32.mrb[20].mxu1  ;;  %v2206_v58 = vpop.permute.xlu1 %2205 }
 0x396   : > { %v2813_v12 = vpop.f32.mrb[21].mxu1  ;;  %v2222_v23 = vpop.permute.xlu0 %2221 }
 0x397   : > { %v4467_v6 = vadd.f32 %v2813_v12, %v2812_v46  ;;  %v2815_v11 = vpop.f32.mrb[22].mxu1  ;;  %2917 = vmatmul.mubr.msk.bf16.gmra.mrb[108].mxu1 %vm293_vm0, %v1359_v32  ;;  %2930 = vmatprep.subr.bf16.mxu0 %v2222_v23 }
 0x398   : > { %v2816_v43 = vpop.f32.mrb[23].mxu1  ;;  %2918 = vmatprep.mubr.msk.bf16.mxu1 %vm293_vm0, %v1361_v5  ;;  %3040 = vmatprep.subr.bf16.mxu1 %v2222_v23 }
 0x399   : > { %5497 = vst [vmem:[#allocation48_spill] sm:$0xff] %v4467_v6  ;;  %v4471_v47 = vadd.f32 %v2816_v43, %v2815_v11  ;;  %2931 = vmatpush3.bf16.msra.mxu0 %v2206_v58  ;;  %3048 = vmatpush3.bf16.msra.mxu1 %v2206_v58  ;;  %v2208_v39 = vpop.permute.xlu1 %2207 }
 0x39a   : > { %v2224_v1 = vpop.permute.xlu0 %2223 }
 0x39b   : > { %5498 = vst [vmem:[#allocation44_spill] sm:$0xff] %v4471_v47  ;;  %2932 = vmatprep.subr.bf16.mxu0 %v2224_v1  ;;  %3041 = vmatprep.subr.bf16.mxu1 %v2224_v1 }
 0x39d   : > { %v2818_v17 = vpop.f32.mrb[24].mxu1  ;;  %2933 = vmatpush3.bf16.msra.mxu0 %v2208_v39  ;;  %3049 = vmatpush3.bf16.msra.mxu1 %v2208_v39  ;;  %v2226_v48 = vpop.permute.xlu1 %2225 }
 0x39e   : > { %v2819_v19 = vpop.f32.mrb[25].mxu1  ;;  %2934 = vmatprep.subr.bf16.mxu0 %v2226_v48  ;;  %3042 = vmatprep.subr.bf16.mxu1 %v2226_v48  ;;  %v2228_v27 = vpop.permute.xlu0 %2227 }
 0x39f   : > { %v4473_v55 = vadd.f32 %v2819_v19, %v2818_v17  ;;  %v2821_v20 = vpop.f32.mrb[26].mxu1  ;;  %2919 = vmatmul.mubr.msk.bf16.gmra.mrb[112].mxu1 %vm293_vm0, %v1361_v5 }
 0x3a0   : > { %v2822_v57 = vpop.f32.mrb[27].mxu1  ;;  %2920 = vmatprep.mubr.msk.bf16.mxu1 %vm293_vm0, %v1363_v37 }
 0x3a1   : > { %5499 = vst [vmem:[#allocation45_spill] sm:$0xff] %v4473_v55  ;;  %v4477_v14 = vadd.f32 %v2822_v57, %v2821_v20  ;;  %v2210_v44 = vpop.permute.xlu1 %2209 }
 0x3a2   : > { %2935 = vmatpush3.bf16.msra.mxu0 %v2210_v44  ;;  %3050 = vmatpush3.bf16.msra.mxu1 %v2210_v44 }
 0x3a3   : > { %5500 = vst [vmem:[#allocation49_spill] sm:$0xff] %v4477_v14  ;;  %2936 = vmatprep.subr.bf16.mxu0 %v2228_v27  ;;  %3043 = vmatprep.subr.bf16.mxu1 %v2228_v27 }
 0x3a5   : > { %v2824_v24 = vpop.f32.mrb[28].mxu1  ;;  %v2212_v61 = vpop.permute.xlu1 %2211 }
 0x3a6   : > { %v2825_v2 = vpop.f32.mrb[29].mxu1  ;;  %2937 = vmatpush3.bf16.msra.mxu0 %v2212_v61  ;;  %3051 = vmatpush3.bf16.msra.mxu1 %v2212_v61 }
 0x3a7   : > { %v4479_v50 = vadd.f32 %v2825_v2, %v2824_v24  ;;  %v2827_v53 = vpop.f32.mrb[30].mxu1  ;;  %2921 = vmatmul.mubr.msk.bf16.gmra.mrb[116].mxu1 %vm293_vm0, %v1363_v37 }
 0x3a8   : > { %v2828_v7 = vpop.f32.mrb[31].mxu1  ;;  %2922 = vmatprep.mubr.msk.bf16.mxu1 %vm293_vm0, %v1365_v36 }
 0x3a9   : > { %5501 = vst [vmem:[#allocation50_spill] sm:$0xff] %v4479_v50  ;;  %v4483_v0 = vadd.f32 %v2828_v7, %v2827_v53  ;;  %v2230_v5 = vpop.permute.xlu1 %2229 }
 0x3aa   : > { %2938 = vmatprep.subr.bf16.mxu0 %v2230_v5  ;;  %3044 = vmatprep.subr.bf16.mxu1 %v2230_v5 }
 0x3ab   : > { %5502 = vst [vmem:[#allocation51_spill] sm:$0xff] %v4483_v0 }
 0x3af   : > { %2923 = vmatmul.mubr.msk.bf16.gmra.mrb[120].mxu1 %vm293_vm0, %v1365_v36 }
 0x3b0   : > { %2924 = vmatprep.mubr.msk.bf16.mxu1 %vm293_vm0, %v1367_v26 }
 0x3b7   : > { %2925 = vmatmul.mubr.msk.bf16.gmra.mrb[124].mxu1 %vm293_vm0, %v1367_v26 }
 0x3d2   : > { %v2830_v38 = vpop.f32.mrb[32].mxu1 }
 0x3d3   : > { %v2831_v41 = vpop.f32.mrb[33].mxu1 }
 0x3d4   : > { %v4488_v28 = vadd.f32 %v2831_v41, %v2830_v38  ;;  %v2833_v59 = vpop.f32.mrb[34].mxu1 }
 0x3d5   : > { %v2834_v9 = vpop.f32.mrb[35].mxu1 }
 0x3d6   : > { %5503 = vst [vmem:[#allocation11_spill] sm:$0xff] %v4488_v28  ;;  %v4490_v62 = vadd.f32 %v2834_v9, %v2833_v59 }
 0x3d8   : > { %5504 = vst [vmem:[#allocation14_spill] sm:$0xff] %v4490_v62 }
 0x3da   : > { %v2836_v52 = vpop.f32.mrb[36].mxu1 }
 0x3db   : > { %v2837_v42 = vpop.f32.mrb[37].mxu1 }
 0x3dc   : > { %v4492_v63 = vadd.f32 %v2837_v42, %v2836_v52  ;;  %v2839_v31 = vpop.f32.mrb[38].mxu1 }
 0x3dd   : > { %v2840_v56 = vpop.f32.mrb[39].mxu1 }
 0x3de   : > { %5505 = vst [vmem:[#allocation12_spill] sm:$0xff] %v4492_v63  ;;  %v4494_v30 = vadd.f32 %v2840_v56, %v2839_v31 }
 0x3e0   : > { %5506 = vst [vmem:[#allocation13_spill] sm:$0xff] %v4494_v30 }
 0x3e2   : > { %v2842_v15 = vpop.f32.mrb[40].mxu1 }
 0x3e3   : > { %v2843_v3 = vpop.f32.mrb[41].mxu1 }
 0x3e4   : > { %v4496_v40 = vadd.f32 %v2843_v3, %v2842_v15  ;;  %v2845_v34 = vpop.f32.mrb[42].mxu1 }
 0x3e5   : > { %v2846_v32 = vpop.f32.mrb[43].mxu1 }
 0x3e6   : > { %5507 = vst [vmem:[#allocation16_spill] sm:$0xff] %v4496_v40  ;;  %v4498_v46 = vadd.f32 %v2846_v32, %v2845_v34 }
 0x3e8   : > { %5508 = vst [vmem:[#allocation15_spill] sm:$0xff] %v4498_v46 }
 0x3ea   : > { %v2848_v12 = vpop.f32.mrb[44].mxu1 }
 0x3eb   : > { %v2849_v11 = vpop.f32.mrb[45].mxu1 }
 0x3ec   : > { %v4500_v43 = vadd.f32 %v2849_v11, %v2848_v12  ;;  %v2851_v17 = vpop.f32.mrb[46].mxu1 }
 0x3ed   : > { %v2852_v37 = vpop.f32.mrb[47].mxu1 }
 0x3ee   : > { %5509 = vst [vmem:[#allocation18_spill] sm:$0xff] %v4500_v43  ;;  %v4502_v19 = vadd.f32 %v2852_v37, %v2851_v17 }
 0x3f0   : > { %5510 = vst [vmem:[#allocation17_spill] sm:$0xff] %v4502_v19 }
 0x3f2   : > { %v2854_v20 = vpop.f32.mrb[48].mxu1 }
 0x3f3   : > { %v2855_v57 = vpop.f32.mrb[49].mxu1 }
 0x3f4   : > { %v4504_v24 = vadd.f32 %v2855_v57, %v2854_v20  ;;  %v2857_v36 = vpop.f32.mrb[50].mxu1 }
 0x3f5   : > { %v2858_v2 = vpop.f32.mrb[51].mxu1 }
 0x3f6   : > { %5511 = vst [vmem:[#allocation8_spill] sm:$0xff] %v4504_v24  ;;  %v4506_v53 = vadd.f32 %v2858_v2, %v2857_v36 }
 0x3f8   : > { %5512 = vst [vmem:[#allocation19_spill] sm:$0xff] %v4506_v53 }
 0x3fa   : > { %v2860_v7 = vpop.f32.mrb[52].mxu1 }
 0x3fb   : > { %v2861_v26 = vpop.f32.mrb[53].mxu1 }
 0x3fc   : > { %v4508_v18 = vadd.f32 %v2861_v26, %v2860_v7  ;;  %v2863_v25 = vpop.f32.mrb[54].mxu1 }
 0x3fd   : > { %v2864_v51 = vpop.f32.mrb[55].mxu1 }
 0x3fe   : > { %5513 = vst [vmem:[#allocation20_spill] sm:$0xff] %v4508_v18  ;;  %v4510_v49 = vadd.f32 %v2864_v51, %v2863_v25 }
 0x400   : > { %5514 = vst [vmem:[#allocation21_spill] sm:$0xff] %v4510_v49 }
 0x402   : > { %v2866_v38 = vpop.f32.mrb[56].mxu1 }
 0x403   : > { %v2867_v23 = vpop.f32.mrb[57].mxu1 }
 0x404   : > { %v4512_v41 = vadd.f32 %v2867_v23, %v2866_v38  ;;  %v2869_v58 = vpop.f32.mrb[58].mxu1 }
 0x405   : > { %v2870_v59 = vpop.f32.mrb[59].mxu1 }
 0x406   : > { %5515 = vst [vmem:[#allocation22_spill] sm:$0xff] %v4512_v41  ;;  %v4514_v9 = vadd.f32 %v2870_v59, %v2869_v58 }
 0x408   : > { %5516 = vst [vmem:[#allocation23_spill] sm:$0xff] %v4514_v9 }
 0x40a   : > { %v2872_v1 = vpop.f32.mrb[60].mxu1 }
 0x40b   : > { %v2873_v39 = vpop.f32.mrb[61].mxu1 }
 0x40c   : > { %v4516_v52 = vadd.f32 %v2873_v39, %v2872_v1  ;;  %v2875_v42 = vpop.f32.mrb[62].mxu1 }
 0x40d   : > { %v2876_v48 = vpop.f32.mrb[63].mxu1 }
 0x40e   : > { %5517 = vst [vmem:[#allocation24_spill] sm:$0xff] %v4516_v52  ;;  %v4518_v31 = vadd.f32 %v2876_v48, %v2875_v42 }
 0x410   : > { %5518 = vst [vmem:[#allocation25_spill] sm:$0xff] %v4518_v31 }
 0x412   : > { %v4520_v56 = vpop.f32.mrb[64].mxu1 }
 0x413   : > { %v4522_v44 = vpop.f32.mrb[65].mxu1 }
 0x414   : > { %v1689_v27 = vmax.f32 %v4520_v56, %v4522_v44  ;;  %v4526_v15 = vpop.f32.mrb[66].mxu1 }
 0x415   : > { %v4528_v3 = vpop.f32.mrb[67].mxu1 }
 0x416   : > { %v1692_v61 = vmax.f32 %v4526_v15, %v4528_v3  ;;  %1690 = vmax.xlane.f32.xlu0 %v1689_v27 }
 0x418   : > { %1693 = vmax.xlane.f32.xlu1 %v1692_v61 }
 0x41a   : > { %v4532_v34 = vpop.f32.mrb[68].mxu1 }
 0x41b   : > { %v4534_v32 = vpop.f32.mrb[69].mxu1 }
 0x41c   : > { %v1695_v5 = vmax.f32 %v4532_v34, %v4534_v32  ;;  %v4538_v12 = vpop.f32.mrb[70].mxu1 }
 0x41d   : > { %v4540_v11 = vpop.f32.mrb[71].mxu1 }
 0x41e   : > { %1696 = vmax.xlane.f32.xlu0 %v1695_v5  ;;  %v1698_v17 = vmax.f32 %v4538_v12, %v4540_v11 }
 0x422   : > { %1699 = vmax.xlane.f32.xlu0 %v1698_v17  ;;  %v4544_v37 = vpop.f32.mrb[72].mxu1 }
 0x423   : > { %v4546_v20 = vpop.f32.mrb[73].mxu1 }
 0x424   : > { %v1701_v57 = vmax.f32 %v4544_v37, %v4546_v20  ;;  %v4550_v36 = vpop.f32.mrb[74].mxu1 }
 0x425   : > { %v4552_v2 = vpop.f32.mrb[75].mxu1 }
 0x426   : > { %1702 = vmax.xlane.f32.xlu0 %v1701_v57  ;;  %v1704_v7 = vmax.f32 %v4550_v36, %v4552_v2 }
 0x429   : > { %2213 = vrot.lane.b32.xlu1 %v5448_v13, %s3476_s20 }
 0x42a   : > { %v4558_v26 = vpop.f32.mrb[76].mxu1 }
 0x42b   : > { %v4560_v25 = vpop.f32.mrb[77].mxu1 }
 0x42c   : > { %v1707_v51 = vmax.f32 %v4558_v26, %v4560_v25  ;;  %v4564_v38 = vpop.f32.mrb[78].mxu1 }
 0x42d   : > { %v4566_v23 = vpop.f32.mrb[79].mxu1 }
 0x42e   : > { %1708 = vmax.xlane.f32.xlu0 %v1707_v51  ;;  %v1710_v58 = vmax.f32 %v4564_v38, %v4566_v23 }
 0x432   : > { %v4570_v59 = vpop.f32.mrb[80].mxu1 }
 0x433   : > { %v4572_v1 = vpop.f32.mrb[81].mxu1 }
 0x434   : > { %v1713_v13 = vmax.f32 %v4570_v59, %v4572_v1  ;;  %v4576_v39 = vpop.f32.mrb[82].mxu1 }
 0x435   : > { %v4578_v42 = vpop.f32.mrb[83].mxu1 }
 0x436   : > { %1714 = vmax.xlane.f32.xlu0 %v1713_v13  ;;  %v1716_v48 = vmax.f32 %v4576_v39, %v4578_v42 }
 0x43a   : > { %v4582_v27 = vpop.f32.mrb[84].mxu1 }
 0x43b   : > { %v4584_v61 = vpop.f32.mrb[85].mxu1 }
 0x43c   : > { %v1719_v5 = vmax.f32 %v4582_v27, %v4584_v61  ;;  %v4588_v17 = vpop.f32.mrb[86].mxu1 }
 0x43d   : > { %v4590_v57 = vpop.f32.mrb[87].mxu1 }
 0x43e   : > { %1720 = vmax.xlane.f32.xlu0 %v1719_v5  ;;  %v1722_v51 = vmax.f32 %v4588_v17, %v4590_v57 }
 0x442   : > { %v4594_v31 = vpop.f32.mrb[88].mxu1 }
 0x443   : > { %v4596_v13 = vpop.f32.mrb[89].mxu1 }
 0x444   : > { %v1725_v52 = vmax.f32 %v4594_v31, %v4596_v13  ;;  %v4600_v9 = vpop.f32.mrb[90].mxu1 }
 0x445   : > { %v4602_v41 = vpop.f32.mrb[91].mxu1 }
 0x446   : > { %1726 = vmax.xlane.f32.xlu0 %v1725_v52  ;;  %v1728_v49 = vmax.f32 %v4600_v9, %v4602_v41 }
 0x44a   : > { %v4606_v18 = vpop.f32.mrb[92].mxu1 }
 0x44b   : > { %v4608_v5 = vpop.f32.mrb[93].mxu1 }
 0x44c   : > { %v1731_v53 = vmax.f32 %v4606_v18, %v4608_v5  ;;  %v4612_v24 = vpop.f32.mrb[94].mxu1 }
 0x44d   : > { %1705 = vmax.xlane.f32.xlu1 %v1704_v7  ;;  %v4614_v19 = vpop.f32.mrb[95].mxu1 }
 0x44e   : > { %1732 = vmax.xlane.f32.xlu0 %v1731_v53  ;;  %v1734_v43 = vmax.f32 %v4612_v24, %v4614_v19 }
 0x451   : > { %1711 = vmax.xlane.f32.xlu1 %v1710_v58 }
 0x452   : > { %v4618_v52 = vpop.f32.mrb[96].mxu1 }
 0x453   : > { %v4620_v46 = vpop.f32.mrb[97].mxu1 }
 0x454   : > { %5519 = vst [vmem:[#allocation26_spill] sm:$0xff] %v4620_v46  ;;  %v1737_v40 = vmax.f32 %v4618_v52, %v4620_v46  ;;  %v4624_v30 = vpop.f32.mrb[98].mxu1 }
 0x455   : > { %1717 = vmax.xlane.f32.xlu1 %v1716_v48  ;;  %v4626_v63 = vpop.f32.mrb[99].mxu1 }
 0x456   : > { %1738 = vmax.xlane.f32.xlu0 %v1737_v40  ;;  %v1740_v53 = vmax.f32 %v4624_v30, %v4626_v63 }
 0x459   : > { %1723 = vmax.xlane.f32.xlu1 %v1722_v51 }
 0x45a   : > { %v4630_v7 = vpop.f32.mrb[100].mxu1 }
 0x45b   : > { %5520 = vst [vmem:[#allocation27_spill] sm:$0xff] %v4630_v7  ;;  %v4632_v58 = vpop.f32.mrb[101].mxu1 }
 0x45c   : > { %5521 = vst [vmem:[#allocation28_spill] sm:$0xff] %v4632_v58  ;;  %v1743_v62 = vmax.f32 %v4630_v7, %v4632_v58  ;;  %v4636_v28 = vpop.f32.mrb[102].mxu1 }
 0x45d   : > { %1729 = vmax.xlane.f32.xlu1 %v1728_v49  ;;  %v4638_v0 = vpop.f32.mrb[103].mxu1 }
 0x45e   : > { %1744 = vmax.xlane.f32.xlu0 %v1743_v62  ;;  %v1746_v40 = vmax.f32 %v4636_v28, %v4638_v0 }
 0x461   : > { %1735 = vmax.xlane.f32.xlu1 %v1734_v43 }
 0x462   : > { %v4642_v48 = vpop.f32.mrb[104].mxu1 }
 0x463   : > { %5522 = vst [vmem:[#allocation29_spill] sm:$0xff] %v4642_v48  ;;  %v4644_v51 = vpop.f32.mrb[105].mxu1 }
 0x464   : > { %5523 = vst [vmem:[#allocation30_spill] sm:$0xff] %v4644_v51  ;;  %v1749_v50 = vmax.f32 %v4642_v48, %v4644_v51  ;;  %v4648_v14 = vpop.f32.mrb[106].mxu1 }
 0x465   : > { %1741 = vmax.xlane.f32.xlu1 %v1740_v53  ;;  %v4650_v55 = vpop.f32.mrb[107].mxu1 }
 0x466   : > { %1750 = vmax.xlane.f32.xlu0 %v1749_v50  ;;  %v1752_v62 = vmax.f32 %v4648_v14, %v4650_v55 }
 0x469   : > { %1747 = vmax.xlane.f32.xlu1 %v1746_v40 }
 0x46a   : > { %v4654_v49 = vpop.f32.mrb[108].mxu1 }
 0x46b   : > { %5524 = vst [vmem:[#allocation31_spill] sm:$0xff] %v4654_v49  ;;  %v4656_v43 = vpop.f32.mrb[109].mxu1 }
 0x46c   : > { %5525 = vst [vmem:[#allocation53_spill] sm:$0xff] %v4656_v43  ;;  %v1755_v47 = vmax.f32 %v4654_v49, %v4656_v43  ;;  %v4660_v6 = vpop.f32.mrb[110].mxu1 }
 0x46d   : > { %1753 = vmax.xlane.f32.xlu1 %v1752_v62  ;;  %v4662_v60 = vpop.f32.mrb[111].mxu1 }
 0x46e   : > { %v1758_v53 = vmax.f32 %v4660_v6, %v4662_v60 }
 0x471   : > { %1756 = vmax.xlane.f32.xlu1 %v1755_v47 }
 0x472   : > { %v4666_v50 = vpop.f32.mrb[112].mxu1 }
 0x473   : > { %5526 = vst [vmem:[#allocation52_spill] sm:$0xff] %v4666_v50  ;;  %v4668_v16 = vpop.f32.mrb[113].mxu1 }
 0x474   : > { %5527 = vst [vmem:[#allocation32_spill] sm:$0xff] %v4668_v16  ;;  %v1761_v40 = vmax.f32 %v4666_v50, %v4668_v16  ;;  %v4672_v29 = vpop.f32.mrb[114].mxu1 }
 0x475   : > { %1759 = vmax.xlane.f32.xlu1 %v1758_v53  ;;  %v4674_v33 = vpop.f32.mrb[115].mxu1 }
 0x476   : > { %v1764_v62 = vmax.f32 %v4672_v29, %v4674_v33 }
 0x478   : > { %1765 = vmax.xlane.f32.xlu0 %v1764_v62 }
 0x479   : > { %1762 = vmax.xlane.f32.xlu1 %v1761_v40 }
 0x47a   : > { %v4678_v4 = vpop.f32.mrb[116].mxu1 }
 0x47b   : > { %5528 = vst [vmem:[#allocation33_spill] sm:$0xff] %v4678_v4  ;;  %v4680_v47 = vpop.f32.mrb[117].mxu1 }
 0x47c   : > { %5529 = vst [vmem:[#allocation54_spill] sm:$0xff] %v4680_v47  ;;  %v1767_v22 = vmax.f32 %v4678_v4, %v4680_v47  ;;  %v4684_v54 = vpop.f32.mrb[118].mxu1 }
 0x47d   : > { %v4686_v8 = vpop.f32.mrb[119].mxu1 }
 0x47e   : > { %v1770_v53 = vmax.f32 %v4684_v54, %v4686_v8  ;;  %1768 = vmax.xlane.f32.xlu1 %v1767_v22 }
 0x480   : > { %1771 = vmax.xlane.f32.xlu0 %v1770_v53 }
 0x482   : > { %v4690_v35 = vpop.f32.mrb[120].mxu1 }
 0x483   : > { %5530 = vst [vmem:[#allocation58_spill] sm:$0xff] %v4690_v35  ;;  %v4692_v62 = vpop.f32.mrb[121].mxu1 }
 0x484   : > { %5531 = vst [vmem:[#allocation56_spill] sm:$0xff] %v4692_v62  ;;  %v1773_v40 = vmax.f32 %v4690_v35, %v4692_v62  ;;  %v4696_v21 = vpop.f32.mrb[122].mxu1 }
 0x485   : > { %v4698_v16 = vpop.f32.mrb[123].mxu1 }
 0x486   : > { %1774 = vmax.xlane.f32.xlu0 %v1773_v40  ;;  %v1776_v47 = vmax.f32 %v4696_v21, %v4698_v16 }
 0x48a   : > { %1777 = vmax.xlane.f32.xlu0 %v1776_v47  ;;  %v4702_v4 = vpop.f32.mrb[124].mxu1 }
 0x48b   : > { %5532 = vst [vmem:[#allocation57_spill] sm:$0xff] %v4702_v4  ;;  %v4704_v22 = vpop.f32.mrb[125].mxu1 }
 0x48c   : > { %5533 = vst [vmem:[#allocation55_spill] sm:$0xff] %v4704_v22  ;;  %v1779_v53 = vmax.f32 %v4702_v4, %v4704_v22  ;;  %v4708_v50 = vpop.f32.mrb[126].mxu1 }
 0x48d   : > { %v4710_v43 = vpop.f32.mrb[127].mxu1 }
 0x48e   : > { %v1782_v62 = vmax.f32 %v4708_v50, %v4710_v43  ;;  %1780 = vmax.xlane.f32.xlu1 %v1779_v53 }
 0x490   : > { %1783 = vmax.xlane.f32.xlu0 %v1782_v62 }
 0x4a3   : > { %v1691_v40 = vpop.xlane.xlu0 %1690 }
 0x4a4   : > { %v1785_v35 = vsub.f32 %v4520_v56, %v1691_v40  ;;  %v1786_v47 = vsub.f32 %v4522_v44, %v1691_v40 }
 0x4a5   : > { %v1694_v49 = vpop.xlane.xlu1 %1693 }
 0x4a6   : > { %v1849_v51 = vmul.f32 1.442695, %v1785_v35  ;;  %v1851_v48 = vmul.f32 1.442695, %v1786_v47  ;;  %v1787_v58 = vsub.f32 %v4526_v15, %v1694_v49  ;;  %v1788_v22 = vsub.f32 %v4528_v3, %v1694_v49 }
 0x4a8   : > { %3274 = vpow2.f32 %v1849_v51  ;;  %v1853_v4 = vmul.f32 1.442695, %v1787_v58  ;;  %v1855_v7 = vmul.f32 1.442695, %v1788_v22 }
 0x4a9   : > { %3276 = vpow2.f32 %v1851_v48  ;;  %v2214_v46 = vpop.permute.xlu1 %2213 }
 0x4aa   : > { %3278 = vpow2.f32 %v1853_v4  ;;  %2939 = vmatpush3.bf16.msra.mxu0 %v2214_v46  ;;  %3052 = vmatpush3.bf16.msra.mxu1 %v2214_v46 }
 0x4ab   : > { %3280 = vpow2.f32 %v1855_v7  ;;  %v1697_v62 = vpop.xlane.xlu0 %1696 }
 0x4ac   : > { %v1789_v56 = vsub.f32 %v4532_v34, %v1697_v62  ;;  %v1790_v44 = vsub.f32 %v4534_v32, %v1697_v62 }
 0x4ae   : > { %v1857_v35 = vmul.f32 1.442695, %v1789_v56  ;;  %v1859_v53 = vmul.f32 1.442695, %v1790_v44 }
 0x4af   : > { %v1700_v40 = vpop.xlane.xlu0 %1699 }
 0x4b0   : > { %3282 = vpow2.f32 %v1857_v35  ;;  %v1791_v15 = vsub.f32 %v4538_v12, %v1700_v40  ;;  %v1792_v3 = vsub.f32 %v4540_v11, %v1700_v40 }
 0x4b1   : > { %3284 = vpow2.f32 %v1859_v53 }
 0x4b2   : > { %v4722_v58 = vpop.eup %3274  ;;  %v1861_v4 = vmul.f32 1.442695, %v1791_v15  ;;  %v1863_v48 = vmul.f32 1.442695, %v1792_v3 }
 0x4b3   : > { %v4724_v46 = vpop.eup %3276  ;;  %v1703_v7 = vpop.xlane.xlu0 %1702 }
 0x4b4   : > { %v4726_v51 = vpop.eup %3278  ;;  %3286 = vpow2.f32 %v1861_v4  ;;  %v1793_v34 = vsub.f32 %v4544_v37, %v1703_v7  ;;  %v1794_v32 = vsub.f32 %v4546_v20, %v1703_v7  ;;  %v1977_v12 = vadd.f32 %v4724_v46, %v4722_v58 }
 0x4b5   : > { %v4732_v49 = vpop.eup %3280  ;;  %3288 = vpow2.f32 %v1863_v48 }
 0x4b6   : > { %v1865_v11 = vmul.f32 1.442695, %v1793_v34  ;;  %v1867_v22 = vmul.f32 1.442695, %v1794_v32  ;;  %1978 = vadd.xlane.f32.xlu0 %v1977_v12  ;;  %v1980_v47 = vadd.f32 %v4732_v49, %v4726_v51 }
 0x4b8   : > { %3290 = vpow2.f32 %v1865_v11  ;;  %1981 = vadd.xlane.f32.xlu1 %v1980_v47 }
 0x4b9   : > { %3292 = vpow2.f32 %v1867_v22 }
 0x4ba   : > { %v4736_v62 = vpop.eup %3282 }
 0x4bb   : > { %v4738_v37 = vpop.eup %3284  ;;  %v1709_v20 = vpop.xlane.xlu0 %1708 }
 0x4bc   : > { %v1797_v56 = vsub.f32 %v4558_v26, %v1709_v20  ;;  %v1798_v44 = vsub.f32 %v4560_v25, %v1709_v20  ;;  %v1983_v35 = vadd.f32 %v4738_v37, %v4736_v62 }
 0x4be   : > { %v4744_v53 = vpop.eup %3286  ;;  %v1873_v40 = vmul.f32 1.442695, %v1797_v56  ;;  %v1875_v15 = vmul.f32 1.442695, %v1798_v44  ;;  %1984 = vadd.xlane.f32.xlu0 %v1983_v35 }
 0x4bf   : > { %v4746_v3 = vpop.eup %3288 }
 0x4c0   : > { %3294 = vpow2.f32 %v1873_v40  ;;  %v1986_v4 = vadd.f32 %v4746_v3, %v4744_v53 }
 0x4c1   : > { %3296 = vpow2.f32 %v1875_v15 }
 0x4c2   : > { %v4750_v48 = vpop.eup %3290  ;;  %1987 = vadd.xlane.f32.xlu0 %v1986_v4 }
 0x4c3   : > { %v4752_v26 = vpop.eup %3292 }
 0x4c4   : > { %v1989_v25 = vadd.f32 %v4752_v26, %v4750_v48 }
 0x4c6   : > { %1990 = vadd.xlane.f32.xlu0 %v1989_v25 }
 0x4ca   : > { %v4756_v7 = vpop.eup %3294 }
 0x4cb   : > { %5534 = vst [vmem:[#allocation60_spill] sm:$0xff] %v4756_v7  ;;  %v4758_v34 = vpop.eup %3296 }
 0x4cc   : > { %5535 = vst [vmem:[#allocation59_spill] sm:$0xff] %v4758_v34  ;;  %v1995_v32 = vadd.f32 %v4758_v34, %v4756_v7 }
 0x4ce   : > { %1996 = vadd.xlane.f32.xlu1 %v1995_v32 }
 0x4da   : > { %v1706_v12 = vpop.xlane.xlu1 %1705 }
 0x4db   : > { %v1795_v11 = vsub.f32 %v4550_v36, %v1706_v12  ;;  %v1796_v22 = vsub.f32 %v4552_v2, %v1706_v12  ;;  %v1715_v2 = vpop.xlane.xlu0 %1714 }
 0x4dd   : > { %v1869_v47 = vmul.f32 1.442695, %v1795_v11  ;;  %v1871_v20 = vmul.f32 1.442695, %v1796_v22 }
 0x4de   : > { %v1712_v56 = vpop.xlane.xlu1 %1711 }
 0x4df   : > { %3298 = vpow2.f32 %v1869_v47  ;;  %2215 = vrot.lane.b32.xlu1 %v5450_v45, %s3476_s20  ;;  %v1799_v44 = vsub.f32 %v4564_v38, %v1712_v56  ;;  %v1800_v35 = vsub.f32 %v4566_v23, %v1712_v56  ;;  %v1801_v45 = vsub.f32 %v4570_v59, %v1715_v2 }
 0x4e0   : > { %3300 = vpow2.f32 %v1871_v20  ;;  %v1802_v23 = vsub.f32 %v4572_v1, %v1715_v2 }
 0x4e1   : > { %v1877_v40 = vmul.f32 1.442695, %v1799_v44  ;;  %v1879_v15 = vmul.f32 1.442695, %v1800_v35  ;;  %v1881_v20 = vmul.f32 1.442695, %v1801_v45 }
 0x4e2   : > { %v4768_v4 = vpop.xlane.xlu1 %1717  ;;  %v1883_v35 = vmul.f32 1.442695, %v1802_v23 }
 0x4e3   : > { %3302 = vpow2.f32 %v1877_v40  ;;  %v4785_v40 = vpop.xlane.xlu0 %1720 }
 0x4e4   : > { %3304 = vpow2.f32 %v1879_v15 }
 0x4e5   : > { %3306 = vpow2.f32 %v1881_v20 }
 0x4e6   : > { %v1724_v36 = vpop.xlane.xlu1 %1723  ;;  %3308 = vpow2.f32 %v1883_v35 }
 0x4e7   : > { %v1807_v56 = vsub.f32 %v4588_v17, %v1724_v36  ;;  %v1808_v59 = vsub.f32 %v4590_v57, %v1724_v36 }
 0x4e9   : > { %v4770_v25 = vpop.eup %3298  ;;  %v1893_v1 = vmul.f32 1.442695, %v1807_v56  ;;  %v1895_v45 = vmul.f32 1.442695, %v1808_v59 }
 0x4ea   : > { %v4772_v32 = vpop.eup %3300  ;;  %v1730_v12 = vpop.xlane.xlu1 %1729 }
 0x4eb   : > { %v1992_v38 = vadd.f32 %v4772_v32, %v4770_v25  ;;  %v1811_v2 = vsub.f32 %v4600_v9, %v1730_v12  ;;  %v1812_v17 = vsub.f32 %v4602_v41, %v1730_v12  ;;  %3310 = vpow2.f32 %v1893_v1 }
 0x4ec   : > { %3312 = vpow2.f32 %v1895_v45 }
 0x4ed   : > { %v4778_v11 = vpop.eup %3302  ;;  %1993 = vadd.xlane.f32.xlu0 %v1992_v38  ;;  %v4789_v38 = vpop.xlane.xlu0 %1726  ;;  %v1903_v57 = vmul.f32 1.442695, %v1812_v17 }
 0x4ee   : > { %5536 = vst [vmem:[#allocation37_spill] sm:$0xff] %v4778_v11  ;;  %v4780_v22 = vpop.eup %3304  ;;  %v1736_v47 = vpop.xlane.xlu1 %1735 }
 0x4ef   : > { %v1998_v44 = vadd.f32 %v4780_v22, %v4778_v11  ;;  %v1901_v11 = vmul.f32 1.442695, %v1811_v2  ;;  %v1815_v23 = vsub.f32 %v4612_v24, %v1736_v47  ;;  %v1816_v36 = vsub.f32 %v4614_v19, %v1736_v47  ;;  %v4800_v35 = vpop.eup %3306 }
 0x4f0   : > { %v4802_v24 = vpop.eup %3308 }
 0x4f1   : > { %1999 = vadd.xlane.f32.xlu0 %v1998_v44  ;;  %v4793_v34 = vpop.xlane.xlu0 %1732  ;;  %3314 = vpow2.f32 %v1901_v11  ;;  %v1909_v9 = vmul.f32 1.442695, %v1815_v23  ;;  %v1911_v41 = vmul.f32 1.442695, %v1816_v36 }
 0x4f2   : > { %v1742_v15 = vpop.xlane.xlu1 %1741  ;;  %3316 = vpow2.f32 %v1903_v57 }
 0x4f3   : > { %v1819_v56 = vsub.f32 %v4624_v30, %v1742_v15  ;;  %v1820_v12 = vsub.f32 %v4626_v63, %v1742_v15  ;;  %3318 = vpow2.f32 %v1909_v9  ;;  %v2001_v63 = vadd.f32 %v4802_v24, %v4800_v35 }
 0x4f4   : > { %3320 = vpow2.f32 %v1911_v41 }
 0x4f5   : > { %v4797_v44 = vpop.xlane.xlu0 %1738  ;;  %v1917_v1 = vmul.f32 1.442695, %v1819_v56  ;;  %v1919_v30 = vmul.f32 1.442695, %v1820_v12  ;;  %v4810_v2 = vpop.eup %3310 }
 0x4f6   : > { %v1748_v7 = vpop.xlane.xlu1 %1747  ;;  %v4814_v15 = vpop.eup %3312 }
 0x4f7   : > { %v1823_v19 = vsub.f32 %v4636_v28, %v1748_v7  ;;  %v1824_v47 = vsub.f32 %v4638_v0, %v1748_v7  ;;  %3322 = vpow2.f32 %v1917_v1  ;;  %v2010_v7 = vadd.f32 %v4814_v15, %v4810_v2 }
 0x4f8   : > { %3324 = vpow2.f32 %v1919_v30 }
 0x4f9   : > { %v4807_v11 = vpop.xlane.xlu0 %1744  ;;  %v1925_v45 = vmul.f32 1.442695, %v1823_v19  ;;  %v1927_v23 = vmul.f32 1.442695, %v1824_v47 }
 0x4fa   : > { %v1754_v20 = vpop.xlane.xlu1 %1753 }
 0x4fb   : > { %v1827_v17 = vsub.f32 %v4648_v14, %v1754_v20  ;;  %v1828_v57 = vsub.f32 %v4650_v55, %v1754_v20  ;;  %v4820_v0 = vpop.eup %3314  ;;  %3326 = vpow2.f32 %v1925_v45 }
 0x4fc   : > { %v4824_v9 = vpop.eup %3316  ;;  %3328 = vpow2.f32 %v1927_v23  ;;  %v1804_v23 = vsub.f32 %v4578_v42, %v4768_v4  ;;  %v1809_v42 = vsub.f32 %v4594_v31, %v4789_v38 }
 0x4fd   : > { %v4817_v28 = vpop.xlane.xlu0 %1750  ;;  %v1933_v56 = vmul.f32 1.442695, %v1827_v17  ;;  %v1935_v14 = vmul.f32 1.442695, %v1828_v57  ;;  %v4830_v12 = vpop.eup %3318  ;;  %v2016_v1 = vadd.f32 %v4824_v9, %v4820_v0  ;;  %v1803_v17 = vsub.f32 %v4576_v39, %v4768_v4 }
 0x4fe   : > { %v4804_v59 = vpop.xlane.xlu1 %1756  ;;  %v4834_v19 = vpop.eup %3320  ;;  %v1897_v31 = vmul.f32 1.442695, %v1809_v42  ;;  %v1817_v42 = vsub.f32 %v4618_v52, %v4797_v44 }
 0x4ff   : > { %3330 = vpow2.f32 %v1933_v56  ;;  %v1806_v56 = vsub.f32 %v4584_v61, %v4785_v40  ;;  %v1885_v4 = vmul.f32 1.442695, %v1803_v17 }
 0x500   : > { %3332 = vpow2.f32 %v1935_v14  ;;  %v1810_v14 = vsub.f32 %v4596_v13, %v4789_v38 }
 0x502   : > { %v1760_v36 = vpop.xlane.xlu1 %1759  ;;  %v1899_v13 = vmul.f32 1.442695, %v1810_v14 }
 0x503   : > { %2002 = vadd.xlane.f32.xlu1 %v2001_v63  ;;  %v1831_v41 = vsub.f32 %v4660_v6, %v1760_v36  ;;  %v1832_v55 = vsub.f32 %v4662_v60, %v1760_v36  ;;  %v4838_v63 = vpop.eup %3322  ;;  %v2022_v60 = vadd.f32 %v4834_v19, %v4830_v12 }
 0x504   : > { %v4842_v45 = vpop.eup %3324 }
 0x505   : > { %v1766_v20 = vpop.xlane.xlu0 %1765  ;;  %v1941_v30 = vmul.f32 1.442695, %v1831_v41  ;;  %v2028_v39 = vadd.f32 %v4842_v45, %v4838_v63 }
 0x506   : > { %v1835_v6 = vsub.f32 %v4672_v29, %v1766_v20  ;;  %v1836_v47 = vsub.f32 %v4674_v33, %v1766_v20  ;;  %v1805_v33 = vsub.f32 %v4582_v27, %v4785_v40  ;;  %v1887_v27 = vmul.f32 1.442695, %v1804_v23 }
 0x507   : > { %2231 = vrot.lane.b32.xlu0 %v5451_v10, %s3476_s20  ;;  %2011 = vadd.xlane.f32.xlu1 %v2010_v7  ;;  %v1943_v10 = vmul.f32 1.442695, %v1832_v55  ;;  %3334 = vpow2.f32 %v1941_v30  ;;  %v4850_v7 = vpop.eup %3326  ;;  %v1891_v40 = vmul.f32 1.442695, %v1806_v56 }
 0x508   : > { %v1949_v29 = vmul.f32 1.442695, %v1835_v6  ;;  %v1951_v36 = vmul.f32 1.442695, %v1836_v47  ;;  %v4856_v41 = vpop.eup %3328  ;;  %v1889_v20 = vmul.f32 1.442695, %v1805_v33  ;;  %v1813_v47 = vsub.f32 %v4606_v18, %v4793_v34 }
 0x509   : > { %3336 = vpow2.f32 %v1943_v10  ;;  %v4864_v61 = vpop.eup %3330 }
 0x50a   : > { %3338 = vpow2.f32 %v1949_v29  ;;  %5537 = vst [vmem:[#allocation36_spill] sm:$0xff] %v4864_v61  ;;  %v4868_v30 = vpop.eup %3332 }
 0x50b   : > { %2017 = vadd.xlane.f32.xlu1 %v2016_v1  ;;  %3340 = vpow2.f32 %v1951_v36  ;;  %v2034_v1 = vadd.f32 %v4856_v41, %v4850_v7  ;;  %v2040_v29 = vadd.f32 %v4868_v30, %v4864_v61 }
 0x50c   : > { %3342 = vpow2.f32 %v1885_v4 }
 0x50d   : > { %v1772_v57 = vpop.xlane.xlu0 %1771  ;;  %3344 = vpow2.f32 %v1887_v27  ;;  %v5542_v27 = vld [vmem:[#allocation26_spill] sm:$0xff] }
 0x50e   : > { %v1839_v6 = vsub.f32 %v4684_v54, %v1772_v57  ;;  %v1840_v38 = vsub.f32 %v4686_v8, %v1772_v57  ;;  %3346 = vpow2.f32 %v1889_v20  ;;  %v1814_v54 = vsub.f32 %v4608_v5, %v4793_v34 }
 0x50f   : > { %2023 = vadd.xlane.f32.xlu1 %v2022_v60  ;;  %3348 = vpow2.f32 %v1891_v40  ;;  %v1818_v20 = vsub.f32 %v5542_v27, %v4797_v44 }
 0x510   : > { %3350 = vpow2.f32 %v1897_v31  ;;  %v1957_v57 = vmul.f32 1.442695, %v1839_v6  ;;  %v1959_v18 = vmul.f32 1.442695, %v1840_v38  ;;  %v1907_v56 = vmul.f32 1.442695, %v1814_v54 }
 0x511   : > { %v4876_v23 = vpop.eup %3334  ;;  %3352 = vpow2.f32 %v1899_v13 }
 0x512   : > { %5538 = vst [vmem:[#allocation3_spill] sm:$0xff] %v4876_v23 }
 0x513   : > { %2029 = vadd.xlane.f32.xlu1 %v2028_v39  ;;  %v4862_v55 = vpop.xlane.xlu0 %1774  ;;  %v4882_v8 = vpop.eup %3336 }
 0x514   : > { %5539 = vst [vmem:[#allocation2_spill] sm:$0xff] %v4882_v8  ;;  %v2046_v5 = vadd.f32 %v4882_v8, %v4876_v23 }
 0x517   : > { %2035 = vadd.xlane.f32.xlu1 %v2034_v1  ;;  %v1778_v10 = vpop.xlane.xlu0 %1777 }
 0x518   : > { %v1843_v60 = vsub.f32 %v4696_v21, %v1778_v10  ;;  %v1844_v17 = vsub.f32 %v4698_v16, %v1778_v10  ;;  %v1905_v21 = vmul.f32 1.442695, %v1813_v47  ;;  %v4884_v16 = vpop.eup %3338  ;;  %v1915_v10 = vmul.f32 1.442695, %v1818_v20  ;;  %v5544_v47 = vld [vmem:[#allocation28_spill] sm:$0xff] }
 0x519   : > { %5540 = vst [vmem:[#allocation5_spill] sm:$0xff] %v4884_v16  ;;  %v4888_v34 = vpop.eup %3340 }
 0x51a   : > { %v1965_v33 = vmul.f32 1.442695, %v1843_v60  ;;  %v1967_v36 = vmul.f32 1.442695, %v1844_v17  ;;  %5541 = vst [vmem:[#allocation4_spill] sm:$0xff] %v4888_v34  ;;  %v4896_v40 = vpop.eup %3342  ;;  %v2052_v52 = vadd.f32 %v4888_v34, %v4884_v16  ;;  %v1822_v60 = vsub.f32 %v5544_v47, %v4807_v11  ;;  %v5557_v16 = vld [vmem:[#allocation57_spill] sm:$0xff] }
 0x51b   : > { %2041 = vadd.xlane.f32.xlu1 %v2040_v29  ;;  %v4898_v6 = vpop.eup %3344 }
 0x51c   : > { %3354 = vpow2.f32 %v1965_v33  ;;  %v4902_v13 = vpop.eup %3346  ;;  %v2004_v54 = vadd.f32 %v4898_v6, %v4896_v40 }
 0x51d   : > { %3356 = vpow2.f32 %v1967_v36  ;;  %v1784_v39 = vpop.xlane.xlu0 %1783  ;;  %v4906_v44 = vpop.eup %3348  ;;  %v5545_v36 = vld [vmem:[#allocation29_spill] sm:$0xff] }
 0x51e   : > { %3358 = vpow2.f32 %v1957_v57  ;;  %v1847_v4 = vsub.f32 %v4708_v50, %v1784_v39  ;;  %v1848_v14 = vsub.f32 %v4710_v43, %v1784_v39  ;;  %v1913_v50 = vmul.f32 1.442695, %v1817_v42  ;;  %v5543_v43 = vld [vmem:[#allocation27_spill] sm:$0xff]  ;;  %v4910_v17 = vpop.eup %3350 }
 0x51f   : > { %3360 = vpow2.f32 %v1959_v18  ;;  %2047 = vadd.xlane.f32.xlu1 %v2046_v5  ;;  %v1821_v38 = vsub.f32 %v5543_v43, %v4807_v11  ;;  %v4914_v29 = vpop.eup %3352  ;;  %v1825_v18 = vsub.f32 %v5545_v36, %v4817_v28  ;;  %v1923_v11 = vmul.f32 1.442695, %v1822_v60  ;;  %v5551_v36 = vld [vmem:[#allocation52_spill] sm:$0xff] }
 0x520   : > { %3362 = vpow2.f32 %v1905_v21  ;;  %v1973_v1 = vmul.f32 1.442695, %v1847_v4  ;;  %v1975_v31 = vmul.f32 1.442695, %v1848_v14  ;;  %v2007_v42 = vadd.f32 %v4906_v44, %v4902_v13 }
 0x521   : > { %3364 = vpow2.f32 %v1907_v56  ;;  %v1921_v33 = vmul.f32 1.442695, %v1821_v38  ;;  %v5546_v56 = vld [vmem:[#allocation30_spill] sm:$0xff]  ;;  %v1929_v20 = vmul.f32 1.442695, %v1825_v18  ;;  %v1763_v38 = vpop.xlane.xlu1 %1762  ;;  %v2013_v47 = vadd.f32 %v4914_v29, %v4910_v17 }
 0x522   : > { %3366 = vpow2.f32 %v1973_v1  ;;  %v1826_v39 = vsub.f32 %v5546_v56, %v4817_v28  ;;  %v5549_v1 = vld [vmem:[#allocation31_spill] sm:$0xff]  ;;  %v1833_v18 = vsub.f32 %v5551_v36, %v1763_v38 }
 0x523   : > { %3368 = vpow2.f32 %v1975_v31  ;;  %2053 = vadd.xlane.f32.xlu1 %v2052_v52  ;;  %v1829_v31 = vsub.f32 %v5549_v1, %v4804_v59 }
 0x524   : > { %3370 = vpow2.f32 %v1913_v50  ;;  %v1931_v52 = vmul.f32 1.442695, %v1826_v39  ;;  %v5550_v50 = vld [vmem:[#allocation53_spill] sm:$0xff] }
 0x525   : > { %3372 = vpow2.f32 %v1915_v10  ;;  %v1830_v43 = vsub.f32 %v5550_v50, %v4804_v59  ;;  %v5552_v59 = vld [vmem:[#allocation32_spill] sm:$0xff] }
 0x526   : > { %v4916_v57 = vpop.eup %3354  ;;  %2005 = vadd.xlane.f32.xlu0 %v2004_v54  ;;  %3374 = vpow2.f32 %v1921_v33  ;;  %v1937_v33 = vmul.f32 1.442695, %v1829_v31  ;;  %v1834_v56 = vsub.f32 %v5552_v59, %v1763_v38  ;;  %v5553_v31 = vld [vmem:[#allocation58_spill] sm:$0xff]  ;;  %v5554_v38 = vld [vmem:[#allocation56_spill] sm:$0xff] }
 0x527   : > { %v4920_v21 = vpop.eup %3356  ;;  %3376 = vpow2.f32 %v1923_v11  ;;  %v1939_v11 = vmul.f32 1.442695, %v1830_v43  ;;  %v1841_v50 = vsub.f32 %v5553_v31, %v4862_v55  ;;  %v1769_v43 = vpop.xlane.xlu1 %1768 }
 0x528   : > { %v4924_v5 = vpop.eup %3358  ;;  %v2064_v4 = vadd.f32 %v4920_v21, %v4916_v57  ;;  %3378 = vpow2.f32 %v1929_v20  ;;  %v1945_v20 = vmul.f32 1.442695, %v1833_v18 }
 0x529   : > { %5547 = vst [vmem:[#allocation7_spill] sm:$0xff] %v4924_v5  ;;  %v4930_v14 = vpop.eup %3360  ;;  %3380 = vpow2.f32 %v1931_v52  ;;  %v1947_v52 = vmul.f32 1.442695, %v1834_v56 }
 0x52a   : > { %5548 = vst [vmem:[#allocation6_spill] sm:$0xff] %v4930_v14  ;;  %v4932_v27 = vpop.eup %3362  ;;  %2008 = vadd.xlane.f32.xlu0 %v2007_v42  ;;  %2065 = vadd.xlane.f32.xlu1 %v2064_v4  ;;  %v2058_v60 = vadd.f32 %v4930_v14, %v4924_v5  ;;  %3382 = vpow2.f32 %v1937_v33  ;;  %v5555_v33 = vld [vmem:[#allocation33_spill] sm:$0xff]  ;;  %v1961_v5 = vmul.f32 1.442695, %v1841_v50  ;;  %v5558_v50 = vld [vmem:[#allocation55_spill] sm:$0xff] }
 0x52b   : > { %v4936_v28 = vpop.eup %3364  ;;  %3384 = vpow2.f32 %v1939_v11  ;;  %v1837_v18 = vsub.f32 %v5555_v33, %v1769_v43 }
 0x52c   : > { %v4940_v10 = vpop.eup %3366  ;;  %v2019_v42 = vadd.f32 %v4936_v28, %v4932_v27  ;;  %3386 = vpow2.f32 %v1945_v20 }
 0x52d   : > { %v4946_v54 = vpop.eup %3368  ;;  %3388 = vpow2.f32 %v1947_v52  ;;  %v1953_v14 = vmul.f32 1.442695, %v1837_v18 }
 0x52e   : > { %2014 = vadd.xlane.f32.xlu0 %v2013_v47  ;;  %2059 = vadd.xlane.f32.xlu1 %v2058_v60  ;;  %v4950_v39 = vpop.eup %3370  ;;  %v2070_v4 = vadd.f32 %v4946_v54, %v4940_v10  ;;  %v1842_v47 = vsub.f32 %v5554_v38, %v4862_v55  ;;  %3390 = vpow2.f32 %v1961_v5 }
 0x52f   : > { %v4956_v1 = vpop.eup %3372 }
 0x530   : > { %v4962_v60 = vpop.eup %3374  ;;  %v2025_v36 = vadd.f32 %v4956_v1, %v4950_v39  ;;  %v1963_v56 = vmul.f32 1.442695, %v1842_v47 }
 0x531   : > { %v4966_v59 = vpop.eup %3376 }
 0x532   : > { %2020 = vadd.xlane.f32.xlu0 %v2019_v42  ;;  %2071 = vadd.xlane.f32.xlu1 %v2070_v4  ;;  %v5556_v42 = vld [vmem:[#allocation54_spill] sm:$0xff]  ;;  %v1781_v4 = vpop.xlane.xlu1 %1780  ;;  %v4970_v31 = vpop.eup %3378  ;;  %v2031_v55 = vadd.f32 %v4966_v59, %v4962_v60  ;;  %3392 = vpow2.f32 %v1963_v56 }
 0x533   : > { %v1838_v11 = vsub.f32 %v5556_v42, %v1769_v43  ;;  %v4974_v38 = vpop.eup %3380  ;;  %v1845_v20 = vsub.f32 %v5557_v16, %v1781_v4  ;;  %v1846_v52 = vsub.f32 %v5558_v50, %v1781_v4  ;;  %3394 = vpow2.f32 %v1953_v14 }
 0x534   : > { %v2037_v43 = vadd.f32 %v4974_v38, %v4970_v31 }
 0x535   : > { %v1955_v33 = vmul.f32 1.442695, %v1838_v11  ;;  %v1969_v42 = vmul.f32 1.442695, %v1845_v20  ;;  %v1971_v18 = vmul.f32 1.442695, %v1846_v52 }
 0x536   : > { %2026 = vadd.xlane.f32.xlu0 %v2025_v36  ;;  %v4978_v36 = vpop.eup %3382 }
 0x537   : > { %5559 = vst [vmem:[#allocation10_spill] sm:$0xff] %v4978_v36  ;;  %v4982_v47 = vpop.eup %3384  ;;  %3396 = vpow2.f32 %v1955_v33 }
 0x538   : > { %v4984_v5 = vpop.eup %3386  ;;  %v2043_v16 = vadd.f32 %v4982_v47, %v4978_v36  ;;  %3398 = vpow2.f32 %v1969_v42 }
 0x539   : > { %5560 = vst [vmem:[#allocation9_spill] sm:$0xff] %v4984_v5  ;;  %v4988_v11 = vpop.eup %3388  ;;  %3400 = vpow2.f32 %v1971_v18 }
 0x53a   : > { %2032 = vadd.xlane.f32.xlu0 %v2031_v55  ;;  %5561 = vst [vmem:[#allocation26_spill] sm:$0xff] %v4988_v11  ;;  %v4990_v4 = vpop.eup %3390  ;;  %v2049_v14 = vadd.f32 %v4988_v11, %v4984_v5 }
 0x53c   : > { %v4994_v55 = vpop.eup %3392 }
 0x53d   : > { %v4996_v33 = vpop.eup %3394  ;;  %v2061_v50 = vadd.f32 %v4994_v55, %v4990_v4 }
 0x53e   : > { %2038 = vadd.xlane.f32.xlu0 %v2037_v43  ;;  %5562 = vst [vmem:[#allocation27_spill] sm:$0xff] %v4996_v33 }
 0x541   : > { %v5000_v52 = vpop.eup %3396 }
 0x542   : > { %2044 = vadd.xlane.f32.xlu0 %v2043_v16  ;;  %5563 = vst [vmem:[#allocation28_spill] sm:$0xff] %v5000_v52  ;;  %v5002_v43 = vpop.eup %3398  ;;  %v2055_v42 = vadd.f32 %v5000_v52, %v4996_v33 }
 0x543   : > { %v1979_v56 = vpop.xlane.xlu0 %1978  ;;  %v5006_v18 = vpop.eup %3400 }
 0x544   : > { %3402 = vrcp.f32 %v1979_v56 }
 0x545   : > { %v1982_v20 = vpop.xlane.xlu1 %1981 }
 0x546   : > { %3404 = vrcp.f32 %v1982_v20  ;;  %2050 = vadd.xlane.f32.xlu0 %v2049_v14  ;;  %v2067_v14 = vadd.f32 %v5006_v18, %v5002_v43 }
 0x54a   : > { %2062 = vadd.xlane.f32.xlu0 %v2061_v50 }
 0x54b   : > { %v1985_v50 = vpop.xlane.xlu0 %1984 }
 0x54e   : > { %v3403_v16 = vpop.eup %3402  ;;  %2056 = vadd.xlane.f32.xlu0 %v2055_v42 }
 0x54f   : > { %v2106_v20 = vmul.f32 %v3403_v16, %v4724_v46  ;;  %v1988_v23 = vpop.xlane.xlu0 %1987 }
 0x550   : > { %v3405_v56 = vpop.eup %3404  ;;  %3406 = vrcp.f32 %v1988_v23 }
 0x551   : > { %v2108_v5 = vmul.f32 %v3405_v56, %v4732_v49  ;;  %3408 = vrcp.f32 %v1985_v50  ;;  %v2107_v61 = vmul.f32 %v3405_v56, %v4726_v51 }
 0x552   : > { %2068 = vadd.xlane.f32.xlu0 %v2067_v14 }
 0x553   : > { %v2170_v34 = vpack.c.bf16 %v2108_v5, %v2106_v20  ;;  %v1991_v11 = vpop.xlane.xlu0 %1990  ;;  %v2105_v5 = vmul.f32 %v3403_v16, %v4722_v58 }
 0x555   : > { %2281 = vmatprep.mubr.bf16.mxu0 %v2170_v34 }
 0x55a   : > { %v3407_v42 = vpop.eup %3406 }
 0x55b   : > { %v1997_v36 = vpop.xlane.xlu1 %1996  ;;  %v3409_v8 = vpop.eup %3408  ;;  %v2112_v49 = vmul.f32 %v3407_v42, %v4746_v3  ;;  %v2111_v56 = vmul.f32 %v3407_v42, %v4744_v53 }
 0x55c   : > { %v2110_v23 = vmul.f32 %v3409_v8, %v4738_v37  ;;  %v2109_v58 = vmul.f32 %v3409_v8, %v4736_v62  ;;  %v5565_v62 = vld [vmem:[#allocation37_spill] sm:$0xff] }
 0x55e   : > { %v2172_v14 = vpack.c.bf16 %v2112_v49, %v2110_v23  ;;  %v2171_v20 = vpack.c.bf16 %v2111_v56, %v2109_v58  ;;  %v5564_v49 = vld [vmem:[#allocation59_spill] sm:$0xff] }
 0x55f   : > { %v2216_v34 = vpop.permute.xlu1 %2215 }
 0x57a   : > { %v1994_v33 = vpop.xlane.xlu0 %1993 }
 0x57b   : > { %3410 = vrcp.f32 %v1994_v33  ;;  %v2169_v33 = vpack.c.bf16 %v2107_v61, %v2105_v5  ;;  %v5566_v5 = vld [vmem:[#allocation60_spill] sm:$0xff] }
 0x57c   : > { %3412 = vrcp.f32 %v1991_v11 }
 0x57e   : > { %v2000_v52 = vpop.xlane.xlu0 %1999 }
 0x57f   : > { %3414 = vrcp.f32 %v2000_v52 }
 0x580   : > { %3416 = vrcp.f32 %v1997_v36 }
 0x582   : > { %v2232_v46 = vpop.permute.xlu0 %2231 }
 0x583   : > { %2940 = vmatprep.subr.bf16.mxu0 %v2232_v46  ;;  %3045 = vmatprep.subr.bf16.mxu1 %v2232_v46 }
 0x584   : > { %2941 = vmatpush3.bf16.msra.mxu0 %v2216_v34  ;;  %3053 = vmatpush3.bf16.msra.mxu1 %v2216_v34 }
 0x585   : > { %v3411_v11 = vpop.eup %3410 }
 0x586   : > { %v3413_v51 = vpop.eup %3412  ;;  %v2116_v3 = vmul.f32 %v3411_v11, %v4772_v32  ;;  %v2115_v61 = vmul.f32 %v3411_v11, %v4770_v25 }
 0x587   : > { %2282 = vmatmul.mubr.bf16.vlgmr.msra.gmra.mrb[64].mxu0 %v2169_v33  ;;  %v2114_v16 = vmul.f32 %v3413_v51, %v4752_v26  ;;  %v2113_v52 = vmul.f32 %v3413_v51, %v4750_v48 }
 0x588   : > { %2289 = vmatprep.mubr.bf16.mxu0 %v2172_v14 }
 0x589   : > { %v2174_v50 = vpack.c.bf16 %v2116_v3, %v2114_v16  ;;  %v3415_v46 = vpop.eup %3414  ;;  %v2173_v42 = vpack.c.bf16 %v2115_v61, %v2113_v52 }
 0x58a   : > { %v3417_v37 = vpop.eup %3416  ;;  %v2120_v36 = vmul.f32 %v3415_v46, %v4780_v22  ;;  %v2119_v26 = vmul.f32 %v3415_v46, %v5565_v62 }
 0x58b   : > { %v2118_v53 = vmul.f32 %v3417_v37, %v5564_v49  ;;  %v2117_v34 = vmul.f32 %v3417_v37, %v5566_v5 }
 0x58d   : > { %v2176_v32 = vpack.c.bf16 %v2120_v36, %v2118_v53  ;;  %v2175_v23 = vpack.c.bf16 %v2119_v26, %v2117_v34 }
 0x58f   : > { %2290 = vmatmul.mubr.bf16.gmra.mrb[68].mxu0 %v2171_v20 }
 0x590   : > { %2297 = vmatprep.mubr.bf16.mxu0 %v2174_v50  ;;  %v2003_v8 = vpop.xlane.xlu1 %2002 }
 0x591   : > { %3418 = vrcp.f32 %v2003_v8 }
 0x594   : > { %v2012_v33 = vpop.xlane.xlu1 %2011 }
 0x597   : > { %2298 = vmatmul.mubr.bf16.gmra.mrb[72].mxu0 %v2173_v42 }
 0x598   : > { %2305 = vmatprep.mubr.bf16.mxu0 %v2176_v32  ;;  %v2018_v14 = vpop.xlane.xlu1 %2017 }
 0x59b   : > { %v3419_v3 = vpop.eup %3418 }
 0x59c   : > { %v2024_v25 = vpop.xlane.xlu1 %2023  ;;  %v2122_v50 = vmul.f32 %v3419_v3, %v4802_v24  ;;  %v2121_v37 = vmul.f32 %v3419_v3, %v4800_v35 }
 0x59f   : > { %2306 = vmatmul.mubr.bf16.gmra.mrb[76].mxu0 %v2175_v23 }
 0x5a0   : > { %v2030_v22 = vpop.xlane.xlu1 %2029 }
 0x5a4   : > { %v2036_v51 = vpop.xlane.xlu1 %2035 }
 0x5a8   : > { %v5026_v16 = vpop.xlane.xlu1 %2041 }
 0x5ac   : > { %v5034_v26 = vpop.xlane.xlu1 %2047 }
 0x5b3   : > { %v2006_v11 = vpop.xlane.xlu0 %2005 }
 0x5b4   : > { %3420 = vrcp.f32 %v2006_v11 }
 0x5b5   : > { %3422 = vrcp.f32 %v2012_v33 }
 0x5b7   : > { %v2009_v48 = vpop.xlane.xlu0 %2008 }
 0x5b8   : > { %3424 = vrcp.f32 %v2009_v48 }
 0x5b9   : > { %3426 = vrcp.f32 %v2018_v14 }
 0x5bb   : > { %v2015_v56 = vpop.xlane.xlu0 %2014 }
 0x5bc   : > { %3428 = vrcp.f32 %v2015_v56 }
 0x5be   : > { %v3421_v58 = vpop.eup %3420 }
 0x5bf   : > { %v2021_v20 = vpop.xlane.xlu0 %2020  ;;  %v2124_v46 = vmul.f32 %v3421_v58, %v4898_v6  ;;  %v2123_v61 = vmul.f32 %v3421_v58, %v4896_v40  ;;  %v3423_v36 = vpop.eup %3422 }
 0x5c0   : > { %3430 = vrcp.f32 %v2021_v20  ;;  %v2128_v62 = vmul.f32 %v3423_v36, %v4814_v15  ;;  %v2127_v34 = vmul.f32 %v3423_v36, %v4810_v2 }
 0x5c1   : > { %v2178_v52 = vpack.c.bf16 %v2124_v46, %v2122_v50  ;;  %v2177_v49 = vpack.c.bf16 %v2123_v61, %v2121_v37  ;;  %3432 = vrcp.f32 %v2024_v25 }
 0x5c2   : > { %v3425_v53 = vpop.eup %3424 }
 0x5c3   : > { %v2027_v42 = vpop.xlane.xlu0 %2026  ;;  %2313 = vmatprep.mubr.bf16.mxu0 %v2178_v52  ;;  %v2126_v32 = vmul.f32 %v3425_v53, %v4906_v44  ;;  %v3427_v24 = vpop.eup %3426  ;;  %v2125_v40 = vmul.f32 %v3425_v53, %v4902_v13 }
 0x5c4   : > { %2314 = vmatmul.mubr.bf16.gmra.mrb[80].mxu0 %v2177_v49  ;;  %v2132_v23 = vmul.f32 %v3427_v24, %v4824_v9  ;;  %v5040_v44 = vpop.xlane.xlu1 %2053  ;;  %3434 = vrcp.f32 %v2027_v42  ;;  %v2131_v2 = vmul.f32 %v3427_v24, %v4820_v0 }
 0x5c5   : > { %v2180_v6 = vpack.c.bf16 %v2128_v62, %v2126_v32  ;;  %v2179_v15 = vpack.c.bf16 %v2127_v34, %v2125_v40  ;;  %3436 = vrcp.f32 %v2030_v22 }
 0x5c6   : > { %v3429_v35 = vpop.eup %3428 }
 0x5c7   : > { %v2033_v8 = vpop.xlane.xlu0 %2032  ;;  %2321 = vmatprep.mubr.bf16.mxu0 %v2180_v6  ;;  %v2130_v5 = vmul.f32 %v3429_v35, %v4914_v29  ;;  %v2129_v48 = vmul.f32 %v3429_v35, %v4910_v17 }
 0x5c8   : > { %v2066_v13 = vpop.xlane.xlu1 %2065  ;;  %3438 = vrcp.f32 %v2033_v8 }
 0x5c9   : > { %v2182_v14 = vpack.c.bf16 %v2132_v23, %v2130_v5  ;;  %v2181_v3 = vpack.c.bf16 %v2131_v2, %v2129_v48  ;;  %3440 = vrcp.f32 %v2036_v51  ;;  %v5568_v48 = vld [vmem:[#allocation2_spill] sm:$0xff] }
 0x5ca   : > { %v3431_v25 = vpop.eup %3430  ;;  %3442 = vrcp.f32 %v2066_v13  ;;  %v5567_v13 = vld [vmem:[#allocation36_spill] sm:$0xff]  ;;  %v5569_v2 = vld [vmem:[#allocation10_spill] sm:$0xff] }
 0x5cb   : > { %v2039_v33 = vpop.xlane.xlu0 %2038  ;;  %v3433_v11 = vpop.eup %3432  ;;  %v2134_v29 = vmul.f32 %v3431_v25, %v4936_v28  ;;  %v2133_v17 = vmul.f32 %v3431_v25, %v4932_v27 }
 0x5cc   : > { %2322 = vmatmul.mubr.bf16.gmra.mrb[84].mxu0 %v2179_v15  ;;  %v2136_v9 = vmul.f32 %v3433_v11, %v4834_v19  ;;  %v5046_v22 = vpop.xlane.xlu1 %2059  ;;  %v2135_v0 = vmul.f32 %v3433_v11, %v4830_v12 }
 0x5cd   : > { %2329 = vmatprep.mubr.bf16.mxu0 %v2182_v14 }
 0x5ce   : > { %v2184_v20 = vpack.c.bf16 %v2136_v9, %v2134_v29  ;;  %v3435_v50 = vpop.eup %3434  ;;  %v2183_v36 = vpack.c.bf16 %v2135_v0, %v2133_v17  ;;  %v5573_v0 = vld [vmem:[#allocation9_spill] sm:$0xff] }
 0x5cf   : > { %v2045_v56 = vpop.xlane.xlu0 %2044  ;;  %v3437_v46 = vpop.eup %3436  ;;  %v2138_v28 = vmul.f32 %v3435_v50, %v4956_v1  ;;  %v2137_v53 = vmul.f32 %v3435_v50, %v4950_v39 }
 0x5d0   : > { %v2140_v19 = vmul.f32 %v3437_v46, %v4842_v45  ;;  %v2072_v61 = vpop.xlane.xlu1 %2071  ;;  %v2139_v45 = vmul.f32 %v3437_v46, %v4838_v63 }
 0x5d2   : > { %v2186_v52 = vpack.c.bf16 %v2140_v19, %v2138_v28  ;;  %v3439_v49 = vpop.eup %3438 }
 0x5d3   : > { %v2051_v58 = vpop.xlane.xlu0 %2050  ;;  %v3441_v27 = vpop.eup %3440  ;;  %v2142_v12 = vmul.f32 %v3439_v49, %v4966_v59  ;;  %v2141_v5 = vmul.f32 %v3439_v49, %v4962_v60 }
 0x5d4   : > { %2330 = vmatmul.mubr.bf16.gmra.mrb[88].mxu0 %v2181_v3  ;;  %v3443_v1 = vpop.eup %3442  ;;  %v2144_v32 = vmul.f32 %v3441_v27, %v4856_v41 }
 0x5d5   : > { %2337 = vmatprep.mubr.bf16.mxu0 %v2184_v20  ;;  %v2163_v24 = vmul.f32 %v3443_v1, %v4916_v57  ;;  %v2164_v39 = vmul.f32 %v3443_v1, %v4920_v21  ;;  %v5572_v20 = vld [vmem:[#allocation4_spill] sm:$0xff]  ;;  %v5577_v1 = vld [vmem:[#allocation27_spill] sm:$0xff] }
 0x5d6   : > { %v2188_v35 = vpack.c.bf16 %v2144_v32, %v2142_v12  ;;  %v5578_v12 = vld [vmem:[#allocation7_spill] sm:$0xff] }
 0x5d7   : > { %v2063_v37 = vpop.xlane.xlu0 %2062 }
 0x5d8   : > { %3444 = vrcp.f32 %v2063_v37 }
 0x5d9   : > { %3446 = vrcp.f32 %v2039_v33 }
 0x5da   : > { %3448 = vrcp.f32 %v5026_v16  ;;  %v2185_v16 = vpack.c.bf16 %v2139_v45, %v2137_v53 }
 0x5db   : > { %v2057_v51 = vpop.xlane.xlu0 %2056  ;;  %3450 = vrcp.f32 %v2072_v61 }
 0x5dc   : > { %2338 = vmatmul.mubr.bf16.gmra.mrb[92].mxu0 %v2183_v36  ;;  %v5575_v36 = vld [vmem:[#allocation5_spill] sm:$0xff] }
 0x5dd   : > { %2345 = vmatprep.mubr.bf16.mxu0 %v2186_v52  ;;  %v5576_v52 = vld [vmem:[#allocation6_spill] sm:$0xff] }
 0x5df   : > { %v2069_v42 = vpop.xlane.xlu0 %2068 }
 0x5e0   : > { %3452 = vrcp.f32 %v2069_v42 }
 0x5e1   : > { %3454 = vrcp.f32 %v2045_v56 }
 0x5e2   : > { %v3445_v62 = vpop.eup %3444  ;;  %3456 = vrcp.f32 %v5034_v26 }
 0x5e3   : > { %v2161_v6 = vmul.f32 %v3445_v62, %v4990_v4  ;;  %v2162_v40 = vmul.f32 %v3445_v62, %v4994_v55  ;;  %v3447_v8 = vpop.eup %3446  ;;  %v2143_v4 = vmul.f32 %v3441_v27, %v4850_v7  ;;  %3458 = vrcp.f32 %v2051_v58  ;;  %v5571_v58 = vld [vmem:[#allocation3_spill] sm:$0xff] }
 0x5e4   : > { %2346 = vmatmul.mubr.bf16.gmra.mrb[96].mxu0 %v2185_v16  ;;  %v3449_v41 = vpop.eup %3448  ;;  %v2146_v34 = vmul.f32 %v3447_v8, %v4974_v38  ;;  %3460 = vrcp.f32 %v5040_v44  ;;  %v2145_v11 = vmul.f32 %v3447_v8, %v4970_v31  ;;  %v5570_v31 = vld [vmem:[#allocation26_spill] sm:$0xff] }
 0x5e5   : > { %2353 = vmatprep.mubr.bf16.mxu0 %v2188_v35  ;;  %v2198_v63 = vpack.c.bf16 %v2164_v39, %v2162_v40  ;;  %v2197_v59 = vpack.c.bf16 %v2163_v24, %v2161_v6  ;;  %v3451_v57 = vpop.eup %3450  ;;  %v2148_v55 = vmul.f32 %v3449_v41, %v4868_v30  ;;  %v2187_v23 = vpack.c.bf16 %v2143_v4, %v2141_v5 }
 0x5e6   : > { %v2168_v26 = vmul.f32 %v3451_v57, %v4946_v54  ;;  %v2167_v60 = vmul.f32 %v3451_v57, %v4940_v10  ;;  %3462 = vrcp.f32 %v2057_v51 }
 0x5e7   : > { %2393 = vmatprep.mubr.bf16.mxu1 %v2198_v63  ;;  %v2190_v15 = vpack.c.bf16 %v2148_v55, %v2146_v34  ;;  %3464 = vrcp.f32 %v5046_v22  ;;  %v5574_v22 = vld [vmem:[#allocation28_spill] sm:$0xff] }
 0x5e8   : > { %2394 = vmatmul.mubr.bf16.vlgmr.msra.gmra.mrb[128].mxu1 %v2197_v59 }
 0x5ea   : > { %v3453_v21 = vpop.eup %3452 }
 0x5eb   : > { %v2166_v33 = vmul.f32 %v3453_v21, %v5006_v18  ;;  %v2165_v14 = vmul.f32 %v3453_v21, %v5002_v43  ;;  %v3455_v25 = vpop.eup %3454  ;;  %v2147_v18 = vmul.f32 %v3449_v41, %v5567_v13 }
 0x5ec   : > { %2354 = vmatmul.mubr.bf16.gmra.mrb[100].mxu0 %v2187_v23  ;;  %v3457_v30 = vpop.eup %3456  ;;  %v2150_v54 = vmul.f32 %v3455_v25, %v4982_v47  ;;  %v2149_v9 = vmul.f32 %v3455_v25, %v5569_v2 }
 0x5ed   : > { %2361 = vmatprep.mubr.bf16.mxu0 %v2190_v15  ;;  %v2200_v7 = vpack.c.bf16 %v2168_v26, %v2166_v33  ;;  %v2199_v38 = vpack.c.bf16 %v2167_v60, %v2165_v14  ;;  %v2152_v43 = vmul.f32 %v3457_v30, %v5568_v48  ;;  %v2189_v10 = vpack.c.bf16 %v2147_v18, %v2145_v11  ;;  %v3459_v29 = vpop.eup %3458 }
 0x5ee   : > { %v3461_v44 = vpop.eup %3460  ;;  %v2154_v3 = vmul.f32 %v3459_v29, %v5570_v31  ;;  %v2151_v47 = vmul.f32 %v3457_v30, %v5571_v58  ;;  %v2153_v19 = vmul.f32 %v3459_v29, %v5573_v0 }
 0x5ef   : > { %2401 = vmatprep.mubr.bf16.mxu1 %v2200_v7  ;;  %v2192_v56 = vpack.c.bf16 %v2152_v43, %v2150_v54  ;;  %v2156_v50 = vmul.f32 %v3461_v44, %v5572_v20  ;;  %v2155_v51 = vmul.f32 %v3461_v44, %v5575_v36 }
 0x5f0   : > { %2402 = vmatmul.mubr.bf16.gmra.mrb[132].mxu1 %v2199_v38  ;;  %v2191_v46 = vpack.c.bf16 %v2151_v47, %v2149_v9  ;;  %v3463_v37 = vpop.eup %3462 }
 0x5f1   : > { %v2194_v17 = vpack.c.bf16 %v2156_v50, %v2154_v3  ;;  %v3465_v28 = vpop.eup %3464  ;;  %v2158_v61 = vmul.f32 %v3463_v37, %v5574_v22  ;;  %v2193_v27 = vpack.c.bf16 %v2155_v51, %v2153_v19  ;;  %v2157_v42 = vmul.f32 %v3463_v37, %v5577_v1 }
 0x5f2   : > { %v2160_v49 = vmul.f32 %v3465_v28, %v5576_v52  ;;  %v2159_v45 = vmul.f32 %v3465_v28, %v5578_v12 }
 0x5f4   : > { %2362 = vmatmul.mubr.bf16.gmra.mrb[104].mxu0 %v2189_v10  ;;  %v2196_v53 = vpack.c.bf16 %v2160_v49, %v2158_v61  ;;  %v2195_v32 = vpack.c.bf16 %v2159_v45, %v2157_v42 }
 0x5f5   : > { %2369 = vmatprep.mubr.bf16.mxu0 %v2192_v56 }
 0x5fc   : > { %2370 = vmatmul.mubr.bf16.gmra.mrb[108].mxu0 %v2191_v46 }
 0x5fd   : > { %2377 = vmatprep.mubr.bf16.mxu0 %v2194_v17 }
 0x604   : > { %2378 = vmatmul.mubr.bf16.gmra.mrb[112].mxu0 %v2193_v27 }
 0x605   : > { %2385 = vmatprep.mubr.bf16.mxu0 %v2196_v53 }
 0x60c   : > { %2386 = vmatmul.mubr.bf16.gmra.mrb[116].mxu0 %v2195_v32 }
 0x65a   : > { %v2942_v62 = vpop.f32.mrb[64].mxu0 }
 0x65b   : > { %v2943_v24 = vpop.f32.mrb[65].mxu0 }
 0x65c   : > { %v2944_v16 = vadd.f32 %v2943_v24, %v2942_v62  ;;  %v2945_v6 = vpop.f32.mrb[66].mxu0 }
 0x65d   : > { %v2946_v35 = vpop.f32.mrb[67].mxu0 }
 0x65e   : > { %v2947_v40 = vadd.f32 %v2946_v35, %v2945_v6  ;;  %2442 = vrot.lane.b32.xlu0 %v2944_v16, %s3477_s21 }
 0x660   : > { %2444 = vrot.lane.b32.xlu1 %v2947_v40, %s3477_s21 }
 0x662   : > { %v2948_v39 = vpop.f32.mrb[68].mxu0 }
 0x663   : > { %v2949_v8 = vpop.f32.mrb[69].mxu0 }
 0x664   : > { %v2950_v63 = vadd.f32 %v2949_v8, %v2948_v39  ;;  %v2951_v59 = vpop.f32.mrb[70].mxu0 }
 0x665   : > { %v2952_v41 = vpop.f32.mrb[71].mxu0 }
 0x666   : > { %v2953_v5 = vadd.f32 %v2952_v41, %v2951_v59  ;;  %2446 = vrot.lane.b32.xlu1 %v2950_v63, %s3477_s21 }
 0x66a   : > { %v2954_v57 = vpop.f32.mrb[72].mxu0  ;;  %2448 = vrot.lane.b32.xlu1 %v2953_v5, %s3477_s21 }
 0x66b   : > { %v2955_v34 = vpop.f32.mrb[73].mxu0 }
 0x66c   : > { %v2956_v4 = vadd.f32 %v2955_v34, %v2954_v57  ;;  %v2957_v55 = vpop.f32.mrb[74].mxu0 }
 0x66d   : > { %v2958_v21 = vpop.f32.mrb[75].mxu0 }
 0x66e   : > { %v2959_v23 = vadd.f32 %v2958_v21, %v2957_v55  ;;  %2450 = vrot.lane.b32.xlu0 %v2956_v4, %s3477_s21 }
 0x670   : > { %2452 = vrot.lane.b32.xlu1 %v2959_v23, %s3477_s21  ;;  %v5579_v23 = vld [vmem:[#allocation34_spill] sm:$0xff] }
 0x672   : > { %v2960_v26 = vpop.f32.mrb[76].mxu0 }
 0x673   : > { %v2961_v15 = vpop.f32.mrb[77].mxu0 }
 0x674   : > { %v2962_v33 = vadd.f32 %v2961_v15, %v2960_v26  ;;  %v2963_v14 = vpop.f32.mrb[78].mxu0 }
 0x675   : > { %v2964_v60 = vpop.f32.mrb[79].mxu0 }
 0x676   : > { %v2965_v25 = vadd.f32 %v2964_v60, %v2963_v14  ;;  %2454 = vrot.lane.b32.xlu0 %v2962_v33, %s3477_s21 }
 0x678   : > { %2456 = vrot.lane.b32.xlu1 %v2965_v25, %s3477_s21 }
 0x697   : > { %v2966_v7 = vpop.f32.mrb[80].mxu0 }
 0x698   : > { %v2967_v38 = vpop.f32.mrb[81].mxu0 }
 0x699   : > { %v2968_v30 = vadd.f32 %v2967_v38, %v2966_v7  ;;  %v2969_v11 = vpop.f32.mrb[82].mxu0  ;;  %v5580_v7 = vld [vmem:[#allocation35_spill] sm:$0xff] }
 0x69a   : > { %v2970_v54 = vpop.f32.mrb[83].mxu0 }
 0x69b   : > { %v2971_v13 = vadd.f32 %v2970_v54, %v2969_v11  ;;  %2458 = vrot.lane.b32.xlu0 %v2968_v30, %s3477_s21 }
 0x69d   : > { %2460 = vrot.lane.b32.xlu1 %v2971_v13, %s3477_s21 }
 0x69f   : > { %v2972_v18 = vpop.f32.mrb[84].mxu0 }
 0x6a0   : > { %v2973_v48 = vpop.f32.mrb[85].mxu0 }
 0x6a1   : > { %v2974_v43 = vadd.f32 %v2973_v48, %v2972_v18  ;;  %v2975_v10 = vpop.f32.mrb[86].mxu0  ;;  %v5581_v18 = vld [vmem:[#allocation38_spill] sm:$0xff] }
 0x6a2   : > { %v2976_v56 = vpop.f32.mrb[87].mxu0 }
 0x6a3   : > { %v2977_v29 = vadd.f32 %v2976_v56, %v2975_v10  ;;  %2462 = vrot.lane.b32.xlu0 %v2974_v43, %s3477_s21 }
 0x6a5   : > { %2464 = vrot.lane.b32.xlu1 %v2977_v29, %s3477_s21 }
 0x6a7   : > { %v2978_v44 = vpop.f32.mrb[88].mxu0 }
 0x6a8   : > { %v2979_v2 = vpop.f32.mrb[89].mxu0 }
 0x6a9   : > { %v2980_v9 = vadd.f32 %v2979_v2, %v2978_v44  ;;  %v2981_v31 = vpop.f32.mrb[90].mxu0  ;;  %v5582_v44 = vld [vmem:[#allocation39_spill] sm:$0xff] }
 0x6aa   : > { %v2982_v3 = vpop.f32.mrb[91].mxu0 }
 0x6ab   : > { %v2983_v58 = vadd.f32 %v2982_v3, %v2981_v31  ;;  %2466 = vrot.lane.b32.xlu0 %v2980_v9, %s3477_s21 }
 0x6ad   : > { %2468 = vrot.lane.b32.xlu1 %v2983_v58, %s3477_s21  ;;  %v5583_v58 = vld [vmem:[#allocation40_spill] sm:$0xff] }
 0x6af   : > { %v2984_v47 = vpop.f32.mrb[92].mxu0 }
 0x6b0   : > { %v2985_v20 = vpop.f32.mrb[93].mxu0 }
 0x6b1   : > { %v2986_v50 = vadd.f32 %v2985_v20, %v2984_v47  ;;  %v2987_v46 = vpop.f32.mrb[94].mxu0 }
 0x6b2   : > { %v2988_v17 = vpop.f32.mrb[95].mxu0 }
 0x6b3   : > { %v2989_v37 = vadd.f32 %v2988_v17, %v2987_v46  ;;  %2470 = vrot.lane.b32.xlu0 %v2986_v50, %s3477_s21 }
 0x6b5   : > { %2472 = vrot.lane.b32.xlu1 %v2989_v37, %s3477_s21 }
 0x6b7   : > { %v2990_v28 = vpop.f32.mrb[96].mxu0 }
 0x6b8   : > { %v2991_v0 = vpop.f32.mrb[97].mxu0 }
 0x6b9   : > { %v2992_v19 = vadd.f32 %v2991_v0, %v2990_v28  ;;  %v2993_v22 = vpop.f32.mrb[98].mxu0  ;;  %v5584_v28 = vld [vmem:[#allocation41_spill] sm:$0xff] }
 0x6ba   : > { %v2994_v61 = vpop.f32.mrb[99].mxu0 }
 0x6bb   : > { %v2995_v36 = vadd.f32 %v2994_v61, %v2993_v22  ;;  %2474 = vrot.lane.b32.xlu0 %v2992_v19, %s3477_s21  ;;  %v3026_v51 = vpop.f32.mrb[128].mxu1  ;;  %v5585_v22 = vld [vmem:[#allocation46_spill] sm:$0xff] }
 0x6bc   : > { %v3027_v52 = vpop.f32.mrb[129].mxu1 }
 0x6bd   : > { %v5103_v49 = vadd.f32 %v3027_v52, %v3026_v51  ;;  %2476 = vrot.lane.b32.xlu1 %v2995_v36, %s3477_s21  ;;  %v3029_v27 = vpop.f32.mrb[130].mxu1  ;;  %v5586_v51 = vld [vmem:[#allocation47_spill] sm:$0xff] }
 0x6be   : > { %v3030_v53 = vpop.f32.mrb[131].mxu1 }
 0x6bf   : > { %v5106_v1 = vadd.f32 %v3030_v53, %v3029_v27  ;;  %v2996_v42 = vpop.f32.mrb[100].mxu0  ;;  %v5587_v27 = vld [vmem:[#allocation42_spill] sm:$0xff] }
 0x6c0   : > { %v2997_v12 = vpop.f32.mrb[101].mxu0 }
 0x6c1   : > { %v2998_v45 = vadd.f32 %v2997_v12, %v2996_v42  ;;  %v2999_v32 = vpop.f32.mrb[102].mxu0  ;;  %v5588_v42 = vld [vmem:[#allocation43_spill] sm:$0xff] }
 0x6c2   : > { %v3000_v62 = vpop.f32.mrb[103].mxu0 }
 0x6c3   : > { %v3001_v24 = vadd.f32 %v3000_v62, %v2999_v32  ;;  %2478 = vrot.lane.b32.xlu0 %v2998_v45, %s3477_s21  ;;  %v3032_v16 = vpop.f32.mrb[132].mxu1  ;;  %v5589_v32 = vld [vmem:[#allocation48_spill] sm:$0xff] }
 0x6c4   : > { %v3033_v6 = vpop.f32.mrb[133].mxu1 }
 0x6c5   : > { %v5109_v35 = vadd.f32 %v3033_v6, %v3032_v16  ;;  %2480 = vrot.lane.b32.xlu1 %v3001_v24, %s3477_s21  ;;  %v3035_v40 = vpop.f32.mrb[134].mxu1  ;;  %v5590_v16 = vld [vmem:[#allocation44_spill] sm:$0xff] }
 0x6c6   : > { %v3036_v39 = vpop.f32.mrb[135].mxu1 }
 0x6c7   : > { %v3037_v8 = vadd.f32 %v3036_v39, %v3035_v40  ;;  %v3002_v63 = vpop.f32.mrb[104].mxu0  ;;  %v5591_v40 = vld [vmem:[#allocation45_spill] sm:$0xff] }
 0x6c8   : > { %v3003_v59 = vpop.f32.mrb[105].mxu0 }
 0x6c9   : > { %v3004_v41 = vadd.f32 %v3003_v59, %v3002_v63  ;;  %v3005_v5 = vpop.f32.mrb[106].mxu0  ;;  %v5592_v63 = vld [vmem:[#allocation49_spill] sm:$0xff] }
 0x6ca   : > { %v3006_v57 = vpop.f32.mrb[107].mxu0 }
 0x6cb   : > { %v3007_v34 = vadd.f32 %v3006_v57, %v3005_v5  ;;  %2482 = vrot.lane.b32.xlu0 %v3004_v41, %s3477_s21  ;;  %v5593_v5 = vld [vmem:[#allocation50_spill] sm:$0xff] }
 0x6cd   : > { %2484 = vrot.lane.b32.xlu1 %v3007_v34, %s3477_s21 }
 0x6cf   : > { %v3008_v4 = vpop.f32.mrb[108].mxu0 }
 0x6d0   : > { %v2443_v55 = vpop.permute.xlu0 %2442  ;;  %v3009_v21 = vpop.f32.mrb[109].mxu0 }
 0x6d1   : > { %v2538_v26 = vsel %vm293_vm0, %v5579_v23, %v2443_v55  ;;  %v3010_v15 = vadd.f32 %v3009_v21, %v3008_v4  ;;  %v3011_v33 = vpop.f32.mrb[110].mxu0  ;;  %v5594_v4 = vld [vmem:[#allocation51_spill] sm:$0xff] }
 0x6d2   : > { %2571 = vst.msk [vmem:[%s5118_s24] sm:$0xff] %vm2570_vm1, %v2538_v26  ;;  %v3012_v14 = vpop.f32.mrb[111].mxu0  ;;  %v2445_v60 = vpop.permute.xlu1 %2444  ;;  %v5595_v23 = vld [vmem:[#allocation11_spill] sm:$0xff] }
 0x6d3   : > { %v3013_v25 = vadd.f32 %v3012_v14, %v3011_v33  ;;  %v2539_v38 = vsel %vm293_vm0, %v5580_v7, %v2445_v60  ;;  %2486 = vrot.lane.b32.xlu0 %v3010_v15, %s3477_s21  ;;  %v5596_v33 = vld [vmem:[#allocation14_spill] sm:$0xff] }
 0x6d4   : > { %2572 = vst.msk [vmem:[%s5118_s24 + $0x8] sm:$0xff] %vm2570_vm1, %v2539_v38 }
 0x6d5   : > { %2488 = vrot.lane.b32.xlu1 %v3013_v25, %s3477_s21  ;;  %v5597_v25 = vld [vmem:[#allocation12_spill] sm:$0xff] }
 0x6d7   : > { %v3014_v30 = vpop.f32.mrb[112].mxu0 }
 0x6d8   : > { %v3015_v11 = vpop.f32.mrb[113].mxu0  ;;  %v2447_v54 = vpop.permute.xlu1 %2446 }
 0x6d9   : > { %v3016_v13 = vadd.f32 %v3015_v11, %v3014_v30  ;;  %v2540_v48 = vsel %vm293_vm0, %v5581_v18, %v2447_v54  ;;  %v3017_v43 = vpop.f32.mrb[114].mxu0  ;;  %v5598_v30 = vld [vmem:[#allocation13_spill] sm:$0xff] }
 0x6da   : > { %2573 = vst.msk [vmem:[%s5118_s24 + $0x10] sm:$0xff] %vm2570_vm1, %v2540_v48  ;;  %v3018_v10 = vpop.f32.mrb[115].mxu0 }
 0x6db   : > { %v3019_v56 = vadd.f32 %v3018_v10, %v3017_v43  ;;  %2490 = vrot.lane.b32.xlu0 %v3016_v13, %s3477_s21  ;;  %v5599_v13 = vld [vmem:[#allocation16_spill] sm:$0xff]  ;;  %v5600_v43 = vld [vmem:[#allocation15_spill] sm:$0xff] }
 0x6dc   : > { %v2449_v29 = vpop.permute.xlu1 %2448 }
 0x6dd   : > { %v2541_v2 = vsel %vm293_vm0, %v5582_v44, %v2449_v29  ;;  %2492 = vrot.lane.b32.xlu1 %v3019_v56, %s3477_s21  ;;  %v5601_v29 = vld [vmem:[#allocation18_spill] sm:$0xff] }
 0x6de   : > { %2574 = vst.msk [vmem:[%s5118_s24 + $0x18] sm:$0xff] %vm2570_vm1, %v2541_v2 }
 0x6df   : > { %v3020_v9 = vpop.f32.mrb[116].mxu0 }
 0x6e0   : > { %v2451_v31 = vpop.permute.xlu0 %2450  ;;  %v3021_v3 = vpop.f32.mrb[117].mxu0 }
 0x6e1   : > { %v2542_v47 = vsel %vm293_vm0, %v5583_v58, %v2451_v31  ;;  %v3022_v20 = vadd.f32 %v3021_v3, %v3020_v9  ;;  %v3023_v50 = vpop.f32.mrb[118].mxu0  ;;  %v5602_v9 = vld [vmem:[#allocation17_spill] sm:$0xff]  ;;  %v5603_v58 = vld [vmem:[#allocation8_spill] sm:$0xff] }
 0x6e2   : > { %2575 = vst.msk [vmem:[%s5118_s24 + $0x20] sm:$0xff] %vm2570_vm1, %v2542_v47  ;;  %v3024_v46 = vpop.f32.mrb[119].mxu0  ;;  %v2453_v17 = vpop.permute.xlu1 %2452 }
 0x6e3   : > { %v3025_v37 = vadd.f32 %v3024_v46, %v3023_v50  ;;  %v2543_v0 = vsel %vm293_vm0, %v5584_v28, %v2453_v17  ;;  %2494 = vrot.lane.b32.xlu0 %v3022_v20, %s3477_s21  ;;  %v5604_v50 = vld [vmem:[#allocation19_spill] sm:$0xff] }
 0x6e4   : > { %2576 = vst.msk [vmem:[%s5118_s24 + $0x28] sm:$0xff] %vm2570_vm1, %v2543_v0 }
 0x6e5   : > { %2496 = vrot.lane.b32.xlu1 %v3025_v37, %s3477_s21  ;;  %v5605_v37 = vld [vmem:[#allocation20_spill] sm:$0xff] }
 0x6e7   : > { %2498 = vrot.lane.b32.xlu0 %v5103_v49, %s3477_s21 }
 0x6e8   : > { %v2455_v19 = vpop.permute.xlu0 %2454 }
 0x6e9   : > { %v2544_v61 = vsel %vm293_vm0, %v5585_v22, %v2455_v19  ;;  %2500 = vrot.lane.b32.xlu1 %v5106_v1, %s3477_s21  ;;  %v5606_v19 = vld [vmem:[#allocation21_spill] sm:$0xff] }
 0x6ea   : > { %2577 = vst.msk [vmem:[%s5118_s24 + $0x30] sm:$0xff] %vm2570_vm1, %v2544_v61  ;;  %v2457_v36 = vpop.permute.xlu1 %2456 }
 0x6eb   : > { %v2545_v52 = vsel %vm293_vm0, %v5586_v51, %v2457_v36  ;;  %2502 = vrot.lane.b32.xlu0 %v5109_v35, %s3477_s21  ;;  %v5607_v36 = vld [vmem:[#allocation22_spill] sm:$0xff] }
 0x6ec   : > { %2578 = vst.msk [vmem:[%s5118_s24 + $0x38] sm:$0xff] %vm2570_vm1, %v2545_v52 }
 0x6ed   : > { %2504 = vrot.lane.b32.xlu1 %v3037_v8, %s3477_s21 }
 0x70d   : > { %v2459_v49 = vpop.permute.xlu0 %2458 }
 0x70e   : > { %v2546_v53 = vsel %vm293_vm0, %v5587_v27, %v2459_v49  ;;  %v5608_v49 = vld [vmem:[#allocation23_spill] sm:$0xff] }
 0x70f   : > { %2579 = vst.msk [vmem:[%s5118_s24 + $0x40] sm:$0xff] %vm2570_vm1, %v2546_v53  ;;  %v2461_v1 = vpop.permute.xlu1 %2460 }
 0x710   : > { %v2547_v12 = vsel %vm293_vm0, %v5588_v42, %v2461_v1  ;;  %v5609_v1 = vld [vmem:[#allocation24_spill] sm:$0xff] }
 0x711   : > { %2580 = vst.msk [vmem:[%s5118_s24 + $0x48] sm:$0xff] %vm2570_vm1, %v2547_v12 }
 0x715   : > { %v2463_v45 = vpop.permute.xlu0 %2462 }
 0x716   : > { %v2548_v62 = vsel %vm293_vm0, %v5589_v32, %v2463_v45  ;;  %v5610_v45 = vld [vmem:[#allocation25_spill] sm:$0xff] }
 0x717   : > { %2581 = vst.msk [vmem:[%s5118_s24 + $0x50] sm:$0xff] %vm2570_vm1, %v2548_v62  ;;  %v2465_v24 = vpop.permute.xlu1 %2464 }
 0x718   : > { %v2549_v6 = vsel %vm293_vm0, %v5590_v16, %v2465_v24 }
 0x719   : > { %2582 = vst.msk [vmem:[%s5118_s24 + $0x58] sm:$0xff] %vm2570_vm1, %v2549_v6 }
 0x71d   : > { %v2467_v35 = vpop.permute.xlu0 %2466 }
 0x71e   : > { %v2550_v39 = vsel %vm293_vm0, %v5591_v40, %v2467_v35 }
 0x71f   : > { %2583 = vst.msk [vmem:[%s5118_s24 + $0x60] sm:$0xff] %vm2570_vm1, %v2550_v39  ;;  %v2469_v8 = vpop.permute.xlu1 %2468 }
 0x720   : > { %v2551_v59 = vsel %vm293_vm0, %v5592_v63, %v2469_v8 }
 0x721   : > { %2584 = vst.msk [vmem:[%s5118_s24 + $0x68] sm:$0xff] %vm2570_vm1, %v2551_v59 }
 0x725   : > { %v2471_v41 = vpop.permute.xlu0 %2470 }
 0x726   : > { %v2552_v57 = vsel %vm293_vm0, %v5593_v5, %v2471_v41 }
 0x727   : > { %2585 = vst.msk [vmem:[%s5118_s24 + $0x70] sm:$0xff] %vm2570_vm1, %v2552_v57  ;;  %v2473_v34 = vpop.permute.xlu1 %2472 }
 0x728   : > { %v2553_v55 = vsel %vm293_vm0, %v5594_v4, %v2473_v34 }
 0x729   : > { %2586 = vst.msk [vmem:[%s5118_s24 + $0x78] sm:$0xff] %vm2570_vm1, %v2553_v55 }
 0x72d   : > { %v2475_v21 = vpop.permute.xlu0 %2474 }
 0x72e   : > { %v2554_v26 = vsel %vm293_vm0, %v5595_v23, %v2475_v21 }
 0x72f   : > { %2587 = vst.msk [vmem:[%s5118_s24 + $0x80] sm:$0xff] %vm2570_vm1, %v2554_v26  ;;  %v2477_v15 = vpop.permute.xlu1 %2476 }
 0x730   : > { %v2555_v14 = vsel %vm293_vm0, %v5596_v33, %v2477_v15 }
 0x731   : > { %2588 = vst.msk [vmem:[%s5118_s24 + $0x88] sm:$0xff] %vm2570_vm1, %v2555_v14 }
 0x735   : > { %v2479_v60 = vpop.permute.xlu0 %2478 }
 0x736   : > { %v2556_v7 = vsel %vm293_vm0, %v5597_v25, %v2479_v60 }
 0x737   : > { %2589 = vst.msk [vmem:[%s5118_s24 + $0x90] sm:$0xff] %vm2570_vm1, %v2556_v7  ;;  %v2481_v38 = vpop.permute.xlu1 %2480 }
 0x738   : > { %v2557_v11 = vsel %vm293_vm0, %v5598_v30, %v2481_v38 }
 0x739   : > { %2590 = vst.msk [vmem:[%s5118_s24 + $0x98] sm:$0xff] %vm2570_vm1, %v2557_v11 }
 0x73d   : > { %v2483_v54 = vpop.permute.xlu0 %2482 }
 0x73e   : > { %v2558_v18 = vsel %vm293_vm0, %v5599_v13, %v2483_v54 }
 0x73f   : > { %2591 = vst.msk [vmem:[%s5118_s24 + $0xa0] sm:$0xff] %vm2570_vm1, %v2558_v18  ;;  %v2485_v48 = vpop.permute.xlu1 %2484 }
 0x740   : > { %v2559_v10 = vsel %vm293_vm0, %v5600_v43, %v2485_v48 }
 0x741   : > { %2592 = vst.msk [vmem:[%s5118_s24 + $0xa8] sm:$0xff] %vm2570_vm1, %v2559_v10 }
 0x745   : > { %v2487_v56 = vpop.permute.xlu0 %2486 }
 0x746   : > { %v2560_v44 = vsel %vm293_vm0, %v5601_v29, %v2487_v56 }
 0x747   : > { %2593 = vst.msk [vmem:[%s5118_s24 + $0xb0] sm:$0xff] %vm2570_vm1, %v2560_v44  ;;  %v2489_v2 = vpop.permute.xlu1 %2488 }
 0x748   : > { %v2561_v31 = vsel %vm293_vm0, %v5602_v9, %v2489_v2 }
 0x749   : > { %2594 = vst.msk [vmem:[%s5118_s24 + $0xb8] sm:$0xff] %vm2570_vm1, %v2561_v31 }
 0x74d   : > { %v2491_v3 = vpop.permute.xlu0 %2490 }
 0x74e   : > { %v2562_v47 = vsel %vm293_vm0, %v5603_v58, %v2491_v3 }
 0x74f   : > { %2595 = vst.msk [vmem:[%s5118_s24 + $0xc0] sm:$0xff] %vm2570_vm1, %v2562_v47  ;;  %v2493_v20 = vpop.permute.xlu1 %2492 }
 0x750   : > { %v2563_v46 = vsel %vm293_vm0, %v5604_v50, %v2493_v20 }
 0x751   : > { %2596 = vst.msk [vmem:[%s5118_s24 + $0xc8] sm:$0xff] %vm2570_vm1, %v2563_v46 }
 0x755   : > { %v2495_v17 = vpop.permute.xlu0 %2494 }
 0x756   : > { %v2564_v28 = vsel %vm293_vm0, %v5605_v37, %v2495_v17 }
 0x757   : > { %2597 = vst.msk [vmem:[%s5118_s24 + $0xd0] sm:$0xff] %vm2570_vm1, %v2564_v28  ;;  %v2497_v0 = vpop.permute.xlu1 %2496 }
 0x758   : > { %v2565_v22 = vsel %vm293_vm0, %v5606_v19, %v2497_v0 }
 0x759   : > { %2598 = vst.msk [vmem:[%s5118_s24 + $0xd8] sm:$0xff] %vm2570_vm1, %v2565_v22  ;;  %v2499_v61 = vpop.permute.xlu0 %2498 }
 0x75a   : > { %v2566_v51 = vsel %vm293_vm0, %v5607_v36, %v2499_v61 }
 0x75b   : > { %2599 = vst.msk [vmem:[%s5118_s24 + $0xe0] sm:$0xff] %vm2570_vm1, %v2566_v51  ;;  %v2501_v52 = vpop.permute.xlu1 %2500 }
 0x75c   : > { %v2567_v27 = vsel %vm293_vm0, %v5608_v49, %v2501_v52 }
 0x75d   : > { %2600 = vst.msk [vmem:[%s5118_s24 + $0xe8] sm:$0xff] %vm2570_vm1, %v2567_v27  ;;  %v2503_v53 = vpop.permute.xlu0 %2502 }
 0x75e   : > { %v2568_v42 = vsel %vm293_vm0, %v5609_v1, %v2503_v53 }
 0x75f   : > { %2601 = vst.msk [vmem:[%s5118_s24 + $0xf0] sm:$0xff] %vm2570_vm1, %v2568_v42  ;;  %v2505_v12 = vpop.permute.xlu1 %2504 }
 0x760   : > { %v2569_v32 = vsel %vm293_vm0, %v5610_v45, %v2505_v12 }
 0x761   : > { %2602 = vst.msk [vmem:[%s5118_s24 + $0xf8] sm:$0xff] %vm2570_vm1, %v2569_v32 }
 0x762 PF: > { %s12_s9 = sadd.s32 1, %s3472_s9  }
 0x763   : > { %p9_p4 = scmp.ge.s32.totalorder %s12_s9, 4  }
 0x765   :  { %11 = sbr.rel (!%p9_p4) target bundleno = 1 (0x1), region = 61 }

// kernel: c2former_forward.32
= control target key start
LH: loop header
LB: loop body
LE: loop exit
PB: predicated region body
PF: predicated region fallthrough
CT: control target
= control target key end

     0   :  { %s999_s15 = smov 0   ;;  %s1001_s16 = smov 0   ;;  %s1613_s0 = inlined_call_operand.vmem [shape: f32[2,256,8], index: 0, kind: input, shape index: {}]   ;;  %s1614_s1 = inlined_call_operand.vmem [shape: f32[2,256,8], index: 1, kind: input, shape index: {}]   ;;  %s1615_s2 = inlined_call_operand.vmem [shape: f32[2,256,8], index: 2, kind: input, shape index: {}]   ;;  %s1616_s3 = inlined_call_operand.vmem [shape: f32[2,4,8], index: 3, kind: input, shape index: {}]   ;;  %s1617_s4 = inlined_call_operand.vmem [shape: f32[2,256,8], index: 4, kind: output, shape index: {}]  }
   0x1   :  { %s1003_s17 = smov 0  }
   0x2 LB: > { %s33_s18 = sadd.s32 1, %s968_s16  ;;  %p906_p0 = scmp.ge.s32.totalorder %s972_s17, 1  ;;  %s972_s17 = sphi %s1003_s17, %s14_s17   ;;  %s968_s16 = sphi %s1001_s16, %s1675_s16   ;;  %s964_s15 = sphi %s999_s15, %s1674_s15  }
   0x3   : > { %p35_p1 = scmp.ge.s32.totalorder %s33_s18, 2  ;;  %p255_p2 = scmp.lt.s32.totalorder %s972_s17, 3 }
   0x5   : > { %s1677_s18 = smov (%p35_p1, %s33_s18), 0  ;;  %p256_p3 = pnand %p906_p0, %p255_p2 }
   0x7   : > { %259 = sbr.rel (%p256_p3) target bundleno = 93 (0x5d), region = 36 }
   0xe   : > { %p327_p4 = scmp.lt.s32.totalorder %s964_s15, 1  ;;  %v437_v0 = vlaneseq  ;;  %vm709_vm2 = vcmask 64512  }
  0x10   : > { %s1679_s15 = smov (!%p327_p4, %s964_s15), 1  ;;  %v1020_v1 = vshrl.u32 %v437_v0, 7 }
  0x11   : > { %s913_s19 = sshll.u32 %s1679_s15, 2  ;;  %s1022_s23 = sshll.u32 %s1679_s15, 8 }
  0x12   : > { %s371_s22 = scalar_lea.vmem %s1616_s3, %s913_s19  ;;  %s1028_s26 = scalar_lea.vmem %s1613_s0, %s1022_s23  ;;  %v439_v5 = vsub.s32 2, %v1020_v1  ;;  %v643_v6 = vsub.s32 0, %v1020_v1  ;;  %v475_v23 = vsub.s32 3, %v1020_v1 }
  0x13   : > { %v385_v2 = vld [vmem:[%s371_s22] sm:$0xf]  ;;  %s1035_s29 = scalar_lea.vmem %s1615_s2, %s1022_s23  ;;  %v1045_v12 = vld [vmem:[%s1028_s26 + $0x8] sm:$0xff]  ;;  %v1051_v15 = vld [vmem:[%s1028_s26 + $0x10] sm:$0xff]  ;;  %s1249_s6 = scalar_lea.vmem %s1614_s1, %s1022_s23 }
  0x14   : > { %v387_v3 = vmul.f32 0.00390625, %v385_v2  ;;  %v1039_v8 = vld [vmem:[%s1028_s26] sm:$0xff]  ;;  %v610_v13 = vld [vmem:[%s1035_s29 + $0x8] sm:$0xff]  ;;  %v611_v16 = vld [vmem:[%s1035_s29 + $0x10] sm:$0xff]  ;;  %s1369_s9 = scalar_lea.vmem %s1617_s4, %s1022_s23 }
  0x15   : > { %v609_v11 = vld [vmem:[%s1035_s29] sm:$0xff]  ;;  %v1055_v17 = vld [vmem:[%s1028_s26 + $0x18] sm:$0xff]  ;;  %v1065_v25 = vld [vmem:[%s1028_s26 + $0x28] sm:$0xff] }
  0x16   : > { %v388_v4 = vmul.f32 %v387_v3, %v387_v3  ;;  %v1041_v10 = vrot.slane %v387_v3, %v439_v5  ;;  %v1048_v14 = vrot.slane %v387_v3, %v643_v6  ;;  %v612_v20 = vld [vmem:[%s1035_s29 + $0x18] sm:$0xff]  ;;  %v1059_v21 = vld [vmem:[%s1028_s26 + $0x20] sm:$0xff]  ;;  %v614_v26 = vld [vmem:[%s1035_s29 + $0x28] sm:$0xff] }
  0x17   : > { %v613_v22 = vld [vmem:[%s1035_s29 + $0x20] sm:$0xff]  ;;  %v1069_v27 = vld [vmem:[%s1028_s26 + $0x30] sm:$0xff]  ;;  %v1077_v32 = vld [vmem:[%s1028_s26 + $0x38] sm:$0xff] }
  0x18   : > { %v390_v7 = vrot.slane %v388_v4, 7  ;;  %1624 = vst [vmem:[#allocation2_spill] sm:$0xff] %v1048_v14  ;;  %v615_v31 = vld [vmem:[%s1035_s29 + $0x30] sm:$0xff]  ;;  %v616_v33 = vld [vmem:[%s1035_s29 + $0x38] sm:$0xff]  ;;  %v1081_v34 = vadd.f32 %v1048_v14, %v609_v11  ;;  %v1086_v36 = vadd.f32 %v1048_v14, %v610_v13  ;;  %v1091_v38 = vld [vmem:[%s1028_s26 + $0x40] sm:$0xff]  ;;  %v1099_v41 = vadd.f32 %v1048_v14, %v611_v16 }
  0x19   : > { %v617_v39 = vld [vmem:[%s1035_s29 + $0x40] sm:$0xff]  ;;  %v1095_v40 = vld [vmem:[%s1028_s26 + $0x48] sm:$0xff]  ;;  %v1104_v43 = vadd.f32 %v1048_v14, %v612_v20  ;;  %v1108_v45 = vld [vmem:[%s1028_s26 + $0x50] sm:$0xff]  ;;  %v1114_v48 = vadd.f32 %v1048_v14, %v613_v22  ;;  %v1126_v53 = vadd.f32 %v1048_v14, %v614_v26  ;;  %v1131_v55 = vadd.f32 %v1048_v14, %v615_v31 }
  0x1a   : > { %v392_v9 = vsub.f32 %v387_v3, %v390_v7  ;;  %v618_v44 = vld [vmem:[%s1035_s29 + $0x48] sm:$0xff]  ;;  %v619_v46 = vld [vmem:[%s1035_s29 + $0x50] sm:$0xff]  ;;  %v1119_v50 = vld [vmem:[%s1028_s26 + $0x58] sm:$0xff]  ;;  %v1141_v60 = vadd.f32 %v1048_v14, %v616_v33  ;;  %v1146_v62 = vadd.f32 %v1048_v14, %v617_v39 }
  0x1b   : > { %v620_v51 = vld [vmem:[%s1035_s29 + $0x58] sm:$0xff]  ;;  %v1123_v52 = vld [vmem:[%s1028_s26 + $0x60] sm:$0xff]  ;;  %v1137_v58 = vld [vmem:[%s1028_s26 + $0x68] sm:$0xff]  ;;  %v1158_v4 = vadd.f32 %v1048_v14, %v618_v44  ;;  %v1163_v6 = vadd.f32 %v1048_v14, %v619_v46 }
  0x1c   : > { %v393_v18 = vmul.f32 1.0039216, %v392_v9  ;;  %v402_v19 = vmax.f32 %v392_v9, 0.0  ;;  %v621_v57 = vld [vmem:[%s1035_s29 + $0x60] sm:$0xff]  ;;  %v622_v59 = vld [vmem:[%s1035_s29 + $0x68] sm:$0xff]  ;;  %v1151_v0 = vld [vmem:[%s1028_s26 + $0x70] sm:$0xff]  ;;  %v1175_v16 = vadd.f32 %v1048_v14, %v620_v51 }
  0x1d   : > { %v623_v2 = vld [vmem:[%s1035_s29 + $0x70] sm:$0xff]  ;;  %v1155_v3 = vld [vmem:[%s1028_s26 + $0x78] sm:$0xff]  ;;  %v1169_v11 = vld [vmem:[%s1028_s26 + $0x80] sm:$0xff]  ;;  %v1193_v33 = vadd.f32 %v1048_v14, %v622_v59 }
  0x1e   : > { %v1071_v28 = vmax.f32 %v393_v18, 0.0  ;;  %v403_v29 = vadd.f32 1e-05, %v402_v19  ;;  %v624_v9 = vld [vmem:[%s1035_s29 + $0x78] sm:$0xff]  ;;  %v625_v13 = vld [vmem:[%s1035_s29 + $0x80] sm:$0xff]  ;;  %v1180_v19 = vld [vmem:[%s1028_s26 + $0x88] sm:$0xff]  ;;  %v1203_v18 = vadd.f32 %v1048_v14, %v623_v2 }
  0x1f   : > { %v626_v20 = vld [vmem:[%s1035_s29 + $0x88] sm:$0xff]  ;;  %v1184_v22 = vld [vmem:[%s1028_s26 + $0x90] sm:$0xff]  ;;  %v1197_v44 = vld [vmem:[%s1028_s26 + $0x98] sm:$0xff]  ;;  %v1208_v31 = vadd.f32 %v1048_v14, %v624_v9  ;;  %v1220_v2 = vadd.f32 %v1048_v14, %v625_v13 }
  0x20   : > { %946 = vrsqrt.f32 %v1071_v28  ;;  %vm397_vm0 = vcmp.eq.f32.partialorder %v1071_v28, inf  ;;  %vm399_vm1 = vcmp.eq.f32.partialorder %v1071_v28, 0.0  ;;  %v400_v26 = vand.u32 2147483648, %v1071_v28  ;;  %v627_v39 = vld [vmem:[%s1035_s29 + $0x90] sm:$0xff]  ;;  %v628_v46 = vld [vmem:[%s1035_s29 + $0x98] sm:$0xff]  ;;  %v1211_v59 = vld [vmem:[%s1028_s26 + $0xa0] sm:$0xff] }
  0x21   : > { %948 = vrsqrt.f32 %v403_v29  ;;  %v1188_v29 = vadd.f32 %v1048_v14, %v621_v57  ;;  %v629_v7 = vld [vmem:[%s1035_s29 + $0xa0] sm:$0xff]  ;;  %v1215_v5 = vld [vmem:[%s1028_s26 + $0xa8] sm:$0xff]  ;;  %v1225_v57 = vadd.f32 %v1048_v14, %v626_v20  ;;  %v1229_v61 = vld [vmem:[%s1028_s26 + $0xb0] sm:$0xff]  ;;  %v1234_v54 = vadd.f32 %v1048_v14, %v627_v39 }
  0x22   : > { %v630_v9 = vld [vmem:[%s1035_s29 + $0xa8] sm:$0xff]  ;;  %v1239_v51 = vadd.f32 %v1048_v14, %v628_v46  ;;  %v631_v63 = vld [vmem:[%s1035_s29 + $0xb0] sm:$0xff]  ;;  %v1243_v20 = vld [vmem:[%s1028_s26 + $0xb8] sm:$0xff]  ;;  %v1254_v56 = vadd.f32 %v1048_v14, %v629_v7 }
  0x23   : > { %1625 = vst [vmem:[#allocation3_spill] sm:$0xff] %v1243_v20  ;;  %v1259_v13 = vadd.f32 %v1048_v14, %v630_v9  ;;  %v632_v47 = vld [vmem:[%s1035_s29 + $0xb8] sm:$0xff]  ;;  %v1263_v42 = vld [vmem:[%s1028_s26 + $0xc0] sm:$0xff]  ;;  %v1269_v39 = vadd.f32 %v1048_v14, %v631_v63  ;;  %v1275_v35 = vld [vmem:[%s1028_s26 + $0xc8] sm:$0xff] }
  0x24   : > { %1626 = vst [vmem:[#allocation4_spill] sm:$0xff] %v1254_v56  ;;  %1628 = vst [vmem:[#allocation6_spill] sm:$0xff] %v1263_v42  ;;  %v633_v9 = vld [vmem:[%s1035_s29 + $0xc0] sm:$0xff]  ;;  %v634_v46 = vld [vmem:[%s1035_s29 + $0xc8] sm:$0xff]  ;;  %v1636_v42 = vsub.f32 %v1045_v12, %v1041_v10  ;;  %v1640_v12 = vsub.f32 %v1059_v21, %v1041_v10 }
  0x25   : > { %1627 = vst [vmem:[#allocation5_spill] sm:$0xff] %v1259_v13  ;;  %1629 = vst [vmem:[#allocation7_spill] sm:$0xff] %v1269_v39  ;;  %v1287_v7 = vadd.f32 %v1048_v14, %v633_v9  ;;  %v1291_v39 = vld [vmem:[%s1028_s26 + $0xd0] sm:$0xff]  ;;  %v510_v13 = vld [vmem:[%s1249_s6 + $0x8] sm:$0xff]  ;;  %v1301_v63 = vadd.f32 %v1048_v14, %v634_v46  ;;  %v1637_v46 = vsub.f32 %v1051_v15, %v1041_v10 }
  0x26   : > { %1630 = vst [vmem:[#allocation8_spill] sm:$0xff] %v1275_v35  ;;  %1633 = vst [vmem:[#allocation11_spill] sm:$0xff] %v1291_v39  ;;  %v512_v9 = vld [vmem:[%s1249_s6 + $0x18] sm:$0xff]  ;;  %v513_v39 = vld [vmem:[%s1249_s6 + $0x20] sm:$0xff]  ;;  %v1641_v15 = vsub.f32 %v1065_v25, %v1041_v10 }
  0x27   : > { %1632 = vst [vmem:[#allocation10_spill] sm:$0xff] %v1287_v7  ;;  %1634 = vst [vmem:[#allocation12_spill] sm:$0xff] %v1301_v63  ;;  %v515_v35 = vld [vmem:[%s1249_s6 + $0x30] sm:$0xff] }
  0x2a   : > { %v947_v49 = vpop.eup %946 }
  0x2b   : > { %v949_v24 = vpop.eup %948  ;;  %v396_v37 = vmul.f32 %v947_v49, %v1071_v28  ;;  %v1282_v49 = vadd.f32 %v1048_v14, %v632_v47  ;;  %v511_v14 = vld [vmem:[%s1249_s6 + $0x10] sm:$0xff] }
  0x2c   : > { %v1279_v30 = vrot.slane %v949_v24, %v475_v23  ;;  %v509_v24 = vld [vmem:[%s1249_s6] sm:$0xff] }
  0x2d   : > { %1631 = vst [vmem:[#allocation9_spill] sm:$0xff] %v1282_v49  ;;  %v398_v23 = vsel %vm397_vm0, %v1071_v28, %v396_v37  ;;  %v1635_v37 = vsub.f32 %v1039_v8, %v1041_v10  ;;  %v1638_v28 = vsub.s32 1, %v1020_v1  ;;  %v1639_v8 = vsub.f32 %v1055_v17, %v1041_v10  ;;  %v516_v1 = vld [vmem:[%s1249_s6 + $0x38] sm:$0xff] }
  0x2e   : > { %v401_v7 = vsel %vm399_vm1, %v400_v26, %v398_v23  ;;  %v478_v47 = vmul.f32 %v1279_v30, %v1636_v42  ;;  %v479_v63 = vmul.f32 %v1279_v30, %v1637_v46  ;;  %v481_v42 = vmul.f32 %v1279_v30, %v1640_v12  ;;  %v514_v46 = vld [vmem:[%s1249_s6 + $0x28] sm:$0xff] }
  0x2f   : > { %v477_v49 = vmul.f32 %v1279_v30, %v1635_v37  ;;  %v1324_v26 = vrot.slane %v401_v7, %v1638_v28  ;;  %v480_v23 = vmul.f32 %v1279_v30, %v1639_v8  ;;  %v482_v37 = vmul.f32 %v1279_v30, %v1641_v15 }
  0x30   : > { %v1642_v7 = vsub.f32 %v1069_v27, %v1041_v10  ;;  %v1643_v28 = vsub.f32 %v1077_v32, %v1041_v10  ;;  %v1644_v8 = vsub.f32 %v1091_v38, %v1041_v10  ;;  %v1645_v12 = vsub.f32 %v1095_v40, %v1041_v10 }
  0x31   : > { %v545_v27 = vadd.f32 %v1324_v26, %v509_v24  ;;  %v547_v32 = vadd.f32 %v1324_v26, %v511_v14  ;;  %v549_v38 = vadd.f32 %v1324_v26, %v513_v39  ;;  %v551_v56 = vadd.f32 %v1324_v26, %v515_v35  ;;  %v517_v35 = vld [vmem:[%s1249_s6 + $0x40] sm:$0xff] }
  0x32   : > { %v483_v17 = vmul.f32 %v1279_v30, %v1642_v7  ;;  %v484_v21 = vmul.f32 %v1279_v30, %v1643_v28  ;;  %v485_v25 = vmul.f32 %v1279_v30, %v1644_v8  ;;  %v486_v15 = vmul.f32 %v1279_v30, %v1645_v12 }
  0x33   : > { %v546_v7 = vadd.f32 %v1324_v26, %v510_v13  ;;  %v548_v28 = vadd.f32 %v1324_v26, %v512_v9  ;;  %v550_v8 = vadd.f32 %v1324_v26, %v514_v46  ;;  %v552_v40 = vadd.f32 %v1324_v26, %v516_v1  ;;  %v519_v1 = vld [vmem:[%s1249_s6 + $0x50] sm:$0xff] }
  0x34   : > { %v577_v12 = vmul.f32 %v545_v27, %v477_v49  ;;  %v579_v13 = vmul.f32 %v547_v32, %v479_v63  ;;  %v581_v14 = vmul.f32 %v549_v38, %v481_v42  ;;  %v583_v39 = vmul.f32 %v551_v56, %v483_v17  ;;  %v518_v49 = vld [vmem:[%s1249_s6 + $0x48] sm:$0xff]  ;;  %v520_v42 = vld [vmem:[%s1249_s6 + $0x58] sm:$0xff]  ;;  %v521_v56 = vld [vmem:[%s1249_s6 + $0x60] sm:$0xff] }
  0x35   : > { %v578_v24 = vmul.f32 %v546_v7, %v478_v47  ;;  %v580_v20 = vmul.f32 %v548_v28, %v480_v23  ;;  %v582_v9 = vmul.f32 %v550_v8, %v482_v37  ;;  %v584_v46 = vmul.f32 %v552_v40, %v484_v21  ;;  %v523_v38 = vld [vmem:[%s1249_s6 + $0x70] sm:$0xff] }
  0x36   : > { %v677_v47 = vadd.f32 %v1081_v34, %v577_v12  ;;  %v679_v23 = vadd.f32 %v1099_v41, %v579_v13  ;;  %v681_v37 = vadd.f32 %v1114_v48, %v581_v14  ;;  %v683_v21 = vadd.f32 %v1131_v55, %v583_v39  ;;  %v522_v55 = vld [vmem:[%s1249_s6 + $0x68] sm:$0xff]  ;;  %v525_v39 = vld [vmem:[%s1249_s6 + $0x80] sm:$0xff] }
  0x37   : > { %v678_v63 = vadd.f32 %v1086_v36, %v578_v24  ;;  %v680_v27 = vadd.f32 %v1104_v43, %v580_v20  ;;  %v682_v17 = vadd.f32 %v1126_v53, %v582_v9  ;;  %v684_v34 = vadd.f32 %v1141_v60, %v584_v46 }
  0x38   : > { %710 = vst.msk [vmem:[%s1369_s9] sm:$0xff] %vm709_vm2, %v677_v47  ;;  %712 = vst.msk [vmem:[%s1369_s9 + $0x10] sm:$0xff] %vm709_vm2, %v679_v23  ;;  %v553_v36 = vadd.f32 %v1324_v26, %v517_v35  ;;  %v554_v41 = vadd.f32 %v1324_v26, %v518_v49  ;;  %v1646_v43 = vsub.f32 %v1108_v45, %v1041_v10 }
  0x39   : > { %711 = vst.msk [vmem:[%s1369_s9 + $0x8] sm:$0xff] %vm709_vm2, %v678_v63  ;;  %713 = vst.msk [vmem:[%s1369_s9 + $0x18] sm:$0xff] %vm709_vm2, %v680_v27  ;;  %v555_v53 = vadd.f32 %v1324_v26, %v519_v1  ;;  %v1647_v60 = vsub.f32 %v1119_v50, %v1041_v10  ;;  %v556_v20 = vadd.f32 %v1324_v26, %v520_v42  ;;  %v526_v1 = vld [vmem:[%s1249_s6 + $0x88] sm:$0xff]  ;;  %v528_v42 = vld [vmem:[%s1249_s6 + $0x98] sm:$0xff] }
  0x3a   : > { %v487_v48 = vmul.f32 %v1279_v30, %v1646_v43  ;;  %714 = vst.msk [vmem:[%s1369_s9 + $0x20] sm:$0xff] %vm709_vm2, %v681_v37  ;;  %715 = vst.msk [vmem:[%s1369_s9 + $0x28] sm:$0xff] %vm709_vm2, %v682_v17  ;;  %v1648_v7 = vsub.f32 %v1123_v52, %v1041_v10  ;;  %v557_v28 = vadd.f32 %v1324_v26, %v521_v56 }
  0x3b   : > { %716 = vst.msk [vmem:[%s1369_s9 + $0x30] sm:$0xff] %vm709_vm2, %v683_v21  ;;  %717 = vst.msk [vmem:[%s1369_s9 + $0x38] sm:$0xff] %vm709_vm2, %v684_v34  ;;  %v488_v45 = vmul.f32 %v1279_v30, %v1647_v60  ;;  %v585_v8 = vmul.f32 %v553_v36, %v485_v25  ;;  %v586_v40 = vmul.f32 %v554_v41, %v486_v15  ;;  %v524_v15 = vld [vmem:[%s1249_s6 + $0x78] sm:$0xff]  ;;  %v529_v36 = vld [vmem:[%s1249_s6 + $0xa0] sm:$0xff] }
  0x3c   : > { %v489_v32 = vmul.f32 %v1279_v30, %v1648_v7  ;;  %v587_v12 = vmul.f32 %v555_v53, %v487_v48  ;;  %v1649_v24 = vsub.f32 %v1137_v58, %v1041_v10  ;;  %v558_v52 = vadd.f32 %v1324_v26, %v522_v55  ;;  %v530_v53 = vld [vmem:[%s1249_s6 + $0xa8] sm:$0xff] }
  0x3d   : > { %v588_v13 = vmul.f32 %v556_v20, %v488_v45  ;;  %v1650_v9 = vsub.f32 %v1151_v0, %v1041_v10  ;;  %v685_v46 = vadd.f32 %v1146_v62, %v585_v8  ;;  %v686_v58 = vadd.f32 %v1158_v4, %v586_v40  ;;  %v527_v4 = vld [vmem:[%s1249_s6 + $0x90] sm:$0xff] }
  0x3e   : > { %v490_v50 = vmul.f32 %v1279_v30, %v1649_v24  ;;  %v589_v14 = vmul.f32 %v557_v28, %v489_v32  ;;  %v687_v35 = vadd.f32 %v1163_v6, %v587_v12  ;;  %v559_v49 = vadd.f32 %v1324_v26, %v523_v38  ;;  %v531_v20 = vld [vmem:[%s1249_s6 + $0xb0] sm:$0xff]  ;;  %v532_v38 = vld [vmem:[%s1249_s6 + $0xb8] sm:$0xff]  ;;  %v533_v24 = vld [vmem:[%s1249_s6 + $0xc0] sm:$0xff] }
  0x3f   : > { %v491_v25 = vmul.f32 %v1279_v30, %v1650_v9  ;;  %v688_v47 = vadd.f32 %v1175_v16, %v588_v13  ;;  %v1651_v23 = vsub.f32 %v1155_v3, %v1041_v10  ;;  %718 = vst.msk [vmem:[%s1369_s9 + $0x40] sm:$0xff] %vm709_vm2, %v685_v46  ;;  %719 = vst.msk [vmem:[%s1369_s9 + $0x48] sm:$0xff] %vm709_vm2, %v686_v58  ;;  %v1661_v46 = vld [vmem:[#allocation4_spill] sm:$0xff] }
  0x40   : > { %v689_v0 = vadd.f32 %v1188_v29, %v589_v14  ;;  %v590_v63 = vmul.f32 %v558_v52, %v490_v50  ;;  %720 = vst.msk [vmem:[%s1369_s9 + $0x50] sm:$0xff] %vm709_vm2, %v687_v35  ;;  %v560_v16 = vadd.f32 %v1324_v26, %v524_v15  ;;  %v1652_v29 = vsub.f32 %v1169_v11, %v1041_v10  ;;  %v534_v14 = vld [vmem:[%s1249_s6 + $0xc8] sm:$0xff] }
  0x41   : > { %v492_v62 = vmul.f32 %v1279_v30, %v1651_v23  ;;  %v591_v6 = vmul.f32 %v559_v49, %v491_v25  ;;  %v561_v27 = vadd.f32 %v1324_v26, %v525_v39  ;;  %721 = vst.msk [vmem:[%s1369_s9 + $0x58] sm:$0xff] %vm709_vm2, %v688_v47  ;;  %v1653_v37 = vsub.f32 %v1180_v19, %v1041_v10  ;;  %v1659_v25 = vld [vmem:[#allocation3_spill] sm:$0xff]  ;;  %v535_v39 = vld [vmem:[%s1249_s6 + $0xd0] sm:$0xff]  ;;  %v1662_v49 = vld [vmem:[#allocation6_spill] sm:$0xff] }
  0x42   : > { %v493_v3 = vmul.f32 %v1279_v30, %v1652_v29  ;;  %722 = vst.msk [vmem:[%s1369_s9 + $0x60] sm:$0xff] %vm709_vm2, %v689_v0  ;;  %v690_v56 = vadd.f32 %v1193_v33, %v590_v63  ;;  %v562_v11 = vadd.f32 %v1324_v26, %v526_v1  ;;  %v1654_v21 = vsub.f32 %v1184_v22, %v1041_v10  ;;  %v635_v0 = vld [vmem:[%s1035_s29 + $0xd0] sm:$0xff]  ;;  %v432_v63 = vld [vmem:[%s1028_s26 + $0xd8] sm:$0xff] }
  0x43   : > { %v494_v17 = vmul.f32 %v1279_v30, %v1653_v37  ;;  %v691_v41 = vadd.f32 %v1203_v18, %v591_v6  ;;  %v592_v43 = vmul.f32 %v560_v16, %v492_v62  ;;  %v563_v33 = vadd.f32 %v1324_v26, %v527_v4  ;;  %v1664_v23 = vld [vmem:[#allocation5_spill] sm:$0xff]  ;;  %v1665_v6 = vld [vmem:[#allocation8_spill] sm:$0xff] }
  0x44   : > { %v495_v34 = vmul.f32 %v1279_v30, %v1654_v21  ;;  %v593_v48 = vmul.f32 %v561_v27, %v493_v3  ;;  %723 = vst.msk [vmem:[%s1369_s9 + $0x68] sm:$0xff] %vm709_vm2, %v690_v56  ;;  %v1655_v55 = vsub.f32 %v1197_v44, %v1041_v10  ;;  %v564_v60 = vadd.f32 %v1324_v26, %v528_v42  ;;  %v536_v27 = vld [vmem:[%s1249_s6 + $0xd8] sm:$0xff]  ;;  %v1667_v56 = vld [vmem:[#allocation7_spill] sm:$0xff] }
  0x45   : > { %v594_v19 = vmul.f32 %v562_v11, %v494_v17  ;;  %v1656_v18 = vsub.f32 %v1211_v59, %v1041_v10  ;;  %724 = vst.msk [vmem:[%s1369_s9 + $0x70] sm:$0xff] %vm709_vm2, %v691_v41  ;;  %v692_v7 = vadd.f32 %v1208_v31, %v592_v43  ;;  %v565_v28 = vadd.f32 %v1324_v26, %v529_v36  ;;  %v636_v42 = vld [vmem:[%s1035_s29 + $0xd8] sm:$0xff]  ;;  %v1668_v11 = vld [vmem:[#allocation11_spill] sm:$0xff]  ;;  %v433_v41 = vld [vmem:[%s1028_s26 + $0xe0] sm:$0xff] }
  0x46   : > { %v496_v22 = vmul.f32 %v1279_v30, %v1655_v55  ;;  %v693_v32 = vadd.f32 %v1220_v2, %v593_v48  ;;  %v595_v44 = vmul.f32 %v563_v33, %v495_v34  ;;  %v1657_v59 = vsub.f32 %v1215_v5, %v1041_v10  ;;  %v537_v43 = vld [vmem:[%s1249_s6 + $0xe0] sm:$0xff]  ;;  %v1670_v48 = vld [vmem:[#allocation9_spill] sm:$0xff] }
  0x47   : > { %v497_v45 = vmul.f32 %v1279_v30, %v1656_v18  ;;  %v694_v8 = vadd.f32 %v1225_v57, %v594_v19  ;;  %v566_v31 = vadd.f32 %v1324_v26, %v530_v53  ;;  %725 = vst.msk [vmem:[%s1369_s9 + $0x78] sm:$0xff] %vm709_vm2, %v692_v7  ;;  %v1658_v57 = vsub.f32 %v1229_v61, %v1041_v10  ;;  %v1671_v19 = vld [vmem:[#allocation2_spill] sm:$0xff]  ;;  %v434_v18 = vld [vmem:[%s1028_s26 + $0xe8] sm:$0xff] }
  0x48   : > { %v596_v40 = vmul.f32 %v564_v60, %v496_v22  ;;  %v498_v12 = vmul.f32 %v1279_v30, %v1657_v59  ;;  %726 = vst.msk [vmem:[%s1369_s9 + $0x80] sm:$0xff] %vm709_vm2, %v693_v32  ;;  %v695_v2 = vadd.f32 %v1234_v54, %v595_v44  ;;  %v567_v13 = vadd.f32 %v1324_v26, %v531_v20  ;;  %v637_v60 = vld [vmem:[%s1035_s29 + $0xe0] sm:$0xff] }
  0x49   : > { %v597_v50 = vmul.f32 %v565_v28, %v497_v45  ;;  %v499_v5 = vmul.f32 %v1279_v30, %v1658_v57  ;;  %727 = vst.msk [vmem:[%s1369_s9 + $0x88] sm:$0xff] %vm709_vm2, %v694_v8  ;;  %v1660_v54 = vsub.f32 %v1659_v25, %v1041_v10  ;;  %v568_v61 = vadd.f32 %v1324_v26, %v532_v38  ;;  %v538_v45 = vld [vmem:[%s1249_s6 + $0xe8] sm:$0xff]  ;;  %v1672_v20 = vld [vmem:[#allocation10_spill] sm:$0xff]  ;;  %v435_v8 = vld [vmem:[%s1028_s26 + $0xf0] sm:$0xff] }
  0x4a   : > { %v696_v52 = vadd.f32 %v1239_v51, %v596_v40  ;;  %v598_v9 = vmul.f32 %v566_v31, %v498_v12  ;;  %728 = vst.msk [vmem:[%s1369_s9 + $0x90] sm:$0xff] %vm709_vm2, %v695_v2  ;;  %v1663_v51 = vsub.f32 %v1662_v49, %v1041_v10  ;;  %v569_v47 = vadd.f32 %v1324_v26, %v533_v24  ;;  %v638_v38 = vld [vmem:[%s1035_s29 + $0xe8] sm:$0xff]  ;;  %v1673_v40 = vld [vmem:[#allocation12_spill] sm:$0xff]  ;;  %v436_v57 = vld [vmem:[%s1028_s26 + $0xf8] sm:$0xff] }
  0x4b   : > { %v500_v15 = vmul.f32 %v1279_v30, %v1660_v54  ;;  %v697_v58 = vadd.f32 %v1661_v46, %v597_v50  ;;  %v599_v35 = vmul.f32 %v567_v13, %v499_v5  ;;  %v1666_v16 = vsub.f32 %v1665_v6, %v1041_v10  ;;  %v539_v2 = vld [vmem:[%s1249_s6 + $0xf0] sm:$0xff] }
  0x4c   : > { %v501_v1 = vmul.f32 %v1279_v30, %v1663_v51  ;;  %729 = vst.msk [vmem:[%s1369_s9 + $0x98] sm:$0xff] %vm709_vm2, %v696_v52  ;;  %v698_v62 = vadd.f32 %v1664_v23, %v598_v9  ;;  %v570_v3 = vadd.f32 %v1324_v26, %v534_v14  ;;  %v1669_v21 = vsub.f32 %v1668_v11, %v1041_v10  ;;  %v639_v50 = vld [vmem:[%s1035_s29 + $0xf0] sm:$0xff]  ;;  %v540_v9 = vld [vmem:[%s1249_s6 + $0xf8] sm:$0xff] }
  0x4d   : > { %v600_v4 = vmul.f32 %v568_v61, %v500_v15  ;;  %v502_v29 = vmul.f32 %v1279_v30, %v1666_v16  ;;  %730 = vst.msk [vmem:[%s1369_s9 + $0xa0] sm:$0xff] %vm709_vm2, %v697_v58  ;;  %v699_v37 = vadd.f32 %v1667_v56, %v599_v35  ;;  %v571_v36 = vadd.f32 %v1324_v26, %v535_v39  ;;  %v640_v39 = vld [vmem:[%s1035_s29 + $0xf8] sm:$0xff] }
  0x4e   : > { %v601_v17 = vmul.f32 %v569_v47, %v501_v1  ;;  %v503_v34 = vmul.f32 %v1279_v30, %v1669_v21  ;;  %731 = vst.msk [vmem:[%s1369_s9 + $0xa8] sm:$0xff] %vm709_vm2, %v698_v62  ;;  %v671_v55 = vadd.f32 %v1671_v19, %v635_v0  ;;  %v468_v22 = vsub.f32 %v432_v63, %v1041_v10 }
  0x4f   : > { %v700_v33 = vadd.f32 %v1670_v48, %v600_v4  ;;  %v602_v53 = vmul.f32 %v570_v3, %v502_v29  ;;  %732 = vst.msk [vmem:[%s1369_s9 + $0xb0] sm:$0xff] %vm709_vm2, %v699_v37  ;;  %v572_v44 = vadd.f32 %v1324_v26, %v536_v27  ;;  %v672_v28 = vadd.f32 %v1671_v19, %v636_v42 }
  0x50   : > { %v701_v7 = vadd.f32 %v1672_v20, %v601_v17  ;;  %v603_v32 = vmul.f32 %v571_v36, %v503_v34  ;;  %v504_v12 = vmul.f32 %v1279_v30, %v468_v22  ;;  %v469_v31 = vsub.f32 %v433_v41, %v1041_v10 }
  0x51   : > { %733 = vst.msk [vmem:[%s1369_s9 + $0xb8] sm:$0xff] %vm709_vm2, %v700_v33  ;;  %v702_v59 = vadd.f32 %v1673_v40, %v602_v53  ;;  %v573_v24 = vadd.f32 %v1324_v26, %v537_v43  ;;  %v673_v13 = vadd.f32 %v1671_v19, %v637_v60  ;;  %v470_v14 = vsub.f32 %v434_v18, %v1041_v10 }
  0x52   : > { %734 = vst.msk [vmem:[%s1369_s9 + $0xc0] sm:$0xff] %vm709_vm2, %v701_v7  ;;  %v703_v5 = vadd.f32 %v671_v55, %v603_v32  ;;  %v574_v52 = vadd.f32 %v1324_v26, %v538_v45  ;;  %v604_v25 = vmul.f32 %v572_v44, %v504_v12  ;;  %v505_v54 = vmul.f32 %v1279_v30, %v469_v31 }
  0x53   : > { %735 = vst.msk [vmem:[%s1369_s9 + $0xc8] sm:$0xff] %vm709_vm2, %v702_v59  ;;  %v674_v15 = vadd.f32 %v1671_v19, %v638_v38  ;;  %v471_v61 = vsub.f32 %v435_v8, %v1041_v10  ;;  %v506_v46 = vmul.f32 %v1279_v30, %v470_v14  ;;  %v575_v58 = vadd.f32 %v1324_v26, %v539_v2 }
  0x54   : > { %736 = vst.msk [vmem:[%s1369_s9 + $0xd0] sm:$0xff] %vm709_vm2, %v703_v5  ;;  %v675_v35 = vadd.f32 %v1671_v19, %v639_v50  ;;  %v472_v49 = vsub.f32 %v436_v57, %v1041_v10  ;;  %v704_v51 = vadd.f32 %v672_v28, %v604_v25  ;;  %v605_v1 = vmul.f32 %v573_v24, %v505_v54 }
  0x55   : > { %v507_v47 = vmul.f32 %v1279_v30, %v471_v61  ;;  %v576_v0 = vadd.f32 %v1324_v26, %v540_v9  ;;  %v606_v63 = vmul.f32 %v574_v52, %v506_v46  ;;  %v676_v62 = vadd.f32 %v1671_v19, %v640_v39 }
  0x56   : > { %v508_v23 = vmul.f32 %v1279_v30, %v472_v49  ;;  %737 = vst.msk [vmem:[%s1369_s9 + $0xd8] sm:$0xff] %vm709_vm2, %v704_v51  ;;  %v705_v4 = vadd.f32 %v673_v13, %v605_v1 }
  0x57   : > { %v607_v6 = vmul.f32 %v575_v58, %v507_v47  ;;  %v706_v16 = vadd.f32 %v674_v15, %v606_v63 }
  0x58   : > { %v608_v29 = vmul.f32 %v576_v0, %v508_v23  ;;  %738 = vst.msk [vmem:[%s1369_s9 + $0xe0] sm:$0xff] %vm709_vm2, %v705_v4 }
  0x59   : > { %v707_v10 = vadd.f32 %v675_v35, %v607_v6  ;;  %739 = vst.msk [vmem:[%s1369_s9 + $0xe8] sm:$0xff] %vm709_vm2, %v706_v16 }
  0x5a   : > { %v708_v3 = vadd.f32 %v676_v62, %v608_v29 }
  0x5b   : > { %740 = vst.msk [vmem:[%s1369_s9 + $0xf0] sm:$0xff] %vm709_vm2, %v707_v10 }
  0x5c   : > { %741 = vst.msk [vmem:[%s1369_s9 + $0xf8] sm:$0xff] %vm709_vm2, %v708_v3 }
  0x5d PF: > { %s14_s17 = sadd.s32 1, %s972_s17   ;;  %s1674_s15 = smov %s968_s16 }
  0x5e   : > { %p11_p5 = scmp.ge.s32.totalorder %s14_s17, 4   ;;  %s1675_s16 = smov %s1677_s18 }
  0x60   :  { %13 = sbr.rel (!%p11_p5) target bundleno = 2 (0x2), region = 75 }

// kernel: c2former_forward.20
= control target key start
LH: loop header
LB: loop body
LE: loop exit
PB: predicated region body
PF: predicated region fallthrough
CT: control target
= control target key end

     0   :  { %vm121_vm0 = vcmask 130048   ;;  %vm507_vm1 = vcmask 64512   ;;  %s1285_s1 = inlined_call_operand.vmem [shape: f32[16,8], index: 1, kind: input, shape index: {}]   ;;  %s1286_s0 = inlined_call_operand.vmem [shape: f32[512,16], index: 0, kind: input, shape index: {}]   ;;  %s1287_s2 = inlined_call_operand.vmem [shape: f32[1,8], index: 2, kind: input, shape index: {}]   ;;  %s1288_s3 = inlined_call_operand.vmem [shape: f32[512,8], index: 3, kind: output, shape index: {}]  }
   0x1   :  { %v111_v0 = vld [vmem:[%s1285_s1] sm:$0xff]  ;;  %v112_v1 = vld [vmem:[%s1285_s1 + $0x8] sm:$0xff]  ;;  %v17_v9 = vld [vmem:[%s1286_s0 + $0x10] sm:$0xff] }
   0x2   :  { %v15_v2 = vld [vmem:[%s1286_s0] sm:$0xff]  ;;  %v113_v3 = vpack.c.bf16 %v112_v1, %v111_v0  ;;  %v16_v4 = vld [vmem:[%s1286_s0 + $0x8] sm:$0xff]  ;;  %v18_v10 = vld [vmem:[%s1286_s0 + $0x18] sm:$0xff] }
   0x3   :  { %v47_v5 = vld [vmem:[%s1286_s0 + $0x100] sm:$0xff]  ;;  %v48_v6 = vld [vmem:[%s1286_s0 + $0x108] sm:$0xff]  ;;  %v79_v7 = vpack.c.bf16 %v16_v4, %v15_v2  ;;  %v49_v11 = vld [vmem:[%s1286_s0 + $0x110] sm:$0xff]  ;;  %v80_v12 = vpack.c.bf16 %v18_v10, %v17_v9 }
   0x4   :  { %v95_v8 = vpack.c.bf16 %v48_v6, %v47_v5  ;;  %642 = vmatprep.subr.bf16.mxu0 %v113_v3  ;;  %708 = vmatprep.subr.bf16.mxu1 %v113_v3  ;;  %v50_v13 = vld [vmem:[%s1286_s0 + $0x118] sm:$0xff]  ;;  %v19_v14 = vld [vmem:[%s1286_s0 + $0x20] sm:$0xff]  ;;  %v20_v15 = vld [vmem:[%s1286_s0 + $0x28] sm:$0xff] }
   0x5   :  { %643 = vmatpush3.bf16.msra.mxu0 %v113_v3  ;;  %709 = vmatpush3.bf16.msra.mxu1 %v113_v3  ;;  %v96_v16 = vpack.c.bf16 %v50_v13, %v49_v11  ;;  %v81_v17 = vpack.c.bf16 %v20_v15, %v19_v14  ;;  %v51_v18 = vld [vmem:[%s1286_s0 + $0x120] sm:$0xff]  ;;  %v52_v19 = vld [vmem:[%s1286_s0 + $0x128] sm:$0xff]  ;;  %v21_v21 = vld [vmem:[%s1286_s0 + $0x30] sm:$0xff] }
   0x6   :  { %644 = vmatprep.mubr.msk.bf16.mxu0 %vm121_vm0, %v79_v7  ;;  %676 = vmatprep.mubr.msk.bf16.mxu1 %vm121_vm0, %v95_v8  ;;  %v97_v20 = vpack.c.bf16 %v52_v19, %v51_v18  ;;  %v22_v22 = vld [vmem:[%s1286_s0 + $0x38] sm:$0xff]  ;;  %v53_v23 = vld [vmem:[%s1286_s0 + $0x130] sm:$0xff]  ;;  %v23_v25 = vld [vmem:[%s1286_s0 + $0x40] sm:$0xff] }
   0x7   :  { %v54_v24 = vld [vmem:[%s1286_s0 + $0x138] sm:$0xff]  ;;  %v24_v26 = vld [vmem:[%s1286_s0 + $0x48] sm:$0xff]  ;;  %v55_v27 = vld [vmem:[%s1286_s0 + $0x140] sm:$0xff]  ;;  %v82_v29 = vpack.c.bf16 %v22_v22, %v21_v21 }
   0x8   :  { %645 = vmatmul.mubr.msk.bf16.vlgmr.msra.gmra.mrb[0].mxu0 %vm121_vm0, %v80_v12  ;;  %677 = vmatmul.mubr.msk.bf16.vlgmr.msra.gmra.mrb[0].mxu1 %vm121_vm0, %v96_v16  ;;  %v56_v28 = vld [vmem:[%s1286_s0 + $0x148] sm:$0xff]  ;;  %v98_v30 = vpack.c.bf16 %v54_v24, %v53_v23  ;;  %v83_v31 = vpack.c.bf16 %v24_v26, %v23_v25  ;;  %v25_v33 = vld [vmem:[%s1286_s0 + $0x50] sm:$0xff]  ;;  %v26_v34 = vld [vmem:[%s1286_s0 + $0x58] sm:$0xff] }
   0x9   :  { %648 = vmatprep.mubr.msk.bf16.mxu0 %vm121_vm0, %v81_v17  ;;  %680 = vmatprep.mubr.msk.bf16.mxu1 %vm121_vm0, %v97_v20  ;;  %v99_v32 = vpack.c.bf16 %v56_v28, %v55_v27  ;;  %v57_v35 = vld [vmem:[%s1286_s0 + $0x150] sm:$0xff]  ;;  %v58_v36 = vld [vmem:[%s1286_s0 + $0x158] sm:$0xff]  ;;  %v27_v37 = vld [vmem:[%s1286_s0 + $0x60] sm:$0xff]  ;;  %v84_v41 = vpack.c.bf16 %v26_v34, %v25_v33 }
   0xa   :  { %v28_v38 = vld [vmem:[%s1286_s0 + $0x68] sm:$0xff]  ;;  %v59_v39 = vld [vmem:[%s1286_s0 + $0x160] sm:$0xff]  ;;  %v100_v42 = vpack.c.bf16 %v58_v36, %v57_v35  ;;  %v29_v45 = vld [vmem:[%s1286_s0 + $0x70] sm:$0xff] }
   0xb   :  { %v60_v40 = vld [vmem:[%s1286_s0 + $0x168] sm:$0xff]  ;;  %v85_v43 = vpack.c.bf16 %v28_v38, %v27_v37  ;;  %v30_v46 = vld [vmem:[%s1286_s0 + $0x78] sm:$0xff]  ;;  %v61_v47 = vld [vmem:[%s1286_s0 + $0x170] sm:$0xff] }
   0xc   :  { %v101_v44 = vpack.c.bf16 %v60_v40, %v59_v39  ;;  %v62_v48 = vld [vmem:[%s1286_s0 + $0x178] sm:$0xff]  ;;  %v31_v49 = vld [vmem:[%s1286_s0 + $0x80] sm:$0xff]  ;;  %v32_v50 = vld [vmem:[%s1286_s0 + $0x88] sm:$0xff]  ;;  %v86_v53 = vpack.c.bf16 %v30_v46, %v29_v45 }
   0xd   :  { %v63_v51 = vld [vmem:[%s1286_s0 + $0x180] sm:$0xff]  ;;  %v64_v52 = vld [vmem:[%s1286_s0 + $0x188] sm:$0xff]  ;;  %v102_v54 = vpack.c.bf16 %v62_v48, %v61_v47  ;;  %v87_v55 = vpack.c.bf16 %v32_v50, %v31_v49  ;;  %v33_v57 = vld [vmem:[%s1286_s0 + $0x90] sm:$0xff] }
   0xe   :  { %v103_v56 = vpack.c.bf16 %v64_v52, %v63_v51  ;;  %v34_v58 = vld [vmem:[%s1286_s0 + $0x98] sm:$0xff]  ;;  %v65_v59 = vld [vmem:[%s1286_s0 + $0x190] sm:$0xff]  ;;  %v35_v61 = vld [vmem:[%s1286_s0 + $0xa0] sm:$0xff] }
   0xf   :  { %v66_v60 = vld [vmem:[%s1286_s0 + $0x198] sm:$0xff]  ;;  %v36_v62 = vld [vmem:[%s1286_s0 + $0xa8] sm:$0xff]  ;;  %v67_v63 = vld [vmem:[%s1286_s0 + $0x1a0] sm:$0xff]  ;;  %v88_v1 = vpack.c.bf16 %v34_v58, %v33_v57 }
  0x10   :  { %649 = vmatmul.mubr.msk.bf16.gmra.mrb[4].mxu0 %vm121_vm0, %v82_v29  ;;  %681 = vmatmul.mubr.msk.bf16.gmra.mrb[4].mxu1 %vm121_vm0, %v98_v30  ;;  %v68_v0 = vld [vmem:[%s1286_s0 + $0x1a8] sm:$0xff]  ;;  %v104_v2 = vpack.c.bf16 %v66_v60, %v65_v59  ;;  %v89_v3 = vpack.c.bf16 %v36_v62, %v35_v61  ;;  %v37_v5 = vld [vmem:[%s1286_s0 + $0xb0] sm:$0xff]  ;;  %v38_v6 = vld [vmem:[%s1286_s0 + $0xb8] sm:$0xff] }
  0x11   :  { %652 = vmatprep.mubr.msk.bf16.mxu0 %vm121_vm0, %v83_v31  ;;  %684 = vmatprep.mubr.msk.bf16.mxu1 %vm121_vm0, %v99_v32  ;;  %v105_v4 = vpack.c.bf16 %v68_v0, %v67_v63  ;;  %v69_v7 = vld [vmem:[%s1286_s0 + $0x1b0] sm:$0xff]  ;;  %v70_v8 = vld [vmem:[%s1286_s0 + $0x1b8] sm:$0xff]  ;;  %v39_v9 = vld [vmem:[%s1286_s0 + $0xc0] sm:$0xff]  ;;  %v90_v13 = vpack.c.bf16 %v38_v6, %v37_v5 }
  0x12   :  { %v40_v10 = vld [vmem:[%s1286_s0 + $0xc8] sm:$0xff]  ;;  %v71_v11 = vld [vmem:[%s1286_s0 + $0x1c0] sm:$0xff]  ;;  %v106_v14 = vpack.c.bf16 %v70_v8, %v69_v7  ;;  %v41_v17 = vld [vmem:[%s1286_s0 + $0xd0] sm:$0xff] }
  0x13   :  { %v72_v12 = vld [vmem:[%s1286_s0 + $0x1c8] sm:$0xff]  ;;  %v91_v15 = vpack.c.bf16 %v40_v10, %v39_v9  ;;  %v42_v18 = vld [vmem:[%s1286_s0 + $0xd8] sm:$0xff]  ;;  %v73_v19 = vld [vmem:[%s1286_s0 + $0x1d0] sm:$0xff] }
  0x14   :  { %v107_v16 = vpack.c.bf16 %v72_v12, %v71_v11  ;;  %v74_v20 = vld [vmem:[%s1286_s0 + $0x1d8] sm:$0xff]  ;;  %v43_v21 = vld [vmem:[%s1286_s0 + $0xe0] sm:$0xff]  ;;  %v44_v22 = vld [vmem:[%s1286_s0 + $0xe8] sm:$0xff]  ;;  %v92_v25 = vpack.c.bf16 %v42_v18, %v41_v17 }
  0x15   :  { %v75_v23 = vld [vmem:[%s1286_s0 + $0x1e0] sm:$0xff]  ;;  %v76_v24 = vld [vmem:[%s1286_s0 + $0x1e8] sm:$0xff]  ;;  %v108_v26 = vpack.c.bf16 %v74_v20, %v73_v19  ;;  %v93_v27 = vpack.c.bf16 %v44_v22, %v43_v21  ;;  %v45_v29 = vld [vmem:[%s1286_s0 + $0xf0] sm:$0xff] }
  0x16   :  { %v109_v28 = vpack.c.bf16 %v76_v24, %v75_v23  ;;  %v46_v30 = vld [vmem:[%s1286_s0 + $0xf8] sm:$0xff]  ;;  %v77_v31 = vld [vmem:[%s1286_s0 + $0x1f0] sm:$0xff]  ;;  %v963_v35 = vld [vmem:[%s1287_s2] ss:$0 sm:$0xff] }
  0x17   :  { %v78_v32 = vld [vmem:[%s1286_s0 + $0x1f8] sm:$0xff]  ;;  %v94_v33 = vpack.c.bf16 %v46_v30, %v45_v29 }
  0x18   :  { %653 = vmatmul.mubr.msk.bf16.gmra.mrb[8].mxu0 %vm121_vm0, %v84_v41  ;;  %685 = vmatmul.mubr.msk.bf16.gmra.mrb[8].mxu1 %vm121_vm0, %v100_v42  ;;  %v110_v34 = vpack.c.bf16 %v78_v32, %v77_v31 }
  0x19   :  { %656 = vmatprep.mubr.msk.bf16.mxu0 %vm121_vm0, %v85_v43  ;;  %688 = vmatprep.mubr.msk.bf16.mxu1 %vm121_vm0, %v101_v44 }
  0x20   :  { %657 = vmatmul.mubr.msk.bf16.gmra.mrb[12].mxu0 %vm121_vm0, %v86_v53  ;;  %689 = vmatmul.mubr.msk.bf16.gmra.mrb[12].mxu1 %vm121_vm0, %v102_v54 }
  0x21   :  { %660 = vmatprep.mubr.msk.bf16.mxu0 %vm121_vm0, %v87_v55  ;;  %692 = vmatprep.mubr.msk.bf16.mxu1 %vm121_vm0, %v103_v56 }
  0x28   :  { %661 = vmatmul.mubr.msk.bf16.gmra.mrb[16].mxu0 %vm121_vm0, %v88_v1  ;;  %693 = vmatmul.mubr.msk.bf16.gmra.mrb[16].mxu1 %vm121_vm0, %v104_v2 }
  0x29   :  { %664 = vmatprep.mubr.msk.bf16.mxu0 %vm121_vm0, %v89_v3  ;;  %696 = vmatprep.mubr.msk.bf16.mxu1 %vm121_vm0, %v105_v4 }
  0x30   :  { %665 = vmatmul.mubr.msk.bf16.gmra.mrb[20].mxu0 %vm121_vm0, %v90_v13  ;;  %697 = vmatmul.mubr.msk.bf16.gmra.mrb[20].mxu1 %vm121_vm0, %v106_v14 }
  0x31   :  { %668 = vmatprep.mubr.msk.bf16.mxu0 %vm121_vm0, %v91_v15  ;;  %700 = vmatprep.mubr.msk.bf16.mxu1 %vm121_vm0, %v107_v16 }
  0x38   :  { %669 = vmatmul.mubr.msk.bf16.gmra.mrb[24].mxu0 %vm121_vm0, %v92_v25  ;;  %701 = vmatmul.mubr.msk.bf16.gmra.mrb[24].mxu1 %vm121_vm0, %v108_v26 }
  0x39   :  { %672 = vmatprep.mubr.msk.bf16.mxu0 %vm121_vm0, %v93_v27  ;;  %704 = vmatprep.mubr.msk.bf16.mxu1 %vm121_vm0, %v109_v28 }
  0x40   :  { %673 = vmatmul.mubr.msk.bf16.gmra.mrb[28].mxu0 %vm121_vm0, %v94_v33  ;;  %705 = vmatmul.mubr.msk.bf16.gmra.mrb[28].mxu1 %vm121_vm0, %v110_v34 }
  0xdb   :  { %v646_v36 = vpop.f32.mrb[0].mxu0  ;;  %v678_v37 = vpop.f32.mrb[0].mxu1 }
  0xdc   :  { %v261_v38 = vadd.f32 %v646_v36, %v963_v35  ;;  %v389_v39 = vadd.f32 %v678_v37, %v963_v35  ;;  %v252_v40 = vpop.f32.mrb[1].mxu0  ;;  %v380_v41 = vpop.f32.mrb[1].mxu1 }
  0xdd   :  { %v253_v42 = vadd.f32 %v963_v35, %v252_v40  ;;  %v381_v43 = vadd.f32 %v963_v35, %v380_v41  ;;  %v647_v44 = vpop.f32.mrb[2].mxu0  ;;  %v679_v45 = vpop.f32.mrb[2].mxu1 }
  0xde   :  { %510 = vst.msk [vmem:[%s1288_s3 + $0x10] sm:$0xff] %vm507_vm1, %v261_v38  ;;  %542 = vst.msk [vmem:[%s1288_s3 + $0x110] sm:$0xff] %vm507_vm1, %v389_v39  ;;  %v264_v46 = vadd.f32 %v647_v44, %v963_v35  ;;  %v392_v47 = vadd.f32 %v679_v45, %v963_v35  ;;  %v255_v48 = vpop.f32.mrb[3].mxu0  ;;  %v383_v49 = vpop.f32.mrb[3].mxu1 }
  0xdf   :  { %508 = vst.msk [vmem:[%s1288_s3] sm:$0xff] %vm507_vm1, %v253_v42  ;;  %540 = vst.msk [vmem:[%s1288_s3 + $0x100] sm:$0xff] %vm507_vm1, %v381_v43  ;;  %v256_v50 = vadd.f32 %v963_v35, %v255_v48  ;;  %v384_v51 = vadd.f32 %v963_v35, %v383_v49 }
  0xe0   :  { %511 = vst.msk [vmem:[%s1288_s3 + $0x18] sm:$0xff] %vm507_vm1, %v264_v46  ;;  %543 = vst.msk [vmem:[%s1288_s3 + $0x118] sm:$0xff] %vm507_vm1, %v392_v47 }
  0xe1   :  { %509 = vst.msk [vmem:[%s1288_s3 + $0x8] sm:$0xff] %vm507_vm1, %v256_v50  ;;  %541 = vst.msk [vmem:[%s1288_s3 + $0x108] sm:$0xff] %vm507_vm1, %v384_v51 }
  0xe3   :  { %v650_v52 = vpop.f32.mrb[4].mxu0  ;;  %v682_v53 = vpop.f32.mrb[4].mxu1 }
  0xe4   :  { %v277_v54 = vadd.f32 %v650_v52, %v963_v35  ;;  %v405_v55 = vadd.f32 %v682_v53, %v963_v35  ;;  %v268_v56 = vpop.f32.mrb[5].mxu0  ;;  %v396_v57 = vpop.f32.mrb[5].mxu1 }
  0xe5   :  { %v269_v58 = vadd.f32 %v963_v35, %v268_v56  ;;  %v397_v59 = vadd.f32 %v963_v35, %v396_v57  ;;  %v651_v60 = vpop.f32.mrb[6].mxu0  ;;  %v683_v61 = vpop.f32.mrb[6].mxu1 }
  0xe6   :  { %514 = vst.msk [vmem:[%s1288_s3 + $0x30] sm:$0xff] %vm507_vm1, %v277_v54  ;;  %546 = vst.msk [vmem:[%s1288_s3 + $0x130] sm:$0xff] %vm507_vm1, %v405_v55  ;;  %v280_v62 = vadd.f32 %v651_v60, %v963_v35  ;;  %v408_v63 = vadd.f32 %v683_v61, %v963_v35  ;;  %v271_v0 = vpop.f32.mrb[7].mxu0  ;;  %v399_v1 = vpop.f32.mrb[7].mxu1 }
  0xe7   :  { %512 = vst.msk [vmem:[%s1288_s3 + $0x20] sm:$0xff] %vm507_vm1, %v269_v58  ;;  %544 = vst.msk [vmem:[%s1288_s3 + $0x120] sm:$0xff] %vm507_vm1, %v397_v59  ;;  %v272_v2 = vadd.f32 %v963_v35, %v271_v0  ;;  %v400_v3 = vadd.f32 %v963_v35, %v399_v1 }
  0xe8   :  { %515 = vst.msk [vmem:[%s1288_s3 + $0x38] sm:$0xff] %vm507_vm1, %v280_v62  ;;  %547 = vst.msk [vmem:[%s1288_s3 + $0x138] sm:$0xff] %vm507_vm1, %v408_v63 }
  0xe9   :  { %513 = vst.msk [vmem:[%s1288_s3 + $0x28] sm:$0xff] %vm507_vm1, %v272_v2  ;;  %545 = vst.msk [vmem:[%s1288_s3 + $0x128] sm:$0xff] %vm507_vm1, %v400_v3 }
  0xeb   :  { %v654_v4 = vpop.f32.mrb[8].mxu0  ;;  %v686_v5 = vpop.f32.mrb[8].mxu1 }
  0xec   :  { %v293_v6 = vadd.f32 %v654_v4, %v963_v35  ;;  %v421_v7 = vadd.f32 %v686_v5, %v963_v35  ;;  %v284_v8 = vpop.f32.mrb[9].mxu0  ;;  %v412_v9 = vpop.f32.mrb[9].mxu1 }
  0xed   :  { %v285_v10 = vadd.f32 %v963_v35, %v284_v8  ;;  %v413_v11 = vadd.f32 %v963_v35, %v412_v9  ;;  %v655_v12 = vpop.f32.mrb[10].mxu0  ;;  %v687_v13 = vpop.f32.mrb[10].mxu1 }
  0xee   :  { %518 = vst.msk [vmem:[%s1288_s3 + $0x50] sm:$0xff] %vm507_vm1, %v293_v6  ;;  %550 = vst.msk [vmem:[%s1288_s3 + $0x150] sm:$0xff] %vm507_vm1, %v421_v7  ;;  %v296_v14 = vadd.f32 %v655_v12, %v963_v35  ;;  %v424_v15 = vadd.f32 %v687_v13, %v963_v35  ;;  %v287_v16 = vpop.f32.mrb[11].mxu0  ;;  %v415_v17 = vpop.f32.mrb[11].mxu1 }
  0xef   :  { %516 = vst.msk [vmem:[%s1288_s3 + $0x40] sm:$0xff] %vm507_vm1, %v285_v10  ;;  %548 = vst.msk [vmem:[%s1288_s3 + $0x140] sm:$0xff] %vm507_vm1, %v413_v11  ;;  %v288_v18 = vadd.f32 %v963_v35, %v287_v16  ;;  %v416_v19 = vadd.f32 %v963_v35, %v415_v17 }
  0xf0   :  { %519 = vst.msk [vmem:[%s1288_s3 + $0x58] sm:$0xff] %vm507_vm1, %v296_v14  ;;  %551 = vst.msk [vmem:[%s1288_s3 + $0x158] sm:$0xff] %vm507_vm1, %v424_v15 }
  0xf1   :  { %517 = vst.msk [vmem:[%s1288_s3 + $0x48] sm:$0xff] %vm507_vm1, %v288_v18  ;;  %549 = vst.msk [vmem:[%s1288_s3 + $0x148] sm:$0xff] %vm507_vm1, %v416_v19 }
  0xf3   :  { %v658_v20 = vpop.f32.mrb[12].mxu0  ;;  %v690_v21 = vpop.f32.mrb[12].mxu1 }
  0xf4   :  { %v309_v22 = vadd.f32 %v658_v20, %v963_v35  ;;  %v437_v23 = vadd.f32 %v690_v21, %v963_v35  ;;  %v300_v24 = vpop.f32.mrb[13].mxu0  ;;  %v428_v25 = vpop.f32.mrb[13].mxu1 }
  0xf5   :  { %v301_v26 = vadd.f32 %v963_v35, %v300_v24  ;;  %v429_v27 = vadd.f32 %v963_v35, %v428_v25  ;;  %v659_v28 = vpop.f32.mrb[14].mxu0  ;;  %v691_v29 = vpop.f32.mrb[14].mxu1 }
  0xf6   :  { %522 = vst.msk [vmem:[%s1288_s3 + $0x70] sm:$0xff] %vm507_vm1, %v309_v22  ;;  %554 = vst.msk [vmem:[%s1288_s3 + $0x170] sm:$0xff] %vm507_vm1, %v437_v23  ;;  %v312_v30 = vadd.f32 %v659_v28, %v963_v35  ;;  %v440_v31 = vadd.f32 %v691_v29, %v963_v35  ;;  %v303_v32 = vpop.f32.mrb[15].mxu0  ;;  %v431_v33 = vpop.f32.mrb[15].mxu1 }
  0xf7   :  { %520 = vst.msk [vmem:[%s1288_s3 + $0x60] sm:$0xff] %vm507_vm1, %v301_v26  ;;  %552 = vst.msk [vmem:[%s1288_s3 + $0x160] sm:$0xff] %vm507_vm1, %v429_v27  ;;  %v304_v34 = vadd.f32 %v963_v35, %v303_v32  ;;  %v432_v36 = vadd.f32 %v963_v35, %v431_v33 }
  0xf8   :  { %523 = vst.msk [vmem:[%s1288_s3 + $0x78] sm:$0xff] %vm507_vm1, %v312_v30  ;;  %555 = vst.msk [vmem:[%s1288_s3 + $0x178] sm:$0xff] %vm507_vm1, %v440_v31 }
  0xf9   :  { %521 = vst.msk [vmem:[%s1288_s3 + $0x68] sm:$0xff] %vm507_vm1, %v304_v34  ;;  %553 = vst.msk [vmem:[%s1288_s3 + $0x168] sm:$0xff] %vm507_vm1, %v432_v36 }
  0xfb   :  { %v662_v37 = vpop.f32.mrb[16].mxu0  ;;  %v694_v38 = vpop.f32.mrb[16].mxu1 }
  0xfc   :  { %v325_v39 = vadd.f32 %v662_v37, %v963_v35  ;;  %v453_v40 = vadd.f32 %v694_v38, %v963_v35  ;;  %v316_v41 = vpop.f32.mrb[17].mxu0  ;;  %v444_v42 = vpop.f32.mrb[17].mxu1 }
  0xfd   :  { %v317_v43 = vadd.f32 %v963_v35, %v316_v41  ;;  %v445_v44 = vadd.f32 %v963_v35, %v444_v42  ;;  %v663_v45 = vpop.f32.mrb[18].mxu0  ;;  %v695_v46 = vpop.f32.mrb[18].mxu1 }
  0xfe   :  { %526 = vst.msk [vmem:[%s1288_s3 + $0x90] sm:$0xff] %vm507_vm1, %v325_v39  ;;  %558 = vst.msk [vmem:[%s1288_s3 + $0x190] sm:$0xff] %vm507_vm1, %v453_v40  ;;  %v328_v47 = vadd.f32 %v663_v45, %v963_v35  ;;  %v456_v48 = vadd.f32 %v695_v46, %v963_v35  ;;  %v319_v49 = vpop.f32.mrb[19].mxu0  ;;  %v447_v50 = vpop.f32.mrb[19].mxu1 }
  0xff   :  { %524 = vst.msk [vmem:[%s1288_s3 + $0x80] sm:$0xff] %vm507_vm1, %v317_v43  ;;  %556 = vst.msk [vmem:[%s1288_s3 + $0x180] sm:$0xff] %vm507_vm1, %v445_v44  ;;  %v320_v51 = vadd.f32 %v963_v35, %v319_v49  ;;  %v448_v52 = vadd.f32 %v963_v35, %v447_v50 }
 0x100   :  { %527 = vst.msk [vmem:[%s1288_s3 + $0x98] sm:$0xff] %vm507_vm1, %v328_v47  ;;  %559 = vst.msk [vmem:[%s1288_s3 + $0x198] sm:$0xff] %vm507_vm1, %v456_v48 }
 0x101   :  { %525 = vst.msk [vmem:[%s1288_s3 + $0x88] sm:$0xff] %vm507_vm1, %v320_v51  ;;  %557 = vst.msk [vmem:[%s1288_s3 + $0x188] sm:$0xff] %vm507_vm1, %v448_v52 }
 0x103   :  { %v666_v53 = vpop.f32.mrb[20].mxu0  ;;  %v698_v54 = vpop.f32.mrb[20].mxu1 }
 0x104   :  { %v341_v55 = vadd.f32 %v666_v53, %v963_v35  ;;  %v469_v56 = vadd.f32 %v698_v54, %v963_v35  ;;  %v332_v57 = vpop.f32.mrb[21].mxu0  ;;  %v460_v58 = vpop.f32.mrb[21].mxu1 }
 0x105   :  { %v333_v59 = vadd.f32 %v963_v35, %v332_v57  ;;  %v461_v60 = vadd.f32 %v963_v35, %v460_v58  ;;  %v667_v61 = vpop.f32.mrb[22].mxu0  ;;  %v699_v62 = vpop.f32.mrb[22].mxu1 }
 0x106   :  { %530 = vst.msk [vmem:[%s1288_s3 + $0xb0] sm:$0xff] %vm507_vm1, %v341_v55  ;;  %562 = vst.msk [vmem:[%s1288_s3 + $0x1b0] sm:$0xff] %vm507_vm1, %v469_v56  ;;  %v344_v63 = vadd.f32 %v667_v61, %v963_v35  ;;  %v472_v0 = vadd.f32 %v699_v62, %v963_v35  ;;  %v335_v1 = vpop.f32.mrb[23].mxu0  ;;  %v463_v2 = vpop.f32.mrb[23].mxu1 }
 0x107   :  { %528 = vst.msk [vmem:[%s1288_s3 + $0xa0] sm:$0xff] %vm507_vm1, %v333_v59  ;;  %560 = vst.msk [vmem:[%s1288_s3 + $0x1a0] sm:$0xff] %vm507_vm1, %v461_v60  ;;  %v336_v3 = vadd.f32 %v963_v35, %v335_v1  ;;  %v464_v4 = vadd.f32 %v963_v35, %v463_v2 }
 0x108   :  { %531 = vst.msk [vmem:[%s1288_s3 + $0xb8] sm:$0xff] %vm507_vm1, %v344_v63  ;;  %563 = vst.msk [vmem:[%s1288_s3 + $0x1b8] sm:$0xff] %vm507_vm1, %v472_v0 }
 0x109   :  { %529 = vst.msk [vmem:[%s1288_s3 + $0xa8] sm:$0xff] %vm507_vm1, %v336_v3  ;;  %561 = vst.msk [vmem:[%s1288_s3 + $0x1a8] sm:$0xff] %vm507_vm1, %v464_v4 }
 0x10b   :  { %v670_v5 = vpop.f32.mrb[24].mxu0  ;;  %v702_v6 = vpop.f32.mrb[24].mxu1 }
 0x10c   :  { %v357_v7 = vadd.f32 %v670_v5, %v963_v35  ;;  %v485_v8 = vadd.f32 %v702_v6, %v963_v35  ;;  %v348_v9 = vpop.f32.mrb[25].mxu0  ;;  %v476_v10 = vpop.f32.mrb[25].mxu1 }
 0x10d   :  { %v349_v11 = vadd.f32 %v963_v35, %v348_v9  ;;  %v477_v12 = vadd.f32 %v963_v35, %v476_v10  ;;  %v671_v13 = vpop.f32.mrb[26].mxu0  ;;  %v703_v14 = vpop.f32.mrb[26].mxu1 }
 0x10e   :  { %534 = vst.msk [vmem:[%s1288_s3 + $0xd0] sm:$0xff] %vm507_vm1, %v357_v7  ;;  %566 = vst.msk [vmem:[%s1288_s3 + $0x1d0] sm:$0xff] %vm507_vm1, %v485_v8  ;;  %v360_v15 = vadd.f32 %v671_v13, %v963_v35  ;;  %v488_v16 = vadd.f32 %v703_v14, %v963_v35  ;;  %v351_v17 = vpop.f32.mrb[27].mxu0  ;;  %v479_v18 = vpop.f32.mrb[27].mxu1 }
 0x10f   :  { %532 = vst.msk [vmem:[%s1288_s3 + $0xc0] sm:$0xff] %vm507_vm1, %v349_v11  ;;  %564 = vst.msk [vmem:[%s1288_s3 + $0x1c0] sm:$0xff] %vm507_vm1, %v477_v12  ;;  %v352_v19 = vadd.f32 %v963_v35, %v351_v17  ;;  %v480_v20 = vadd.f32 %v963_v35, %v479_v18 }
 0x110   :  { %535 = vst.msk [vmem:[%s1288_s3 + $0xd8] sm:$0xff] %vm507_vm1, %v360_v15  ;;  %567 = vst.msk [vmem:[%s1288_s3 + $0x1d8] sm:$0xff] %vm507_vm1, %v488_v16 }
 0x111   :  { %533 = vst.msk [vmem:[%s1288_s3 + $0xc8] sm:$0xff] %vm507_vm1, %v352_v19  ;;  %565 = vst.msk [vmem:[%s1288_s3 + $0x1c8] sm:$0xff] %vm507_vm1, %v480_v20 }
 0x113   :  { %v674_v21 = vpop.f32.mrb[28].mxu0  ;;  %v706_v22 = vpop.f32.mrb[28].mxu1 }
 0x114   :  { %v373_v23 = vadd.f32 %v674_v21, %v963_v35  ;;  %v501_v24 = vadd.f32 %v706_v22, %v963_v35  ;;  %v364_v25 = vpop.f32.mrb[29].mxu0  ;;  %v492_v26 = vpop.f32.mrb[29].mxu1 }
 0x115   :  { %v365_v27 = vadd.f32 %v963_v35, %v364_v25  ;;  %v493_v28 = vadd.f32 %v963_v35, %v492_v26  ;;  %v675_v29 = vpop.f32.mrb[30].mxu0  ;;  %v707_v30 = vpop.f32.mrb[30].mxu1 }
 0x116   :  { %538 = vst.msk [vmem:[%s1288_s3 + $0xf0] sm:$0xff] %vm507_vm1, %v373_v23  ;;  %570 = vst.msk [vmem:[%s1288_s3 + $0x1f0] sm:$0xff] %vm507_vm1, %v501_v24  ;;  %v376_v31 = vadd.f32 %v675_v29, %v963_v35  ;;  %v504_v32 = vadd.f32 %v707_v30, %v963_v35  ;;  %v367_v33 = vpop.f32.mrb[31].mxu0  ;;  %v495_v34 = vpop.f32.mrb[31].mxu1 }
 0x117   :  { %536 = vst.msk [vmem:[%s1288_s3 + $0xe0] sm:$0xff] %vm507_vm1, %v365_v27  ;;  %568 = vst.msk [vmem:[%s1288_s3 + $0x1e0] sm:$0xff] %vm507_vm1, %v493_v28  ;;  %v368_v36 = vadd.f32 %v963_v35, %v367_v33  ;;  %v496_v37 = vadd.f32 %v963_v35, %v495_v34 }
 0x118   :  { %539 = vst.msk [vmem:[%s1288_s3 + $0xf8] sm:$0xff] %vm507_vm1, %v376_v31  ;;  %571 = vst.msk [vmem:[%s1288_s3 + $0x1f8] sm:$0xff] %vm507_vm1, %v504_v32 }
 0x119   :  { %537 = vst.msk [vmem:[%s1288_s3 + $0xe8] sm:$0xff] %vm507_vm1, %v368_v36  ;;  %569 = vst.msk [vmem:[%s1288_s3 + $0x1e8] sm:$0xff] %vm507_vm1, %v496_v37 }

// kernel: c2former_forward.21
= control target key start
LH: loop header
LB: loop body
LE: loop exit
PB: predicated region body
PF: predicated region fallthrough
CT: control target
= control target key end

     0   :  { %s1105_s12 = smov 0   ;;  %s1107_s13 = smov 0   ;;  %s1445_s0 = inlined_call_operand.vmem [shape: f32[1024,4], index: 0, kind: input, shape index: {}]   ;;  %s1446_s1 = inlined_call_operand.vmem [shape: f32[4,2], index: 1, kind: input, shape index: {}]   ;;  %s1447_s2 = inlined_call_operand.vmem [shape: f32[1,2], index: 2, kind: input, shape index: {}]   ;;  %s1448_s3 = inlined_call_operand.vmem [shape: f32[1024,2], index: 3, kind: output, shape index: {}]  }
   0x1   :  { %s1109_s14 = smov 0  }
   0x2 LB: > { %s25_s15 = sadd.s32 1, %s1079_s13  ;;  %p894_p0 = scmp.ge.s32.totalorder %s1083_s14, 1  ;;  %s1083_s14 = sphi %s1109_s14, %s13_s14   ;;  %s1079_s13 = sphi %s1107_s13, %s1450_s13   ;;  %s1075_s12 = sphi %s1105_s12, %s1449_s12  }
   0x3   : > { %p27_p1 = scmp.ge.s32.totalorder %s25_s15, 2  ;;  %p169_p2 = scmp.lt.s32.totalorder %s1083_s14, 3 }
   0x5   : > { %s1452_s15 = smov (%p27_p1, %s25_s15), 0  ;;  %p170_p3 = pnand %p894_p0, %p169_p2 }
   0x6   : > { %v322_v0 = vld [vmem:[%s1446_s1] sm:$0xf] (!%p170_p3)  ;;  %vm428_vm0 = vcmask (!%p170_p3), 1041408   ;;  %s895_s18 = sshll.u32 (!%p170_p3), %s1075_s12, 6  ;;  %vm331_vm1 = vcmask (!%p170_p3), 31744   ;;  %vm721_vm2 = vcmask (!%p170_p3), 15360  }
   0x7   : > { %173 = sbr.rel (%p170_p3) target bundleno = 296 (0x128), region = 32  ;;  %v323_v1 = vpack.c.bf16 (!%p170_p3), %v322_v0, %v322_v0  ;;  %p204_p4 = scmp.lt.s32.totalorder (!%p170_p3), %s895_s18, 127 }
   0x9   : > { %1035 = vmatprep.subr.msk.bf16.mxu0 (!%p170_p3), %vm428_vm0, %v323_v1  ;;  %1036 = vmatprep.subr.msk.bf16.mxu1 (!%p170_p3), %vm428_vm0, %v323_v1  ;;  %v430_v2 = vsel (!%p170_p3), %vm428_vm0, %v323_v1, 0 }
   0xa   : > { %968 = vmatpush3.bf16.msra.mxu0 (!%p170_p3), %v430_v2  ;;  %1034 = vmatpush3.bf16.msra.mxu1 (!%p170_p3), %v430_v2 }
   0xe   : > { %s1454_s18 = smov (!%p204_p4, %s895_s18), 127 }
   0xf   : > { %s896_s19 = sshll.u32 %s1454_s18, 3 }
  0x10   : > { %s1134_s22 = scalar_lea.vmem %s1445_s0, %s896_s19  ;;  %s1242_s27 = scalar_lea.vmem %s1448_s3, %s896_s19 }
  0x11   : > { %v226_v3 = vld [vmem:[%s1134_s22] sm:$0xff]  ;;  %v227_v4 = vld [vmem:[%s1134_s22 + $0x8] sm:$0xff]  ;;  %v228_v8 = vld [vmem:[%s1134_s22 + $0x10] sm:$0xff] }
  0x12   : > { %v258_v5 = vld [vmem:[%s1134_s22 + $0x100] sm:$0xff]  ;;  %v290_v6 = vpack.c.bf16 %v227_v4, %v226_v3  ;;  %v259_v7 = vld [vmem:[%s1134_s22 + $0x108] sm:$0xff]  ;;  %v229_v9 = vld [vmem:[%s1134_s22 + $0x18] sm:$0xff] }
  0x13   : > { %v306_v10 = vpack.c.bf16 %v259_v7, %v258_v5  ;;  %v291_v11 = vpack.c.bf16 %v229_v9, %v228_v8  ;;  %v260_v12 = vld [vmem:[%s1134_s22 + $0x110] sm:$0xff]  ;;  %v261_v13 = vld [vmem:[%s1134_s22 + $0x118] sm:$0xff]  ;;  %v230_v14 = vld [vmem:[%s1134_s22 + $0x20] sm:$0xff] }
  0x14   : > { %969 = vmatprep.mubr.msk.bf16.mxu0 %vm331_vm1, %v290_v6  ;;  %v307_v15 = vpack.c.bf16 %v261_v13, %v260_v12  ;;  %v231_v16 = vld [vmem:[%s1134_s22 + $0x28] sm:$0xff]  ;;  %v262_v17 = vld [vmem:[%s1134_s22 + $0x120] sm:$0xff]  ;;  %v232_v21 = vld [vmem:[%s1134_s22 + $0x30] sm:$0xff] }
  0x15   : > { %v263_v18 = vld [vmem:[%s1134_s22 + $0x128] sm:$0xff]  ;;  %1001 = vmatprep.mubr.msk.bf16.mxu1 %vm331_vm1, %v306_v10  ;;  %970 = vmatmul.mubr.msk.bf16.vlgmr.msra.gmra.mrb[0].mxu0 %vm331_vm1, %v291_v11  ;;  %v292_v19 = vpack.c.bf16 %v231_v16, %v230_v14  ;;  %v233_v22 = vld [vmem:[%s1134_s22 + $0x38] sm:$0xff]  ;;  %v264_v23 = vld [vmem:[%s1134_s22 + $0x130] sm:$0xff] }
  0x16   : > { %v308_v20 = vpack.c.bf16 %v263_v18, %v262_v17  ;;  %1002 = vmatmul.mubr.msk.bf16.vlgmr.msra.gmra.mrb[0].mxu1 %vm331_vm1, %v307_v15  ;;  %v265_v24 = vld [vmem:[%s1134_s22 + $0x138] sm:$0xff]  ;;  %v234_v25 = vld [vmem:[%s1134_s22 + $0x40] sm:$0xff]  ;;  %v235_v26 = vld [vmem:[%s1134_s22 + $0x48] sm:$0xff]  ;;  %v293_v29 = vpack.c.bf16 %v233_v22, %v232_v21 }
  0x17   : > { %973 = vmatprep.mubr.msk.bf16.mxu0 %vm331_vm1, %v292_v19  ;;  %v266_v27 = vld [vmem:[%s1134_s22 + $0x140] sm:$0xff]  ;;  %v267_v28 = vld [vmem:[%s1134_s22 + $0x148] sm:$0xff]  ;;  %v309_v30 = vpack.c.bf16 %v265_v24, %v264_v23  ;;  %v294_v31 = vpack.c.bf16 %v235_v26, %v234_v25  ;;  %v236_v33 = vld [vmem:[%s1134_s22 + $0x50] sm:$0xff] }
  0x18   : > { %1005 = vmatprep.mubr.msk.bf16.mxu1 %vm331_vm1, %v308_v20  ;;  %v310_v32 = vpack.c.bf16 %v267_v28, %v266_v27  ;;  %v237_v34 = vld [vmem:[%s1134_s22 + $0x58] sm:$0xff]  ;;  %v268_v35 = vld [vmem:[%s1134_s22 + $0x150] sm:$0xff]  ;;  %v238_v37 = vld [vmem:[%s1134_s22 + $0x60] sm:$0xff] }
  0x19   : > { %v269_v36 = vld [vmem:[%s1134_s22 + $0x158] sm:$0xff]  ;;  %v239_v38 = vld [vmem:[%s1134_s22 + $0x68] sm:$0xff]  ;;  %v270_v39 = vld [vmem:[%s1134_s22 + $0x160] sm:$0xff]  ;;  %v295_v41 = vpack.c.bf16 %v237_v34, %v236_v33 }
  0x1a   : > { %v271_v40 = vld [vmem:[%s1134_s22 + $0x168] sm:$0xff]  ;;  %v311_v42 = vpack.c.bf16 %v269_v36, %v268_v35  ;;  %v296_v43 = vpack.c.bf16 %v239_v38, %v238_v37  ;;  %v240_v45 = vld [vmem:[%s1134_s22 + $0x70] sm:$0xff]  ;;  %v241_v46 = vld [vmem:[%s1134_s22 + $0x78] sm:$0xff] }
  0x1b   : > { %v312_v44 = vpack.c.bf16 %v271_v40, %v270_v39  ;;  %v272_v47 = vld [vmem:[%s1134_s22 + $0x170] sm:$0xff]  ;;  %v273_v48 = vld [vmem:[%s1134_s22 + $0x178] sm:$0xff]  ;;  %v242_v49 = vld [vmem:[%s1134_s22 + $0x80] sm:$0xff]  ;;  %v297_v53 = vpack.c.bf16 %v241_v46, %v240_v45 }
  0x1c   : > { %v243_v50 = vld [vmem:[%s1134_s22 + $0x88] sm:$0xff]  ;;  %v274_v51 = vld [vmem:[%s1134_s22 + $0x180] sm:$0xff]  ;;  %v313_v54 = vpack.c.bf16 %v273_v48, %v272_v47  ;;  %v244_v57 = vld [vmem:[%s1134_s22 + $0x90] sm:$0xff] }
  0x1d   : > { %974 = vmatmul.mubr.msk.bf16.gmra.mrb[4].mxu0 %vm331_vm1, %v293_v29  ;;  %v275_v52 = vld [vmem:[%s1134_s22 + $0x188] sm:$0xff]  ;;  %v298_v55 = vpack.c.bf16 %v243_v50, %v242_v49  ;;  %v245_v58 = vld [vmem:[%s1134_s22 + $0x98] sm:$0xff]  ;;  %v276_v59 = vld [vmem:[%s1134_s22 + $0x190] sm:$0xff] }
  0x1e   : > { %1006 = vmatmul.mubr.msk.bf16.gmra.mrb[4].mxu1 %vm331_vm1, %v309_v30  ;;  %977 = vmatprep.mubr.msk.bf16.mxu0 %vm331_vm1, %v294_v31  ;;  %v314_v56 = vpack.c.bf16 %v275_v52, %v274_v51  ;;  %v277_v60 = vld [vmem:[%s1134_s22 + $0x198] sm:$0xff]  ;;  %v246_v61 = vld [vmem:[%s1134_s22 + $0xa0] sm:$0xff]  ;;  %v247_v62 = vld [vmem:[%s1134_s22 + $0xa8] sm:$0xff]  ;;  %v299_v1 = vpack.c.bf16 %v245_v58, %v244_v57 }
  0x1f   : > { %1009 = vmatprep.mubr.msk.bf16.mxu1 %vm331_vm1, %v310_v32  ;;  %v278_v63 = vld [vmem:[%s1134_s22 + $0x1a0] sm:$0xff]  ;;  %v279_v0 = vld [vmem:[%s1134_s22 + $0x1a8] sm:$0xff]  ;;  %v315_v2 = vpack.c.bf16 %v277_v60, %v276_v59  ;;  %v300_v3 = vpack.c.bf16 %v247_v62, %v246_v61  ;;  %v248_v5 = vld [vmem:[%s1134_s22 + $0xb0] sm:$0xff] }
  0x20   : > { %v316_v4 = vpack.c.bf16 %v279_v0, %v278_v63  ;;  %v249_v6 = vld [vmem:[%s1134_s22 + $0xb8] sm:$0xff]  ;;  %v280_v7 = vld [vmem:[%s1134_s22 + $0x1b0] sm:$0xff]  ;;  %v250_v9 = vld [vmem:[%s1134_s22 + $0xc0] sm:$0xff] }
  0x21   : > { %v281_v8 = vld [vmem:[%s1134_s22 + $0x1b8] sm:$0xff]  ;;  %v251_v10 = vld [vmem:[%s1134_s22 + $0xc8] sm:$0xff]  ;;  %v282_v11 = vld [vmem:[%s1134_s22 + $0x1c0] sm:$0xff]  ;;  %v301_v13 = vpack.c.bf16 %v249_v6, %v248_v5 }
  0x22   : > { %v283_v12 = vld [vmem:[%s1134_s22 + $0x1c8] sm:$0xff]  ;;  %v317_v14 = vpack.c.bf16 %v281_v8, %v280_v7  ;;  %v302_v15 = vpack.c.bf16 %v251_v10, %v250_v9  ;;  %v252_v17 = vld [vmem:[%s1134_s22 + $0xd0] sm:$0xff]  ;;  %v253_v18 = vld [vmem:[%s1134_s22 + $0xd8] sm:$0xff] }
  0x23   : > { %v318_v16 = vpack.c.bf16 %v283_v12, %v282_v11  ;;  %v284_v19 = vld [vmem:[%s1134_s22 + $0x1d0] sm:$0xff]  ;;  %v285_v20 = vld [vmem:[%s1134_s22 + $0x1d8] sm:$0xff]  ;;  %v254_v21 = vld [vmem:[%s1134_s22 + $0xe0] sm:$0xff]  ;;  %v303_v25 = vpack.c.bf16 %v253_v18, %v252_v17 }
  0x24   : > { %v255_v22 = vld [vmem:[%s1134_s22 + $0xe8] sm:$0xff]  ;;  %v286_v23 = vld [vmem:[%s1134_s22 + $0x1e0] sm:$0xff]  ;;  %v319_v26 = vpack.c.bf16 %v285_v20, %v284_v19  ;;  %v256_v29 = vld [vmem:[%s1134_s22 + $0xf0] sm:$0xff] }
  0x25   : > { %978 = vmatmul.mubr.msk.bf16.gmra.mrb[8].mxu0 %vm331_vm1, %v295_v41  ;;  %v287_v24 = vld [vmem:[%s1134_s22 + $0x1e8] sm:$0xff]  ;;  %v304_v27 = vpack.c.bf16 %v255_v22, %v254_v21  ;;  %v257_v30 = vld [vmem:[%s1134_s22 + $0xf8] sm:$0xff]  ;;  %v288_v31 = vld [vmem:[%s1134_s22 + $0x1f0] sm:$0xff] }
  0x26   : > { %1010 = vmatmul.mubr.msk.bf16.gmra.mrb[8].mxu1 %vm331_vm1, %v311_v42  ;;  %981 = vmatprep.mubr.msk.bf16.mxu0 %vm331_vm1, %v296_v43  ;;  %v320_v28 = vpack.c.bf16 %v287_v24, %v286_v23  ;;  %v289_v32 = vld [vmem:[%s1134_s22 + $0x1f8] sm:$0xff]  ;;  %v305_v33 = vpack.c.bf16 %v257_v30, %v256_v29  ;;  %v1235_v35 = vld [vmem:[%s1447_s2] ss:$0 sm:$0xff] }
  0x27   : > { %1013 = vmatprep.mubr.msk.bf16.mxu1 %vm331_vm1, %v312_v44  ;;  %v321_v34 = vpack.c.bf16 %v289_v32, %v288_v31 }
  0x2d   : > { %982 = vmatmul.mubr.msk.bf16.gmra.mrb[12].mxu0 %vm331_vm1, %v297_v53 }
  0x2e   : > { %1014 = vmatmul.mubr.msk.bf16.gmra.mrb[12].mxu1 %vm331_vm1, %v313_v54  ;;  %985 = vmatprep.mubr.msk.bf16.mxu0 %vm331_vm1, %v298_v55 }
  0x2f   : > { %1017 = vmatprep.mubr.msk.bf16.mxu1 %vm331_vm1, %v314_v56 }
  0x35   : > { %986 = vmatmul.mubr.msk.bf16.gmra.mrb[16].mxu0 %vm331_vm1, %v299_v1 }
  0x36   : > { %1018 = vmatmul.mubr.msk.bf16.gmra.mrb[16].mxu1 %vm331_vm1, %v315_v2  ;;  %989 = vmatprep.mubr.msk.bf16.mxu0 %vm331_vm1, %v300_v3 }
  0x37   : > { %1021 = vmatprep.mubr.msk.bf16.mxu1 %vm331_vm1, %v316_v4 }
  0x3d   : > { %990 = vmatmul.mubr.msk.bf16.gmra.mrb[20].mxu0 %vm331_vm1, %v301_v13 }
  0x3e   : > { %1022 = vmatmul.mubr.msk.bf16.gmra.mrb[20].mxu1 %vm331_vm1, %v317_v14  ;;  %993 = vmatprep.mubr.msk.bf16.mxu0 %vm331_vm1, %v302_v15 }
  0x3f   : > { %1025 = vmatprep.mubr.msk.bf16.mxu1 %vm331_vm1, %v318_v16 }
  0x45   : > { %994 = vmatmul.mubr.msk.bf16.gmra.mrb[24].mxu0 %vm331_vm1, %v303_v25 }
  0x46   : > { %1026 = vmatmul.mubr.msk.bf16.gmra.mrb[24].mxu1 %vm331_vm1, %v319_v26  ;;  %997 = vmatprep.mubr.msk.bf16.mxu0 %vm331_vm1, %v304_v27 }
  0x47   : > { %1029 = vmatprep.mubr.msk.bf16.mxu1 %vm331_vm1, %v320_v28 }
  0x4d   : > { %998 = vmatmul.mubr.msk.bf16.gmra.mrb[28].mxu0 %vm331_vm1, %v305_v33 }
  0x4e   : > { %1030 = vmatmul.mubr.msk.bf16.gmra.mrb[28].mxu1 %vm331_vm1, %v321_v34 }
  0xe8   : > { %v971_v36 = vpop.f32.mrb[0].mxu0 }
  0xe9   : > { %v475_v37 = vadd.f32 %v971_v36, %v1235_v35  ;;  %v1003_v38 = vpop.f32.mrb[0].mxu1  ;;  %v466_v39 = vpop.f32.mrb[1].mxu0 }
  0xea   : > { %v603_v40 = vadd.f32 %v1003_v38, %v1235_v35  ;;  %v467_v41 = vadd.f32 %v1235_v35, %v466_v39  ;;  %v594_v42 = vpop.f32.mrb[1].mxu1  ;;  %v972_v43 = vpop.f32.mrb[2].mxu0 }
  0xeb   : > { %724 = vst.msk [vmem:[%s1242_s27 + $0x10] sm:$0xff] %vm721_vm2, %v475_v37  ;;  %v595_v44 = vadd.f32 %v1235_v35, %v594_v42  ;;  %v478_v45 = vadd.f32 %v972_v43, %v1235_v35  ;;  %v1004_v46 = vpop.f32.mrb[2].mxu1  ;;  %v469_v47 = vpop.f32.mrb[3].mxu0 }
  0xec   : > { %756 = vst.msk [vmem:[%s1242_s27 + $0x110] sm:$0xff] %vm721_vm2, %v603_v40  ;;  %722 = vst.msk [vmem:[%s1242_s27] sm:$0xff] %vm721_vm2, %v467_v41  ;;  %v606_v48 = vadd.f32 %v1004_v46, %v1235_v35  ;;  %v470_v49 = vadd.f32 %v1235_v35, %v469_v47  ;;  %v597_v50 = vpop.f32.mrb[3].mxu1 }
  0xed   : > { %754 = vst.msk [vmem:[%s1242_s27 + $0x100] sm:$0xff] %vm721_vm2, %v595_v44  ;;  %725 = vst.msk [vmem:[%s1242_s27 + $0x18] sm:$0xff] %vm721_vm2, %v478_v45  ;;  %v598_v51 = vadd.f32 %v1235_v35, %v597_v50 }
  0xee   : > { %757 = vst.msk [vmem:[%s1242_s27 + $0x118] sm:$0xff] %vm721_vm2, %v606_v48  ;;  %723 = vst.msk [vmem:[%s1242_s27 + $0x8] sm:$0xff] %vm721_vm2, %v470_v49 }
  0xef   : > { %755 = vst.msk [vmem:[%s1242_s27 + $0x108] sm:$0xff] %vm721_vm2, %v598_v51 }
  0xf0   : > { %v975_v52 = vpop.f32.mrb[4].mxu0 }
  0xf1   : > { %v491_v53 = vadd.f32 %v975_v52, %v1235_v35  ;;  %v1007_v54 = vpop.f32.mrb[4].mxu1  ;;  %v482_v55 = vpop.f32.mrb[5].mxu0 }
  0xf2   : > { %v619_v56 = vadd.f32 %v1007_v54, %v1235_v35  ;;  %v483_v57 = vadd.f32 %v1235_v35, %v482_v55  ;;  %v610_v58 = vpop.f32.mrb[5].mxu1  ;;  %v976_v59 = vpop.f32.mrb[6].mxu0 }
  0xf3   : > { %728 = vst.msk [vmem:[%s1242_s27 + $0x30] sm:$0xff] %vm721_vm2, %v491_v53  ;;  %v611_v60 = vadd.f32 %v1235_v35, %v610_v58  ;;  %v494_v61 = vadd.f32 %v976_v59, %v1235_v35  ;;  %v1008_v62 = vpop.f32.mrb[6].mxu1  ;;  %v485_v63 = vpop.f32.mrb[7].mxu0 }
  0xf4   : > { %760 = vst.msk [vmem:[%s1242_s27 + $0x130] sm:$0xff] %vm721_vm2, %v619_v56  ;;  %726 = vst.msk [vmem:[%s1242_s27 + $0x20] sm:$0xff] %vm721_vm2, %v483_v57  ;;  %v622_v0 = vadd.f32 %v1008_v62, %v1235_v35  ;;  %v486_v1 = vadd.f32 %v1235_v35, %v485_v63  ;;  %v613_v2 = vpop.f32.mrb[7].mxu1 }
  0xf5   : > { %758 = vst.msk [vmem:[%s1242_s27 + $0x120] sm:$0xff] %vm721_vm2, %v611_v60  ;;  %729 = vst.msk [vmem:[%s1242_s27 + $0x38] sm:$0xff] %vm721_vm2, %v494_v61  ;;  %v614_v3 = vadd.f32 %v1235_v35, %v613_v2 }
  0xf6   : > { %761 = vst.msk [vmem:[%s1242_s27 + $0x138] sm:$0xff] %vm721_vm2, %v622_v0  ;;  %727 = vst.msk [vmem:[%s1242_s27 + $0x28] sm:$0xff] %vm721_vm2, %v486_v1 }
  0xf7   : > { %759 = vst.msk [vmem:[%s1242_s27 + $0x128] sm:$0xff] %vm721_vm2, %v614_v3 }
  0xf8   : > { %v979_v4 = vpop.f32.mrb[8].mxu0 }
  0xf9   : > { %v507_v5 = vadd.f32 %v979_v4, %v1235_v35  ;;  %v1011_v6 = vpop.f32.mrb[8].mxu1  ;;  %v498_v7 = vpop.f32.mrb[9].mxu0 }
  0xfa   : > { %v635_v8 = vadd.f32 %v1011_v6, %v1235_v35  ;;  %v499_v9 = vadd.f32 %v1235_v35, %v498_v7  ;;  %v626_v10 = vpop.f32.mrb[9].mxu1  ;;  %v980_v11 = vpop.f32.mrb[10].mxu0 }
  0xfb   : > { %732 = vst.msk [vmem:[%s1242_s27 + $0x50] sm:$0xff] %vm721_vm2, %v507_v5  ;;  %v627_v12 = vadd.f32 %v1235_v35, %v626_v10  ;;  %v510_v13 = vadd.f32 %v980_v11, %v1235_v35  ;;  %v1012_v14 = vpop.f32.mrb[10].mxu1  ;;  %v501_v15 = vpop.f32.mrb[11].mxu0 }
  0xfc   : > { %764 = vst.msk [vmem:[%s1242_s27 + $0x150] sm:$0xff] %vm721_vm2, %v635_v8  ;;  %730 = vst.msk [vmem:[%s1242_s27 + $0x40] sm:$0xff] %vm721_vm2, %v499_v9  ;;  %v638_v16 = vadd.f32 %v1012_v14, %v1235_v35  ;;  %v502_v17 = vadd.f32 %v1235_v35, %v501_v15  ;;  %v629_v18 = vpop.f32.mrb[11].mxu1 }
  0xfd   : > { %762 = vst.msk [vmem:[%s1242_s27 + $0x140] sm:$0xff] %vm721_vm2, %v627_v12  ;;  %733 = vst.msk [vmem:[%s1242_s27 + $0x58] sm:$0xff] %vm721_vm2, %v510_v13  ;;  %v630_v19 = vadd.f32 %v1235_v35, %v629_v18 }
  0xfe   : > { %765 = vst.msk [vmem:[%s1242_s27 + $0x158] sm:$0xff] %vm721_vm2, %v638_v16  ;;  %731 = vst.msk [vmem:[%s1242_s27 + $0x48] sm:$0xff] %vm721_vm2, %v502_v17 }
  0xff   : > { %763 = vst.msk [vmem:[%s1242_s27 + $0x148] sm:$0xff] %vm721_vm2, %v630_v19 }
 0x100   : > { %v983_v20 = vpop.f32.mrb[12].mxu0 }
 0x101   : > { %v523_v21 = vadd.f32 %v983_v20, %v1235_v35  ;;  %v1015_v22 = vpop.f32.mrb[12].mxu1  ;;  %v514_v23 = vpop.f32.mrb[13].mxu0 }
 0x102   : > { %v651_v24 = vadd.f32 %v1015_v22, %v1235_v35  ;;  %v515_v25 = vadd.f32 %v1235_v35, %v514_v23  ;;  %v642_v26 = vpop.f32.mrb[13].mxu1  ;;  %v984_v27 = vpop.f32.mrb[14].mxu0 }
 0x103   : > { %736 = vst.msk [vmem:[%s1242_s27 + $0x70] sm:$0xff] %vm721_vm2, %v523_v21  ;;  %v643_v28 = vadd.f32 %v1235_v35, %v642_v26  ;;  %v526_v29 = vadd.f32 %v984_v27, %v1235_v35  ;;  %v1016_v30 = vpop.f32.mrb[14].mxu1  ;;  %v517_v31 = vpop.f32.mrb[15].mxu0 }
 0x104   : > { %768 = vst.msk [vmem:[%s1242_s27 + $0x170] sm:$0xff] %vm721_vm2, %v651_v24  ;;  %734 = vst.msk [vmem:[%s1242_s27 + $0x60] sm:$0xff] %vm721_vm2, %v515_v25  ;;  %v654_v32 = vadd.f32 %v1016_v30, %v1235_v35  ;;  %v518_v33 = vadd.f32 %v1235_v35, %v517_v31  ;;  %v645_v34 = vpop.f32.mrb[15].mxu1 }
 0x105   : > { %766 = vst.msk [vmem:[%s1242_s27 + $0x160] sm:$0xff] %vm721_vm2, %v643_v28  ;;  %737 = vst.msk [vmem:[%s1242_s27 + $0x78] sm:$0xff] %vm721_vm2, %v526_v29  ;;  %v646_v36 = vadd.f32 %v1235_v35, %v645_v34 }
 0x106   : > { %769 = vst.msk [vmem:[%s1242_s27 + $0x178] sm:$0xff] %vm721_vm2, %v654_v32  ;;  %735 = vst.msk [vmem:[%s1242_s27 + $0x68] sm:$0xff] %vm721_vm2, %v518_v33 }
 0x107   : > { %767 = vst.msk [vmem:[%s1242_s27 + $0x168] sm:$0xff] %vm721_vm2, %v646_v36 }
 0x108   : > { %v987_v37 = vpop.f32.mrb[16].mxu0 }
 0x109   : > { %v539_v38 = vadd.f32 %v987_v37, %v1235_v35  ;;  %v1019_v39 = vpop.f32.mrb[16].mxu1  ;;  %v530_v40 = vpop.f32.mrb[17].mxu0 }
 0x10a   : > { %v667_v41 = vadd.f32 %v1019_v39, %v1235_v35  ;;  %v531_v42 = vadd.f32 %v1235_v35, %v530_v40  ;;  %v658_v43 = vpop.f32.mrb[17].mxu1  ;;  %v988_v44 = vpop.f32.mrb[18].mxu0 }
 0x10b   : > { %740 = vst.msk [vmem:[%s1242_s27 + $0x90] sm:$0xff] %vm721_vm2, %v539_v38  ;;  %v659_v45 = vadd.f32 %v1235_v35, %v658_v43  ;;  %v542_v46 = vadd.f32 %v988_v44, %v1235_v35  ;;  %v1020_v47 = vpop.f32.mrb[18].mxu1  ;;  %v533_v48 = vpop.f32.mrb[19].mxu0 }
 0x10c   : > { %772 = vst.msk [vmem:[%s1242_s27 + $0x190] sm:$0xff] %vm721_vm2, %v667_v41  ;;  %738 = vst.msk [vmem:[%s1242_s27 + $0x80] sm:$0xff] %vm721_vm2, %v531_v42  ;;  %v670_v49 = vadd.f32 %v1020_v47, %v1235_v35  ;;  %v534_v50 = vadd.f32 %v1235_v35, %v533_v48  ;;  %v661_v51 = vpop.f32.mrb[19].mxu1 }
 0x10d   : > { %770 = vst.msk [vmem:[%s1242_s27 + $0x180] sm:$0xff] %vm721_vm2, %v659_v45  ;;  %741 = vst.msk [vmem:[%s1242_s27 + $0x98] sm:$0xff] %vm721_vm2, %v542_v46  ;;  %v662_v52 = vadd.f32 %v1235_v35, %v661_v51 }
 0x10e   : > { %773 = vst.msk [vmem:[%s1242_s27 + $0x198] sm:$0xff] %vm721_vm2, %v670_v49  ;;  %739 = vst.msk [vmem:[%s1242_s27 + $0x88] sm:$0xff] %vm721_vm2, %v534_v50 }
 0x10f   : > { %771 = vst.msk [vmem:[%s1242_s27 + $0x188] sm:$0xff] %vm721_vm2, %v662_v52 }
 0x110   : > { %v991_v53 = vpop.f32.mrb[20].mxu0 }
 0x111   : > { %v555_v54 = vadd.f32 %v991_v53, %v1235_v35  ;;  %v1023_v55 = vpop.f32.mrb[20].mxu1  ;;  %v546_v56 = vpop.f32.mrb[21].mxu0 }
 0x112   : > { %v683_v57 = vadd.f32 %v1023_v55, %v1235_v35  ;;  %v547_v58 = vadd.f32 %v1235_v35, %v546_v56  ;;  %v674_v59 = vpop.f32.mrb[21].mxu1  ;;  %v992_v60 = vpop.f32.mrb[22].mxu0 }
 0x113   : > { %744 = vst.msk [vmem:[%s1242_s27 + $0xb0] sm:$0xff] %vm721_vm2, %v555_v54  ;;  %v675_v61 = vadd.f32 %v1235_v35, %v674_v59  ;;  %v558_v62 = vadd.f32 %v992_v60, %v1235_v35  ;;  %v1024_v63 = vpop.f32.mrb[22].mxu1  ;;  %v549_v0 = vpop.f32.mrb[23].mxu0 }
 0x114   : > { %776 = vst.msk [vmem:[%s1242_s27 + $0x1b0] sm:$0xff] %vm721_vm2, %v683_v57  ;;  %742 = vst.msk [vmem:[%s1242_s27 + $0xa0] sm:$0xff] %vm721_vm2, %v547_v58  ;;  %v686_v1 = vadd.f32 %v1024_v63, %v1235_v35  ;;  %v550_v2 = vadd.f32 %v1235_v35, %v549_v0  ;;  %v677_v3 = vpop.f32.mrb[23].mxu1 }
 0x115   : > { %774 = vst.msk [vmem:[%s1242_s27 + $0x1a0] sm:$0xff] %vm721_vm2, %v675_v61  ;;  %745 = vst.msk [vmem:[%s1242_s27 + $0xb8] sm:$0xff] %vm721_vm2, %v558_v62  ;;  %v678_v4 = vadd.f32 %v1235_v35, %v677_v3 }
 0x116   : > { %777 = vst.msk [vmem:[%s1242_s27 + $0x1b8] sm:$0xff] %vm721_vm2, %v686_v1  ;;  %743 = vst.msk [vmem:[%s1242_s27 + $0xa8] sm:$0xff] %vm721_vm2, %v550_v2 }
 0x117   : > { %775 = vst.msk [vmem:[%s1242_s27 + $0x1a8] sm:$0xff] %vm721_vm2, %v678_v4 }
 0x118   : > { %v995_v5 = vpop.f32.mrb[24].mxu0 }
 0x119   : > { %v571_v6 = vadd.f32 %v995_v5, %v1235_v35  ;;  %v1027_v7 = vpop.f32.mrb[24].mxu1  ;;  %v562_v8 = vpop.f32.mrb[25].mxu0 }
 0x11a   : > { %v699_v9 = vadd.f32 %v1027_v7, %v1235_v35  ;;  %v563_v10 = vadd.f32 %v1235_v35, %v562_v8  ;;  %v690_v11 = vpop.f32.mrb[25].mxu1  ;;  %v996_v12 = vpop.f32.mrb[26].mxu0 }
 0x11b   : > { %748 = vst.msk [vmem:[%s1242_s27 + $0xd0] sm:$0xff] %vm721_vm2, %v571_v6  ;;  %v691_v13 = vadd.f32 %v1235_v35, %v690_v11  ;;  %v574_v14 = vadd.f32 %v996_v12, %v1235_v35  ;;  %v1028_v15 = vpop.f32.mrb[26].mxu1  ;;  %v565_v16 = vpop.f32.mrb[27].mxu0 }
 0x11c   : > { %780 = vst.msk [vmem:[%s1242_s27 + $0x1d0] sm:$0xff] %vm721_vm2, %v699_v9  ;;  %746 = vst.msk [vmem:[%s1242_s27 + $0xc0] sm:$0xff] %vm721_vm2, %v563_v10  ;;  %v702_v17 = vadd.f32 %v1028_v15, %v1235_v35  ;;  %v566_v18 = vadd.f32 %v1235_v35, %v565_v16  ;;  %v693_v19 = vpop.f32.mrb[27].mxu1 }
 0x11d   : > { %778 = vst.msk [vmem:[%s1242_s27 + $0x1c0] sm:$0xff] %vm721_vm2, %v691_v13  ;;  %749 = vst.msk [vmem:[%s1242_s27 + $0xd8] sm:$0xff] %vm721_vm2, %v574_v14  ;;  %v694_v20 = vadd.f32 %v1235_v35, %v693_v19 }
 0x11e   : > { %781 = vst.msk [vmem:[%s1242_s27 + $0x1d8] sm:$0xff] %vm721_vm2, %v702_v17  ;;  %747 = vst.msk [vmem:[%s1242_s27 + $0xc8] sm:$0xff] %vm721_vm2, %v566_v18 }
 0x11f   : > { %779 = vst.msk [vmem:[%s1242_s27 + $0x1c8] sm:$0xff] %vm721_vm2, %v694_v20 }
 0x120   : > { %v999_v21 = vpop.f32.mrb[28].mxu0 }
 0x121   : > { %v587_v22 = vadd.f32 %v999_v21, %v1235_v35  ;;  %v1031_v23 = vpop.f32.mrb[28].mxu1  ;;  %v578_v24 = vpop.f32.mrb[29].mxu0 }
 0x122   : > { %v715_v25 = vadd.f32 %v1031_v23, %v1235_v35  ;;  %v579_v26 = vadd.f32 %v1235_v35, %v578_v24  ;;  %v706_v27 = vpop.f32.mrb[29].mxu1  ;;  %v1000_v28 = vpop.f32.mrb[30].mxu0 }
 0x123   : > { %752 = vst.msk [vmem:[%s1242_s27 + $0xf0] sm:$0xff] %vm721_vm2, %v587_v22  ;;  %v707_v29 = vadd.f32 %v1235_v35, %v706_v27  ;;  %v590_v30 = vadd.f32 %v1000_v28, %v1235_v35  ;;  %v1032_v31 = vpop.f32.mrb[30].mxu1  ;;  %v581_v32 = vpop.f32.mrb[31].mxu0 }
 0x124   : > { %784 = vst.msk [vmem:[%s1242_s27 + $0x1f0] sm:$0xff] %vm721_vm2, %v715_v25  ;;  %750 = vst.msk [vmem:[%s1242_s27 + $0xe0] sm:$0xff] %vm721_vm2, %v579_v26  ;;  %v718_v33 = vadd.f32 %v1032_v31, %v1235_v35  ;;  %v582_v34 = vadd.f32 %v1235_v35, %v581_v32  ;;  %v709_v36 = vpop.f32.mrb[31].mxu1 }
 0x125   : > { %782 = vst.msk [vmem:[%s1242_s27 + $0x1e0] sm:$0xff] %vm721_vm2, %v707_v29  ;;  %753 = vst.msk [vmem:[%s1242_s27 + $0xf8] sm:$0xff] %vm721_vm2, %v590_v30  ;;  %v710_v37 = vadd.f32 %v1235_v35, %v709_v36 }
 0x126   : > { %785 = vst.msk [vmem:[%s1242_s27 + $0x1f8] sm:$0xff] %vm721_vm2, %v718_v33  ;;  %751 = vst.msk [vmem:[%s1242_s27 + $0xe8] sm:$0xff] %vm721_vm2, %v582_v34 }
 0x127   : > { %783 = vst.msk [vmem:[%s1242_s27 + $0x1e8] sm:$0xff] %vm721_vm2, %v710_v37 }
 0x128 PF: > { %s13_s14 = sadd.s32 1, %s1083_s14   ;;  %s1449_s12 = smov %s1079_s13 }
 0x129   : > { %p10_p5 = scmp.ge.s32.totalorder %s13_s14, 4   ;;  %s1450_s13 = smov %s1452_s15 }
 0x12b   :  { %12 = sbr.rel (!%p10_p5) target bundleno = 2 (0x2), region = 68 }

</bundles_post_ra>
